<compile_context>
chip_gen: v7x
topology: tpu7x:2x2x1
jax: 0.10.0
libtpu: 0.0.40
codegen_flags: <defaults>
</compile_context>

<pallas_src>
import numpy as np
import jax
import jax.numpy as jnp
from jax import lax
from jax.experimental import pallas as pl
from jax.experimental.pallas import tpu as pltpu


_K = 5     # conv kernel size for all three transposed convs
_TB = 8    # images processed per grid step

# Per-layer geometry (derived from the PyTorch module, hard-coded):
#   layer 1: 4x4   -> 7x7   : Wp=11, L=7*11=77,   Npad=11*11+4=125
#   layer 2: 7x7   -> 14x14 : Wp=18, L=14*18=252, Npad=18*18+4=328
#   layer 3: 14x14 -> 28x28 : Wp=32, L=28*32=896, Npad=32*32+4=1028


# ----------------------------------------------------------------------------
# The single fused Pallas kernel: one grid step = TB batch elements.
# ----------------------------------------------------------------------------
def _decoder_kernel(x_ref, w1_ref, b1_ref, w2_ref, b2_ref,
                    cmask_ref, s1_ref, wc1_ref, bc1_ref,
                    s2_ref, wc2_ref, bc2_ref,
                    s3_ref, wc3_ref, bc3_ref, o_ref, h2_scr):
    f32 = jnp.float32
    bf16 = jnp.bfloat16

    # ---- Batched MLP over the TB images of this step ------------------------
    # bf16 MXU operands, f32 accumulate / bias / ReLU.
    xb = x_ref[...].astype(bf16)                                   # (TB, 10)
    h = jnp.dot(xb, w1_ref[...], preferred_element_type=f32)
    h = jnp.maximum(h + b1_ref[...], 0.0)                          # (TB, 256)
    h = jnp.dot(h.astype(bf16), w2_ref[...], preferred_element_type=f32)
    h = jnp.maximum(h + b2_ref[...], 0.0)                          # (TB, 512)
    h2_scr[...] = h                                                # VMEM scratch

    # Hoist the 25 wc3 column extractions out of the per-image loop.
    w3 = wc3_ref[...]                                              # (16, 25) f32
    w3_cols = [w3[:, t:t + 1] for t in range(_K * _K)]

    def conv_taps(xp_b, wc_ref, cout, wp, length):
        # Transposed conv as 25 full-image matmuls over the zero-dilated,
        # zero-padded input (junk columns between output rows are computed
        # but never consumed downstream).  bf16 operands, f32 accumulation.
        acc = jnp.zeros((cout, length), f32)
        for kh in range(_K):
            for kw in range(_K):
                t = kh * _K + kw
                off = kh * wp + kw
                w_tap = wc_ref[t * cout:(t + 1) * cout, :]         # (cout, cin)
                acc = acc + jnp.dot(w_tap, xp_b[:, off:off + length],
                                    preferred_element_type=f32)
        return acc

    def body(i, carry):
        # ---- View(-1,32,4,4) + dilate/pad the ConvT-1 input -----------------
        # Channels on sublanes, flattened (dilated+padded) spatial on lanes.
        h_row = h2_scr[pl.ds(i, 1), :].astype(bf16)                # (1, 512)
        hb = jnp.broadcast_to(h_row, (32, 512)) * cmask_ref[...]   # (32, 512)
        xp = jnp.dot(hb, s1_ref[...], preferred_element_type=f32)  # (32, 125)

        # ---- ConvT(32->32) + ReLU : 4x4 -> 7x7 -------------------------------
        y = conv_taps(xp.astype(bf16), wc1_ref, 32, 11, 77)
        y = jnp.maximum(y + bc1_ref[...], 0.0)                     # (32, 77)

        # ---- dilate/pad + ConvT(32->16) + ReLU : 7x7 -> 14x14 ----------------
        xp = jnp.dot(y.astype(bf16), s2_ref[...],
                     preferred_element_type=f32)                   # (32, 328)
        y = conv_taps(xp.astype(bf16), wc2_ref, 16, 18, 252)
        y = jnp.maximum(y + bc2_ref[...], 0.0)                     # (16, 252)

        # ---- dilate/pad + ConvT(16->1) : 14x14 -> 28x28 ----------------------
        xp = jnp.dot(y.astype(bf16), s3_ref[...],
                     preferred_element_type=f32)                   # (16, 1028)
        # Cout == 1: f32 VPU multiply-accumulate, spatial on lanes (skip MXU).
        acc = jnp.zeros((16, 896), f32)
        for kh in range(_K):
            for kw in range(_K):
                t = kh * _K + kw
                off = kh * 32 + kw
                acc = acc + xp[:, off:off + 896] * w3_cols[t]
        out_row = jnp.sum(acc, axis=0, keepdims=True) + bc3_ref[...]   # (1, 896)
        o_ref[pl.ds(i, 1), :] = out_row
        return carry

    lax.fori_loop(0, _TB, body, 0)


# ----------------------------------------------------------------------------
# One-time parameter preparation (weight flips/transposes, scatter matrices).
# ----------------------------------------------------------------------------
def _scatter_matrix(h_src, w_src, src_stride, wp_out, pad, n_src, n_pad):
    """0/1 matrix that zero-dilates (stride 2) and zero-pads a flattened image
    in the transposed (channels-on-rows, spatial-on-columns) layout."""
    s = np.zeros((n_src, n_pad), np.float32)
    for h in range(h_src):
        for w in range(w_src):
            s[h * src_stride + w, (pad + 2 * h) * wp_out + (pad + 2 * w)] = 1.0
    return jnp.asarray(s)


def prepare_params(params):
    p = params
    bf16 = jnp.bfloat16

    def conv_w(w):  # (Cin, Cout, K, K) -> (K*K*Cout, Cin), spatially flipped
        cin, cout = w.shape[0], w.shape[1]
        return jnp.transpose(w[:, :, ::-1, ::-1], (2, 3, 1, 0)).reshape(
            _K * _K * cout, cin).astype(bf16)

    s1_basic = _scatter_matrix(4, 4, 4, 11, 2, 16, 125)            # (16, 125)
    return {
        # MXU operands in bf16; biases stay f32.
        "w1": p["w1"].astype(bf16), "b1": p["b1"].reshape(1, -1),
        "w2": p["w2"].astype(bf16), "b2": p["b2"].reshape(1, -1),
        # View(-1,32,4,4): row c of the mask picks lanes [16c, 16c+16) of h2.
        "cmask": jnp.asarray(np.kron(np.eye(32, dtype=np.float32),
                                     np.ones((1, 16), np.float32))
                             ).astype(bf16),                       # (32, 512)
        "s1": jnp.tile(s1_basic, (32, 1)).astype(bf16),            # (512, 125)
        "wc1": conv_w(p["cw1"]), "bc1": p["cb1"].reshape(-1, 1),
        "s2": _scatter_matrix(7, 7, 11, 18, 2, 77, 328).astype(bf16),
        "wc2": conv_w(p["cw2"]), "bc2": p["cb2"].reshape(-1, 1),
        "s3": _scatter_matrix(14, 14, 18, 32, 2, 252, 1028).astype(bf16),
        # Final layer runs on the VPU in f32 (v5e has no bf16 VPU).
        "wc3": p["cw3"][:, 0, ::-1, ::-1].reshape(16, 25),
        "bc3": p["cb3"].reshape(1, 1),
    }


# ----------------------------------------------------------------------------
# Full module forward.  x: (B, 10) f32 -> (B, 1, 28, 28) f32 (NCHW).
# ----------------------------------------------------------------------------
def conv_decoder_mnist_forward(x, prep):
    B, latent = x.shape
    n_blocks = -(-B // _TB)                  # ceil(B / TB)
    Bp = n_blocks * _TB
    # Pad the batch to a multiple of TB; padded rows are dropped afterwards.
    x_pad = jnp.pad(x.astype(jnp.float32), ((0, Bp - B), (0, 0)))

    args = (x_pad, prep["w1"], prep["b1"], prep["w2"], prep["b2"],
            prep["cmask"], prep["s1"], prep["wc1"], prep["bc1"],
            prep["s2"], prep["wc2"], prep["bc2"],
            prep["s3"], prep["wc3"], prep["bc3"])

    in_specs = [pl.BlockSpec((_TB, latent), lambda b: (b, 0))]
    # Grid-invariant constants: full-array blocks, revisited every step
    # (no re-DMA after the first fetch).
    in_specs += [pl.BlockSpec(a.shape, lambda b: (0, 0)) for a in args[1:]]

    out = pl.pallas_call(
        _decoder_kernel,
        out_shape=jax.ShapeDtypeStruct((Bp, 28 * 32), jnp.float32),
        grid=(n_blocks,),
        in_specs=in_specs,
        out_specs=pl.BlockSpec((_TB, 28 * 32), lambda b: (b, 0)),
        scratch_shapes=[pltpu.VMEM((_TB, 512), jnp.float32)],
        compiler_params=pltpu.CompilerParams(
            dimension_semantics=("parallel",)),
    )(*args)

    # Drop batch padding and the junk columns (Wp=32 -> OW=28); restore NCHW.
    y = out[:B].reshape(B, 28, 32)[:, :, :28]
    return y.reshape(B, 1, 28, 28)


# ----------------------------------------------------------------------------
# Pure-JAX reference (for the internal correctness check)
# ----------------------------------------------------------------------------
def _ref_convT(x_nhwc, w, b, stride, padding, output_padding):
    K = w.shape[2]
    wk = jnp.transpose(w[:, :, ::-1, ::-1], (2, 3, 0, 1))  # HWIO
    pad = (K - 1 - padding, K - 1 - padding + output_padding)
    y = jax.lax.conv_general_dilated(
        x_nhwc, wk, window_strides=(1, 1), padding=[pad, pad],
        lhs_dilation=(stride, stride),
        dimension_numbers=("NHWC", "HWIO", "NHWC"),
        precision=jax.lax.Precision.HIGHEST)
    return y + b.reshape(1, 1, 1, -1)


def _ref_forward(x, p):
    h = jnp.maximum(x @ p["w1"] + p["b1"], 0.0)
    h = jnp.maximum(h @ p["w2"] + p["b2"], 0.0)
    B = h.shape[0]
    h = jnp.transpose(h.reshape(B, 32, 4, 4), (0, 2, 3, 1))
    h = jnp.maximum(_ref_convT(h, p["cw1"], p["cb1"], 2, 2, 0), 0.0)
    h = jnp.maximum(_ref_convT(h, p["cw2"], p["cb2"], 2, 2, 1), 0.0)
    h = _ref_convT(h, p["cw3"], p["cb3"], 2, 2, 1)
    return jnp.transpose(h, (0, 3, 1, 2))


# ----------------------------------------------------------------------------
# Deterministic parameter init (PyTorch-default-style uniform(+-1/sqrt(fan_in)))
# ----------------------------------------------------------------------------
def init_params(key):
    def u(k, shape, fan_in):
        bound = 1.0 / float(np.sqrt(fan_in))
        return jax.random.uniform(k, shape, jnp.float32, -bound, bound)

    ks = jax.random.split(key, 10)
    return {
        "w1": u(ks[0], (10, 256), 10),   "b1": u(ks[1], (1, 256), 10),
        "w2": u(ks[2], (256, 512), 256), "b2": u(ks[3], (1, 512), 256),
        # ConvTranspose2d weights in PyTorch layout (Cin, Cout, kH, kW)
        "cw1": u(ks[4], (32, 32, 5, 5), 32 * 25), "cb1": u(ks[5], (32,), 32 * 25),
        "cw2": u(ks[6], (32, 16, 5, 5), 32 * 25), "cb2": u(ks[7], (16,), 32 * 25),
        "cw3": u(ks[8], (16, 1, 5, 5), 16 * 25),  "cb3": u(ks[9], (1,), 16 * 25),
    }


if __name__ == "__main__":
    key = jax.random.PRNGKey(0)
    pkey, xkey = jax.random.split(key)
    params = init_params(pkey)
    prep = prepare_params(params)          # one-time weight/scatter preparation

    x = jax.random.normal(xkey, (2, 10), jnp.float32)   # batch=2, latent_dim=10

    fwd = jax.jit(conv_decoder_mnist_forward)
    out = jax.block_until_ready(fwd(x, prep))
    assert out.shape == (2, 1, 28, 28), out.shape

    # f32 reference; kernel uses bf16 MXU operands with f32 accumulation.
    ref = jax.block_until_ready(_ref_forward(x, params))
    max_err = float(jnp.max(jnp.abs(out - ref)))
    assert jnp.allclose(out, ref, atol=2e-2, rtol=2e-2), max_err

    print("KERNEL_OK")
</pallas_src>

<mosaic_0001>
module attributes {stable_mosaic.version = 11 : i64} {
  func.func @_decoder_kernel(%arg0: i32, %arg1: memref<8x10xf32, #tpu.memory_space<vmem>>, %arg2: memref<10x256xbf16, #tpu.memory_space<vmem>>, %arg3: memref<1x256xf32, #tpu.memory_space<vmem>>, %arg4: memref<256x512xbf16, #tpu.memory_space<vmem>>, %arg5: memref<1x512xf32, #tpu.memory_space<vmem>>, %arg6: memref<32x512xbf16, #tpu.memory_space<vmem>>, %arg7: memref<512x125xbf16, #tpu.memory_space<vmem>>, %arg8: memref<800x32xbf16, #tpu.memory_space<vmem>>, %arg9: memref<32x1xf32, #tpu.memory_space<vmem>>, %arg10: memref<77x328xbf16, #tpu.memory_space<vmem>>, %arg11: memref<400x32xbf16, #tpu.memory_space<vmem>>, %arg12: memref<16x1xf32, #tpu.memory_space<vmem>>, %arg13: memref<252x1028xbf16, #tpu.memory_space<vmem>>, %arg14: memref<16x25xf32, #tpu.memory_space<vmem>>, %arg15: memref<1x1xf32, #tpu.memory_space<vmem>>, %arg16: memref<8x896xf32, #tpu.memory_space<vmem>>, %arg17: memref<8x512xf32, #tpu.memory_space<vmem>>) attributes {dimension_semantics = [#tpu.dimension_semantics<parallel>], iteration_bounds = array<i64: 1>, scalar_prefetch = 0 : i64, scratch_operands = 1 : i64, tpu.core_type = #tpu.core_type<tc>, window_params = [{transform_indices = @transform_0, window_bounds = array<i64: 8, 10>}, {pipeline_mode = #tpu.pipeline_mode<synchronous>, transform_indices = @transform_1, window_bounds = array<i64: 10, 256>}, {pipeline_mode = #tpu.pipeline_mode<synchronous>, transform_indices = @transform_2, window_bounds = array<i64: 1, 256>}, {pipeline_mode = #tpu.pipeline_mode<synchronous>, transform_indices = @transform_3, window_bounds = array<i64: 256, 512>}, {pipeline_mode = #tpu.pipeline_mode<synchronous>, transform_indices = @transform_4, window_bounds = array<i64: 1, 512>}, {pipeline_mode = #tpu.pipeline_mode<synchronous>, transform_indices = @transform_5, window_bounds = array<i64: 32, 512>}, {pipeline_mode = #tpu.pipeline_mode<synchronous>, transform_indices = @transform_6, window_bounds = array<i64: 512, 125>}, {pipeline_mode = #tpu.pipeline_mode<synchronous>, transform_indices = @transform_7, window_bounds = array<i64: 800, 32>}, {pipeline_mode = #tpu.pipeline_mode<synchronous>, transform_indices = @transform_8, window_bounds = array<i64: 32, 1>}, {pipeline_mode = #tpu.pipeline_mode<synchronous>, transform_indices = @transform_9, window_bounds = array<i64: 77, 328>}, {pipeline_mode = #tpu.pipeline_mode<synchronous>, transform_indices = @transform_10, window_bounds = array<i64: 400, 32>}, {pipeline_mode = #tpu.pipeline_mode<synchronous>, transform_indices = @transform_11, window_bounds = array<i64: 16, 1>}, {pipeline_mode = #tpu.pipeline_mode<synchronous>, transform_indices = @transform_12, window_bounds = array<i64: 252, 1028>}, {pipeline_mode = #tpu.pipeline_mode<synchronous>, transform_indices = @transform_13, window_bounds = array<i64: 16, 25>}, {pipeline_mode = #tpu.pipeline_mode<synchronous>, transform_indices = @transform_14, window_bounds = array<i64: 1, 1>}, {transform_indices = @transform_15, window_bounds = array<i64: 8, 896>}]} {
    %c0 = arith.constant 0 : index
    %c0_0 = arith.constant 0 : index
    %0 = vector.load %arg1[%c0, %c0_0] : memref<8x10xf32, #tpu.memory_space<vmem>>, vector<8x10xf32>
    %1 = arith.truncf %0 : vector<8x10xf32> to vector<8x10xbf16>
    %c0_1 = arith.constant 0 : index
    %c0_2 = arith.constant 0 : index
    %2 = vector.load %arg2[%c0_1, %c0_2] : memref<10x256xbf16, #tpu.memory_space<vmem>>, vector<10x256xbf16>
    %cst = arith.constant dense<0.000000e+00> : vector<8x256xf32>
    %3 = tpu.matmul %1, %2, %cst {dimension_numbers = #tpu.dot_dimension_numbers<[1], [0], [0], [1], [0, 0, 1, 1], [], []>} : vector<8x10xbf16>, vector<10x256xbf16>, vector<8x256xf32> -> vector<8x256xf32>
    %c0_3 = arith.constant 0 : index
    %c0_4 = arith.constant 0 : index
    %4 = vector.load %arg3[%c0_3, %c0_4] : memref<1x256xf32, #tpu.memory_space<vmem>>, vector<1x256xf32>
    %5 = vector.broadcast %4 : vector<1x256xf32> to vector<8x256xf32>
    %6 = arith.addf %3, %5 : vector<8x256xf32>
    %cst_5 = arith.constant 0.000000e+00 : f32
    %7 = vector.broadcast %cst_5 : f32 to vector<8x256xf32>
    %8 = arith.maximumf %6, %7 : vector<8x256xf32>
    %9 = arith.truncf %8 : vector<8x256xf32> to vector<8x256xbf16>
    %c0_6 = arith.constant 0 : index
    %c0_7 = arith.constant 0 : index
    %10 = vector.load %arg4[%c0_6, %c0_7] : memref<256x512xbf16, #tpu.memory_space<vmem>>, vector<256x512xbf16>
    %cst_8 = arith.constant dense<0.000000e+00> : vector<8x512xf32>
    %11 = tpu.matmul %9, %10, %cst_8 {dimension_numbers = #tpu.dot_dimension_numbers<[1], [0], [0], [1], [0, 0, 1, 1], [], []>} : vector<8x256xbf16>, vector<256x512xbf16>, vector<8x512xf32> -> vector<8x512xf32>
    %c0_9 = arith.constant 0 : index
    %c0_10 = arith.constant 0 : index
    %12 = vector.load %arg5[%c0_9, %c0_10] : memref<1x512xf32, #tpu.memory_space<vmem>>, vector<1x512xf32>
    %13 = vector.broadcast %12 : vector<1x512xf32> to vector<8x512xf32>
    %14 = arith.addf %11, %13 : vector<8x512xf32>
    %cst_11 = arith.constant 0.000000e+00 : f32
    %15 = vector.broadcast %cst_11 : f32 to vector<8x512xf32>
    %16 = arith.maximumf %14, %15 : vector<8x512xf32>
    %c0_12 = arith.constant 0 : index
    %c0_13 = arith.constant 0 : index
    %17 = vector.load %arg17[%c0_12, %c0_13] : memref<8x512xf32, #tpu.memory_space<vmem>>, vector<8x512xf32>
    tpu.vector_store %arg17[%c0_12, %c0_13], %16 {strides = array<i32>} : memref<8x512xf32, #tpu.memory_space<vmem>>, vector<8x512xf32>,
    %c0_14 = arith.constant 0 : index
    %c0_15 = arith.constant 0 : index
    %18 = vector.load %arg14[%c0_14, %c0_15] : memref<16x25xf32, #tpu.memory_space<vmem>>, vector<16x25xf32>
    %19 = vector.extract_strided_slice %18 {offsets = [0, 0], sizes = [16, 1], strides = [1, 1]} : vector<16x25xf32> to vector<16x1xf32>
    %20 = vector.extract_strided_slice %18 {offsets = [0, 1], sizes = [16, 1], strides = [1, 1]} : vector<16x25xf32> to vector<16x1xf32>
    %21 = vector.extract_strided_slice %18 {offsets = [0, 2], sizes = [16, 1], strides = [1, 1]} : vector<16x25xf32> to vector<16x1xf32>
    %22 = vector.extract_strided_slice %18 {offsets = [0, 3], sizes = [16, 1], strides = [1, 1]} : vector<16x25xf32> to vector<16x1xf32>
    %23 = vector.extract_strided_slice %18 {offsets = [0, 4], sizes = [16, 1], strides = [1, 1]} : vector<16x25xf32> to vector<16x1xf32>
    %24 = vector.extract_strided_slice %18 {offsets = [0, 5], sizes = [16, 1], strides = [1, 1]} : vector<16x25xf32> to vector<16x1xf32>
    %25 = vector.extract_strided_slice %18 {offsets = [0, 6], sizes = [16, 1], strides = [1, 1]} : vector<16x25xf32> to vector<16x1xf32>
    %26 = vector.extract_strided_slice %18 {offsets = [0, 7], sizes = [16, 1], strides = [1, 1]} : vector<16x25xf32> to vector<16x1xf32>
    %27 = vector.extract_strided_slice %18 {offsets = [0, 8], sizes = [16, 1], strides = [1, 1]} : vector<16x25xf32> to vector<16x1xf32>
    %28 = vector.extract_strided_slice %18 {offsets = [0, 9], sizes = [16, 1], strides = [1, 1]} : vector<16x25xf32> to vector<16x1xf32>
    %29 = vector.extract_strided_slice %18 {offsets = [0, 10], sizes = [16, 1], strides = [1, 1]} : vector<16x25xf32> to vector<16x1xf32>
    %30 = vector.extract_strided_slice %18 {offsets = [0, 11], sizes = [16, 1], strides = [1, 1]} : vector<16x25xf32> to vector<16x1xf32>
    %31 = vector.extract_strided_slice %18 {offsets = [0, 12], sizes = [16, 1], strides = [1, 1]} : vector<16x25xf32> to vector<16x1xf32>
    %32 = vector.extract_strided_slice %18 {offsets = [0, 13], sizes = [16, 1], strides = [1, 1]} : vector<16x25xf32> to vector<16x1xf32>
    %33 = vector.extract_strided_slice %18 {offsets = [0, 14], sizes = [16, 1], strides = [1, 1]} : vector<16x25xf32> to vector<16x1xf32>
    %34 = vector.extract_strided_slice %18 {offsets = [0, 15], sizes = [16, 1], strides = [1, 1]} : vector<16x25xf32> to vector<16x1xf32>
    %35 = vector.extract_strided_slice %18 {offsets = [0, 16], sizes = [16, 1], strides = [1, 1]} : vector<16x25xf32> to vector<16x1xf32>
    %36 = vector.extract_strided_slice %18 {offsets = [0, 17], sizes = [16, 1], strides = [1, 1]} : vector<16x25xf32> to vector<16x1xf32>
    %37 = vector.extract_strided_slice %18 {offsets = [0, 18], sizes = [16, 1], strides = [1, 1]} : vector<16x25xf32> to vector<16x1xf32>
    %38 = vector.extract_strided_slice %18 {offsets = [0, 19], sizes = [16, 1], strides = [1, 1]} : vector<16x25xf32> to vector<16x1xf32>
    %39 = vector.extract_strided_slice %18 {offsets = [0, 20], sizes = [16, 1], strides = [1, 1]} : vector<16x25xf32> to vector<16x1xf32>
    %40 = vector.extract_strided_slice %18 {offsets = [0, 21], sizes = [16, 1], strides = [1, 1]} : vector<16x25xf32> to vector<16x1xf32>
    %41 = vector.extract_strided_slice %18 {offsets = [0, 22], sizes = [16, 1], strides = [1, 1]} : vector<16x25xf32> to vector<16x1xf32>
    %42 = vector.extract_strided_slice %18 {offsets = [0, 23], sizes = [16, 1], strides = [1, 1]} : vector<16x25xf32> to vector<16x1xf32>
    %43 = vector.extract_strided_slice %18 {offsets = [0, 24], sizes = [16, 1], strides = [1, 1]} : vector<16x25xf32> to vector<16x1xf32>
    %c0_i32 = arith.constant 0 : i32
    %c8_i32 = arith.constant 8 : i32
    %44 = arith.addi %c0_i32, %c8_i32 : i32
    %c1_i32 = arith.constant 1 : i32
    scf.for %arg18 = %c0_i32 to %44 step %c1_i32  : i32 {
      %45 = arith.index_cast %arg18 : i32 to index
      %c0_17 = arith.constant 0 : index
      %46 = vector.load %arg17[%45, %c0_17] : memref<8x512xf32, #tpu.memory_space<vmem>>, vector<1x512xf32>
      %47 = arith.truncf %46 : vector<1x512xf32> to vector<1x512xbf16>
      %48 = vector.shape_cast %47 : vector<1x512xbf16> to vector<1x512xbf16>
      %49 = vector.broadcast %48 : vector<1x512xbf16> to vector<32x512xbf16>
      %c0_18 = arith.constant 0 : index
      %c0_19 = arith.constant 0 : index
      %50 = vector.load %arg6[%c0_18, %c0_19] : memref<32x512xbf16, #tpu.memory_space<vmem>>, vector<32x512xbf16>
      %51 = arith.mulf %49, %50 : vector<32x512xbf16>
      %c0_20 = arith.constant 0 : index
      %c0_21 = arith.constant 0 : index
      %52 = vector.load %arg7[%c0_20, %c0_21] : memref<512x125xbf16, #tpu.memory_space<vmem>>, vector<512x125xbf16>
      %cst_22 = arith.constant dense<0.000000e+00> : vector<32x125xf32>
      %53 = tpu.matmul %51, %52, %cst_22 {dimension_numbers = #tpu.dot_dimension_numbers<[1], [0], [0], [1], [0, 0, 1, 1], [], []>} : vector<32x512xbf16>, vector<512x125xbf16>, vector<32x125xf32> -> vector<32x125xf32>
      %54 = arith.truncf %53 : vector<32x125xf32> to vector<32x125xbf16>
      %cst_23 = arith.constant 0.000000e+00 : f32
      %55 = vector.broadcast %cst_23 : f32 to vector<32x77xf32>
      %c0_24 = arith.constant 0 : index
      %c0_25 = arith.constant 0 : index
      %56 = vector.load %arg8[%c0_24, %c0_25] : memref<800x32xbf16, #tpu.memory_space<vmem>>, vector<32x32xbf16>
      %57 = vector.extract_strided_slice %54 {offsets = [0, 0], sizes = [32, 77], strides = [1, 1]} : vector<32x125xbf16> to vector<32x77xbf16>
      %cst_26 = arith.constant dense<0.000000e+00> : vector<32x77xf32>
      %58 = tpu.matmul %56, %57, %cst_26 {dimension_numbers = #tpu.dot_dimension_numbers<[1], [0], [0], [1], [0, 0, 1, 1], [], []>} : vector<32x32xbf16>, vector<32x77xbf16>, vector<32x77xf32> -> vector<32x77xf32>
      %59 = arith.addf %55, %58 : vector<32x77xf32>
      %c32 = arith.constant 32 : index
      %c0_27 = arith.constant 0 : index
      %60 = vector.load %arg8[%c32, %c0_27] : memref<800x32xbf16, #tpu.memory_space<vmem>>, vector<32x32xbf16>
      %61 = vector.extract_strided_slice %54 {offsets = [0, 1], sizes = [32, 77], strides = [1, 1]} : vector<32x125xbf16> to vector<32x77xbf16>
      %cst_28 = arith.constant dense<0.000000e+00> : vector<32x77xf32>
      %62 = tpu.matmul %60, %61, %cst_28 {dimension_numbers = #tpu.dot_dimension_numbers<[1], [0], [0], [1], [0, 0, 1, 1], [], []>} : vector<32x32xbf16>, vector<32x77xbf16>, vector<32x77xf32> -> vector<32x77xf32>
      %63 = arith.addf %59, %62 : vector<32x77xf32>
      %c64 = arith.constant 64 : index
      %c0_29 = arith.constant 0 : index
      %64 = vector.load %arg8[%c64, %c0_29] : memref<800x32xbf16, #tpu.memory_space<vmem>>, vector<32x32xbf16>
      %65 = vector.extract_strided_slice %54 {offsets = [0, 2], sizes = [32, 77], strides = [1, 1]} : vector<32x125xbf16> to vector<32x77xbf16>
      %cst_30 = arith.constant dense<0.000000e+00> : vector<32x77xf32>
      %66 = tpu.matmul %64, %65, %cst_30 {dimension_numbers = #tpu.dot_dimension_numbers<[1], [0], [0], [1], [0, 0, 1, 1], [], []>} : vector<32x32xbf16>, vector<32x77xbf16>, vector<32x77xf32> -> vector<32x77xf32>
      %67 = arith.addf %63, %66 : vector<32x77xf32>
      %c96 = arith.constant 96 : index
      %c0_31 = arith.constant 0 : index
      %68 = vector.load %arg8[%c96, %c0_31] : memref<800x32xbf16, #tpu.memory_space<vmem>>, vector<32x32xbf16>
      %69 = vector.extract_strided_slice %54 {offsets = [0, 3], sizes = [32, 77], strides = [1, 1]} : vector<32x125xbf16> to vector<32x77xbf16>
      %cst_32 = arith.constant dense<0.000000e+00> : vector<32x77xf32>
      %70 = tpu.matmul %68, %69, %cst_32 {dimension_numbers = #tpu.dot_dimension_numbers<[1], [0], [0], [1], [0, 0, 1, 1], [], []>} : vector<32x32xbf16>, vector<32x77xbf16>, vector<32x77xf32> -> vector<32x77xf32>
      %71 = arith.addf %67, %70 : vector<32x77xf32>
      %c128 = arith.constant 128 : index
      %c0_33 = arith.constant 0 : index
      %72 = vector.load %arg8[%c128, %c0_33] : memref<800x32xbf16, #tpu.memory_space<vmem>>, vector<32x32xbf16>
      %73 = vector.extract_strided_slice %54 {offsets = [0, 4], sizes = [32, 77], strides = [1, 1]} : vector<32x125xbf16> to vector<32x77xbf16>
      %cst_34 = arith.constant dense<0.000000e+00> : vector<32x77xf32>
      %74 = tpu.matmul %72, %73, %cst_34 {dimension_numbers = #tpu.dot_dimension_numbers<[1], [0], [0], [1], [0, 0, 1, 1], [], []>} : vector<32x32xbf16>, vector<32x77xbf16>, vector<32x77xf32> -> vector<32x77xf32>
      %75 = arith.addf %71, %74 : vector<32x77xf32>
      %c160 = arith.constant 160 : index
      %c0_35 = arith.constant 0 : index
      %76 = vector.load %arg8[%c160, %c0_35] : memref<800x32xbf16, #tpu.memory_space<vmem>>, vector<32x32xbf16>
      %77 = vector.extract_strided_slice %54 {offsets = [0, 11], sizes = [32, 77], strides = [1, 1]} : vector<32x125xbf16> to vector<32x77xbf16>
      %cst_36 = arith.constant dense<0.000000e+00> : vector<32x77xf32>
      %78 = tpu.matmul %76, %77, %cst_36 {dimension_numbers = #tpu.dot_dimension_numbers<[1], [0], [0], [1], [0, 0, 1, 1], [], []>} : vector<32x32xbf16>, vector<32x77xbf16>, vector<32x77xf32> -> vector<32x77xf32>
      %79 = arith.addf %75, %78 : vector<32x77xf32>
      %c192 = arith.constant 192 : index
      %c0_37 = arith.constant 0 : index
      %80 = vector.load %arg8[%c192, %c0_37] : memref<800x32xbf16, #tpu.memory_space<vmem>>, vector<32x32xbf16>
      %81 = vector.extract_strided_slice %54 {offsets = [0, 12], sizes = [32, 77], strides = [1, 1]} : vector<32x125xbf16> to vector<32x77xbf16>
      %cst_38 = arith.constant dense<0.000000e+00> : vector<32x77xf32>
      %82 = tpu.matmul %80, %81, %cst_38 {dimension_numbers = #tpu.dot_dimension_numbers<[1], [0], [0], [1], [0, 0, 1, 1], [], []>} : vector<32x32xbf16>, vector<32x77xbf16>, vector<32x77xf32> -> vector<32x77xf32>
      %83 = arith.addf %79, %82 : vector<32x77xf32>
      %c224 = arith.constant 224 : index
      %c0_39 = arith.constant 0 : index
      %84 = vector.load %arg8[%c224, %c0_39] : memref<800x32xbf16, #tpu.memory_space<vmem>>, vector<32x32xbf16>
      %85 = vector.extract_strided_slice %54 {offsets = [0, 13], sizes = [32, 77], strides = [1, 1]} : vector<32x125xbf16> to vector<32x77xbf16>
      %cst_40 = arith.constant dense<0.000000e+00> : vector<32x77xf32>
      %86 = tpu.matmul %84, %85, %cst_40 {dimension_numbers = #tpu.dot_dimension_numbers<[1], [0], [0], [1], [0, 0, 1, 1], [], []>} : vector<32x32xbf16>, vector<32x77xbf16>, vector<32x77xf32> -> vector<32x77xf32>
      %87 = arith.addf %83, %86 : vector<32x77xf32>
      %c256 = arith.constant 256 : index
      %c0_41 = arith.constant 0 : index
      %88 = vector.load %arg8[%c256, %c0_41] : memref<800x32xbf16, #tpu.memory_space<vmem>>, vector<32x32xbf16>
      %89 = vector.extract_strided_slice %54 {offsets = [0, 14], sizes = [32, 77], strides = [1, 1]} : vector<32x125xbf16> to vector<32x77xbf16>
      %cst_42 = arith.constant dense<0.000000e+00> : vector<32x77xf32>
      %90 = tpu.matmul %88, %89, %cst_42 {dimension_numbers = #tpu.dot_dimension_numbers<[1], [0], [0], [1], [0, 0, 1, 1], [], []>} : vector<32x32xbf16>, vector<32x77xbf16>, vector<32x77xf32> -> vector<32x77xf32>
      %91 = arith.addf %87, %90 : vector<32x77xf32>
      %c288 = arith.constant 288 : index
      %c0_43 = arith.constant 0 : index
      %92 = vector.load %arg8[%c288, %c0_43] : memref<800x32xbf16, #tpu.memory_space<vmem>>, vector<32x32xbf16>
      %93 = vector.extract_strided_slice %54 {offsets = [0, 15], sizes = [32, 77], strides = [1, 1]} : vector<32x125xbf16> to vector<32x77xbf16>
      %cst_44 = arith.constant dense<0.000000e+00> : vector<32x77xf32>
      %94 = tpu.matmul %92, %93, %cst_44 {dimension_numbers = #tpu.dot_dimension_numbers<[1], [0], [0], [1], [0, 0, 1, 1], [], []>} : vector<32x32xbf16>, vector<32x77xbf16>, vector<32x77xf32> -> vector<32x77xf32>
      %95 = arith.addf %91, %94 : vector<32x77xf32>
      %c320 = arith.constant 320 : index
      %c0_45 = arith.constant 0 : index
      %96 = vector.load %arg8[%c320, %c0_45] : memref<800x32xbf16, #tpu.memory_space<vmem>>, vector<32x32xbf16>
      %97 = vector.extract_strided_slice %54 {offsets = [0, 22], sizes = [32, 77], strides = [1, 1]} : vector<32x125xbf16> to vector<32x77xbf16>
      %cst_46 = arith.constant dense<0.000000e+00> : vector<32x77xf32>
      %98 = tpu.matmul %96, %97, %cst_46 {dimension_numbers = #tpu.dot_dimension_numbers<[1], [0], [0], [1], [0, 0, 1, 1], [], []>} : vector<32x32xbf16>, vector<32x77xbf16>, vector<32x77xf32> -> vector<32x77xf32>
      %99 = arith.addf %95, %98 : vector<32x77xf32>
      %c352 = arith.constant 352 : index
      %c0_47 = arith.constant 0 : index
      %100 = vector.load %arg8[%c352, %c0_47] : memref<800x32xbf16, #tpu.memory_space<vmem>>, vector<32x32xbf16>
      %101 = vector.extract_strided_slice %54 {offsets = [0, 23], sizes = [32, 77], strides = [1, 1]} : vector<32x125xbf16> to vector<32x77xbf16>
      %cst_48 = arith.constant dense<0.000000e+00> : vector<32x77xf32>
      %102 = tpu.matmul %100, %101, %cst_48 {dimension_numbers = #tpu.dot_dimension_numbers<[1], [0], [0], [1], [0, 0, 1, 1], [], []>} : vector<32x32xbf16>, vector<32x77xbf16>, vector<32x77xf32> -> vector<32x77xf32>
      %103 = arith.addf %99, %102 : vector<32x77xf32>
      %c384 = arith.constant 384 : index
      %c0_49 = arith.constant 0 : index
      %104 = vector.load %arg8[%c384, %c0_49] : memref<800x32xbf16, #tpu.memory_space<vmem>>, vector<32x32xbf16>
      %105 = vector.extract_strided_slice %54 {offsets = [0, 24], sizes = [32, 77], strides = [1, 1]} : vector<32x125xbf16> to vector<32x77xbf16>
      %cst_50 = arith.constant dense<0.000000e+00> : vector<32x77xf32>
      %106 = tpu.matmul %104, %105, %cst_50 {dimension_numbers = #tpu.dot_dimension_numbers<[1], [0], [0], [1], [0, 0, 1, 1], [], []>} : vector<32x32xbf16>, vector<32x77xbf16>, vector<32x77xf32> -> vector<32x77xf32>
      %107 = arith.addf %103, %106 : vector<32x77xf32>
      %c416 = arith.constant 416 : index
      %c0_51 = arith.constant 0 : index
      %108 = vector.load %arg8[%c416, %c0_51] : memref<800x32xbf16, #tpu.memory_space<vmem>>, vector<32x32xbf16>
      %109 = vector.extract_strided_slice %54 {offsets = [0, 25], sizes = [32, 77], strides = [1, 1]} : vector<32x125xbf16> to vector<32x77xbf16>
      %cst_52 = arith.constant dense<0.000000e+00> : vector<32x77xf32>
      %110 = tpu.matmul %108, %109, %cst_52 {dimension_numbers = #tpu.dot_dimension_numbers<[1], [0], [0], [1], [0, 0, 1, 1], [], []>} : vector<32x32xbf16>, vector<32x77xbf16>, vector<32x77xf32> -> vector<32x77xf32>
      %111 = arith.addf %107, %110 : vector<32x77xf32>
      %c448 = arith.constant 448 : index
      %c0_53 = arith.constant 0 : index
      %112 = vector.load %arg8[%c448, %c0_53] : memref<800x32xbf16, #tpu.memory_space<vmem>>, vector<32x32xbf16>
      %113 = vector.extract_strided_slice %54 {offsets = [0, 26], sizes = [32, 77], strides = [1, 1]} : vector<32x125xbf16> to vector<32x77xbf16>
      %cst_54 = arith.constant dense<0.000000e+00> : vector<32x77xf32>
      %114 = tpu.matmul %112, %113, %cst_54 {dimension_numbers = #tpu.dot_dimension_numbers<[1], [0], [0], [1], [0, 0, 1, 1], [], []>} : vector<32x32xbf16>, vector<32x77xbf16>, vector<32x77xf32> -> vector<32x77xf32>
      %115 = arith.addf %111, %114 : vector<32x77xf32>
      %c480 = arith.constant 480 : index
      %c0_55 = arith.constant 0 : index
      %116 = vector.load %arg8[%c480, %c0_55] : memref<800x32xbf16, #tpu.memory_space<vmem>>, vector<32x32xbf16>
      %117 = vector.extract_strided_slice %54 {offsets = [0, 33], sizes = [32, 77], strides = [1, 1]} : vector<32x125xbf16> to vector<32x77xbf16>
      %cst_56 = arith.constant dense<0.000000e+00> : vector<32x77xf32>
      %118 = tpu.matmul %116, %117, %cst_56 {dimension_numbers = #tpu.dot_dimension_numbers<[1], [0], [0], [1], [0, 0, 1, 1], [], []>} : vector<32x32xbf16>, vector<32x77xbf16>, vector<32x77xf32> -> vector<32x77xf32>
      %119 = arith.addf %115, %118 : vector<32x77xf32>
      %c512 = arith.constant 512 : index
      %c0_57 = arith.constant 0 : index
      %120 = vector.load %arg8[%c512, %c0_57] : memref<800x32xbf16, #tpu.memory_space<vmem>>, vector<32x32xbf16>
      %121 = vector.extract_strided_slice %54 {offsets = [0, 34], sizes = [32, 77], strides = [1, 1]} : vector<32x125xbf16> to vector<32x77xbf16>
      %cst_58 = arith.constant dense<0.000000e+00> : vector<32x77xf32>
      %122 = tpu.matmul %120, %121, %cst_58 {dimension_numbers = #tpu.dot_dimension_numbers<[1], [0], [0], [1], [0, 0, 1, 1], [], []>} : vector<32x32xbf16>, vector<32x77xbf16>, vector<32x77xf32> -> vector<32x77xf32>
      %123 = arith.addf %119, %122 : vector<32x77xf32>
      %c544 = arith.constant 544 : index
      %c0_59 = arith.constant 0 : index
      %124 = vector.load %arg8[%c544, %c0_59] : memref<800x32xbf16, #tpu.memory_space<vmem>>, vector<32x32xbf16>
      %125 = vector.extract_strided_slice %54 {offsets = [0, 35], sizes = [32, 77], strides = [1, 1]} : vector<32x125xbf16> to vector<32x77xbf16>
      %cst_60 = arith.constant dense<0.000000e+00> : vector<32x77xf32>
      %126 = tpu.matmul %124, %125, %cst_60 {dimension_numbers = #tpu.dot_dimension_numbers<[1], [0], [0], [1], [0, 0, 1, 1], [], []>} : vector<32x32xbf16>, vector<32x77xbf16>, vector<32x77xf32> -> vector<32x77xf32>
      %127 = arith.addf %123, %126 : vector<32x77xf32>
      %c576 = arith.constant 576 : index
      %c0_61 = arith.constant 0 : index
      %128 = vector.load %arg8[%c576, %c0_61] : memref<800x32xbf16, #tpu.memory_space<vmem>>, vector<32x32xbf16>
      %129 = vector.extract_strided_slice %54 {offsets = [0, 36], sizes = [32, 77], strides = [1, 1]} : vector<32x125xbf16> to vector<32x77xbf16>
      %cst_62 = arith.constant dense<0.000000e+00> : vector<32x77xf32>
      %130 = tpu.matmul %128, %129, %cst_62 {dimension_numbers = #tpu.dot_dimension_numbers<[1], [0], [0], [1], [0, 0, 1, 1], [], []>} : vector<32x32xbf16>, vector<32x77xbf16>, vector<32x77xf32> -> vector<32x77xf32>
      %131 = arith.addf %127, %130 : vector<32x77xf32>
      %c608 = arith.constant 608 : index
      %c0_63 = arith.constant 0 : index
      %132 = vector.load %arg8[%c608, %c0_63] : memref<800x32xbf16, #tpu.memory_space<vmem>>, vector<32x32xbf16>
      %133 = vector.extract_strided_slice %54 {offsets = [0, 37], sizes = [32, 77], strides = [1, 1]} : vector<32x125xbf16> to vector<32x77xbf16>
      %cst_64 = arith.constant dense<0.000000e+00> : vector<32x77xf32>
      %134 = tpu.matmul %132, %133, %cst_64 {dimension_numbers = #tpu.dot_dimension_numbers<[1], [0], [0], [1], [0, 0, 1, 1], [], []>} : vector<32x32xbf16>, vector<32x77xbf16>, vector<32x77xf32> -> vector<32x77xf32>
      %135 = arith.addf %131, %134 : vector<32x77xf32>
      %c640 = arith.constant 640 : index
      %c0_65 = arith.constant 0 : index
      %136 = vector.load %arg8[%c640, %c0_65] : memref<800x32xbf16, #tpu.memory_space<vmem>>, vector<32x32xbf16>
      %137 = vector.extract_strided_slice %54 {offsets = [0, 44], sizes = [32, 77], strides = [1, 1]} : vector<32x125xbf16> to vector<32x77xbf16>
      %cst_66 = arith.constant dense<0.000000e+00> : vector<32x77xf32>
      %138 = tpu.matmul %136, %137, %cst_66 {dimension_numbers = #tpu.dot_dimension_numbers<[1], [0], [0], [1], [0, 0, 1, 1], [], []>} : vector<32x32xbf16>, vector<32x77xbf16>, vector<32x77xf32> -> vector<32x77xf32>
      %139 = arith.addf %135, %138 : vector<32x77xf32>
      %c672 = arith.constant 672 : index
      %c0_67 = arith.constant 0 : index
      %140 = vector.load %arg8[%c672, %c0_67] : memref<800x32xbf16, #tpu.memory_space<vmem>>, vector<32x32xbf16>
      %141 = vector.extract_strided_slice %54 {offsets = [0, 45], sizes = [32, 77], strides = [1, 1]} : vector<32x125xbf16> to vector<32x77xbf16>
      %cst_68 = arith.constant dense<0.000000e+00> : vector<32x77xf32>
      %142 = tpu.matmul %140, %141, %cst_68 {dimension_numbers = #tpu.dot_dimension_numbers<[1], [0], [0], [1], [0, 0, 1, 1], [], []>} : vector<32x32xbf16>, vector<32x77xbf16>, vector<32x77xf32> -> vector<32x77xf32>
      %143 = arith.addf %139, %142 : vector<32x77xf32>
      %c704 = arith.constant 704 : index
      %c0_69 = arith.constant 0 : index
      %144 = vector.load %arg8[%c704, %c0_69] : memref<800x32xbf16, #tpu.memory_space<vmem>>, vector<32x32xbf16>
      %145 = vector.extract_strided_slice %54 {offsets = [0, 46], sizes = [32, 77], strides = [1, 1]} : vector<32x125xbf16> to vector<32x77xbf16>
      %cst_70 = arith.constant dense<0.000000e+00> : vector<32x77xf32>
      %146 = tpu.matmul %144, %145, %cst_70 {dimension_numbers = #tpu.dot_dimension_numbers<[1], [0], [0], [1], [0, 0, 1, 1], [], []>} : vector<32x32xbf16>, vector<32x77xbf16>, vector<32x77xf32> -> vector<32x77xf32>
      %147 = arith.addf %143, %146 : vector<32x77xf32>
      %c736 = arith.constant 736 : index
      %c0_71 = arith.constant 0 : index
      %148 = vector.load %arg8[%c736, %c0_71] : memref<800x32xbf16, #tpu.memory_space<vmem>>, vector<32x32xbf16>
      %149 = vector.extract_strided_slice %54 {offsets = [0, 47], sizes = [32, 77], strides = [1, 1]} : vector<32x125xbf16> to vector<32x77xbf16>
      %cst_72 = arith.constant dense<0.000000e+00> : vector<32x77xf32>
      %150 = tpu.matmul %148, %149, %cst_72 {dimension_numbers = #tpu.dot_dimension_numbers<[1], [0], [0], [1], [0, 0, 1, 1], [], []>} : vector<32x32xbf16>, vector<32x77xbf16>, vector<32x77xf32> -> vector<32x77xf32>
      %151 = arith.addf %147, %150 : vector<32x77xf32>
      %c768 = arith.constant 768 : index
      %c0_73 = arith.constant 0 : index
      %152 = vector.load %arg8[%c768, %c0_73] : memref<800x32xbf16, #tpu.memory_space<vmem>>, vector<32x32xbf16>
      %153 = vector.extract_strided_slice %54 {offsets = [0, 48], sizes = [32, 77], strides = [1, 1]} : vector<32x125xbf16> to vector<32x77xbf16>
      %cst_74 = arith.constant dense<0.000000e+00> : vector<32x77xf32>
      %154 = tpu.matmul %152, %153, %cst_74 {dimension_numbers = #tpu.dot_dimension_numbers<[1], [0], [0], [1], [0, 0, 1, 1], [], []>} : vector<32x32xbf16>, vector<32x77xbf16>, vector<32x77xf32> -> vector<32x77xf32>
      %155 = arith.addf %151, %154 : vector<32x77xf32>
      %c0_75 = arith.constant 0 : index
      %c0_76 = arith.constant 0 : index
      %156 = vector.load %arg9[%c0_75, %c0_76] : memref<32x1xf32, #tpu.memory_space<vmem>>, vector<32x1xf32>
      %157 = vector.broadcast %156 : vector<32x1xf32> to vector<32x77xf32>
      %158 = arith.addf %155, %157 : vector<32x77xf32>
      %cst_77 = arith.constant 0.000000e+00 : f32
      %159 = vector.broadcast %cst_77 : f32 to vector<32x77xf32>
      %160 = arith.maximumf %158, %159 : vector<32x77xf32>
      %161 = arith.truncf %160 : vector<32x77xf32> to vector<32x77xbf16>
      %c0_78 = arith.constant 0 : index
      %c0_79 = arith.constant 0 : index
      %162 = vector.load %arg10[%c0_78, %c0_79] : memref<77x328xbf16, #tpu.memory_space<vmem>>, vector<77x328xbf16>
      %cst_80 = arith.constant dense<0.000000e+00> : vector<32x328xf32>
      %163 = tpu.matmul %161, %162, %cst_80 {dimension_numbers = #tpu.dot_dimension_numbers<[1], [0], [0], [1], [0, 0, 1, 1], [], []>} : vector<32x77xbf16>, vector<77x328xbf16>, vector<32x328xf32> -> vector<32x328xf32>
      %164 = arith.truncf %163 : vector<32x328xf32> to vector<32x328xbf16>
      %cst_81 = arith.constant 0.000000e+00 : f32
      %165 = vector.broadcast %cst_81 : f32 to vector<16x252xf32>
      %c0_82 = arith.constant 0 : index
      %c0_83 = arith.constant 0 : index
      %166 = vector.load %arg11[%c0_82, %c0_83] : memref<400x32xbf16, #tpu.memory_space<vmem>>, vector<16x32xbf16>
      %167 = vector.extract_strided_slice %164 {offsets = [0, 0], sizes = [32, 252], strides = [1, 1]} : vector<32x328xbf16> to vector<32x252xbf16>
      %cst_84 = arith.constant dense<0.000000e+00> : vector<16x252xf32>
      %168 = tpu.matmul %166, %167, %cst_84 {dimension_numbers = #tpu.dot_dimension_numbers<[1], [0], [0], [1], [0, 0, 1, 1], [], []>} : vector<16x32xbf16>, vector<32x252xbf16>, vector<16x252xf32> -> vector<16x252xf32>
      %169 = arith.addf %165, %168 : vector<16x252xf32>
      %c16 = arith.constant 16 : index
      %c0_85 = arith.constant 0 : index
      %170 = vector.load %arg11[%c16, %c0_85] : memref<400x32xbf16, #tpu.memory_space<vmem>>, vector<16x32xbf16>
      %171 = vector.extract_strided_slice %164 {offsets = [0, 1], sizes = [32, 252], strides = [1, 1]} : vector<32x328xbf16> to vector<32x252xbf16>
      %cst_86 = arith.constant dense<0.000000e+00> : vector<16x252xf32>
      %172 = tpu.matmul %170, %171, %cst_86 {dimension_numbers = #tpu.dot_dimension_numbers<[1], [0], [0], [1], [0, 0, 1, 1], [], []>} : vector<16x32xbf16>, vector<32x252xbf16>, vector<16x252xf32> -> vector<16x252xf32>
      %173 = arith.addf %169, %172 : vector<16x252xf32>
      %c32_87 = arith.constant 32 : index
      %c0_88 = arith.constant 0 : index
      %174 = vector.load %arg11[%c32_87, %c0_88] : memref<400x32xbf16, #tpu.memory_space<vmem>>, vector<16x32xbf16>
      %175 = vector.extract_strided_slice %164 {offsets = [0, 2], sizes = [32, 252], strides = [1, 1]} : vector<32x328xbf16> to vector<32x252xbf16>
      %cst_89 = arith.constant dense<0.000000e+00> : vector<16x252xf32>
      %176 = tpu.matmul %174, %175, %cst_89 {dimension_numbers = #tpu.dot_dimension_numbers<[1], [0], [0], [1], [0, 0, 1, 1], [], []>} : vector<16x32xbf16>, vector<32x252xbf16>, vector<16x252xf32> -> vector<16x252xf32>
      %177 = arith.addf %173, %176 : vector<16x252xf32>
      %c48 = arith.constant 48 : index
      %c0_90 = arith.constant 0 : index
      %178 = vector.load %arg11[%c48, %c0_90] : memref<400x32xbf16, #tpu.memory_space<vmem>>, vector<16x32xbf16>
      %179 = vector.extract_strided_slice %164 {offsets = [0, 3], sizes = [32, 252], strides = [1, 1]} : vector<32x328xbf16> to vector<32x252xbf16>
      %cst_91 = arith.constant dense<0.000000e+00> : vector<16x252xf32>
      %180 = tpu.matmul %178, %179, %cst_91 {dimension_numbers = #tpu.dot_dimension_numbers<[1], [0], [0], [1], [0, 0, 1, 1], [], []>} : vector<16x32xbf16>, vector<32x252xbf16>, vector<16x252xf32> -> vector<16x252xf32>
      %181 = arith.addf %177, %180 : vector<16x252xf32>
      %c64_92 = arith.constant 64 : index
      %c0_93 = arith.constant 0 : index
      %182 = vector.load %arg11[%c64_92, %c0_93] : memref<400x32xbf16, #tpu.memory_space<vmem>>, vector<16x32xbf16>
      %183 = vector.extract_strided_slice %164 {offsets = [0, 4], sizes = [32, 252], strides = [1, 1]} : vector<32x328xbf16> to vector<32x252xbf16>
      %cst_94 = arith.constant dense<0.000000e+00> : vector<16x252xf32>
      %184 = tpu.matmul %182, %183, %cst_94 {dimension_numbers = #tpu.dot_dimension_numbers<[1], [0], [0], [1], [0, 0, 1, 1], [], []>} : vector<16x32xbf16>, vector<32x252xbf16>, vector<16x252xf32> -> vector<16x252xf32>
      %185 = arith.addf %181, %184 : vector<16x252xf32>
      %c80 = arith.constant 80 : index
      %c0_95 = arith.constant 0 : index
      %186 = vector.load %arg11[%c80, %c0_95] : memref<400x32xbf16, #tpu.memory_space<vmem>>, vector<16x32xbf16>
      %187 = vector.extract_strided_slice %164 {offsets = [0, 18], sizes = [32, 252], strides = [1, 1]} : vector<32x328xbf16> to vector<32x252xbf16>
      %cst_96 = arith.constant dense<0.000000e+00> : vector<16x252xf32>
      %188 = tpu.matmul %186, %187, %cst_96 {dimension_numbers = #tpu.dot_dimension_numbers<[1], [0], [0], [1], [0, 0, 1, 1], [], []>} : vector<16x32xbf16>, vector<32x252xbf16>, vector<16x252xf32> -> vector<16x252xf32>
      %189 = arith.addf %185, %188 : vector<16x252xf32>
      %c96_97 = arith.constant 96 : index
      %c0_98 = arith.constant 0 : index
      %190 = vector.load %arg11[%c96_97, %c0_98] : memref<400x32xbf16, #tpu.memory_space<vmem>>, vector<16x32xbf16>
      %191 = vector.extract_strided_slice %164 {offsets = [0, 19], sizes = [32, 252], strides = [1, 1]} : vector<32x328xbf16> to vector<32x252xbf16>
      %cst_99 = arith.constant dense<0.000000e+00> : vector<16x252xf32>
      %192 = tpu.matmul %190, %191, %cst_99 {dimension_numbers = #tpu.dot_dimension_numbers<[1], [0], [0], [1], [0, 0, 1, 1], [], []>} : vector<16x32xbf16>, vector<32x252xbf16>, vector<16x252xf32> -> vector<16x252xf32>
      %193 = arith.addf %189, %192 : vector<16x252xf32>
      %c112 = arith.constant 112 : index
      %c0_100 = arith.constant 0 : index
      %194 = vector.load %arg11[%c112, %c0_100] : memref<400x32xbf16, #tpu.memory_space<vmem>>, vector<16x32xbf16>
      %195 = vector.extract_strided_slice %164 {offsets = [0, 20], sizes = [32, 252], strides = [1, 1]} : vector<32x328xbf16> to vector<32x252xbf16>
      %cst_101 = arith.constant dense<0.000000e+00> : vector<16x252xf32>
      %196 = tpu.matmul %194, %195, %cst_101 {dimension_numbers = #tpu.dot_dimension_numbers<[1], [0], [0], [1], [0, 0, 1, 1], [], []>} : vector<16x32xbf16>, vector<32x252xbf16>, vector<16x252xf32> -> vector<16x252xf32>
      %197 = arith.addf %193, %196 : vector<16x252xf32>
      %c128_102 = arith.constant 128 : index
      %c0_103 = arith.constant 0 : index
      %198 = vector.load %arg11[%c128_102, %c0_103] : memref<400x32xbf16, #tpu.memory_space<vmem>>, vector<16x32xbf16>
      %199 = vector.extract_strided_slice %164 {offsets = [0, 21], sizes = [32, 252], strides = [1, 1]} : vector<32x328xbf16> to vector<32x252xbf16>
      %cst_104 = arith.constant dense<0.000000e+00> : vector<16x252xf32>
      %200 = tpu.matmul %198, %199, %cst_104 {dimension_numbers = #tpu.dot_dimension_numbers<[1], [0], [0], [1], [0, 0, 1, 1], [], []>} : vector<16x32xbf16>, vector<32x252xbf16>, vector<16x252xf32> -> vector<16x252xf32>
      %201 = arith.addf %197, %200 : vector<16x252xf32>
      %c144 = arith.constant 144 : index
      %c0_105 = arith.constant 0 : index
      %202 = vector.load %arg11[%c144, %c0_105] : memref<400x32xbf16, #tpu.memory_space<vmem>>, vector<16x32xbf16>
      %203 = vector.extract_strided_slice %164 {offsets = [0, 22], sizes = [32, 252], strides = [1, 1]} : vector<32x328xbf16> to vector<32x252xbf16>
      %cst_106 = arith.constant dense<0.000000e+00> : vector<16x252xf32>
      %204 = tpu.matmul %202, %203, %cst_106 {dimension_numbers = #tpu.dot_dimension_numbers<[1], [0], [0], [1], [0, 0, 1, 1], [], []>} : vector<16x32xbf16>, vector<32x252xbf16>, vector<16x252xf32> -> vector<16x252xf32>
      %205 = arith.addf %201, %204 : vector<16x252xf32>
      %c160_107 = arith.constant 160 : index
      %c0_108 = arith.constant 0 : index
      %206 = vector.load %arg11[%c160_107, %c0_108] : memref<400x32xbf16, #tpu.memory_space<vmem>>, vector<16x32xbf16>
      %207 = vector.extract_strided_slice %164 {offsets = [0, 36], sizes = [32, 252], strides = [1, 1]} : vector<32x328xbf16> to vector<32x252xbf16>
      %cst_109 = arith.constant dense<0.000000e+00> : vector<16x252xf32>
      %208 = tpu.matmul %206, %207, %cst_109 {dimension_numbers = #tpu.dot_dimension_numbers<[1], [0], [0], [1], [0, 0, 1, 1], [], []>} : vector<16x32xbf16>, vector<32x252xbf16>, vector<16x252xf32> -> vector<16x252xf32>
      %209 = arith.addf %205, %208 : vector<16x252xf32>
      %c176 = arith.constant 176 : index
      %c0_110 = arith.constant 0 : index
      %210 = vector.load %arg11[%c176, %c0_110] : memref<400x32xbf16, #tpu.memory_space<vmem>>, vector<16x32xbf16>
      %211 = vector.extract_strided_slice %164 {offsets = [0, 37], sizes = [32, 252], strides = [1, 1]} : vector<32x328xbf16> to vector<32x252xbf16>
      %cst_111 = arith.constant dense<0.000000e+00> : vector<16x252xf32>
      %212 = tpu.matmul %210, %211, %cst_111 {dimension_numbers = #tpu.dot_dimension_numbers<[1], [0], [0], [1], [0, 0, 1, 1], [], []>} : vector<16x32xbf16>, vector<32x252xbf16>, vector<16x252xf32> -> vector<16x252xf32>
      %213 = arith.addf %209, %212 : vector<16x252xf32>
      %c192_112 = arith.constant 192 : index
      %c0_113 = arith.constant 0 : index
      %214 = vector.load %arg11[%c192_112, %c0_113] : memref<400x32xbf16, #tpu.memory_space<vmem>>, vector<16x32xbf16>
      %215 = vector.extract_strided_slice %164 {offsets = [0, 38], sizes = [32, 252], strides = [1, 1]} : vector<32x328xbf16> to vector<32x252xbf16>
      %cst_114 = arith.constant dense<0.000000e+00> : vector<16x252xf32>
      %216 = tpu.matmul %214, %215, %cst_114 {dimension_numbers = #tpu.dot_dimension_numbers<[1], [0], [0], [1], [0, 0, 1, 1], [], []>} : vector<16x32xbf16>, vector<32x252xbf16>, vector<16x252xf32> -> vector<16x252xf32>
      %217 = arith.addf %213, %216 : vector<16x252xf32>
      %c208 = arith.constant 208 : index
      %c0_115 = arith.constant 0 : index
      %218 = vector.load %arg11[%c208, %c0_115] : memref<400x32xbf16, #tpu.memory_space<vmem>>, vector<16x32xbf16>
      %219 = vector.extract_strided_slice %164 {offsets = [0, 39], sizes = [32, 252], strides = [1, 1]} : vector<32x328xbf16> to vector<32x252xbf16>
      %cst_116 = arith.constant dense<0.000000e+00> : vector<16x252xf32>
      %220 = tpu.matmul %218, %219, %cst_116 {dimension_numbers = #tpu.dot_dimension_numbers<[1], [0], [0], [1], [0, 0, 1, 1], [], []>} : vector<16x32xbf16>, vector<32x252xbf16>, vector<16x252xf32> -> vector<16x252xf32>
      %221 = arith.addf %217, %220 : vector<16x252xf32>
      %c224_117 = arith.constant 224 : index
      %c0_118 = arith.constant 0 : index
      %222 = vector.load %arg11[%c224_117, %c0_118] : memref<400x32xbf16, #tpu.memory_space<vmem>>, vector<16x32xbf16>
      %223 = vector.extract_strided_slice %164 {offsets = [0, 40], sizes = [32, 252], strides = [1, 1]} : vector<32x328xbf16> to vector<32x252xbf16>
      %cst_119 = arith.constant dense<0.000000e+00> : vector<16x252xf32>
      %224 = tpu.matmul %222, %223, %cst_119 {dimension_numbers = #tpu.dot_dimension_numbers<[1], [0], [0], [1], [0, 0, 1, 1], [], []>} : vector<16x32xbf16>, vector<32x252xbf16>, vector<16x252xf32> -> vector<16x252xf32>
      %225 = arith.addf %221, %224 : vector<16x252xf32>
      %c240 = arith.constant 240 : index
      %c0_120 = arith.constant 0 : index
      %226 = vector.load %arg11[%c240, %c0_120] : memref<400x32xbf16, #tpu.memory_space<vmem>>, vector<16x32xbf16>
      %227 = vector.extract_strided_slice %164 {offsets = [0, 54], sizes = [32, 252], strides = [1, 1]} : vector<32x328xbf16> to vector<32x252xbf16>
      %cst_121 = arith.constant dense<0.000000e+00> : vector<16x252xf32>
      %228 = tpu.matmul %226, %227, %cst_121 {dimension_numbers = #tpu.dot_dimension_numbers<[1], [0], [0], [1], [0, 0, 1, 1], [], []>} : vector<16x32xbf16>, vector<32x252xbf16>, vector<16x252xf32> -> vector<16x252xf32>
      %229 = arith.addf %225, %228 : vector<16x252xf32>
      %c256_122 = arith.constant 256 : index
      %c0_123 = arith.constant 0 : index
      %230 = vector.load %arg11[%c256_122, %c0_123] : memref<400x32xbf16, #tpu.memory_space<vmem>>, vector<16x32xbf16>
      %231 = vector.extract_strided_slice %164 {offsets = [0, 55], sizes = [32, 252], strides = [1, 1]} : vector<32x328xbf16> to vector<32x252xbf16>
      %cst_124 = arith.constant dense<0.000000e+00> : vector<16x252xf32>
      %232 = tpu.matmul %230, %231, %cst_124 {dimension_numbers = #tpu.dot_dimension_numbers<[1], [0], [0], [1], [0, 0, 1, 1], [], []>} : vector<16x32xbf16>, vector<32x252xbf16>, vector<16x252xf32> -> vector<16x252xf32>
      %233 = arith.addf %229, %232 : vector<16x252xf32>
      %c272 = arith.constant 272 : index
      %c0_125 = arith.constant 0 : index
      %234 = vector.load %arg11[%c272, %c0_125] : memref<400x32xbf16, #tpu.memory_space<vmem>>, vector<16x32xbf16>
      %235 = vector.extract_strided_slice %164 {offsets = [0, 56], sizes = [32, 252], strides = [1, 1]} : vector<32x328xbf16> to vector<32x252xbf16>
      %cst_126 = arith.constant dense<0.000000e+00> : vector<16x252xf32>
      %236 = tpu.matmul %234, %235, %cst_126 {dimension_numbers = #tpu.dot_dimension_numbers<[1], [0], [0], [1], [0, 0, 1, 1], [], []>} : vector<16x32xbf16>, vector<32x252xbf16>, vector<16x252xf32> -> vector<16x252xf32>
      %237 = arith.addf %233, %236 : vector<16x252xf32>
      %c288_127 = arith.constant 288 : index
      %c0_128 = arith.constant 0 : index
      %238 = vector.load %arg11[%c288_127, %c0_128] : memref<400x32xbf16, #tpu.memory_space<vmem>>, vector<16x32xbf16>
      %239 = vector.extract_strided_slice %164 {offsets = [0, 57], sizes = [32, 252], strides = [1, 1]} : vector<32x328xbf16> to vector<32x252xbf16>
      %cst_129 = arith.constant dense<0.000000e+00> : vector<16x252xf32>
      %240 = tpu.matmul %238, %239, %cst_129 {dimension_numbers = #tpu.dot_dimension_numbers<[1], [0], [0], [1], [0, 0, 1, 1], [], []>} : vector<16x32xbf16>, vector<32x252xbf16>, vector<16x252xf32> -> vector<16x252xf32>
      %241 = arith.addf %237, %240 : vector<16x252xf32>
      %c304 = arith.constant 304 : index
      %c0_130 = arith.constant 0 : index
      %242 = vector.load %arg11[%c304, %c0_130] : memref<400x32xbf16, #tpu.memory_space<vmem>>, vector<16x32xbf16>
      %243 = vector.extract_strided_slice %164 {offsets = [0, 58], sizes = [32, 252], strides = [1, 1]} : vector<32x328xbf16> to vector<32x252xbf16>
      %cst_131 = arith.constant dense<0.000000e+00> : vector<16x252xf32>
      %244 = tpu.matmul %242, %243, %cst_131 {dimension_numbers = #tpu.dot_dimension_numbers<[1], [0], [0], [1], [0, 0, 1, 1], [], []>} : vector<16x32xbf16>, vector<32x252xbf16>, vector<16x252xf32> -> vector<16x252xf32>
      %245 = arith.addf %241, %244 : vector<16x252xf32>
      %c320_132 = arith.constant 320 : index
      %c0_133 = arith.constant 0 : index
      %246 = vector.load %arg11[%c320_132, %c0_133] : memref<400x32xbf16, #tpu.memory_space<vmem>>, vector<16x32xbf16>
      %247 = vector.extract_strided_slice %164 {offsets = [0, 72], sizes = [32, 252], strides = [1, 1]} : vector<32x328xbf16> to vector<32x252xbf16>
      %cst_134 = arith.constant dense<0.000000e+00> : vector<16x252xf32>
      %248 = tpu.matmul %246, %247, %cst_134 {dimension_numbers = #tpu.dot_dimension_numbers<[1], [0], [0], [1], [0, 0, 1, 1], [], []>} : vector<16x32xbf16>, vector<32x252xbf16>, vector<16x252xf32> -> vector<16x252xf32>
      %249 = arith.addf %245, %248 : vector<16x252xf32>
      %c336 = arith.constant 336 : index
      %c0_135 = arith.constant 0 : index
      %250 = vector.load %arg11[%c336, %c0_135] : memref<400x32xbf16, #tpu.memory_space<vmem>>, vector<16x32xbf16>
      %251 = vector.extract_strided_slice %164 {offsets = [0, 73], sizes = [32, 252], strides = [1, 1]} : vector<32x328xbf16> to vector<32x252xbf16>
      %cst_136 = arith.constant dense<0.000000e+00> : vector<16x252xf32>
      %252 = tpu.matmul %250, %251, %cst_136 {dimension_numbers = #tpu.dot_dimension_numbers<[1], [0], [0], [1], [0, 0, 1, 1], [], []>} : vector<16x32xbf16>, vector<32x252xbf16>, vector<16x252xf32> -> vector<16x252xf32>
      %253 = arith.addf %249, %252 : vector<16x252xf32>
      %c352_137 = arith.constant 352 : index
      %c0_138 = arith.constant 0 : index
      %254 = vector.load %arg11[%c352_137, %c0_138] : memref<400x32xbf16, #tpu.memory_space<vmem>>, vector<16x32xbf16>
      %255 = vector.extract_strided_slice %164 {offsets = [0, 74], sizes = [32, 252], strides = [1, 1]} : vector<32x328xbf16> to vector<32x252xbf16>
      %cst_139 = arith.constant dense<0.000000e+00> : vector<16x252xf32>
      %256 = tpu.matmul %254, %255, %cst_139 {dimension_numbers = #tpu.dot_dimension_numbers<[1], [0], [0], [1], [0, 0, 1, 1], [], []>} : vector<16x32xbf16>, vector<32x252xbf16>, vector<16x252xf32> -> vector<16x252xf32>
      %257 = arith.addf %253, %256 : vector<16x252xf32>
      %c368 = arith.constant 368 : index
      %c0_140 = arith.constant 0 : index
      %258 = vector.load %arg11[%c368, %c0_140] : memref<400x32xbf16, #tpu.memory_space<vmem>>, vector<16x32xbf16>
      %259 = vector.extract_strided_slice %164 {offsets = [0, 75], sizes = [32, 252], strides = [1, 1]} : vector<32x328xbf16> to vector<32x252xbf16>
      %cst_141 = arith.constant dense<0.000000e+00> : vector<16x252xf32>
      %260 = tpu.matmul %258, %259, %cst_141 {dimension_numbers = #tpu.dot_dimension_numbers<[1], [0], [0], [1], [0, 0, 1, 1], [], []>} : vector<16x32xbf16>, vector<32x252xbf16>, vector<16x252xf32> -> vector<16x252xf32>
      %261 = arith.addf %257, %260 : vector<16x252xf32>
      %c384_142 = arith.constant 384 : index
      %c0_143 = arith.constant 0 : index
      %262 = vector.load %arg11[%c384_142, %c0_143] : memref<400x32xbf16, #tpu.memory_space<vmem>>, vector<16x32xbf16>
      %263 = vector.extract_strided_slice %164 {offsets = [0, 76], sizes = [32, 252], strides = [1, 1]} : vector<32x328xbf16> to vector<32x252xbf16>
      %cst_144 = arith.constant dense<0.000000e+00> : vector<16x252xf32>
      %264 = tpu.matmul %262, %263, %cst_144 {dimension_numbers = #tpu.dot_dimension_numbers<[1], [0], [0], [1], [0, 0, 1, 1], [], []>} : vector<16x32xbf16>, vector<32x252xbf16>, vector<16x252xf32> -> vector<16x252xf32>
      %265 = arith.addf %261, %264 : vector<16x252xf32>
      %c0_145 = arith.constant 0 : index
      %c0_146 = arith.constant 0 : index
      %266 = vector.load %arg12[%c0_145, %c0_146] : memref<16x1xf32, #tpu.memory_space<vmem>>, vector<16x1xf32>
      %267 = vector.broadcast %266 : vector<16x1xf32> to vector<16x252xf32>
      %268 = arith.addf %265, %267 : vector<16x252xf32>
      %cst_147 = arith.constant 0.000000e+00 : f32
      %269 = vector.broadcast %cst_147 : f32 to vector<16x252xf32>
      %270 = arith.maximumf %268, %269 : vector<16x252xf32>
      %271 = arith.truncf %270 : vector<16x252xf32> to vector<16x252xbf16>
      %c0_148 = arith.constant 0 : index
      %c0_149 = arith.constant 0 : index
      %272 = vector.load %arg13[%c0_148, %c0_149] : memref<252x1028xbf16, #tpu.memory_space<vmem>>, vector<252x1028xbf16>
      %cst_150 = arith.constant dense<0.000000e+00> : vector<16x1028xf32>
      %273 = tpu.matmul %271, %272, %cst_150 {dimension_numbers = #tpu.dot_dimension_numbers<[1], [0], [0], [1], [0, 0, 1, 1], [], []>} : vector<16x252xbf16>, vector<252x1028xbf16>, vector<16x1028xf32> -> vector<16x1028xf32>
      %cst_151 = arith.constant 0.000000e+00 : f32
      %274 = vector.broadcast %cst_151 : f32 to vector<16x896xf32>
      %275 = vector.extract_strided_slice %273 {offsets = [0, 0], sizes = [16, 896], strides = [1, 1]} : vector<16x1028xf32> to vector<16x896xf32>
      %276 = vector.broadcast %19 : vector<16x1xf32> to vector<16x896xf32>
      %277 = arith.mulf %275, %276 : vector<16x896xf32>
      %278 = arith.addf %274, %277 : vector<16x896xf32>
      %279 = vector.extract_strided_slice %273 {offsets = [0, 1], sizes = [16, 896], strides = [1, 1]} : vector<16x1028xf32> to vector<16x896xf32>
      %280 = vector.broadcast %20 : vector<16x1xf32> to vector<16x896xf32>
      %281 = arith.mulf %279, %280 : vector<16x896xf32>
      %282 = arith.addf %278, %281 : vector<16x896xf32>
      %283 = vector.extract_strided_slice %273 {offsets = [0, 2], sizes = [16, 896], strides = [1, 1]} : vector<16x1028xf32> to vector<16x896xf32>
      %284 = vector.broadcast %21 : vector<16x1xf32> to vector<16x896xf32>
      %285 = arith.mulf %283, %284 : vector<16x896xf32>
      %286 = arith.addf %282, %285 : vector<16x896xf32>
      %287 = vector.extract_strided_slice %273 {offsets = [0, 3], sizes = [16, 896], strides = [1, 1]} : vector<16x1028xf32> to vector<16x896xf32>
      %288 = vector.broadcast %22 : vector<16x1xf32> to vector<16x896xf32>
      %289 = arith.mulf %287, %288 : vector<16x896xf32>
      %290 = arith.addf %286, %289 : vector<16x896xf32>
      %291 = vector.extract_strided_slice %273 {offsets = [0, 4], sizes = [16, 896], strides = [1, 1]} : vector<16x1028xf32> to vector<16x896xf32>
      %292 = vector.broadcast %23 : vector<16x1xf32> to vector<16x896xf32>
      %293 = arith.mulf %291, %292 : vector<16x896xf32>
      %294 = arith.addf %290, %293 : vector<16x896xf32>
      %295 = vector.extract_strided_slice %273 {offsets = [0, 32], sizes = [16, 896], strides = [1, 1]} : vector<16x1028xf32> to vector<16x896xf32>
      %296 = vector.broadcast %24 : vector<16x1xf32> to vector<16x896xf32>
      %297 = arith.mulf %295, %296 : vector<16x896xf32>
      %298 = arith.addf %294, %297 : vector<16x896xf32>
      %299 = vector.extract_strided_slice %273 {offsets = [0, 33], sizes = [16, 896], strides = [1, 1]} : vector<16x1028xf32> to vector<16x896xf32>
      %300 = vector.broadcast %25 : vector<16x1xf32> to vector<16x896xf32>
      %301 = arith.mulf %299, %300 : vector<16x896xf32>
      %302 = arith.addf %298, %301 : vector<16x896xf32>
      %303 = vector.extract_strided_slice %273 {offsets = [0, 34], sizes = [16, 896], strides = [1, 1]} : vector<16x1028xf32> to vector<16x896xf32>
      %304 = vector.broadcast %26 : vector<16x1xf32> to vector<16x896xf32>
      %305 = arith.mulf %303, %304 : vector<16x896xf32>
      %306 = arith.addf %302, %305 : vector<16x896xf32>
      %307 = vector.extract_strided_slice %273 {offsets = [0, 35], sizes = [16, 896], strides = [1, 1]} : vector<16x1028xf32> to vector<16x896xf32>
      %308 = vector.broadcast %27 : vector<16x1xf32> to vector<16x896xf32>
      %309 = arith.mulf %307, %308 : vector<16x896xf32>
      %310 = arith.addf %306, %309 : vector<16x896xf32>
      %311 = vector.extract_strided_slice %273 {offsets = [0, 36], sizes = [16, 896], strides = [1, 1]} : vector<16x1028xf32> to vector<16x896xf32>
      %312 = vector.broadcast %28 : vector<16x1xf32> to vector<16x896xf32>
      %313 = arith.mulf %311, %312 : vector<16x896xf32>
      %314 = arith.addf %310, %313 : vector<16x896xf32>
      %315 = vector.extract_strided_slice %273 {offsets = [0, 64], sizes = [16, 896], strides = [1, 1]} : vector<16x1028xf32> to vector<16x896xf32>
      %316 = vector.broadcast %29 : vector<16x1xf32> to vector<16x896xf32>
      %317 = arith.mulf %315, %316 : vector<16x896xf32>
      %318 = arith.addf %314, %317 : vector<16x896xf32>
      %319 = vector.extract_strided_slice %273 {offsets = [0, 65], sizes = [16, 896], strides = [1, 1]} : vector<16x1028xf32> to vector<16x896xf32>
      %320 = vector.broadcast %30 : vector<16x1xf32> to vector<16x896xf32>
      %321 = arith.mulf %319, %320 : vector<16x896xf32>
      %322 = arith.addf %318, %321 : vector<16x896xf32>
      %323 = vector.extract_strided_slice %273 {offsets = [0, 66], sizes = [16, 896], strides = [1, 1]} : vector<16x1028xf32> to vector<16x896xf32>
      %324 = vector.broadcast %31 : vector<16x1xf32> to vector<16x896xf32>
      %325 = arith.mulf %323, %324 : vector<16x896xf32>
      %326 = arith.addf %322, %325 : vector<16x896xf32>
      %327 = vector.extract_strided_slice %273 {offsets = [0, 67], sizes = [16, 896], strides = [1, 1]} : vector<16x1028xf32> to vector<16x896xf32>
      %328 = vector.broadcast %32 : vector<16x1xf32> to vector<16x896xf32>
      %329 = arith.mulf %327, %328 : vector<16x896xf32>
      %330 = arith.addf %326, %329 : vector<16x896xf32>
      %331 = vector.extract_strided_slice %273 {offsets = [0, 68], sizes = [16, 896], strides = [1, 1]} : vector<16x1028xf32> to vector<16x896xf32>
      %332 = vector.broadcast %33 : vector<16x1xf32> to vector<16x896xf32>
      %333 = arith.mulf %331, %332 : vector<16x896xf32>
      %334 = arith.addf %330, %333 : vector<16x896xf32>
      %335 = vector.extract_strided_slice %273 {offsets = [0, 96], sizes = [16, 896], strides = [1, 1]} : vector<16x1028xf32> to vector<16x896xf32>
      %336 = vector.broadcast %34 : vector<16x1xf32> to vector<16x896xf32>
      %337 = arith.mulf %335, %336 : vector<16x896xf32>
      %338 = arith.addf %334, %337 : vector<16x896xf32>
      %339 = vector.extract_strided_slice %273 {offsets = [0, 97], sizes = [16, 896], strides = [1, 1]} : vector<16x1028xf32> to vector<16x896xf32>
      %340 = vector.broadcast %35 : vector<16x1xf32> to vector<16x896xf32>
      %341 = arith.mulf %339, %340 : vector<16x896xf32>
      %342 = arith.addf %338, %341 : vector<16x896xf32>
      %343 = vector.extract_strided_slice %273 {offsets = [0, 98], sizes = [16, 896], strides = [1, 1]} : vector<16x1028xf32> to vector<16x896xf32>
      %344 = vector.broadcast %36 : vector<16x1xf32> to vector<16x896xf32>
      %345 = arith.mulf %343, %344 : vector<16x896xf32>
      %346 = arith.addf %342, %345 : vector<16x896xf32>
      %347 = vector.extract_strided_slice %273 {offsets = [0, 99], sizes = [16, 896], strides = [1, 1]} : vector<16x1028xf32> to vector<16x896xf32>
      %348 = vector.broadcast %37 : vector<16x1xf32> to vector<16x896xf32>
      %349 = arith.mulf %347, %348 : vector<16x896xf32>
      %350 = arith.addf %346, %349 : vector<16x896xf32>
      %351 = vector.extract_strided_slice %273 {offsets = [0, 100], sizes = [16, 896], strides = [1, 1]} : vector<16x1028xf32> to vector<16x896xf32>
      %352 = vector.broadcast %38 : vector<16x1xf32> to vector<16x896xf32>
      %353 = arith.mulf %351, %352 : vector<16x896xf32>
      %354 = arith.addf %350, %353 : vector<16x896xf32>
      %355 = vector.extract_strided_slice %273 {offsets = [0, 128], sizes = [16, 896], strides = [1, 1]} : vector<16x1028xf32> to vector<16x896xf32>
      %356 = vector.broadcast %39 : vector<16x1xf32> to vector<16x896xf32>
      %357 = arith.mulf %355, %356 : vector<16x896xf32>
      %358 = arith.addf %354, %357 : vector<16x896xf32>
      %359 = vector.extract_strided_slice %273 {offsets = [0, 129], sizes = [16, 896], strides = [1, 1]} : vector<16x1028xf32> to vector<16x896xf32>
      %360 = vector.broadcast %40 : vector<16x1xf32> to vector<16x896xf32>
      %361 = arith.mulf %359, %360 : vector<16x896xf32>
      %362 = arith.addf %358, %361 : vector<16x896xf32>
      %363 = vector.extract_strided_slice %273 {offsets = [0, 130], sizes = [16, 896], strides = [1, 1]} : vector<16x1028xf32> to vector<16x896xf32>
      %364 = vector.broadcast %41 : vector<16x1xf32> to vector<16x896xf32>
      %365 = arith.mulf %363, %364 : vector<16x896xf32>
      %366 = arith.addf %362, %365 : vector<16x896xf32>
      %367 = vector.extract_strided_slice %273 {offsets = [0, 131], sizes = [16, 896], strides = [1, 1]} : vector<16x1028xf32> to vector<16x896xf32>
      %368 = vector.broadcast %42 : vector<16x1xf32> to vector<16x896xf32>
      %369 = arith.mulf %367, %368 : vector<16x896xf32>
      %370 = arith.addf %366, %369 : vector<16x896xf32>
      %371 = vector.extract_strided_slice %273 {offsets = [0, 132], sizes = [16, 896], strides = [1, 1]} : vector<16x1028xf32> to vector<16x896xf32>
      %372 = vector.broadcast %43 : vector<16x1xf32> to vector<16x896xf32>
      %373 = arith.mulf %371, %372 : vector<16x896xf32>
      %374 = arith.addf %370, %373 : vector<16x896xf32>
      %cst_152 = arith.constant dense<0.000000e+00> : vector<896xf32>
      %375 = vector.multi_reduction <add>, %374, %cst_152 [0] : vector<16x896xf32> to vector<896xf32>
      %376 = vector.shape_cast %375 : vector<896xf32> to vector<1x896xf32>
      %c0_153 = arith.constant 0 : index
      %c0_154 = arith.constant 0 : index
      %377 = vector.load %arg15[%c0_153, %c0_154] : memref<1x1xf32, #tpu.memory_space<vmem>>, vector<1x1xf32>
      %378 = vector.broadcast %377 : vector<1x1xf32> to vector<1x896xf32>
      %379 = arith.addf %376, %378 : vector<1x896xf32>
      %380 = arith.index_cast %arg18 : i32 to index
      %c0_155 = arith.constant 0 : index
      %381 = vector.load %arg16[%380, %c0_155] : memref<8x896xf32, #tpu.memory_space<vmem>>, vector<1x896xf32>
      tpu.vector_store %arg16[%380, %c0_155], %379 {strides = array<i32>} : memref<8x896xf32, #tpu.memory_space<vmem>>, vector<1x896xf32>,
    }
    %c8_i32_16 = arith.constant 8 : i32
    return
  }
  func.func @transform_0(%arg0: i32) -> (i32, i32) {
    %c0_i32 = arith.constant 0 : i32
    %c0_i32_0 = arith.constant 0 : i32
    return %arg0, %c0_i32 : i32, i32
  }
  func.func @transform_1(%arg0: i32) -> (i32, i32) {
    %c0_i32 = arith.constant 0 : i32
    %c0_i32_0 = arith.constant 0 : i32
    %c0_i32_1 = arith.constant 0 : i32
    return %c0_i32, %c0_i32_0 : i32, i32
  }
  func.func @transform_2(%arg0: i32) -> (i32, i32) {
    %c0_i32 = arith.constant 0 : i32
    %c0_i32_0 = arith.constant 0 : i32
    %c0_i32_1 = arith.constant 0 : i32
    return %c0_i32, %c0_i32_0 : i32, i32
  }
  func.func @transform_3(%arg0: i32) -> (i32, i32) {
    %c0_i32 = arith.constant 0 : i32
    %c0_i32_0 = arith.constant 0 : i32
    %c0_i32_1 = arith.constant 0 : i32
    return %c0_i32, %c0_i32_0 : i32, i32
  }
  func.func @transform_4(%arg0: i32) -> (i32, i32) {
    %c0_i32 = arith.constant 0 : i32
    %c0_i32_0 = arith.constant 0 : i32
    %c0_i32_1 = arith.constant 0 : i32
    return %c0_i32, %c0_i32_0 : i32, i32
  }
  func.func @transform_5(%arg0: i32) -> (i32, i32) {
    %c0_i32 = arith.constant 0 : i32
    %c0_i32_0 = arith.constant 0 : i32
    %c0_i32_1 = arith.constant 0 : i32
    return %c0_i32, %c0_i32_0 : i32, i32
  }
  func.func @transform_6(%arg0: i32) -> (i32, i32) {
    %c0_i32 = arith.constant 0 : i32
    %c0_i32_0 = arith.constant 0 : i32
    %c0_i32_1 = arith.constant 0 : i32
    return %c0_i32, %c0_i32_0 : i32, i32
  }
  func.func @transform_7(%arg0: i32) -> (i32, i32) {
    %c0_i32 = arith.constant 0 : i32
    %c0_i32_0 = arith.constant 0 : i32
    %c0_i32_1 = arith.constant 0 : i32
    return %c0_i32, %c0_i32_0 : i32, i32
  }
  func.func @transform_8(%arg0: i32) -> (i32, i32) {
    %c0_i32 = arith.constant 0 : i32
    %c0_i32_0 = arith.constant 0 : i32
    %c0_i32_1 = arith.constant 0 : i32
    return %c0_i32, %c0_i32_0 : i32, i32
  }
  func.func @transform_9(%arg0: i32) -> (i32, i32) {
    %c0_i32 = arith.constant 0 : i32
    %c0_i32_0 = arith.constant 0 : i32
    %c0_i32_1 = arith.constant 0 : i32
    return %c0_i32, %c0_i32_0 : i32, i32
  }
  func.func @transform_10(%arg0: i32) -> (i32, i32) {
    %c0_i32 = arith.constant 0 : i32
    %c0_i32_0 = arith.constant 0 : i32
    %c0_i32_1 = arith.constant 0 : i32
    return %c0_i32, %c0_i32_0 : i32, i32
  }
  func.func @transform_11(%arg0: i32) -> (i32, i32) {
    %c0_i32 = arith.constant 0 : i32
    %c0_i32_0 = arith.constant 0 : i32
    %c0_i32_1 = arith.constant 0 : i32
    return %c0_i32, %c0_i32_0 : i32, i32
  }
  func.func @transform_12(%arg0: i32) -> (i32, i32) {
    %c0_i32 = arith.constant 0 : i32
    %c0_i32_0 = arith.constant 0 : i32
    %c0_i32_1 = arith.constant 0 : i32
    return %c0_i32, %c0_i32_0 : i32, i32
  }
  func.func @transform_13(%arg0: i32) -> (i32, i32) {
    %c0_i32 = arith.constant 0 : i32
    %c0_i32_0 = arith.constant 0 : i32
    %c0_i32_1 = arith.constant 0 : i32
    return %c0_i32, %c0_i32_0 : i32, i32
  }
  func.func @transform_14(%arg0: i32) -> (i32, i32) {
    %c0_i32 = arith.constant 0 : i32
    %c0_i32_0 = arith.constant 0 : i32
    %c0_i32_1 = arith.constant 0 : i32
    return %c0_i32, %c0_i32_0 : i32, i32
  }
  func.func @transform_15(%arg0: i32) -> (i32, i32) {
    %c0_i32 = arith.constant 0 : i32
    %c0_i32_0 = arith.constant 0 : i32
    return %arg0, %c0_i32 : i32, i32
  }
}

</mosaic_0001>

<bundles_post_ra>
// kernel: conv_decoder_mnist_forward.1
= control target key start
LH: loop header
LB: loop body
LE: loop exit
PB: predicated region body
PF: predicated region fallthrough
CT: control target
= control target key end

     0   :  { %vm81_vm0 = vcmask 1044480   ;;  %v10868_v2 = vmov 0   ;;  %vm77_vm1 = vcmask 80896   ;;  %s15871_s1 = inlined_call_operand.vmem [shape: bf16[10,256], index: 1, kind: input, shape index: {}]   ;;  %s15872_s5 = inlined_call_operand.vmem [shape: bf16[32,512], index: 5, kind: input, shape index: {}]   ;;  %s15873_s6 = inlined_call_operand.vmem [shape: bf16[512,125], index: 6, kind: input, shape index: {}]   ;;  %s15874_s7 = inlined_call_operand.vmem [shape: bf16[800,32], index: 7, kind: input, shape index: {}]   ;;  %s15875_s8 = inlined_call_operand.vmem [shape: f32[32,1], index: 8, kind: input, shape index: {}]   ;;  %s15876_s9 = inlined_call_operand.vmem [shape: bf16[77,328], index: 9, kind: input, shape index: {}]   ;;  %s15877_s10 = inlined_call_operand.vmem [shape: bf16[400,32], index: 10, kind: input, shape index: {}]   ;;  %s15878_s11 = inlined_call_operand.vmem [shape: f32[16,1], index: 11, kind: input, shape index: {}]   ;;  %s15879_s12 = inlined_call_operand.vmem [shape: bf16[252,1028], index: 12, kind: input, shape index: {}]   ;;  %s15880_s14 = inlined_call_operand.<no memory space> [shape: f32[1,1], index: 14, kind: input, shape index: {}]   ;;  %s15881_s15 = inlined_call_operand.vmem [shape: f32[8,896], index: 15, kind: output, shape index: {}]   ;;  %s15882_s0 = inlined_call_operand.vmem [shape: f32[8,10], index: 0, kind: input, shape index: {}]   ;;  %s15883_s3 = inlined_call_operand.vmem [shape: bf16[256,512], index: 3, kind: input, shape index: {}]   ;;  %s15884_s2 = inlined_call_operand.vmem [shape: f32[1,256], index: 2, kind: input, shape index: {}]   ;;  %s15885_s13 = inlined_call_operand.vmem [shape: f32[16,25], index: 13, kind: input, shape index: {}]   ;;  %s15886_s4 = inlined_call_operand.vmem [shape: f32[1,512], index: 4, kind: input, shape index: {}]  }
   0x1   :  { %v20_v0 = vstv %s15880_s14  ;;  %v10364_v1 = vld [vmem:[%s15871_s1 + $0x4] ss:$8 sps:$4 sm:$0x1f]   ;;  %120 = vmatprep.mubr.bf16.mxu0 %v10868_v2  ;;  %v10366_v3 = vld [vmem:[%s15871_s1] ss:$8 sps:$4 sm:$0x1f]  }
   0x2   :  { %21 = vst [vmem:[#allocation3] sm:$0x1] %v20_v0  ;;  %v53_v4 = vld [vmem:[%s15882_s0] sm:$0xff]  ;;  %9252 = vmatprep.subr.msk.bf16.mxu0 %vm81_vm0, %v10364_v1  ;;  %v83_v6 = vsel %vm81_vm0, %v10366_v3, 0  ;;  %v10369_v8 = vld [vmem:[%s15883_s3 + $0x8] ss:$16 sps:$4 sm:$0xff]  }
   0x3   :  { %v10367_v5 = vld [vmem:[%s15883_s3 + $0x4] ss:$16 sps:$4 sm:$0xff]   ;;  %v54_v7 = vpack.c.bf16 %v53_v4, %v53_v4  ;;  %v10371_v9 = vld [vmem:[%s15883_s3 + $0xc] ss:$16 sps:$4 sm:$0xff]   ;;  %89 = vmatpush1.bf16.msra.mxu0 %v83_v6  ;;  %v10372_v10 = vld [vmem:[%s15883_s3] ss:$16 sps:$4 sm:$0xff]  }
   0x4   :  { %539 = vmatprep.subr.bf16.mxu1 %v10367_v5  ;;  %580 = vmatprep.subr.bf16.mxu0 %v10371_v9  ;;  %v10373_v11 = vld [vmem:[%s15883_s3 + $0x24] ss:$16 sps:$4 sm:$0xff]   ;;  %v10377_v12 = vld [vmem:[%s15883_s3 + $0x2c] ss:$16 sps:$4 sm:$0xff]   ;;  %v10378_v13 = vld [vmem:[%s15883_s3 + $0x20] ss:$16 sps:$4 sm:$0xff]  }
   0x5   :  { %540 = vmatpush1.bf16.msra.mxu1 %v10372_v10  ;;  %v10379_v14 = vld [vmem:[%s15883_s3 + $0x44] ss:$16 sps:$4 sm:$0xff]   ;;  %v10375_v15 = vld [vmem:[%s15883_s3 + $0x28] ss:$16 sps:$4 sm:$0xff]   ;;  %v10383_v16 = vld [vmem:[%s15883_s3 + $0x4c] ss:$16 sps:$4 sm:$0xff]  }
   0x6   :  { %9253 = vmatmul.mubr.msk.bf16.vlgmr.msra.gmra.mrb[0].mxu0 %vm77_vm1, %v54_v7  ;;  %541 = vmatprep.subr.bf16.mxu1 %v10373_v11  ;;  %v10384_v17 = vld [vmem:[%s15883_s3 + $0x40] ss:$16 sps:$4 sm:$0xff]   ;;  %v10385_v18 = vld [vmem:[%s15883_s3 + $0x64] ss:$16 sps:$4 sm:$0xff]   ;;  %v10381_v19 = vld [vmem:[%s15883_s3 + $0x48] ss:$16 sps:$4 sm:$0xff]   ;;  %v15911_v7 = vlaneseq }
   0x7   :  { %581 = vmatpush1.bf16.msra.mxu0 %v10369_v8  ;;  %v10389_v20 = vld [vmem:[%s15883_s3 + $0x6c] ss:$16 sps:$4 sm:$0xff]   ;;  %v10390_v21 = vld [vmem:[%s15883_s3 + $0x60] ss:$16 sps:$4 sm:$0xff]   ;;  %v10391_v22 = vld [vmem:[%s15883_s3 + $0x84] ss:$16 sps:$4 sm:$0xff]  }
   0x8   :  { %582 = vmatprep.subr.bf16.mxu0 %v10377_v12  ;;  %v10387_v23 = vld [vmem:[%s15883_s3 + $0x68] ss:$16 sps:$4 sm:$0xff]   ;;  %v10395_v24 = vld [vmem:[%s15883_s3 + $0x8c] ss:$16 sps:$4 sm:$0xff]   ;;  %v10396_v25 = vld [vmem:[%s15883_s3 + $0x80] ss:$16 sps:$4 sm:$0xff]  }
   0x9   :  { %542 = vmatpush1.bf16.msra.mxu1 %v10378_v13  ;;  %v10397_v26 = vld [vmem:[%s15883_s3 + $0xa4] ss:$16 sps:$4 sm:$0xff]   ;;  %v10393_v27 = vld [vmem:[%s15883_s3 + $0x88] ss:$16 sps:$4 sm:$0xff]   ;;  %v10401_v28 = vld [vmem:[%s15883_s3 + $0xac] ss:$16 sps:$4 sm:$0xff]  }
   0xa   :  { %543 = vmatprep.subr.bf16.mxu1 %v10379_v14  ;;  %v10402_v29 = vld [vmem:[%s15883_s3 + $0xa0] ss:$16 sps:$4 sm:$0xff]   ;;  %v10403_v30 = vld [vmem:[%s15883_s3 + $0xc4] ss:$16 sps:$4 sm:$0xff]   ;;  %v10399_v31 = vld [vmem:[%s15883_s3 + $0xa8] ss:$16 sps:$4 sm:$0xff]  }
   0xb   :  { %583 = vmatpush1.bf16.msra.mxu0 %v10375_v15  ;;  %v10407_v32 = vld [vmem:[%s15883_s3 + $0xcc] ss:$16 sps:$4 sm:$0xff]   ;;  %v10408_v33 = vld [vmem:[%s15883_s3 + $0xc0] ss:$16 sps:$4 sm:$0xff]   ;;  %v10409_v34 = vld [vmem:[%s15883_s3 + $0xe4] ss:$16 sps:$4 sm:$0xff]  }
   0xc   :  { %584 = vmatprep.subr.bf16.mxu0 %v10383_v16  ;;  %v10405_v35 = vld [vmem:[%s15883_s3 + $0xc8] ss:$16 sps:$4 sm:$0xff]   ;;  %v10413_v36 = vld [vmem:[%s15883_s3 + $0xec] ss:$16 sps:$4 sm:$0xff]   ;;  %v10414_v37 = vld [vmem:[%s15883_s3 + $0xe0] ss:$16 sps:$4 sm:$0xff]  }
   0xd   :  { %544 = vmatpush1.bf16.msra.mxu1 %v10384_v17  ;;  %v10415_v38 = vld [vmem:[%s15883_s3 + $0x104] ss:$16 sps:$4 sm:$0xff]   ;;  %v10411_v39 = vld [vmem:[%s15883_s3 + $0xe8] ss:$16 sps:$4 sm:$0xff]   ;;  %v10419_v40 = vld [vmem:[%s15883_s3 + $0x10c] ss:$16 sps:$4 sm:$0xff]  }
   0xe   :  { %545 = vmatprep.subr.bf16.mxu1 %v10385_v18  ;;  %v10420_v41 = vld [vmem:[%s15883_s3 + $0x100] ss:$16 sps:$4 sm:$0xff]   ;;  %v10421_v42 = vld [vmem:[%s15883_s3 + $0x124] ss:$16 sps:$4 sm:$0xff]   ;;  %v10417_v43 = vld [vmem:[%s15883_s3 + $0x108] ss:$16 sps:$4 sm:$0xff]  }
   0xf   :  { %585 = vmatpush1.bf16.msra.mxu0 %v10381_v19  ;;  %v10425_v44 = vld [vmem:[%s15883_s3 + $0x12c] ss:$16 sps:$4 sm:$0xff]   ;;  %v10423_v45 = vld [vmem:[%s15883_s3 + $0x128] ss:$16 sps:$4 sm:$0xff]   ;;  %v10426_v46 = vld [vmem:[%s15883_s3 + $0x120] ss:$16 sps:$4 sm:$0xff]  }
  0x10   :  { %586 = vmatprep.subr.bf16.mxu0 %v10389_v20  ;;  %v10427_v47 = vld [vmem:[%s15883_s3 + $0x144] ss:$16 sps:$4 sm:$0xff]   ;;  %v10431_v48 = vld [vmem:[%s15883_s3 + $0x14c] ss:$16 sps:$4 sm:$0xff]   ;;  %v10432_v49 = vld [vmem:[%s15883_s3 + $0x140] ss:$16 sps:$4 sm:$0xff]  }
  0x11   :  { %546 = vmatpush1.bf16.msra.mxu1 %v10390_v21  ;;  %v10433_v50 = vld [vmem:[%s15883_s3 + $0x164] ss:$16 sps:$4 sm:$0xff]   ;;  %v10429_v51 = vld [vmem:[%s15883_s3 + $0x148] ss:$16 sps:$4 sm:$0xff]   ;;  %v10437_v52 = vld [vmem:[%s15883_s3 + $0x16c] ss:$16 sps:$4 sm:$0xff]  }
  0x12   :  { %547 = vmatprep.subr.bf16.mxu1 %v10391_v22  ;;  %v10438_v53 = vld [vmem:[%s15883_s3 + $0x160] ss:$16 sps:$4 sm:$0xff]   ;;  %v10439_v54 = vld [vmem:[%s15883_s3 + $0x184] ss:$16 sps:$4 sm:$0xff]   ;;  %v10435_v55 = vld [vmem:[%s15883_s3 + $0x168] ss:$16 sps:$4 sm:$0xff]  }
  0x13   :  { %587 = vmatpush1.bf16.msra.mxu0 %v10387_v23  ;;  %v10443_v56 = vld [vmem:[%s15883_s3 + $0x18c] ss:$16 sps:$4 sm:$0xff]   ;;  %v10444_v57 = vld [vmem:[%s15883_s3 + $0x180] ss:$16 sps:$4 sm:$0xff]   ;;  %v10445_v58 = vld [vmem:[%s15883_s3 + $0x1a4] ss:$16 sps:$4 sm:$0xff]  }
  0x14   :  { %588 = vmatprep.subr.bf16.mxu0 %v10395_v24  ;;  %v10441_v59 = vld [vmem:[%s15883_s3 + $0x188] ss:$16 sps:$4 sm:$0xff]   ;;  %v10449_v60 = vld [vmem:[%s15883_s3 + $0x1ac] ss:$16 sps:$4 sm:$0xff]   ;;  %v10450_v61 = vld [vmem:[%s15883_s3 + $0x1a0] ss:$16 sps:$4 sm:$0xff]  }
  0x15   :  { %548 = vmatpush1.bf16.msra.mxu1 %v10396_v25  ;;  %v10447_v62 = vld [vmem:[%s15883_s3 + $0x1a8] ss:$16 sps:$4 sm:$0xff]   ;;  %v10451_v63 = vld [vmem:[%s15883_s3 + $0x1c4] ss:$16 sps:$4 sm:$0xff]   ;;  %v10455_v0 = vld [vmem:[%s15883_s3 + $0x1cc] ss:$16 sps:$4 sm:$0xff]  }
  0x16   :  { %549 = vmatprep.subr.bf16.mxu1 %v10397_v26  ;;  %v10453_v1 = vld [vmem:[%s15883_s3 + $0x1c8] ss:$16 sps:$4 sm:$0xff]   ;;  %v10456_v2 = vld [vmem:[%s15883_s3 + $0x1c0] ss:$16 sps:$4 sm:$0xff]   ;;  %v10457_v3 = vld [vmem:[%s15883_s3 + $0x1e4] ss:$16 sps:$4 sm:$0xff]  }
  0x17   :  { %589 = vmatpush1.bf16.msra.mxu0 %v10393_v27  ;;  %v10461_v4 = vld [vmem:[%s15883_s3 + $0x1ec] ss:$16 sps:$4 sm:$0xff]   ;;  %v10459_v5 = vld [vmem:[%s15883_s3 + $0x1e8] ss:$16 sps:$4 sm:$0xff]   ;;  %v10462_v6 = vld [vmem:[%s15883_s3 + $0x1e0] ss:$16 sps:$4 sm:$0xff]  }
  0x18   :  { %590 = vmatprep.subr.bf16.mxu0 %v10401_v28  ;;  %v11233_v8 = vshrl.u32 %v15911_v7, 7  ;;  %v57_v10 = vld [vmem:[%s15884_s2] sm:$0x3]  ;;  %v11254_v25 = vld [vmem:[%s15885_s13 + $0x8] sm:$0xff] }
  0x19   :  { %550 = vmatpush1.bf16.msra.mxu1 %v10402_v29  ;;  %v11249_v24 = vld [vmem:[%s15885_s13] sm:$0xff]  ;;  %16244 = vst [vmem:[#allocation8_spill] sm:$0xff] %v11254_v25 }
  0x1a   :  { %551 = vmatprep.subr.bf16.mxu1 %v10403_v30  ;;  %16240 = vst [vmem:[#allocation4_spill] sm:$0xff] %v11233_v8  ;;  %v11236_v9 = vsub.s32 0, %v11233_v8  ;;  %v11242_v11 = vsub.s32 1, %v11233_v8  ;;  %16243 = vst [vmem:[#allocation7_spill] sm:$0xff] %v11249_v24  ;;  %v15909_v26 = vsub.s32 2, %v11233_v8  ;;  %v15910_v28 = vsub.s32 3, %v11233_v8 }
  0x1b   :  { %591 = vmatpush1.bf16.msra.mxu0 %v10399_v31  ;;  %v197_v27 = vld [vmem:[%s15886_s4] sm:$0xf]  ;;  %s11267_s4 = smov 0  }
  0x1c   :  { %592 = vmatprep.subr.bf16.mxu0 %v10407_v32  ;;  %16241 = vst [vmem:[#allocation5_spill] sm:$0xff] %v11236_v9  ;;  %16242 = vst [vmem:[#allocation6_spill] sm:$0xff] %v11242_v11  ;;  %v62_v12 = vrot.slane %v57_v10, %v11236_v9  ;;  %v66_v13 = vrot.slane %v57_v10, %v11242_v11  ;;  %v202_v29 = vrot.slane %v197_v27, %v11236_v9 }
  0x1d   :  { %552 = vmatpush1.bf16.msra.mxu1 %v10408_v33  ;;  %v210_v30 = vrot.slane %v197_v27, %v15909_v26  ;;  %v206_v31 = vrot.slane %v197_v27, %v11242_v11  ;;  %v214_v32 = vrot.slane %v197_v27, %v15910_v28 }
  0x1e   :  { %553 = vmatprep.subr.bf16.mxu1 %v10409_v34 }
  0x1f   :  { %593 = vmatpush1.bf16.msra.mxu0 %v10405_v35 }
  0x20   :  { %594 = vmatprep.subr.bf16.mxu0 %v10413_v36 }
  0x21   :  { %554 = vmatpush1.bf16.msra.mxu1 %v10414_v37 }
  0x22   :  { %555 = vmatprep.subr.bf16.mxu1 %v10415_v38 }
  0x23   :  { %595 = vmatpush1.bf16.msra.mxu0 %v10411_v39 }
  0x24   :  { %596 = vmatprep.subr.bf16.mxu0 %v10419_v40 }
  0x25   :  { %556 = vmatpush1.bf16.msra.mxu1 %v10420_v41 }
  0x26   :  { %557 = vmatprep.subr.bf16.mxu1 %v10421_v42 }
  0x27   :  { %597 = vmatpush1.bf16.msra.mxu0 %v10417_v43 }
  0x28   :  { %598 = vmatprep.subr.bf16.mxu0 %v10425_v44 }
  0x29   :  { %558 = vmatpush1.bf16.msra.mxu1 %v10426_v46 }
  0x2a   :  { %559 = vmatprep.subr.bf16.mxu1 %v10427_v47 }
  0x2b   :  { %599 = vmatpush1.bf16.msra.mxu0 %v10423_v45 }
  0x2c   :  { %600 = vmatprep.subr.bf16.mxu0 %v10431_v48 }
  0x2d   :  { %560 = vmatpush1.bf16.msra.mxu1 %v10432_v49 }
  0x2e   :  { %561 = vmatprep.subr.bf16.mxu1 %v10433_v50 }
  0x2f   :  { %601 = vmatpush1.bf16.msra.mxu0 %v10429_v51 }
  0x30   :  { %602 = vmatprep.subr.bf16.mxu0 %v10437_v52 }
  0x31   :  { %562 = vmatpush1.bf16.msra.mxu1 %v10438_v53 }
  0x32   :  { %563 = vmatprep.subr.bf16.mxu1 %v10439_v54 }
  0x33   :  { %603 = vmatpush1.bf16.msra.mxu0 %v10435_v55 }
  0x34   :  { %604 = vmatprep.subr.bf16.mxu0 %v10443_v56 }
  0x35   :  { %564 = vmatpush1.bf16.msra.mxu1 %v10444_v57 }
  0x36   :  { %565 = vmatprep.subr.bf16.mxu1 %v10445_v58 }
  0x37   :  { %605 = vmatpush1.bf16.msra.mxu0 %v10441_v59 }
  0x38   :  { %606 = vmatprep.subr.bf16.mxu0 %v10449_v60 }
  0x39   :  { %566 = vmatpush1.bf16.msra.mxu1 %v10450_v61 }
  0x3a   :  { %567 = vmatprep.subr.bf16.mxu1 %v10451_v63 }
  0x3b   :  { %607 = vmatpush1.bf16.msra.mxu0 %v10447_v62 }
  0x3c   :  { %608 = vmatprep.subr.bf16.mxu0 %v10455_v0 }
  0x3d   :  { %568 = vmatpush1.bf16.msra.mxu1 %v10456_v2 }
  0x3e   :  { %569 = vmatprep.subr.bf16.mxu1 %v10457_v3 }
  0x3f   :  { %609 = vmatpush1.bf16.msra.mxu0 %v10453_v1 }
  0x40   :  { %610 = vmatprep.subr.bf16.mxu0 %v10461_v4 }
  0x41   :  { %570 = vmatpush1.bf16.msra.mxu1 %v10462_v6 }
  0x43   :  { %611 = vmatpush1.bf16.msra.mxu0 %v10459_v5 }
  0xd9   :  { %v122_v14 = vpop.f32.mrb[0].mxu0 }
  0xda   :  { %v123_v15 = vadd.f32 %v122_v14, %v62_v12  ;;  %v124_v16 = vpop.f32.mrb[1].mxu0 }
  0xdb   :  { %v125_v17 = vadd.f32 %v124_v16, %v66_v13  ;;  %v126_v18 = vpop.f32.mrb[2].mxu0 }
  0xdc   :  { %v129_v19 = vmax.f32 %v123_v15, 0.0  ;;  %v127_v20 = vpop.f32.mrb[3].mxu0 }
  0xdd   :  { %v130_v21 = vmax.f32 %v125_v17, 0.0 }
  0xde   :  { %v131_v23 = vpack.c.bf16 %v129_v19, %v129_v19 }
  0xdf   :  { %v132_v22 = vpack.c.bf16 %v130_v21, %v130_v21 }
  0xe1   :  { %571 = vmatprep.mubr.bf16.mxu1 %v132_v22  ;;  %612 = vmatprep.mubr.bf16.mxu0 %v132_v22 }
  0xe2   :  { %572 = vmatmul.mubr.bf16.vlgmr.msra.gmra.mrb[0].mxu1 %v131_v23  ;;  %613 = vmatmul.mubr.bf16.vlgmr.msra.gmra.mrb[4].mxu0 %v131_v23 }
 0x1b5   :  { %v573_v33 = vpop.f32.mrb[0].mxu1  ;;  %v614_v34 = vpop.f32.mrb[4].mxu0 }
 0x1b6   :  { %v574_v35 = vadd.f32 %v573_v33, %v202_v29  ;;  %v615_v36 = vadd.f32 %v614_v34, %v210_v30  ;;  %v575_v37 = vpop.f32.mrb[1].mxu1  ;;  %v616_v38 = vpop.f32.mrb[5].mxu0 }
 0x1b7   :  { %v576_v39 = vadd.f32 %v575_v37, %v206_v31  ;;  %v617_v40 = vadd.f32 %v616_v38, %v214_v32  ;;  %v577_v41 = vpop.f32.mrb[2].mxu1  ;;  %v618_v42 = vpop.f32.mrb[6].mxu0 }
 0x1b8   :  { %v621_v43 = vmax.f32 %v574_v35, 0.0  ;;  %v623_v44 = vmax.f32 %v615_v36, 0.0  ;;  %v578_v45 = vpop.f32.mrb[3].mxu1  ;;  %v619_v46 = vpop.f32.mrb[7].mxu0 }
 0x1b9   :  { %v622_v47 = vmax.f32 %v576_v39, 0.0  ;;  %v624_v48 = vmax.f32 %v617_v40, 0.0 }
 0x1ba   :  { %625 = vst [vmem:[#allocation2] sm:$0xff] %v621_v43  ;;  %627 = vst [vmem:[#allocation2 + $0x10] sm:$0xff] %v623_v44 }
 0x1bb   :  { %626 = vst [vmem:[#allocation2 + $0x8] sm:$0xff] %v622_v47  ;;  %628 = vst [vmem:[#allocation2 + $0x18] sm:$0xff] %v624_v48 }
 0x1bc LB: > { %v16245_v25 = vld [vmem:[#allocation8_spill] sm:$0xff]  ;;  %v16246_v24 = vld [vmem:[#allocation7_spill] sm:$0xff]  ;;  %v16247_v9 = vld [vmem:[#allocation5_spill] sm:$0xff]  ;;  %s637_s25 = sshra.s32 %s10866_s4, 3  ;;  %s640_s3 = sand.u32 7, %s10866_s4  ;;  %vm16072_vm2 = vcmask 261120   ;;  %s10866_s4 = sphi %s11267_s4, %s636_s4  }
 0x1bd   : > { %v16248_v8 = vld [vmem:[#allocation4_spill] sm:$0xff]  ;;  %s9682_s14 = smul.u32 56, %s637_s25  ;;  %v10521_v57 = vld [vmem:[%s15873_s6 + $0x50] sm:$0xff]   ;;  %v10525_v61 = vld [vmem:[%s15873_s6 + $0x58] sm:$0xff]   ;;  %s9683_s28 = sshll.u32 %s637_s25, 5  ;;  %vm3213_vm3 = vcmask 1045504  }
 0x1be   : > { %v10513_v49 = vld [vmem:[%s15873_s6 + $0x40] sm:$0xff]   ;;  %v10517_v53 = vld [vmem:[%s15873_s6 + $0x48] sm:$0xff]   ;;  %v10522_v58 = vld [vmem:[%s15873_s6 + $0xd0] sm:$0xff]   ;;  %s643_s17 = sadd.s32 %s9683_s28, %s640_s3  ;;  %v16250_v28 = vsub.s32 3, %v16248_v8  ;;  %v16251_v26 = vsub.s32 2, %v16248_v8  ;;  %s15936_s26 = smov 126  }
 0x1bf   : > { %v10514_v50 = vld [vmem:[%s15873_s6 + $0xc0] sm:$0xff]   ;;  %9684 = vmatprep.subr.bf16.mxu0 %v10513_v49  ;;  %v10518_v54 = vld [vmem:[%s15873_s6 + $0xc8] sm:$0xff]   ;;  %s11302_s1 = sadd.s32 %s9682_s14, %s640_s3  ;;  %v10523_v59 = vld [vmem:[%s15873_s6 + $0x10] sm:$0xff]   ;;  %s644_s27 = scalar_lea.vmem [#allocation2], %s643_s17  ;;  %vm3214_vm4 = vcmask 1046528   ;;  %vm3206_vm5 = vcmask 629760  }
 0x1c0   : > { %v10515_v51 = vld [vmem:[%s15873_s6] sm:$0xff]   ;;  %9712 = vmatprep.subr.bf16.mxu1 %v10514_v50  ;;  %v10519_v55 = vld [vmem:[%s15873_s6 + $0x8] sm:$0xff]   ;;  %v10524_v60 = vld [vmem:[%s15873_s6 + $0x90] sm:$0xff]   ;;  %s15939_s14 = smov 125   ;;  %s15901_s28 = smov 124   ;;  %vm3355_vm6 = vcmask 1039360  }
 0x1c1   : > { %v10516_v52 = vld [vmem:[%s15873_s6 + $0x80] sm:$0xff]   ;;  %9685 = vmatpush3.bf16.msra.mxu0 %v10515_v51  ;;  %v10520_v56 = vld [vmem:[%s15873_s6 + $0x88] sm:$0xff]   ;;  %v10526_v62 = vld [vmem:[%s15873_s6 + $0xd8] sm:$0xff]   ;;  %s10873_s2 = smov 117   ;;  %s10874_s29 = smov 116   ;;  %v16280_v8 = vmov 11  }
 0x1c2   : > { %9713 = vmatpush3.bf16.msra.mxu1 %v10516_v52  ;;  %9686 = vmatprep.subr.bf16.mxu0 %v10517_v53  ;;  %v10527_v63 = vld [vmem:[%s15873_s6 + $0x18] sm:$0xff]   ;;  %v10529_v1 = vld [vmem:[%s15873_s6 + $0x60] sm:$0xff]   ;;  %v10533_v5 = vld [vmem:[%s15873_s6 + $0x68] sm:$0xff]   ;;  %s10875_s30 = smov 115   ;;  %s10876_s0 = smov 114   ;;  %vm3474_vm7 = vcmask 1031168  }
 0x1c3   : > { %9714 = vmatprep.subr.bf16.mxu1 %v10518_v54  ;;  %v10528_v0 = vld [vmem:[%s15873_s6 + $0x98] sm:$0xff]   ;;  %v10530_v2 = vld [vmem:[%s15873_s6 + $0xe0] sm:$0xff]   ;;  %v10534_v6 = vld [vmem:[%s15873_s6 + $0xe8] sm:$0xff]   ;;  %s10877_s13 = smov 113   ;;  %s10878_s16 = smov 106   ;;  %vm3546_vm8 = vcmask 1022976  }
 0x1c4   : > { %v10531_v3 = vld [vmem:[%s15873_s6 + $0x20] sm:$0xff]   ;;  %v10535_v10 = vld [vmem:[%s15873_s6 + $0x28] sm:$0xff]   ;;  %v10537_v13 = vld [vmem:[%s15873_s6 + $0x70] sm:$0xff]   ;;  %s10879_s17 = smov 105   ;;  %s10880_s18 = smov 104   ;;  %vm3618_vm9 = vcmask 1014784  }
 0x1c5   : > { %9687 = vmatpush3.bf16.msra.mxu0 %v10519_v55  ;;  %v10532_v4 = vld [vmem:[%s15873_s6 + $0xa0] sm:$0xff]   ;;  %v10536_v12 = vld [vmem:[%s15873_s6 + $0xa8] sm:$0xff]   ;;  %v10538_v14 = vld [vmem:[%s15873_s6 + $0xf0] sm:$0xff]   ;;  %s10881_s25 = smov 103   ;;  %s10882_s19 = smov 102   ;;  %vm3696_vm10 = vcmask 900096  }
 0x1c6   : > { %9715 = vmatpush3.bf16.msra.mxu1 %v10520_v56  ;;  %9688 = vmatprep.subr.bf16.mxu0 %v10521_v57  ;;  %v10539_v15 = vld [vmem:[%s15873_s6 + $0x30] sm:$0xff]   ;;  %v10541_v17 = vld [vmem:[%s15873_s6 + $0x78] sm:$0xff]   ;;  %s15889_s20 = smov 95   ;;  %s15891_s21 = smov 94   ;;  %vm3774_vm11 = vcmask 891904   ;;  %vm3852_vm12 = vcmask 883712  }
 0x1c7   : > { %9716 = vmatprep.subr.bf16.mxu1 %v10522_v58  ;;  %v10540_v16 = vld [vmem:[%s15873_s6 + $0xb0] sm:$0xff]   ;;  %v10542_v18 = vld [vmem:[%s15873_s6 + $0xf8] sm:$0xff]   ;;  %s15887_s22 = smov 93   ;;  %s10886_s23 = smov 92   ;;  %vm3930_vm13 = vcmask 875520   ;;  %vm4008_vm14 = vcmask 867328  }
 0x1c8   : > { %v10543_v19 = vld [vmem:[%s15873_s6 + $0x38] sm:$0xff]   ;;  %v10545_v31 = vld [vmem:[%s15872_s5] ss:$16 sps:$4 sm:$0xff]   ;;  %v10547_v32 = vld [vmem:[%s15872_s5 + $0x4] ss:$16 sps:$4 sm:$0xff]   ;;  %s10887_s24 = smov 91  }
 0x1c9   : > { %9689 = vmatpush3.bf16.msra.mxu0 %v10523_v59  ;;  %v10544_v20 = vld [vmem:[%s15873_s6 + $0xb8] sm:$0xff]   ;;  %v10551_v42 = vld [vmem:[%s15872_s5 + $0x24] ss:$16 sps:$4 sm:$0xff]   ;;  %v10555_v54 = vld [vmem:[%s15872_s5 + $0x20] ss:$16 sps:$4 sm:$0xff]   ;;  %s10888_s3 = smov 84  }
 0x1ca   : > { %9717 = vmatpush3.bf16.msra.mxu1 %v10524_v60  ;;  %9690 = vmatprep.subr.bf16.mxu0 %v10525_v61  ;;  %v645_v21 = vld [vmem:[%s644_s27] ss:$8 sm:$0xf]  ;;  %v10550_v37 = vld [vmem:[%s15872_s5 + $0xc] ss:$16 sps:$4 sm:$0xff]   ;;  %s15944_s27 = smov 127  }
 0x1cb   : > { %9718 = vmatprep.subr.bf16.mxu1 %v10526_v62  ;;  %v16249_v11 = vld [vmem:[#allocation6_spill] sm:$0xff]  ;;  %v662_v23 = vrot.slane %v645_v21, %v16250_v28  ;;  %v650_v27 = vrot.slane %v645_v21, %v16247_v9  ;;  %v658_v29 = vrot.slane %v645_v21, %v16251_v26  ;;  %v10553_v43 = vld [vmem:[%s15872_s5 + $0x2c] ss:$16 sps:$4 sm:$0xff]   ;;  %vm16142_vm15 = vcmask 752640   ;;  %s636_s4 = sadd.s32 1, %s10866_s4  }
 0x1cc   : > { %v654_v22 = vrot.slane %v645_v21, %v16249_v11  ;;  %v10548_v34 = vld [vmem:[%s15872_s5 + $0x8] ss:$16 sps:$4 sm:$0xff]   ;;  %vm4164_vm0 = vcmask 744448   ;;  %vm4242_vm1 = vcmask 736256   ;;  %p633_p0 = scmp.ge.s32.totalorder %s636_s4, 8  }
 0x1cd   : > { %9691 = vmatpush3.bf16.msra.mxu0 %v10527_v63  ;;  %v670_v33 = vpack.c.bf16 %v662_v23, %v662_v23  ;;  %v667_v35 = vpack.c.bf16 %v650_v27, %v650_v27  ;;  %v669_v36 = vpack.c.bf16 %v658_v29, %v658_v29  ;;  %v10556_v55 = vld [vmem:[%s15872_s5 + $0x28] ss:$16 sps:$4 sm:$0xff]  }
 0x1ce   : > { %9719 = vmatpush3.bf16.msra.mxu1 %v10528_v0  ;;  %9692 = vmatprep.subr.bf16.mxu0 %v10529_v1  ;;  %v668_v30 = vpack.c.bf16 %v654_v22, %v654_v22 }
 0x1cf   : > { %9720 = vmatprep.subr.bf16.mxu1 %v10530_v2  ;;  %v693_v39 = vpack.i.b16 %v670_v33, %v670_v33  ;;  %v672_v40 = vpack.i.b16 %v667_v35, %v667_v35  ;;  %v686_v41 = vpack.i.b16 %v669_v36, %v669_v36  ;;  %v10558_v35 = vld [vmem:[%s15874_s7 + $0x18] sm:$0xff]   ;;  %v10559_v36 = vld [vmem:[%s15874_s7] sm:$0xff]  }
 0x1d0   : > { %v679_v38 = vpack.i.b16 %v668_v30, %v668_v30 }
 0x1d1   : > { %9693 = vmatpush3.bf16.msra.mxu0 %v10531_v3  ;;  %v698_v45 = vrot.slane %v693_v39, %v16247_v9  ;;  %v677_v46 = vrot.slane %v672_v40, %v16247_v9  ;;  %v691_v47 = vrot.slane %v686_v41, %v16247_v9  ;;  %v10561_v39 = vld [vmem:[%s15874_s7 + $0x20] sm:$0xff]  }
 0x1d2   : > { %9721 = vmatpush3.bf16.msra.mxu1 %v10532_v4  ;;  %9694 = vmatprep.subr.bf16.mxu0 %v10533_v5  ;;  %v684_v44 = vrot.slane %v679_v38, %v16247_v9  ;;  %v10560_v38 = vld [vmem:[%s15874_s7 + $0x8] sm:$0xff]  }
 0x1d3   : > { %9722 = vmatprep.subr.bf16.mxu1 %v10534_v6  ;;  %v750_v49 = vmul.bf16 %v10550_v37, %v698_v45  ;;  %v747_v50 = vmul.bf16 %v10545_v31, %v677_v46  ;;  %v749_v51 = vmul.bf16 %v10548_v34, %v691_v47  ;;  %v754_v53 = vmul.bf16 %v10553_v43, %v698_v45  ;;  %v10563_v43 = vld [vmem:[%s15874_s7 + $0x30] sm:$0xff]  }
 0x1d4   : > { %v748_v48 = vmul.bf16 %v10547_v32, %v684_v44  ;;  %v752_v52 = vmul.bf16 %v10551_v42, %v684_v44  ;;  %v751_v56 = vmul.bf16 %v10555_v54, %v677_v46  ;;  %v753_v57 = vmul.bf16 %v10556_v55, %v691_v47  ;;  %v10562_v42 = vld [vmem:[%s15874_s7 + $0x28] sm:$0xff]   ;;  %v10564_v46 = vld [vmem:[%s15874_s7 + $0x38] sm:$0xff]   ;;  %v10565_v47 = vld [vmem:[%s15874_s7 + $0x40] sm:$0xff]  }
 0x1d5   : > { %9695 = vmatpush3.bf16.msra.mxu0 %v10535_v10  ;;  %1092 = vmatprep.mubr.bf16.mxu1 %v750_v49  ;;  %v10568_v54 = vld [vmem:[%s15874_s7 + $0x58] sm:$0xff]   ;;  %v10569_v55 = vld [vmem:[%s15874_s7 + $0x60] sm:$0xff]  }
 0x1d6   : > { %9723 = vmatpush3.bf16.msra.mxu1 %v10536_v12  ;;  %9696 = vmatprep.subr.bf16.mxu0 %v10537_v13  ;;  %v10557_v12 = vld [vmem:[%s15874_s7 + $0x10] sm:$0xff]  }
 0x1d7   : > { %9724 = vmatprep.subr.bf16.mxu1 %v10538_v14  ;;  %1043 = vmatprep.mubr.bf16.mxu0 %v748_v48 }
 0x1d9   : > { %9697 = vmatpush3.bf16.msra.mxu0 %v10539_v15 }
 0x1da   : > { %9725 = vmatpush3.bf16.msra.mxu1 %v10540_v16  ;;  %9698 = vmatprep.subr.bf16.mxu0 %v10541_v17 }
 0x1db   : > { %9726 = vmatprep.subr.bf16.mxu1 %v10542_v18 }
 0x1dd   : > { %9699 = vmatpush3.bf16.msra.mxu0 %v10543_v19 }
 0x1de   : > { %9727 = vmatpush3.bf16.msra.mxu1 %v10544_v20 }
 0x1e0   : > { %1044 = vmatmul.mubr.bf16.vlgmr.msra.gmra.mrb[0].mxu0 %v747_v50  ;;  %v10566_v50 = vld [vmem:[%s15874_s7 + $0x48] sm:$0xff]  }
 0x1e1   : > { %1093 = vmatmul.mubr.bf16.vlgmr.msra.gmra.mrb[0].mxu1 %v749_v51  ;;  %1051 = vmatprep.mubr.bf16.mxu0 %v752_v52  ;;  %v10567_v51 = vld [vmem:[%s15874_s7 + $0x50] sm:$0xff]  }
 0x1e2   : > { %1100 = vmatprep.mubr.bf16.mxu1 %v754_v53 }
 0x1e8   : > { %1052 = vmatmul.mubr.bf16.gmra.mrb[4].mxu0 %v751_v56 }
 0x1e9   : > { %1101 = vmatmul.mubr.bf16.gmra.mrb[4].mxu1 %v753_v57  ;;  %9873 = vmatprep.mubr.msk.bf16.mxu0 %vm16072_vm2, %v10557_v12 }
 0x2b3   : > { %v9700_v58 = vpop.f32.mrb[0].mxu0 }
 0x2b4   : > { %v9728_v59 = vpop.f32.mrb[0].mxu1  ;;  %v9701_v60 = vpop.f32.mrb[1].mxu0 }
 0x2b5   : > { %v9729_v61 = vpop.f32.mrb[1].mxu1  ;;  %v9702_v62 = vadd.f32 %v9701_v60, %v9700_v58  ;;  %v9703_v0 = vpop.f32.mrb[2].mxu0  ;;  %v10570_v58 = vld [vmem:[%s15874_s7 + $0x68] sm:$0xff]  }
 0x2b6   : > { %v9730_v63 = vadd.f32 %v9729_v61, %v9728_v59  ;;  %v9731_v1 = vpop.f32.mrb[2].mxu1  ;;  %v9704_v2 = vpop.f32.mrb[3].mxu0  ;;  %v10571_v59 = vld [vmem:[%s15874_s7 + $0x70] sm:$0xff]  }
 0x2b7   : > { %v9732_v3 = vpop.f32.mrb[3].mxu1  ;;  %v9705_v5 = vadd.f32 %v9704_v2, %v9703_v0  ;;  %v10574_v2 = vld [vmem:[%s15874_s7 + $0x88] sm:$0xff]  }
 0x2b8   : > { %v1095_v4 = vadd.f32 %v9730_v63, %v9702_v62  ;;  %v9733_v6 = vadd.f32 %v9732_v3, %v9731_v1  ;;  %v10572_v62 = vld [vmem:[%s15874_s7 + $0x78] sm:$0xff]   ;;  %v10573_v63 = vld [vmem:[%s15874_s7 + $0x80] sm:$0xff]   ;;  %v10575_v3 = vld [vmem:[%s15874_s7 + $0x90] sm:$0xff]  }
 0x2ba   : > { %v1098_v10 = vadd.f32 %v9733_v6, %v9705_v5  ;;  %v10576_v6 = vld [vmem:[%s15874_s7 + $0x98] sm:$0xff]  }
 0x2bb   : > { %v9706_v14 = vpop.f32.mrb[4].mxu0 }
 0x2bc   : > { %v11417_v13 = vpack.c.bf16 %v1098_v10, %v1095_v4  ;;  %v9734_v15 = vpop.f32.mrb[4].mxu1  ;;  %v9707_v16 = vpop.f32.mrb[5].mxu0  ;;  %v10577_v10 = vld [vmem:[%s15874_s7 + $0xa0] sm:$0xff]  }
 0x2bd   : > { %v9735_v17 = vpop.f32.mrb[5].mxu1  ;;  %v9708_v18 = vadd.f32 %v9707_v16, %v9706_v14  ;;  %v9709_v20 = vpop.f32.mrb[6].mxu0  ;;  %v10578_v14 = vld [vmem:[%s15874_s7 + $0xa8] sm:$0xff]  }
 0x2be   : > { %v9736_v19 = vadd.f32 %v9735_v17, %v9734_v15  ;;  %v9737_v21 = vpop.f32.mrb[6].mxu1  ;;  %1272 = vrot.lane.b32.xlu1 %v11417_v13, %s15936_s26  ;;  %1131 = vrot.lane.b32.xlu0 %v11417_v13, %s15944_s27  ;;  %v9710_v22 = vpop.f32.mrb[7].mxu0  ;;  %v10579_v15 = vld [vmem:[%s15874_s7 + $0xb0] sm:$0xff]  }
 0x2bf   : > { %v9738_v23 = vpop.f32.mrb[7].mxu1  ;;  %v9711_v29 = vadd.f32 %v9710_v22, %v9709_v20  ;;  %v10582_v22 = vld [vmem:[%s15874_s7 + $0xc8] sm:$0xff]  }
 0x2c0   : > { %v1103_v27 = vadd.f32 %v9736_v19, %v9708_v18  ;;  %v9739_v30 = vadd.f32 %v9738_v23, %v9737_v21  ;;  %v10580_v18 = vld [vmem:[%s15874_s7 + $0xb8] sm:$0xff]   ;;  %v10581_v19 = vld [vmem:[%s15874_s7 + $0xc0] sm:$0xff]   ;;  %v10583_v23 = vld [vmem:[%s15874_s7 + $0xd0] sm:$0xff]  }
 0x2c2   : > { %v1106_v31 = vadd.f32 %v9739_v30, %v9711_v29  ;;  %v10584_v30 = vld [vmem:[%s15874_s7 + $0xd8] sm:$0xff]  }
 0x2c4   : > { %v11424_v32 = vpack.c.bf16 %v1106_v31, %v1103_v27  ;;  %v10585_v31 = vld [vmem:[%s15874_s7 + $0xe0] sm:$0xff]  }
 0x2c6   : > { %1274 = vrot.lane.b32.xlu1 %v11424_v32, %s15936_s26  ;;  %1133 = vrot.lane.b32.xlu0 %v11424_v32, %s15944_s27 }
 0x2ca   : > { %1353 = vrot.lane.b32.xlu1 %v11424_v32, %s15939_s14  ;;  %1351 = vrot.lane.b32.xlu0 %v11417_v13, %s15939_s14 }
 0x2ce   : > { %1432 = vrot.lane.b32.xlu1 %v11424_v32, %s15901_s28  ;;  %1430 = vrot.lane.b32.xlu0 %v11417_v13, %s15901_s28 }
 0x2d2   : > { %1511 = vrot.lane.b32.xlu1 %v11424_v32, %s10873_s2  ;;  %1509 = vrot.lane.b32.xlu0 %v11417_v13, %s10873_s2  ;;  %s10889_s2 = smov 83  }
 0x2d6   : > { %1590 = vrot.lane.b32.xlu1 %v11424_v32, %s10874_s29  ;;  %1588 = vrot.lane.b32.xlu0 %v11417_v13, %s10874_s29  ;;  %s10890_s29 = smov 82  }
 0x2da   : > { %1669 = vrot.lane.b32.xlu1 %v11424_v32, %s10875_s30  ;;  %1667 = vrot.lane.b32.xlu0 %v11417_v13, %s10875_s30  ;;  %s10891_s30 = smov 81  }
 0x2de   : > { %1748 = vrot.lane.b32.xlu1 %v11424_v32, %s10876_s0  ;;  %1746 = vrot.lane.b32.xlu0 %v11417_v13, %s10876_s0  ;;  %s10892_s0 = smov 80  }
 0x2e2   : > { %1827 = vrot.lane.b32.xlu1 %v11424_v32, %s10877_s13  ;;  %1825 = vrot.lane.b32.xlu0 %v11417_v13, %s10877_s13  ;;  %s15907_s13 = smov 108  }
 0x2e6   : > { %1906 = vrot.lane.b32.xlu1 %v11424_v32, %s10878_s16  ;;  %1904 = vrot.lane.b32.xlu0 %v11417_v13, %s10878_s16 }
 0x2ea   : > { %1985 = vrot.lane.b32.xlu1 %v11424_v32, %s10879_s17  ;;  %1983 = vrot.lane.b32.xlu0 %v11417_v13, %s10879_s17  ;;  %s10908_s17 = smov 107  }
 0x2ee   : > { %2064 = vrot.lane.b32.xlu1 %v11424_v32, %s10880_s18  ;;  %2062 = vrot.lane.b32.xlu0 %v11417_v13, %s10880_s18  ;;  %s10909_s18 = smov 90  }
 0x2f2   : > { %2143 = vrot.lane.b32.xlu1 %v11424_v32, %s10881_s25  ;;  %2141 = vrot.lane.b32.xlu0 %v11417_v13, %s10881_s25  ;;  %s10910_s25 = smov 89  }
 0x2f6   : > { %2222 = vrot.lane.b32.xlu1 %v11424_v32, %s10882_s19  ;;  %2220 = vrot.lane.b32.xlu0 %v11417_v13, %s10882_s19  ;;  %s10911_s19 = smov 88  }
 0x2fa   : > { %2301 = vrot.lane.b32.xlu1 %v11424_v32, %s15889_s20  ;;  %2299 = vrot.lane.b32.xlu0 %v11417_v13, %s15889_s20  ;;  %s15895_s20 = smov 70  }
 0x2fe   : > { %2380 = vrot.lane.b32.xlu1 %v11424_v32, %s15891_s21  ;;  %2378 = vrot.lane.b32.xlu0 %v11417_v13, %s15891_s21  ;;  %s15897_s21 = smov 56  }
 0x302   : > { %2459 = vrot.lane.b32.xlu1 %v11424_v32, %s15887_s22  ;;  %2457 = vrot.lane.b32.xlu0 %v11417_v13, %s15887_s22  ;;  %s15893_s22 = smov 71  }
 0x306   : > { %2538 = vrot.lane.b32.xlu1 %v11424_v32, %s10886_s23  ;;  %2536 = vrot.lane.b32.xlu0 %v11417_v13, %s10886_s23 }
 0x30a   : > { %2617 = vrot.lane.b32.xlu1 %v11424_v32, %s10887_s24  ;;  %2615 = vrot.lane.b32.xlu0 %v11417_v13, %s10887_s24 }
 0x30e   : > { %2696 = vrot.lane.b32.xlu1 %v11424_v32, %s10888_s3  ;;  %2694 = vrot.lane.b32.xlu0 %v11417_v13, %s10888_s3  ;;  %s10912_s3 = smov 74  }
 0x312   : > { %2775 = vrot.lane.b32.xlu1 %v11424_v32, %s10889_s2  ;;  %2773 = vrot.lane.b32.xlu0 %v11417_v13, %s10889_s2  ;;  %s10913_s2 = smov 73  }
 0x316   : > { %2854 = vrot.lane.b32.xlu1 %v11424_v32, %s10890_s29  ;;  %2852 = vrot.lane.b32.xlu0 %v11417_v13, %s10890_s29  ;;  %s10914_s29 = smov 72  }
 0x31a   : > { %2933 = vrot.lane.b32.xlu1 %v11424_v32, %s10891_s30  ;;  %2931 = vrot.lane.b32.xlu0 %v11417_v13, %s10891_s30  ;;  %s15903_s30 = smov 110  }
 0x31e   : > { %3012 = vrot.lane.b32.xlu1 %v11424_v32, %s10892_s0  ;;  %3010 = vrot.lane.b32.xlu0 %v11417_v13, %s10892_s0  ;;  %s15905_s0 = smov 109  }
 0x330   : > { %v1132_v33 = vpop.permute.xlu0 %1131  ;;  %v1273_v37 = vpop.permute.xlu1 %1272 }
 0x331   : > { %9869 = vmatprep.subr.bf16.mxu0 %v1132_v33 }
 0x332   : > { %9870 = vmatpush3.bf16.msra.mxu0 %v1132_v33  ;;  %v3076_v33 = vld [vmem:[%s15875_s8 + $0x8] sm:$0xff] }
 0x338   : > { %v1134_v34 = vpop.permute.xlu0 %1133  ;;  %v1275_v40 = vpop.permute.xlu1 %1274 }
 0x339   : > { %9871 = vmatprep.subr.bf16.mxu0 %v1134_v34 }
 0x33a   : > { %9872 = vmatpush3.bf16.msra.mxu0 %v1134_v34 }
 0x33b   : > { %9877 = vmatprep.subr.bf16.mxu0 %v11417_v13 }
 0x33c   : > { %v1352_v41 = vpop.permute.xlu0 %1351  ;;  %v1354_v44 = vpop.permute.xlu1 %1353 }
 0x33d   : > { %9874 = vmatmul.mubr.msk.bf16.vlgmr.msra.gmra.mrb[8].mxu0 %vm16072_vm2, %v10558_v35  ;;  %v15912_v35 = vmov 0  }
 0x33e   : > { %9878 = vmatpush3.bf16.msra.mxu0 %v11417_v13  ;;  %9881 = vmatprep.mubr.msk.bf16.mxu0 %vm16072_vm2, %v10559_v36  ;;  %v3075_v36 = vld [vmem:[%s15875_s8] sm:$0xff] }
 0x33f   : > { %9879 = vmatprep.subr.bf16.mxu0 %v11424_v32  ;;  %10464 = vset.pattern.permute.xlu1 %v15912_v35 }
 0x340   : > { %v1431_v45 = vpop.permute.xlu0 %1430  ;;  %v1433_v48 = vpop.permute.xlu1 %1432  ;;  %3086 = vperm.xlu1 %10464, %v3076_v33   ;;  %10463 = vset.pattern.permute.xlu0 %v15912_v35  ;;  %v10894_v33 = vmov 65535  }
 0x341   : > { %3258 = vmatprep.mubr.bf16.mxu1 %v15912_v35  ;;  %3081 = vperm.xlu0 %10463, %v3075_v36   ;;  %v10619_v36 = vld [vmem:[%s15876_s9 + $0x60] ss:$12 sps:$4 sm:$0x7f]  }
 0x342   : > { %9880 = vmatpush3.bf16.msra.mxu0 %v11424_v32 }
 0x343   : > { %9885 = vmatprep.subr.bf16.mxu0 %v1273_v37 }
 0x344   : > { %v1510_v49 = vpop.permute.xlu0 %1509  ;;  %v1512_v52 = vpop.permute.xlu1 %1511 }
 0x348   : > { %v1589_v53 = vpop.permute.xlu0 %1588  ;;  %v1591_v56 = vpop.permute.xlu1 %1590 }
 0x349   : > { %9882 = vmatmul.mubr.msk.bf16.vlgmr.msra.gmra.mrb[8].mxu0 %vm16072_vm2, %v10560_v38  ;;  %v10609_v38 = vld [vmem:[%s15876_s9 + $0x4] ss:$12 sps:$4 sm:$0xff]  }
 0x34a   : > { %9886 = vmatpush3.bf16.msra.mxu0 %v1273_v37  ;;  %9889 = vmatprep.mubr.msk.bf16.mxu0 %vm16072_vm2, %v10561_v39  ;;  %v10607_v37 = vld [vmem:[%s15876_s9] ss:$12 sps:$4 sm:$0xff]   ;;  %v10612_v39 = vld [vmem:[%s15876_s9 + $0x1c] ss:$12 sps:$4 sm:$0xff]  }
 0x34b   : > { %9887 = vmatprep.subr.bf16.mxu0 %v1275_v40  ;;  %3226 = vmatprep.subr.bf16.mxu1 %v10609_v38 }
 0x34c   : > { %v1668_v57 = vpop.permute.xlu0 %1667  ;;  %v1670_v60 = vpop.permute.xlu1 %1669  ;;  %3227 = vmatpush1.bf16.msra.mxu1 %v10607_v37 }
 0x34d   : > { %3228 = vmatprep.subr.bf16.mxu1 %v10612_v39 }
 0x34e   : > { %9888 = vmatpush3.bf16.msra.mxu0 %v1275_v40  ;;  %v3077_v40 = vld [vmem:[%s15875_s8 + $0x10] sm:$0xff] }
 0x34f   : > { %9893 = vmatprep.subr.bf16.mxu0 %v1352_v41  ;;  %3091 = vperm.xlu1 %10464, %v3077_v40   ;;  %v11747_v40 = vld [vmem:[%s15876_s9 + $0x8] ss:$12 sps:$4 sm:$0xff]  }
 0x350   : > { %v1747_v61 = vpop.permute.xlu0 %1746  ;;  %v1749_v0 = vpop.permute.xlu1 %1748 }
 0x354   : > { %v1826_v1 = vpop.permute.xlu0 %1825  ;;  %v1828_v4 = vpop.permute.xlu1 %1827 }
 0x355   : > { %9890 = vmatmul.mubr.msk.bf16.vlgmr.msra.gmra.mrb[8].mxu0 %vm16072_vm2, %v10562_v42  ;;  %v10587_v42 = vld [vmem:[%s15874_s7 + $0xf0] sm:$0xff]  }
 0x356   : > { %9894 = vmatpush3.bf16.msra.mxu0 %v1352_v41  ;;  %9897 = vmatprep.mubr.msk.bf16.mxu0 %vm16072_vm2, %v10563_v43  ;;  %v10586_v41 = vld [vmem:[%s15874_s7 + $0xe8] sm:$0xff]   ;;  %v3078_v43 = vld [vmem:[%s15875_s8 + $0x18] sm:$0xff] }
 0x357   : > { %9895 = vmatprep.subr.bf16.mxu0 %v1354_v44  ;;  %3096 = vperm.xlu0 %10463, %v3078_v43   ;;  %v10897_v43 = vmov 3  }
 0x358   : > { %v1905_v5 = vpop.permute.xlu0 %1904  ;;  %v1907_v12 = vpop.permute.xlu1 %1906 }
 0x35a   : > { %9896 = vmatpush3.bf16.msra.mxu0 %v1354_v44  ;;  %v5237_v44 = vld [vmem:[%s15878_s11] sm:$0xff] }
 0x35b   : > { %9901 = vmatprep.subr.bf16.mxu0 %v1431_v45  ;;  %5241 = vperm.xlu1 %10464, %v5237_v44   ;;  %v10898_v44 = vmov 4  }
 0x35c   : > { %v1984_v13 = vpop.permute.xlu0 %1983  ;;  %v1986_v16 = vpop.permute.xlu1 %1985 }
 0x35f   : > { %6392 = vperm.xlu1 %10464, %v16246_v24  }
 0x360   : > { %v2063_v17 = vpop.permute.xlu0 %2062  ;;  %v2065_v20 = vpop.permute.xlu1 %2064 }
 0x361   : > { %9898 = vmatmul.mubr.msk.bf16.vlgmr.msra.gmra.mrb[8].mxu0 %vm16072_vm2, %v10564_v46  ;;  %v10615_v46 = vld [vmem:[%s15876_s9 + $0x34] ss:$12 sps:$4 sm:$0xff]  }
 0x362   : > { %9902 = vmatpush3.bf16.msra.mxu0 %v1431_v45  ;;  %9905 = vmatprep.mubr.msk.bf16.mxu0 %vm16072_vm2, %v10565_v47  ;;  %v10610_v45 = vld [vmem:[%s15876_s9 + $0x18] ss:$12 sps:$4 sm:$0xff]  }
 0x363   : > { %9903 = vmatprep.subr.bf16.mxu0 %v1433_v48  ;;  %3229 = vmatpush1.bf16.msra.mxu1 %v10610_v45  ;;  %v10899_v45 = vmov 5  }
 0x364   : > { %v2142_v21 = vpop.permute.xlu0 %2141  ;;  %v2144_v27 = vpop.permute.xlu1 %2143  ;;  %3230 = vmatprep.subr.bf16.mxu1 %v10615_v46  ;;  %v10900_v46 = vmov 6  }
 0x366   : > { %9904 = vmatpush3.bf16.msra.mxu0 %v1433_v48  ;;  %v10613_v48 = vld [vmem:[%s15876_s9 + $0x30] ss:$12 sps:$4 sm:$0xff]  }
 0x367   : > { %9909 = vmatprep.subr.bf16.mxu0 %v1510_v49  ;;  %3231 = vmatpush1.bf16.msra.mxu1 %v10613_v48  ;;  %v10902_v48 = vmov 8  }
 0x368   : > { %v2221_v29 = vpop.permute.xlu0 %2220  ;;  %v2223_v32 = vpop.permute.xlu1 %2222 }
 0x36c   : > { %v2300_v34 = vpop.permute.xlu0 %2299  ;;  %v2302_v47 = vpop.permute.xlu1 %2301 }
 0x36d   : > { %9906 = vmatmul.mubr.msk.bf16.vlgmr.msra.gmra.mrb[8].mxu0 %vm16072_vm2, %v10566_v50  ;;  %v10588_v50 = vld [vmem:[%s15874_s7 + $0xf8] sm:$0xff]  }
 0x36e   : > { %9910 = vmatpush3.bf16.msra.mxu0 %v1510_v49  ;;  %9913 = vmatprep.mubr.msk.bf16.mxu0 %vm16072_vm2, %v10567_v51  ;;  %v10589_v51 = vld [vmem:[%s15874_s7 + $0x100] sm:$0xff]  }
 0x36f   : > { %9911 = vmatprep.subr.bf16.mxu0 %v1512_v52 }
 0x370   : > { %v2379_v49 = vpop.permute.xlu0 %2378 }
 0x372   : > { %9912 = vmatpush3.bf16.msra.mxu0 %v1512_v52  ;;  %v2381_v52 = vpop.permute.xlu1 %2380 }
 0x373   : > { %9917 = vmatprep.subr.bf16.mxu0 %v1589_v53 }
 0x379   : > { %9914 = vmatmul.mubr.msk.bf16.vlgmr.msra.gmra.mrb[8].mxu0 %vm16072_vm2, %v10568_v54  ;;  %v10590_v54 = vld [vmem:[%s15874_s7 + $0x108] sm:$0xff]  }
 0x37a   : > { %9918 = vmatpush3.bf16.msra.mxu0 %v1589_v53  ;;  %9921 = vmatprep.mubr.msk.bf16.mxu0 %vm16072_vm2, %v10569_v55  ;;  %v2458_v53 = vpop.permute.xlu0 %2457  ;;  %v10591_v55 = vld [vmem:[%s15874_s7 + $0x110] sm:$0xff]  }
 0x37b   : > { %9919 = vmatprep.subr.bf16.mxu0 %v1591_v56 }
 0x37e   : > { %9920 = vmatpush3.bf16.msra.mxu0 %v1591_v56  ;;  %v2460_v56 = vpop.permute.xlu1 %2459 }
 0x37f   : > { %9925 = vmatprep.subr.bf16.mxu0 %v1668_v57 }
 0x385   : > { %9922 = vmatmul.mubr.msk.bf16.vlgmr.msra.gmra.mrb[8].mxu0 %vm16072_vm2, %v10570_v58  ;;  %v10592_v58 = vld [vmem:[%s15874_s7 + $0x118] sm:$0xff]  }
 0x386   : > { %9926 = vmatpush3.bf16.msra.mxu0 %v1668_v57  ;;  %9929 = vmatprep.mubr.msk.bf16.mxu0 %vm16072_vm2, %v10571_v59  ;;  %v2537_v57 = vpop.permute.xlu0 %2536  ;;  %v10593_v59 = vld [vmem:[%s15874_s7 + $0x120] sm:$0xff]  }
 0x387   : > { %9927 = vmatprep.subr.bf16.mxu0 %v1670_v60 }
 0x38a   : > { %9928 = vmatpush3.bf16.msra.mxu0 %v1670_v60  ;;  %v2539_v60 = vpop.permute.xlu1 %2538 }
 0x38b   : > { %9933 = vmatprep.subr.bf16.mxu0 %v1747_v61 }
 0x391   : > { %9930 = vmatmul.mubr.msk.bf16.vlgmr.msra.gmra.mrb[8].mxu0 %vm16072_vm2, %v10572_v62  ;;  %v10594_v62 = vld [vmem:[%s15874_s7 + $0x128] sm:$0xff]  }
 0x392   : > { %9934 = vmatpush3.bf16.msra.mxu0 %v1747_v61  ;;  %9937 = vmatprep.mubr.msk.bf16.mxu0 %vm16072_vm2, %v10573_v63  ;;  %v2616_v61 = vpop.permute.xlu0 %2615  ;;  %v10595_v63 = vld [vmem:[%s15874_s7 + $0x130] sm:$0xff]  }
 0x393   : > { %9935 = vmatprep.subr.bf16.mxu0 %v1749_v0 }
 0x396   : > { %9936 = vmatpush3.bf16.msra.mxu0 %v1749_v0  ;;  %v2618_v0 = vpop.permute.xlu1 %2617 }
 0x397   : > { %9941 = vmatprep.subr.bf16.mxu0 %v1826_v1 }
 0x39d   : > { %9938 = vmatmul.mubr.msk.bf16.vlgmr.msra.gmra.mrb[8].mxu0 %vm16072_vm2, %v10574_v2  ;;  %v10596_v2 = vld [vmem:[%s15874_s7 + $0x138] sm:$0xff]  }
 0x39e   : > { %9942 = vmatpush3.bf16.msra.mxu0 %v1826_v1  ;;  %9945 = vmatprep.mubr.msk.bf16.mxu0 %vm16072_vm2, %v10575_v3  ;;  %v2695_v1 = vpop.permute.xlu0 %2694  ;;  %v10597_v3 = vld [vmem:[%s15874_s7 + $0x140] sm:$0xff]  }
 0x39f   : > { %9943 = vmatprep.subr.bf16.mxu0 %v1828_v4 }
 0x3a2   : > { %9944 = vmatpush3.bf16.msra.mxu0 %v1828_v4  ;;  %v2697_v4 = vpop.permute.xlu1 %2696 }
 0x3a3   : > { %9949 = vmatprep.subr.bf16.mxu0 %v1905_v5 }
 0x3a9   : > { %9946 = vmatmul.mubr.msk.bf16.vlgmr.msra.gmra.mrb[8].mxu0 %vm16072_vm2, %v10576_v6  ;;  %v10598_v6 = vld [vmem:[%s15874_s7 + $0x148] sm:$0xff]  }
 0x3aa   : > { %9950 = vmatpush3.bf16.msra.mxu0 %v1905_v5  ;;  %9953 = vmatprep.mubr.msk.bf16.mxu0 %vm16072_vm2, %v10577_v10  ;;  %v2774_v5 = vpop.permute.xlu0 %2773  ;;  %v10599_v10 = vld [vmem:[%s15874_s7 + $0x150] sm:$0xff]  }
 0x3ab   : > { %9951 = vmatprep.subr.bf16.mxu0 %v1907_v12 }
 0x3ae   : > { %9952 = vmatpush3.bf16.msra.mxu0 %v1907_v12  ;;  %v2776_v12 = vpop.permute.xlu1 %2775 }
 0x3af   : > { %9957 = vmatprep.subr.bf16.mxu0 %v1984_v13 }
 0x3b5   : > { %9954 = vmatmul.mubr.msk.bf16.vlgmr.msra.gmra.mrb[8].mxu0 %vm16072_vm2, %v10578_v14  ;;  %v10600_v14 = vld [vmem:[%s15874_s7 + $0x158] sm:$0xff]  }
 0x3b6   : > { %9958 = vmatpush3.bf16.msra.mxu0 %v1984_v13  ;;  %9961 = vmatprep.mubr.msk.bf16.mxu0 %vm16072_vm2, %v10579_v15  ;;  %v2853_v13 = vpop.permute.xlu0 %2852  ;;  %v10601_v15 = vld [vmem:[%s15874_s7 + $0x160] sm:$0xff]  }
 0x3b7   : > { %9959 = vmatprep.subr.bf16.mxu0 %v1986_v16 }
 0x3ba   : > { %9960 = vmatpush3.bf16.msra.mxu0 %v1986_v16  ;;  %v2855_v16 = vpop.permute.xlu1 %2854 }
 0x3bb   : > { %9965 = vmatprep.subr.bf16.mxu0 %v2063_v17 }
 0x3c1   : > { %9962 = vmatmul.mubr.msk.bf16.vlgmr.msra.gmra.mrb[8].mxu0 %vm16072_vm2, %v10580_v18  ;;  %v10602_v18 = vld [vmem:[%s15874_s7 + $0x168] sm:$0xff]  }
 0x3c2   : > { %9966 = vmatpush3.bf16.msra.mxu0 %v2063_v17  ;;  %9969 = vmatprep.mubr.msk.bf16.mxu0 %vm16072_vm2, %v10581_v19  ;;  %v2932_v17 = vpop.permute.xlu0 %2931  ;;  %v10603_v19 = vld [vmem:[%s15874_s7 + $0x170] sm:$0xff]  }
 0x3c3   : > { %9967 = vmatprep.subr.bf16.mxu0 %v2065_v20 }
 0x3c6   : > { %9968 = vmatpush3.bf16.msra.mxu0 %v2065_v20  ;;  %v2934_v20 = vpop.permute.xlu1 %2933 }
 0x3c7   : > { %9973 = vmatprep.subr.bf16.mxu0 %v2142_v21 }
 0x3cd   : > { %9970 = vmatmul.mubr.msk.bf16.vlgmr.msra.gmra.mrb[8].mxu0 %vm16072_vm2, %v10582_v22  ;;  %v10604_v22 = vld [vmem:[%s15874_s7 + $0x178] sm:$0xff]  }
 0x3ce   : > { %9974 = vmatpush3.bf16.msra.mxu0 %v2142_v21  ;;  %9977 = vmatprep.mubr.msk.bf16.mxu0 %vm16072_vm2, %v10583_v23  ;;  %v3011_v21 = vpop.permute.xlu0 %3010  ;;  %v10605_v23 = vld [vmem:[%s15874_s7 + $0x180] sm:$0xff]  }
 0x3cf   : > { %9975 = vmatprep.subr.bf16.mxu0 %v2144_v27 }
 0x3d2   : > { %9976 = vmatpush3.bf16.msra.mxu0 %v2144_v27  ;;  %v3013_v27 = vpop.permute.xlu1 %3012 }
 0x3d3   : > { %9981 = vmatprep.subr.bf16.mxu0 %v2221_v29 }
 0x3d9   : > { %9978 = vmatmul.mubr.msk.bf16.vlgmr.msra.gmra.mrb[8].mxu0 %vm16072_vm2, %v10584_v30  ;;  %v10618_v30 = vld [vmem:[%s15876_s9 + $0x4c] ss:$12 sps:$4 sm:$0xff]  }
 0x3da   : > { %9982 = vmatpush3.bf16.msra.mxu0 %v2221_v29  ;;  %9985 = vmatprep.mubr.msk.bf16.mxu0 %vm16072_vm2, %v10585_v31  ;;  %v10606_v29 = vld [vmem:[%s15874_s7 + $0x188] sm:$0xff]  }
 0x3db   : > { %9983 = vmatprep.subr.bf16.mxu0 %v2223_v32  ;;  %v10616_v31 = vld [vmem:[%s15876_s9 + $0x48] ss:$12 sps:$4 sm:$0xff]   ;;  %3232 = vmatprep.subr.bf16.mxu1 %v10618_v30 }
 0x3dc   : > { %3233 = vmatpush1.bf16.msra.mxu1 %v10616_v31 }
 0x3de   : > { %9984 = vmatpush3.bf16.msra.mxu0 %v2223_v32  ;;  %v10621_v32 = vld [vmem:[%s15876_s9 + $0x64] ss:$12 sps:$4 sm:$0x7f]  }
 0x3df   : > { %9989 = vmatprep.subr.bf16.mxu0 %v2300_v34 }
 0x3e5   : > { %9986 = vmatmul.mubr.msk.bf16.vlgmr.msra.gmra.mrb[8].mxu0 %vm16072_vm2, %v10586_v41  ;;  %v10895_v41 = vmov 1  }
 0x3e6   : > { %9990 = vmatpush3.bf16.msra.mxu0 %v2300_v34  ;;  %9993 = vmatprep.mubr.msk.bf16.mxu0 %vm16072_vm2, %v10587_v42  ;;  %v3215_v34 = vsel %vm3213_vm3, 4294967295, %v10894_v33  ;;  %v10896_v42 = vmov 2  }
 0x3e7   : > { %9991 = vmatprep.subr.bf16.mxu0 %v2302_v47  ;;  %v11740_v37 = vsel %vm3214_vm4, %v3215_v34, 0  ;;  %10465 = vset.pattern.permute.xlu1 %v10895_v41  ;;  %vm4320_vm4 = vcmask 728064  }
 0x3e8   : > { %v3221_v38 = vand.u32 %v10621_v32, %v11740_v37  ;;  %v3218_v39 = vand.u32 %v10619_v36, %v11740_v37  ;;  %10466 = vset.pattern.permute.xlu0 %v10895_v41  ;;  %6429 = vperm.xlu1 %10465, %v16246_v24  }
 0x3e9   : > { %6433 = vperm.xlu0 %10466, %v16245_v25  }
 0x3ea   : > { %9992 = vmatpush3.bf16.msra.mxu0 %v2302_v47  ;;  %3234 = vmatprep.subr.bf16.mxu1 %v3221_v38  ;;  %v10901_v47 = vmov 7  }
 0x3eb   : > { %9997 = vmatprep.subr.bf16.mxu0 %v2379_v49  ;;  %3235 = vmatpush1.bf16.msra.mxu1 %v3218_v39 }
 0x3ec   : > { %10069 = vmatprep.subr.bf16.mxu1 %v11747_v40  ;;  %10468 = vset.pattern.permute.xlu1 %v10896_v42 }
 0x3ed   : > { %10467 = vset.pattern.permute.xlu0 %v10896_v42  ;;  %6548 = vperm.xlu1 %10468, %v16245_v25  }
 0x3ee   : > { %6544 = vperm.xlu0 %10467, %v16246_v24  }
 0x3f1   : > { %9994 = vmatmul.mubr.msk.bf16.vlgmr.msra.gmra.mrb[8].mxu0 %vm16072_vm2, %v10588_v50  ;;  %10469 = vset.pattern.permute.xlu1 %v10897_v43  ;;  %v3087_v50 = vpop.permute.xlu1 %3086 }
 0x3f2   : > { %9998 = vmatpush3.bf16.msra.mxu0 %v2379_v49  ;;  %10001 = vmatprep.mubr.msk.bf16.mxu0 %vm16072_vm2, %v10589_v51  ;;  %v10903_v49 = vmov 9   ;;  %v3082_v51 = vpop.permute.xlu0 %3081 }
 0x3f3   : > { %9999 = vmatprep.subr.bf16.mxu0 %v2381_v52  ;;  %10470 = vset.pattern.permute.xlu0 %v10897_v43 }
 0x3f4   : > { %6659 = vperm.xlu1 %10469, %v16246_v24   ;;  %6663 = vperm.xlu0 %10470, %v16245_v25  }
 0x3f6   : > { %10000 = vmatpush3.bf16.msra.mxu0 %v2381_v52  ;;  %v3092_v52 = vpop.permute.xlu1 %3091 }
 0x3f7   : > { %10005 = vmatprep.subr.bf16.mxu0 %v2458_v53 }
 0x3f8   : > { %10472 = vset.pattern.permute.xlu1 %v10898_v44  ;;  %10471 = vset.pattern.permute.xlu0 %v10898_v44 }
 0x3f9   : > { %6778 = vperm.xlu1 %10472, %v16245_v25   ;;  %6774 = vperm.xlu0 %10471, %v16246_v24  }
 0x3fd   : > { %10002 = vmatmul.mubr.msk.bf16.vlgmr.msra.gmra.mrb[8].mxu0 %vm16072_vm2, %v10590_v54  ;;  %10473 = vset.pattern.permute.xlu1 %v10899_v45  ;;  %v3097_v54 = vpop.permute.xlu0 %3096 }
 0x3fe   : > { %10006 = vmatpush3.bf16.msra.mxu0 %v2458_v53  ;;  %10009 = vmatprep.mubr.msk.bf16.mxu0 %vm16072_vm2, %v10591_v55 }
 0x3ff   : > { %10007 = vmatprep.subr.bf16.mxu0 %v2460_v56  ;;  %10474 = vset.pattern.permute.xlu0 %v10899_v45 }
 0x400   : > { %6888 = vperm.xlu1 %10473, %v16246_v24   ;;  %6892 = vperm.xlu0 %10474, %v16245_v25  }
 0x402   : > { %10008 = vmatpush3.bf16.msra.mxu0 %v2460_v56 }
 0x403   : > { %10013 = vmatprep.subr.bf16.mxu0 %v2537_v57 }
 0x404   : > { %10476 = vset.pattern.permute.xlu1 %v10900_v46  ;;  %10475 = vset.pattern.permute.xlu0 %v10900_v46 }
 0x405   : > { %7007 = vperm.xlu1 %10476, %v16245_v25   ;;  %7003 = vperm.xlu0 %10475, %v16246_v24  }
 0x409   : > { %10010 = vmatmul.mubr.msk.bf16.vlgmr.msra.gmra.mrb[8].mxu0 %vm16072_vm2, %v10592_v58  ;;  %10477 = vset.pattern.permute.xlu1 %v10901_v47 }
 0x40a   : > { %10014 = vmatpush3.bf16.msra.mxu0 %v2537_v57  ;;  %10017 = vmatprep.mubr.msk.bf16.mxu0 %vm16072_vm2, %v10593_v59 }
 0x40b   : > { %10015 = vmatprep.subr.bf16.mxu0 %v2539_v60  ;;  %10478 = vset.pattern.permute.xlu0 %v10901_v47 }
 0x40c   : > { %7118 = vperm.xlu1 %10477, %v16246_v24   ;;  %7122 = vperm.xlu0 %10478, %v16245_v25  }
 0x40e   : > { %10016 = vmatpush3.bf16.msra.mxu0 %v2539_v60 }
 0x40f   : > { %10021 = vmatprep.subr.bf16.mxu0 %v2616_v61 }
 0x410   : > { %10480 = vset.pattern.permute.xlu1 %v10902_v48  ;;  %10479 = vset.pattern.permute.xlu0 %v10902_v48 }
 0x411   : > { %7237 = vperm.xlu1 %10480, %v16245_v25   ;;  %7233 = vperm.xlu0 %10479, %v16246_v24  }
 0x415   : > { %10018 = vmatmul.mubr.msk.bf16.vlgmr.msra.gmra.mrb[8].mxu0 %vm16072_vm2, %v10594_v62  ;;  %10481 = vset.pattern.permute.xlu1 %v10903_v49 }
 0x416   : > { %10022 = vmatpush3.bf16.msra.mxu0 %v2616_v61  ;;  %10025 = vmatprep.mubr.msk.bf16.mxu0 %vm16072_vm2, %v10595_v63 }
 0x417   : > { %10023 = vmatprep.subr.bf16.mxu0 %v2618_v0  ;;  %10482 = vset.pattern.permute.xlu0 %v10903_v49 }
 0x418   : > { %7348 = vperm.xlu1 %10481, %v16246_v24   ;;  %7352 = vperm.xlu0 %10482, %v16245_v25  }
 0x41a   : > { %10024 = vmatpush3.bf16.msra.mxu0 %v2618_v0 }
 0x41b   : > { %10029 = vmatprep.subr.bf16.mxu0 %v2695_v1 }
 0x421   : > { %10026 = vmatmul.mubr.msk.bf16.vlgmr.msra.gmra.mrb[8].mxu0 %vm16072_vm2, %v10596_v2 }
 0x422   : > { %10030 = vmatpush3.bf16.msra.mxu0 %v2695_v1  ;;  %10033 = vmatprep.mubr.msk.bf16.mxu0 %vm16072_vm2, %v10597_v3 }
 0x423   : > { %10031 = vmatprep.subr.bf16.mxu0 %v2697_v4 }
 0x426   : > { %10032 = vmatpush3.bf16.msra.mxu0 %v2697_v4  ;;  %v10623_v4 = vld [vmem:[%s15876_s9 + $0x20] ss:$12 sps:$4 sm:$0xff]  }
 0x427   : > { %10037 = vmatprep.subr.bf16.mxu0 %v2774_v5 }
 0x42d   : > { %10034 = vmatmul.mubr.msk.bf16.vlgmr.msra.gmra.mrb[8].mxu0 %vm16072_vm2, %v10598_v6  ;;  %v10625_v6 = vld [vmem:[%s15876_s9 + $0x50] ss:$12 sps:$4 sm:$0xff]  }
 0x42e   : > { %10038 = vmatpush3.bf16.msra.mxu0 %v2774_v5  ;;  %10041 = vmatprep.mubr.msk.bf16.mxu0 %vm16072_vm2, %v10599_v10  ;;  %v10624_v5 = vld [vmem:[%s15876_s9 + $0x38] ss:$12 sps:$4 sm:$0xff]   ;;  %v10626_v10 = vld [vmem:[%s15876_s9 + $0x68] ss:$12 sps:$4 sm:$0x7f]  }
 0x42f   : > { %10039 = vmatprep.subr.bf16.mxu0 %v2776_v12 }
 0x432   : > { %10040 = vmatpush3.bf16.msra.mxu0 %v2776_v12  ;;  %v3224_v12 = vand.u32 %v10626_v10, %v11740_v37  ;;  %v11852_v37 = vpop.permute.xlu1 %5241 }
 0x433   : > { %10045 = vmatprep.subr.bf16.mxu0 %v2853_v13  ;;  %16252 = vst [vmem:[#allocation9_spill] sm:$0xff] %v11852_v37 }
 0x436   : > { %v11858_v38 = vpop.permute.xlu1 %6392 }
 0x437   : > { %16253 = vst [vmem:[#allocation10_spill] sm:$0xff] %v11858_v38 }
 0x439   : > { %10042 = vmatmul.mubr.msk.bf16.vlgmr.msra.gmra.mrb[8].mxu0 %vm16072_vm2, %v10600_v14 }
 0x43a   : > { %10046 = vmatpush3.bf16.msra.mxu0 %v2853_v13  ;;  %10049 = vmatprep.mubr.msk.bf16.mxu0 %vm16072_vm2, %v10601_v15  ;;  %v10904_v13 = vmov 10  }
 0x43b   : > { %10047 = vmatprep.subr.bf16.mxu0 %v2855_v16  ;;  %10484 = vset.pattern.permute.xlu1 %v10904_v13 }
 0x43c   : > { %10483 = vset.pattern.permute.xlu0 %v10904_v13 }
 0x43e   : > { %10048 = vmatpush3.bf16.msra.mxu0 %v2855_v16 }
 0x43f   : > { %10053 = vmatprep.subr.bf16.mxu0 %v2932_v17 }
 0x445   : > { %10050 = vmatmul.mubr.msk.bf16.vlgmr.msra.gmra.mrb[8].mxu0 %vm16072_vm2, %v10602_v18 }
 0x446   : > { %10054 = vmatpush3.bf16.msra.mxu0 %v2932_v17  ;;  %10057 = vmatprep.mubr.msk.bf16.mxu0 %vm16072_vm2, %v10603_v19 }
 0x447   : > { %10055 = vmatprep.subr.bf16.mxu0 %v2934_v20 }
 0x44a   : > { %10056 = vmatpush3.bf16.msra.mxu0 %v2934_v20 }
 0x44b   : > { %10061 = vmatprep.subr.bf16.mxu0 %v3011_v21 }
 0x451   : > { %10058 = vmatmul.mubr.msk.bf16.vlgmr.msra.gmra.mrb[8].mxu0 %vm16072_vm2, %v10604_v22 }
 0x452   : > { %10062 = vmatpush3.bf16.msra.mxu0 %v3011_v21  ;;  %10065 = vmatprep.mubr.msk.bf16.mxu0 %vm16072_vm2, %v10605_v23 }
 0x453   : > { %10063 = vmatprep.subr.bf16.mxu0 %v3013_v27 }
 0x456   : > { %10064 = vmatpush3.bf16.msra.mxu0 %v3013_v27 }
 0x45d   : > { %10066 = vmatmul.mubr.msk.bf16.vlgmr.msra.gmra.mrb[8].mxu0 %vm16072_vm2, %v10606_v29 }
 0x467   : > { %v11866_v39 = vpop.permute.xlu1 %6429 }
 0x468   : > { %16254 = vst [vmem:[#allocation11_spill] sm:$0xff] %v11866_v39 }
 0x46c   : > { %v11876_v41 = vpop.permute.xlu1 %6548 }
 0x46d   : > { %16256 = vst [vmem:[#allocation13_spill] sm:$0xff] %v11876_v41 }
 0x473   : > { %v11886_v43 = vpop.permute.xlu1 %6659 }
 0x474   : > { %16258 = vst [vmem:[#allocation15_spill] sm:$0xff] %v11886_v43  ;;  %v10928_v43 = vmov 17  }
 0x478   : > { %v11896_v45 = vpop.permute.xlu1 %6778 }
 0x479   : > { %16260 = vst [vmem:[#allocation17_spill] sm:$0xff] %v11896_v45 }
 0x47f   : > { %v11906_v47 = vpop.permute.xlu1 %6888 }
 0x480   : > { %16262 = vst [vmem:[#allocation19_spill] sm:$0xff] %v11906_v47 }
 0x484   : > { %v11916_v49 = vpop.permute.xlu1 %7007 }
 0x485   : > { %16264 = vst [vmem:[#allocation21_spill] sm:$0xff] %v11916_v49  ;;  %v16284_v49 = vmov 12  }
 0x530   : > { %v10067_v53 = vpop.f32.mrb[8].mxu0 }
 0x531   : > { %v3101_v55 = vadd.f32 %v10067_v53, %v3092_v52  ;;  %v3056_v56 = vpop.f32.mrb[9].mxu0 }
 0x532   : > { %v3099_v57 = vadd.f32 %v3082_v51, %v3056_v56  ;;  %v10068_v58 = vpop.f32.mrb[10].mxu0  ;;  %v11926_v51 = vpop.permute.xlu1 %7118 }
 0x533   : > { %v3102_v59 = vadd.f32 %v10068_v58, %v3097_v54  ;;  %v3059_v60 = vpop.f32.mrb[11].mxu0  ;;  %v3105_v62 = vmax.f32 %v3101_v55, 0.0  ;;  %16266 = vst [vmem:[#allocation23_spill] sm:$0xff] %v11926_v51 }
 0x534   : > { %v3100_v61 = vadd.f32 %v3087_v50, %v3059_v60  ;;  %v3103_v0 = vmax.f32 %v3099_v57, 0.0 }
 0x535   : > { %v3106_v63 = vmax.f32 %v3102_v59, 0.0  ;;  %v15919_v59 = vmov 11  }
 0x536   : > { %v3104_v1 = vmax.f32 %v3100_v61, 0.0  ;;  %v11936_v53 = vpop.permute.xlu1 %7237 }
 0x537   : > { %v3108_v2 = vpack.c.bf16 %v3106_v63, %v3105_v62  ;;  %16268 = vst [vmem:[#allocation25_spill] sm:$0xff] %v11936_v53  ;;  %v15918_v63 = vmov 12  }
 0x538   : > { %v3107_v3 = vpack.c.bf16 %v3104_v1, %v3103_v0 }
 0x53a   : > { %9475 = vmatmul.mubr.msk.bf16.vlgmr.msra.gmra.mrb[8].mxu1 %vm3206_vm5, %v3107_v3  ;;  %v11946_v55 = vpop.permute.xlu1 %7348 }
 0x53b   : > { %10070 = vmatpush3.bf16.msra.mxu1 %v11747_v40  ;;  %3268 = vmatprep.mubr.bf16.mxu1 %v15912_v35  ;;  %v11870_v40 = vpop.permute.xlu0 %6433  ;;  %16270 = vst [vmem:[#allocation27_spill] sm:$0xff] %v11946_v55 }
 0x53c   : > { %10071 = vmatprep.subr.bf16.mxu1 %v10623_v4  ;;  %16255 = vst [vmem:[#allocation12_spill] sm:$0xff] %v11870_v40 }
 0x53f   : > { %10072 = vmatpush3.bf16.msra.mxu1 %v10623_v4  ;;  %v11878_v42 = vpop.permute.xlu0 %6544 }
 0x540   : > { %10073 = vmatprep.subr.bf16.mxu1 %v10624_v5  ;;  %16257 = vst [vmem:[#allocation14_spill] sm:$0xff] %v11878_v42  ;;  %v16300_v42 = vmov 16  }
 0x542   : > { %9476 = vmatmul.mubr.msk.bf16.gmra.mrb[12].mxu1 %vm3206_vm5, %v3108_v2 }
 0x543   : > { %10074 = vmatpush3.bf16.msra.mxu1 %v10624_v5  ;;  %10079 = vmatprep.mubr.msk.bf16.mxu1 %vm3206_vm5, %v3107_v3  ;;  %v11890_v44 = vpop.permute.xlu0 %6663  ;;  %v15917_v3 = vmov 13  }
 0x544   : > { %10075 = vmatprep.subr.bf16.mxu1 %v10625_v6  ;;  %16259 = vst [vmem:[#allocation16_spill] sm:$0xff] %v11890_v44  ;;  %v16292_v44 = vmov 14  }
 0x547   : > { %10076 = vmatpush3.bf16.msra.mxu1 %v10625_v6  ;;  %v11898_v46 = vpop.permute.xlu0 %6774  ;;  %v15916_v6 = vmov 14  }
 0x548   : > { %10077 = vmatprep.subr.bf16.mxu1 %v3224_v12  ;;  %16261 = vst [vmem:[#allocation18_spill] sm:$0xff] %v11898_v46 }
 0x54b   : > { %10078 = vmatpush3.bf16.msra.mxu1 %v3224_v12  ;;  %v11910_v48 = vpop.permute.xlu0 %6892 }
 0x54c   : > { %16263 = vst [vmem:[#allocation20_spill] sm:$0xff] %v11910_v48 }
 0x54e   : > { %10080 = vmatmul.mubr.msk.bf16.vlgmr.msra.gmra.mrb[16].mxu1 %vm3206_vm5, %v3108_v2  ;;  %vm4398_vm5 = vcmask 719872  }
 0x54f   : > { %3397 = vmatprep.mubr.bf16.mxu1 %v15912_v35  ;;  %v11918_v50 = vpop.permute.xlu0 %7003 }
 0x550   : > { %16265 = vst [vmem:[#allocation22_spill] sm:$0xff] %v11918_v50 }
 0x553   : > { %v11930_v52 = vpop.permute.xlu0 %7122 }
 0x554   : > { %16267 = vst [vmem:[#allocation24_spill] sm:$0xff] %v11930_v52 }
 0x557   : > { %v11938_v54 = vpop.permute.xlu0 %7233 }
 0x558   : > { %16269 = vst [vmem:[#allocation26_spill] sm:$0xff] %v11938_v54 }
 0x55b   : > { %v11950_v56 = vpop.permute.xlu0 %7352 }
 0x55c   : > { %16271 = vst [vmem:[#allocation28_spill] sm:$0xff] %v11950_v56  ;;  %v16288_v56 = vmov 13  }
 0x60d   : > { %v3260_v14 = vpop.f32.mrb[8].mxu1 }
 0x60e   : > { %v3262_v15 = vpop.f32.mrb[9].mxu1 }
 0x60f   : > { %v3264_v16 = vpop.f32.mrb[10].mxu1 }
 0x610   : > { %v11788_v17 = vpack.c.bf16 %v3264_v16, %v3260_v14  ;;  %v3266_v18 = vpop.f32.mrb[11].mxu1  ;;  %v15915_v14 = vmov 15  }
 0x611   : > { %v11790_v19 = vpack.c.bf16 %v3266_v18, %v3262_v15 }
 0x612   : > { %3347 = vrot.lane.b32.xlu1 %v11788_v17, %s15944_s27 }
 0x613   : > { %3349 = vrot.lane.b32.xlu0 %v11790_v19, %s15944_s27 }
 0x615   : > { %v3270_v20 = vpop.f32.mrb[12].mxu1 }
 0x616   : > { %3466 = vrot.lane.b32.xlu1 %v11788_v17, %s15936_s26  ;;  %v3272_v21 = vpop.f32.mrb[13].mxu1 }
 0x617   : > { %3468 = vrot.lane.b32.xlu0 %v11790_v19, %s15936_s26  ;;  %v3274_v22 = vpop.f32.mrb[14].mxu1 }
 0x618   : > { %v11800_v23 = vpack.c.bf16 %v3274_v22, %v3270_v20  ;;  %v3276_v27 = vpop.f32.mrb[15].mxu1  ;;  %v15914_v20 = vmov 16  }
 0x619   : > { %v11802_v29 = vpack.c.bf16 %v3276_v27, %v3272_v21 }
 0x61a   : > { %3538 = vrot.lane.b32.xlu1 %v11788_v17, %s15939_s14 }
 0x61b   : > { %3540 = vrot.lane.b32.xlu0 %v11790_v19, %s15939_s14 }
 0x61e   : > { %3610 = vrot.lane.b32.xlu1 %v11788_v17, %s15901_s28 }
 0x61f   : > { %3612 = vrot.lane.b32.xlu0 %v11790_v19, %s15901_s28 }
 0x621   : > { %v10081_v30 = vpop.f32.mrb[16].mxu1 }
 0x622   : > { %v3313_v31 = vpop.f32.mrb[17].mxu1  ;;  %3684 = vrot.lane.b32.xlu1 %v11788_v17, %s15903_s30 }
 0x623   : > { %v10082_v32 = vpop.f32.mrb[18].mxu1  ;;  %3686 = vrot.lane.b32.xlu0 %v11790_v19, %s15903_s30 }
 0x624   : > { %v11816_v33 = vpack.c.bf16 %v10082_v32, %v10081_v30  ;;  %v3316_v34 = vpop.f32.mrb[19].mxu1 }
 0x625   : > { %v11818_v36 = vpack.c.bf16 %v3316_v34, %v3313_v31 }
 0x626   : > { %3762 = vrot.lane.b32.xlu1 %v11788_v17, %s15905_s0 }
 0x627   : > { %3764 = vrot.lane.b32.xlu0 %v11790_v19, %s15905_s0 }
 0x62a   : > { %3840 = vrot.lane.b32.xlu1 %v11788_v17, %s15907_s13 }
 0x62b   : > { %3842 = vrot.lane.b32.xlu0 %v11790_v19, %s15907_s13 }
 0x62e   : > { %3918 = vrot.lane.b32.xlu1 %v11788_v17, %s10908_s17 }
 0x62f   : > { %3920 = vrot.lane.b32.xlu0 %v11790_v19, %s10908_s17 }
 0x632   : > { %3996 = vrot.lane.b32.xlu1 %v11788_v17, %s10878_s16 }
 0x633   : > { %3998 = vrot.lane.b32.xlu0 %v11790_v19, %s10878_s16 }
 0x636   : > { %4074 = vrot.lane.b32.xlu1 %v11788_v17, %s10886_s23 }
 0x637   : > { %4076 = vrot.lane.b32.xlu0 %v11790_v19, %s10886_s23 }
 0x63a   : > { %4152 = vrot.lane.b32.xlu1 %v11788_v17, %s10887_s24 }
 0x63b   : > { %4154 = vrot.lane.b32.xlu0 %v11790_v19, %s10887_s24 }
 0x63e   : > { %4230 = vrot.lane.b32.xlu1 %v11788_v17, %s10909_s18 }
 0x63f   : > { %4232 = vrot.lane.b32.xlu0 %v11790_v19, %s10909_s18 }
 0x642   : > { %4308 = vrot.lane.b32.xlu1 %v11788_v17, %s10910_s25 }
 0x643   : > { %4310 = vrot.lane.b32.xlu0 %v11790_v19, %s10910_s25 }
 0x646   : > { %4386 = vrot.lane.b32.xlu1 %v11788_v17, %s10911_s19 }
 0x647   : > { %4388 = vrot.lane.b32.xlu0 %v11790_v19, %s10911_s19 }
 0x64a   : > { %4464 = vrot.lane.b32.xlu1 %v11788_v17, %s10912_s3 }
 0x64b   : > { %4466 = vrot.lane.b32.xlu0 %v11790_v19, %s10912_s3 }
 0x64e   : > { %4542 = vrot.lane.b32.xlu1 %v11788_v17, %s10913_s2 }
 0x64f   : > { %4544 = vrot.lane.b32.xlu0 %v11790_v19, %s10913_s2 }
 0x652   : > { %4620 = vrot.lane.b32.xlu1 %v11788_v17, %s10914_s29 }
 0x653   : > { %4622 = vrot.lane.b32.xlu0 %v11790_v19, %s10914_s29 }
 0x656   : > { %4698 = vrot.lane.b32.xlu1 %v11788_v17, %s15893_s22 }
 0x657   : > { %4700 = vrot.lane.b32.xlu0 %v11790_v19, %s15893_s22  ;;  %s15899_s22 = smov 55  }
 0x65a   : > { %4776 = vrot.lane.b32.xlu1 %v11788_v17, %s15895_s20 }
 0x65b   : > { %4778 = vrot.lane.b32.xlu0 %v11790_v19, %s15895_s20  ;;  %s10919_s20 = smov 54  }
 0x65e   : > { %4854 = vrot.lane.b32.xlu1 %v11788_v17, %s15897_s21 }
 0x65f   : > { %4856 = vrot.lane.b32.xlu0 %v11790_v19, %s15897_s21  ;;  %s10920_s21 = smov 53  }
 0x662   : > { %4932 = vrot.lane.b32.xlu1 %v11788_v17, %s15899_s22 }
 0x663   : > { %4934 = vrot.lane.b32.xlu0 %v11790_v19, %s15899_s22  ;;  %s15951_s22 = smov 52  }
 0x666   : > { %5010 = vrot.lane.b32.xlu1 %v11788_v17, %s10919_s20 }
 0x667   : > { %5012 = vrot.lane.b32.xlu0 %v11790_v19, %s10919_s20 }
 0x66a   : > { %5088 = vrot.lane.b32.xlu1 %v11788_v17, %s10920_s21 }
 0x66b   : > { %5090 = vrot.lane.b32.xlu0 %v11790_v19, %s10920_s21 }
 0x66e   : > { %5166 = vrot.lane.b32.xlu1 %v11788_v17, %s15951_s22 }
 0x66f   : > { %5168 = vrot.lane.b32.xlu0 %v11790_v19, %s15951_s22 }
 0x672   : > { %3351 = vrot.lane.b32.xlu1 %v11800_v23, %s15944_s27 }
 0x673   : > { %3690 = vrot.lane.b32.xlu0 %v11800_v23, %s15903_s30 }
 0x676   : > { %3470 = vrot.lane.b32.xlu1 %v11800_v23, %s15936_s26 }
 0x677   : > { %3768 = vrot.lane.b32.xlu0 %v11800_v23, %s15905_s0 }
 0x67a   : > { %3542 = vrot.lane.b32.xlu1 %v11800_v23, %s15939_s14 }
 0x67b   : > { %3846 = vrot.lane.b32.xlu0 %v11800_v23, %s15907_s13 }
 0x67e   : > { %3614 = vrot.lane.b32.xlu1 %v11800_v23, %s15901_s28  ;;  %s16272_s28 = smov 71  }
 0x67f   : > { %3924 = vrot.lane.b32.xlu0 %v11800_v23, %s10908_s17 }
 0x682   : > { %7467 = vperm.xlu1 %10484, %v16245_v25  }
 0x683   : > { %4002 = vrot.lane.b32.xlu0 %v11800_v23, %s10878_s16 }
 0x684   : > { %v3348_v57 = vpop.permute.xlu1 %3347 }
 0x685   : > { %v3350_v58 = vpop.permute.xlu0 %3349 }
 0x686   : > { %10485 = vset.pattern.permute.xlu1 %v15919_v59  ;;  %3365 = vmatprep.subr.bf16.mxu1 %v3350_v58  ;;  %v3356_v60 = vsel %vm3355_vm6, %v3348_v57, %v3350_v58 }
 0x687   : > { %4080 = vrot.lane.b32.xlu0 %v11800_v23, %s10886_s23  ;;  %7578 = vperm.xlu1 %10485, %v16246_v24  }
 0x688   : > { %3366 = vmatpush1.bf16.msra.mxu1 %v3356_v60  ;;  %v11960_v61 = vpop.permute.xlu1 %3466 }
 0x689   : > { %v11962_v62 = vpop.permute.xlu0 %3468 }
 0x68b   : > { %4158 = vrot.lane.b32.xlu0 %v11800_v23, %s10887_s24  ;;  %10488 = vset.pattern.permute.xlu1 %v15918_v63 }
 0x68c   : > { %v11967_v0 = vpop.permute.xlu1 %3538  ;;  %7697 = vperm.xlu1 %10488, %v16245_v25  }
 0x68d   : > { %v11970_v1 = vpop.permute.xlu0 %3540 }
 0x68f   : > { %4236 = vrot.lane.b32.xlu0 %v11800_v23, %s10909_s18 }
 0x690   : > { %v11974_v2 = vpop.permute.xlu1 %3610  ;;  %10489 = vset.pattern.permute.xlu1 %v15917_v3 }
 0x691   : > { %7808 = vperm.xlu1 %10489, %v16246_v24   ;;  %v11978_v4 = vpop.permute.xlu0 %3612 }
 0x693   : > { %4314 = vrot.lane.b32.xlu0 %v11800_v23, %s10910_s25 }
 0x694   : > { %v11982_v5 = vpop.permute.xlu1 %3684 }
 0x695   : > { %10492 = vset.pattern.permute.xlu1 %v15916_v6  ;;  %v11985_v10 = vpop.permute.xlu0 %3686 }
 0x696   : > { %7927 = vperm.xlu1 %10492, %v16245_v25  }
 0x697   : > { %4392 = vrot.lane.b32.xlu0 %v11800_v23, %s10911_s19 }
 0x698   : > { %v11990_v12 = vpop.permute.xlu1 %3762 }
 0x699   : > { %v11992_v13 = vpop.permute.xlu0 %3764 }
 0x69a   : > { %10493 = vset.pattern.permute.xlu1 %v15915_v14 }
 0x69b   : > { %4470 = vrot.lane.b32.xlu0 %v11800_v23, %s10912_s3  ;;  %8038 = vperm.xlu1 %10493, %v16246_v24  }
 0x69c   : > { %v11998_v15 = vpop.permute.xlu1 %3840 }
 0x69d   : > { %v12000_v16 = vpop.permute.xlu0 %3842 }
 0x69f   : > { %4548 = vrot.lane.b32.xlu0 %v11800_v23, %s10913_s2  ;;  %3692 = vrot.lane.b32.xlu1 %v11802_v29, %s15903_s30  ;;  %s16273_s30 = smov 70  }
 0x6a0   : > { %v12006_v18 = vpop.permute.xlu1 %3918  ;;  %10496 = vset.pattern.permute.xlu1 %v15914_v20 }
 0x6a1   : > { %v12009_v21 = vpop.permute.xlu0 %3920 }
 0x6a3   : > { %4626 = vrot.lane.b32.xlu0 %v11800_v23, %s10914_s29  ;;  %3770 = vrot.lane.b32.xlu1 %v11802_v29, %s15905_s0  ;;  %s16274_s0 = smov 56  }
 0x6a4   : > { %v12015_v22 = vpop.permute.xlu1 %3996 }
 0x6a5   : > { %v12017_v27 = vpop.permute.xlu0 %3998 }
 0x6a7   : > { %4704 = vrot.lane.b32.xlu0 %v11800_v23, %s16272_s28  ;;  %3848 = vrot.lane.b32.xlu1 %v11802_v29, %s15907_s13  ;;  %s16275_s13 = smov 55  }
 0x6a8   : > { %v12023_v30 = vpop.permute.xlu1 %4074 }
 0x6a9   : > { %v12025_v31 = vpop.permute.xlu0 %4076 }
 0x6ab   : > { %4782 = vrot.lane.b32.xlu0 %v11800_v23, %s16273_s30  ;;  %3926 = vrot.lane.b32.xlu1 %v11802_v29, %s10908_s17 }
 0x6ac   : > { %v12031_v32 = vpop.permute.xlu1 %4152 }
 0x6ad   : > { %v12033_v34 = vpop.permute.xlu0 %4154 }
 0x6af   : > { %4860 = vrot.lane.b32.xlu0 %v11800_v23, %s16274_s0  ;;  %4004 = vrot.lane.b32.xlu1 %v11802_v29, %s10878_s16 }
 0x6b0   : > { %v12039_v57 = vpop.permute.xlu1 %4230 }
 0x6b1   : > { %v12041_v58 = vpop.permute.xlu0 %4232 }
 0x6b3   : > { %4082 = vrot.lane.b32.xlu1 %v11802_v29, %s10886_s23  ;;  %4938 = vrot.lane.b32.xlu0 %v11800_v23, %s16275_s13 }
 0x6b4   : > { %v12047_v60 = vpop.permute.xlu1 %4308 }
 0x6b5   : > { %v12049_v26 = vpop.permute.xlu0 %4310 }
 0x6b7   : > { %4160 = vrot.lane.b32.xlu1 %v11802_v29, %s10887_s24  ;;  %5016 = vrot.lane.b32.xlu0 %v11800_v23, %s10919_s20 }
 0x6b8   : > { %v12055_v28 = vpop.permute.xlu1 %4386 }
 0x6b9   : > { %v12057_v7 = vpop.permute.xlu0 %4388 }
 0x6bb   : > { %4238 = vrot.lane.b32.xlu1 %v11802_v29, %s10909_s18  ;;  %5094 = vrot.lane.b32.xlu0 %v11800_v23, %s10920_s21 }
 0x6bc   : > { %v12063_v35 = vpop.permute.xlu1 %4464 }
 0x6bd   : > { %v12065_v20 = vpop.permute.xlu0 %4466 }
 0x6bf   : > { %4316 = vrot.lane.b32.xlu1 %v11802_v29, %s10910_s25  ;;  %5172 = vrot.lane.b32.xlu0 %v11800_v23, %s15951_s22 }
 0x6c0   : > { %v12071_v14 = vpop.permute.xlu1 %4542 }
 0x6c1   : > { %v12073_v6 = vpop.permute.xlu0 %4544 }
 0x6c3   : > { %4394 = vrot.lane.b32.xlu1 %v11802_v29, %s10911_s19  ;;  %3353 = vrot.lane.b32.xlu0 %v11802_v29, %s15944_s27  ;;  %s16299_s27 = smov 109  }
 0x6c4   : > { %v12079_v3 = vpop.permute.xlu1 %4620 }
 0x6c5   : > { %16276 = vst [vmem:[#allocation29_spill] sm:$0xff] %v12079_v3  ;;  %v12081_v63 = vpop.permute.xlu0 %4622 }
 0x6c6   : > { %16277 = vst [vmem:[#allocation30_spill] sm:$0xff] %v12081_v63 }
 0x6c7   : > { %4472 = vrot.lane.b32.xlu1 %v11802_v29, %s10912_s3  ;;  %7463 = vperm.xlu0 %10483, %v16246_v24  }
 0x6c8   : > { %v12086_v59 = vpop.permute.xlu1 %4698 }
 0x6c9   : > { %16278 = vst [vmem:[#allocation31_spill] sm:$0xff] %v12086_v59  ;;  %v12088_v11 = vpop.permute.xlu0 %4700 }
 0x6ca   : > { %16279 = vst [vmem:[#allocation32_spill] sm:$0xff] %v12088_v11  ;;  %v10935_v11 = vmov 24  }
 0x6cb   : > { %4550 = vrot.lane.b32.xlu1 %v11802_v29, %s10913_s2  ;;  %10486 = vset.pattern.permute.xlu0 %v16280_v8 }
 0x6cc   : > { %v12093_v9 = vpop.permute.xlu1 %4776  ;;  %7582 = vperm.xlu0 %10486, %v16245_v25  }
 0x6cd   : > { %16281 = vst [vmem:[#allocation33_spill] sm:$0xff] %v12093_v9  ;;  %v12096_v38 = vpop.permute.xlu0 %4778 }
 0x6ce   : > { %16282 = vst [vmem:[#allocation34_spill] sm:$0xff] %v12096_v38 }
 0x6cf   : > { %4628 = vrot.lane.b32.xlu1 %v11802_v29, %s10914_s29 }
 0x6d0   : > { %v12100_v53 = vpop.permute.xlu1 %4854  ;;  %10487 = vset.pattern.permute.xlu0 %v16284_v49 }
 0x6d1   : > { %16283 = vst [vmem:[#allocation35_spill] sm:$0xff] %v12100_v53  ;;  %7693 = vperm.xlu0 %10487, %v16246_v24   ;;  %v12104_v45 = vpop.permute.xlu0 %4856  ;;  %v10932_v53 = vmov 21  }
 0x6d2   : > { %16285 = vst [vmem:[#allocation36_spill] sm:$0xff] %v12104_v45 }
 0x6d3   : > { %4706 = vrot.lane.b32.xlu1 %v11802_v29, %s16272_s28 }
 0x6d4   : > { %v12108_v8 = vpop.permute.xlu1 %4932 }
 0x6d5   : > { %16286 = vst [vmem:[#allocation37_spill] sm:$0xff] %v12108_v8  ;;  %3472 = vrot.lane.b32.xlu0 %v11802_v29, %s15936_s26  ;;  %v12112_v41 = vpop.permute.xlu0 %4934  ;;  %s16296_s26 = smov 124   ;;  %v10931_v8 = vmov 20  }
 0x6d6   : > { %16287 = vst [vmem:[#allocation38_spill] sm:$0xff] %v12112_v41  ;;  %10490 = vset.pattern.permute.xlu0 %v16288_v56 }
 0x6d7   : > { %4784 = vrot.lane.b32.xlu1 %v11802_v29, %s16273_s30 }
 0x6d8   : > { %v12117_v49 = vpop.permute.xlu1 %5010 }
 0x6d9   : > { %16289 = vst [vmem:[#allocation39_spill] sm:$0xff] %v12117_v49  ;;  %7812 = vperm.xlu0 %10490, %v16245_v25   ;;  %v12120_v52 = vpop.permute.xlu0 %5012 }
 0x6da   : > { %16290 = vst [vmem:[#allocation40_spill] sm:$0xff] %v12120_v52 }
 0x6db   : > { %4862 = vrot.lane.b32.xlu1 %v11802_v29, %s16274_s0 }
 0x6dc   : > { %v12129_v56 = vpop.permute.xlu1 %5088 }
 0x6dd   : > { %3544 = vrot.lane.b32.xlu0 %v11802_v29, %s15939_s14  ;;  %v12126_v48 = vpop.permute.xlu0 %5090  ;;  %16293 = vst [vmem:[#allocation42_spill] sm:$0xff] %v12129_v56  ;;  %s16298_s14 = smov 110   ;;  %v10930_v56 = vmov 19  }
 0x6de   : > { %16291 = vst [vmem:[#allocation41_spill] sm:$0xff] %v12126_v48  ;;  %10491 = vset.pattern.permute.xlu0 %v16292_v44  ;;  %v16297_v44 = vmov 15  }
 0x6df   : > { %4940 = vrot.lane.b32.xlu1 %v11802_v29, %s16275_s13 }
 0x6e0   : > { %v12138_v54 = vpop.permute.xlu1 %5166 }
 0x6e1   : > { %7923 = vperm.xlu0 %10491, %v16246_v24   ;;  %v12134_v40 = vpop.permute.xlu0 %5168  ;;  %16295 = vst [vmem:[#allocation44_spill] sm:$0xff] %v12138_v54  ;;  %v10929_v54 = vmov 18  }
 0x6e2   : > { %16294 = vst [vmem:[#allocation43_spill] sm:$0xff] %v12134_v40 }
 0x6e3   : > { %5018 = vrot.lane.b32.xlu1 %v11802_v29, %s10919_s20 }
 0x6e4   : > { %v12151_v55 = vpop.permute.xlu1 %3351 }
 0x6e5   : > { %3616 = vrot.lane.b32.xlu0 %v11802_v29, %s16296_s26  ;;  %v12142_v50 = vpop.permute.xlu0 %3690 }
 0x6e6   : > { %10494 = vset.pattern.permute.xlu0 %v16297_v44 }
 0x6e7   : > { %5096 = vrot.lane.b32.xlu1 %v11802_v29, %s10920_s21 }
 0x6e8   : > { %v12159_v44 = vpop.permute.xlu1 %3470 }
 0x6e9   : > { %3694 = vrot.lane.b32.xlu0 %v11816_v33, %s16298_s14  ;;  %v12149_v46 = vpop.permute.xlu0 %3768 }
 0x6eb   : > { %5174 = vrot.lane.b32.xlu1 %v11802_v29, %s15951_s22  ;;  %s16301_s22 = smov 108  }
 0x6ec   : > { %v12170_v37 = vpop.permute.xlu1 %3542 }
 0x6ed   : > { %8042 = vperm.xlu0 %10494, %v16245_v25   ;;  %v12156_v51 = vpop.permute.xlu0 %3846 }
 0x6ef   : > { %8156 = vperm.xlu1 %10496, %v16245_v25  }
 0x6f1   : > { %3772 = vrot.lane.b32.xlu0 %v11816_v33, %s16299_s27  ;;  %v12163_v47 = vpop.permute.xlu0 %3924 }
 0x6f2   : > { %10495 = vset.pattern.permute.xlu0 %v16300_v42  ;;  %v12177_v42 = vpop.permute.xlu1 %3614 }
 0x6f3   : > { %10497 = vset.pattern.permute.xlu1 %v10928_v43 }
 0x6f4   : > { %8267 = vperm.xlu1 %10497, %v16246_v24  }
 0x6f5   : > { %8152 = vperm.xlu0 %10495, %v16246_v24   ;;  %v12168_v39 = vpop.permute.xlu0 %4002 }
 0x6f8   : > { %10500 = vset.pattern.permute.xlu1 %v10929_v54 }
 0x6f9   : > { %8386 = vperm.xlu1 %10500, %v16245_v25   ;;  %3850 = vrot.lane.b32.xlu0 %v11816_v33, %s16301_s22  ;;  %v12175_v40 = vpop.permute.xlu0 %4080 }
 0x6fa   : > { %10498 = vset.pattern.permute.xlu0 %v10928_v43 }
 0x6fd   : > { %10501 = vset.pattern.permute.xlu1 %v10930_v56  ;;  %8271 = vperm.xlu0 %10498, %v16245_v25   ;;  %v12180_v48 = vpop.permute.xlu0 %4158 }
 0x6fe   : > { %8497 = vperm.xlu1 %10501, %v16246_v24  }
 0x701   : > { %v12183_v49 = vpop.permute.xlu1 %7467  ;;  %3928 = vrot.lane.b32.xlu0 %v11816_v33, %s10908_s17  ;;  %v12187_v52 = vpop.permute.xlu0 %4236 }
 0x702   : > { %16302 = vst [vmem:[#allocation45_spill] sm:$0xff] %v12183_v49  ;;  %10504 = vset.pattern.permute.xlu1 %v10931_v8  ;;  %10499 = vset.pattern.permute.xlu0 %v10929_v54  ;;  %v10933_v54 = vmov 22  }
 0x703   : > { %8616 = vperm.xlu1 %10504, %v16245_v25  }
 0x705   : > { %8382 = vperm.xlu0 %10499, %v16246_v24   ;;  %v12191_v43 = vpop.permute.xlu0 %4314 }
 0x706   : > { %v12193_v41 = vpop.permute.xlu1 %7578 }
 0x707   : > { %16303 = vst [vmem:[#allocation46_spill] sm:$0xff] %v12193_v41  ;;  %10505 = vset.pattern.permute.xlu1 %v10932_v53 }
 0x708   : > { %8648 = vperm.xlu1 %10505, %v16246_v24  }
 0x709   : > { %4006 = vrot.lane.b32.xlu0 %v11816_v33, %s10878_s16  ;;  %v12198_v49 = vpop.permute.xlu0 %4392 }
 0x70a   : > { %10502 = vset.pattern.permute.xlu0 %v10930_v56 }
 0x70b   : > { %v12200_v45 = vpop.permute.xlu1 %7697 }
 0x70c   : > { %16304 = vst [vmem:[#allocation47_spill] sm:$0xff] %v12200_v45  ;;  %10507 = vset.pattern.permute.xlu1 %v10933_v54  ;;  %v10934_v45 = vmov 23  }
 0x70d   : > { %8762 = vperm.xlu1 %10507, %v16246_v24   ;;  %8501 = vperm.xlu0 %10502, %v16245_v25   ;;  %v12204_v9 = vpop.permute.xlu0 %4470 }
 0x710   : > { %v12206_v41 = vpop.permute.xlu1 %7808 }
 0x711   : > { %16305 = vst [vmem:[#allocation48_spill] sm:$0xff] %v12206_v41  ;;  %8766 = vperm.xlu1 %10507, %v16245_v25   ;;  %4084 = vrot.lane.b32.xlu0 %v11816_v33, %s10886_s23  ;;  %v12211_v38 = vpop.permute.xlu0 %4548 }
 0x712   : > { %16306 = vst [vmem:[#allocation49_spill] sm:$0xff] %v12211_v38  ;;  %10503 = vset.pattern.permute.xlu0 %v10931_v8 }
 0x715   : > { %v12213_v56 = vpop.permute.xlu1 %7927  ;;  %10509 = vset.pattern.permute.xlu1 %v10934_v45  ;;  %8612 = vperm.xlu0 %10503, %v16246_v24   ;;  %v12216_v54 = vpop.permute.xlu0 %4626 }
 0x716   : > { %16307 = vst [vmem:[#allocation50_spill] sm:$0xff] %v12213_v56  ;;  %16308 = vst [vmem:[#allocation51_spill] sm:$0xff] %v12216_v54  ;;  %8880 = vperm.xlu1 %10509, %v16245_v25  }
 0x719   : > { %4162 = vrot.lane.b32.xlu0 %v11816_v33, %s10887_s24  ;;  %v12221_v41 = vpop.permute.xlu0 %4704 }
 0x71a   : > { %16309 = vst [vmem:[#allocation52_spill] sm:$0xff] %v12221_v41  ;;  %v12223_v59 = vpop.permute.xlu1 %8038  ;;  %10510 = vset.pattern.permute.xlu1 %v10935_v11  ;;  %10506 = vset.pattern.permute.xlu0 %v10932_v53 }
 0x71b   : > { %16310 = vst [vmem:[#allocation53_spill] sm:$0xff] %v12223_v59  ;;  %8990 = vperm.xlu1 %10510, %v16246_v24  }
 0x71d   : > { %8652 = vperm.xlu0 %10506, %v16245_v25   ;;  %v12227_v8 = vpop.permute.xlu0 %4782 }
 0x71e   : > { %16311 = vst [vmem:[#allocation54_spill] sm:$0xff] %v12227_v8  ;;  %v12229_v56 = vpop.permute.xlu1 %3692 }
 0x71f   : > { %3688 = vrot.lane.b32.xlu1 %v11818_v36, %s16298_s14  ;;  %s16387_s14 = smov 126  }
 0x721   : > { %4240 = vrot.lane.b32.xlu0 %v11816_v33, %s10909_s18  ;;  %v12235_v41 = vpop.permute.xlu0 %4860 }
 0x722   : > { %16312 = vst [vmem:[#allocation55_spill] sm:$0xff] %v12235_v41  ;;  %v12237_v59 = vpop.permute.xlu1 %3770  ;;  %10508 = vset.pattern.permute.xlu0 %v10934_v45 }
 0x723   : > { %3766 = vrot.lane.b32.xlu1 %v11818_v36, %s16299_s27  ;;  %s16386_s27 = smov 125  }
 0x725   : > { %8876 = vperm.xlu0 %10508, %v16246_v24   ;;  %v12242_v53 = vpop.permute.xlu0 %4938 }
 0x726   : > { %16313 = vst [vmem:[#allocation56_spill] sm:$0xff] %v12242_v53  ;;  %v12244_v8 = vpop.permute.xlu1 %3848  ;;  %v5238_v53 = vld [vmem:[%s15878_s11 + $0x8] sm:$0xff] }
 0x727   : > { %3844 = vrot.lane.b32.xlu1 %v11818_v36, %s16301_s22  ;;  %s16390_s22 = smov 94  }
 0x729   : > { %4318 = vrot.lane.b32.xlu0 %v11816_v33, %s10910_s25  ;;  %v12250_v54 = vpop.permute.xlu0 %5016 }
 0x72a   : > { %16314 = vst [vmem:[#allocation57_spill] sm:$0xff] %v12250_v54  ;;  %v12252_v41 = vpop.permute.xlu1 %3926  ;;  %10511 = vset.pattern.permute.xlu0 %v10935_v11  ;;  %v16316_v54 = vmov 0  }
 0x72b   : > { %3922 = vrot.lane.b32.xlu1 %v11818_v36, %s10908_s17  ;;  %s10938_s17 = smov 61  }
 0x72d   : > { %8994 = vperm.xlu0 %10511, %v16245_v25   ;;  %v12257_v45 = vpop.permute.xlu0 %5094 }
 0x72e   : > { %16315 = vst [vmem:[#allocation58_spill] sm:$0xff] %v12257_v45  ;;  %v12259_v24 = vpop.permute.xlu1 %4004 }
 0x72f   : > { %4000 = vrot.lane.b32.xlu1 %v11818_v36, %s10878_s16  ;;  %s10936_s16 = smov 96  }
 0x731   : > { %10512 = vset.pattern.permute.xlu0 %v16316_v54  ;;  %v12267_v3 = vpop.permute.xlu0 %5172 }
 0x732   : > { %16317 = vst [vmem:[#allocation59_spill] sm:$0xff] %v12267_v3  ;;  %v12269_v11 = vpop.permute.xlu1 %4082  ;;  %5246 = vperm.xlu0 %10512, %v5238_v53   ;;  %v10627_v3 = vld [vmem:[%s15877_s10 + $0x8] sm:$0xff]  }
 0x733   : > { %4078 = vrot.lane.b32.xlu1 %v11818_v36, %s10886_s23 }
 0x735   : > { %v3354_v45 = vpop.permute.xlu0 %3353 }
 0x736   : > { %v12273_v63 = vpop.permute.xlu1 %4160  ;;  %4396 = vrot.lane.b32.xlu0 %v11816_v33, %s10911_s19  ;;  %3367 = vmatprep.subr.bf16.mxu1 %v3354_v45  ;;  %v3357_v38 = vsel %vm3355_vm6, %v12151_v55, %v3354_v45 }
 0x737   : > { %4156 = vrot.lane.b32.xlu1 %v11818_v36, %s10887_s24  ;;  %3368 = vmatpush1.bf16.msra.mxu1 %v3357_v38  ;;  %s10937_s24 = smov 63  }
 0x738   : > { %3416 = vmatprep.subr.bf16.mxu1 %v11790_v19 }
 0x73a   : > { %v12285_v53 = vpop.permute.xlu1 %4238  ;;  %6397 = vperm.xlu0 %10512, %v16245_v25   ;;  %9480 = vmatmul.mubr.msk.bf16.vlgmr.msra.gmra.mrb[20].mxu1 %vm16072_vm2, %v10627_v3 }
 0x73b   : > { %4234 = vrot.lane.b32.xlu1 %v11818_v36, %s10909_s18  ;;  %3417 = vmatpush1.bf16.msra.mxu1 %v11788_v17  ;;  %v10628_v17 = vld [vmem:[%s15877_s10] sm:$0xff]   ;;  %s10939_s18 = smov 32  }
 0x73c   : > { %3418 = vmatprep.subr.bf16.mxu1 %v11802_v29  ;;  %3448 = vmatprep.mubr.bf16.mxu1 %v16316_v54 }
 0x73e   : > { %v12294_v55 = vpop.permute.xlu1 %4316  ;;  %4474 = vrot.lane.b32.xlu0 %v11816_v33, %s10912_s3 }
 0x73f   : > { %4312 = vrot.lane.b32.xlu1 %v11818_v36, %s10910_s25  ;;  %3419 = vmatpush1.bf16.msra.mxu1 %v11800_v23  ;;  %v3475_v23 = vsel %vm3474_vm7, %v11960_v61, %v11962_v62  ;;  %s16397_s25 = smov 95  }
 0x740   : > { %3484 = vmatprep.subr.bf16.mxu1 %v11962_v62 }
 0x742   : > { %v12302_v19 = vpop.permute.xlu1 %4394  ;;  %4552 = vrot.lane.b32.xlu0 %v11816_v33, %s10913_s2 }
 0x743   : > { %4390 = vrot.lane.b32.xlu1 %v11818_v36, %s10911_s19  ;;  %s10945_s19 = smov 31  }
 0x746   : > { %v12311_v29 = vpop.permute.xlu1 %4472  ;;  %4630 = vrot.lane.b32.xlu0 %v11816_v33, %s10914_s29  ;;  %9482 = vmatmul.mubr.msk.bf16.vlgmr.msra.gmra.mrb[20].mxu1 %vm16072_vm2, %v10628_v17  ;;  %v12319_v38 = vpop.permute.xlu0 %7463 }
 0x747   : > { %16318 = vst [vmem:[#allocation60_spill] sm:$0xff] %v12319_v38  ;;  %3485 = vmatpush1.bf16.msra.mxu1 %v3475_v23  ;;  %4468 = vrot.lane.b32.xlu1 %v11818_v36, %s10912_s3  ;;  %s10946_s3 = smov 29  }
 0x748   : > { %3516 = vmatprep.mubr.bf16.mxu1 %v16316_v54 }
 0x74a   : > { %v12324_v3 = vpop.permute.xlu1 %4550  ;;  %4708 = vrot.lane.b32.xlu0 %v11816_v33, %s16272_s28 }
 0x74b   : > { %4546 = vrot.lane.b32.xlu1 %v11818_v36, %s10913_s2  ;;  %v12330_v45 = vpop.permute.xlu0 %7582  ;;  %s9232_s2 = scalar_lea.vmem %s15881_s15, %s11302_s1 }
 0x74c   : > { %16319 = vst [vmem:[#allocation61_spill] sm:$0xff] %v12330_v45  ;;  %v10629_v45 = vld [vmem:[%s15877_s10 + $0x10] sm:$0xff]  }
 0x74e   : > { %v12332_v17 = vpop.permute.xlu1 %4628  ;;  %4786 = vrot.lane.b32.xlu0 %v11816_v33, %s16273_s30 }
 0x74f   : > { %4624 = vrot.lane.b32.xlu1 %v11818_v36, %s10914_s29  ;;  %s16381_s29 = smov 127  }
 0x750   : > { %v12338_v61 = vpop.permute.xlu0 %7693 }
 0x751   : > { %16320 = vst [vmem:[#allocation62_spill] sm:$0xff] %v12338_v61 }
 0x752   : > { %v12340_v62 = vpop.permute.xlu1 %4706  ;;  %4864 = vrot.lane.b32.xlu0 %v11816_v33, %s16274_s0 }
 0x753   : > { %4702 = vrot.lane.b32.xlu1 %v11818_v36, %s16272_s28  ;;  %s10940_s28 = smov 30  }
 0x754   : > { %v3473_v23 = vpop.permute.xlu0 %3472 }
 0x755   : > { %3486 = vmatprep.subr.bf16.mxu1 %v3473_v23  ;;  %v3476_v25 = vsel %vm3474_vm7, %v12159_v44, %v3473_v23  ;;  %v3547_v44 = vsel %vm3546_vm8, %v11967_v0, %v11970_v1 }
 0x756   : > { %v12351_v38 = vpop.permute.xlu1 %4784  ;;  %4942 = vrot.lane.b32.xlu0 %v11816_v33, %s16275_s13  ;;  %3487 = vmatpush1.bf16.msra.mxu1 %v3476_v25 }
 0x757   : > { %4780 = vrot.lane.b32.xlu1 %v11818_v36, %s16273_s30  ;;  %3556 = vmatprep.subr.bf16.mxu1 %v11970_v1  ;;  %v10630_v1 = vld [vmem:[%s15877_s10 + $0x18] sm:$0xff]   ;;  %s10941_s30 = smov 28  }
 0x758   : > { %v12358_v61 = vpop.permute.xlu0 %7812 }
 0x759   : > { %16321 = vst [vmem:[#allocation63_spill] sm:$0xff] %v12358_v61  ;;  %9484 = vmatmul.mubr.msk.bf16.vlgmr.msra.gmra.mrb[20].mxu1 %vm16072_vm2, %v10629_v45 }
 0x75a   : > { %v12364_v23 = vpop.permute.xlu1 %4862  ;;  %5020 = vrot.lane.b32.xlu0 %v11816_v33, %s10919_s20  ;;  %3557 = vmatpush1.bf16.msra.mxu1 %v3547_v44 }
 0x75b   : > { %4858 = vrot.lane.b32.xlu1 %v11818_v36, %s16274_s0  ;;  %3588 = vmatprep.mubr.bf16.mxu1 %v16316_v54  ;;  %s16324_s0 = smov 52  }
 0x75c   : > { %v3545_v25 = vpop.permute.xlu0 %3544 }
 0x75d   : > { %3558 = vmatprep.subr.bf16.mxu1 %v3545_v25  ;;  %v3548_v45 = vsel %vm3546_vm8, %v12170_v37, %v3545_v25  ;;  %v3619_v25 = vsel %vm3618_vm9, %v11974_v2, %v11978_v4  ;;  %v10631_v2 = vld [vmem:[%s15877_s10 + $0x20] sm:$0xff]  }
 0x75e   : > { %v12373_v61 = vpop.permute.xlu1 %4940  ;;  %5098 = vrot.lane.b32.xlu0 %v11816_v33, %s10920_s21  ;;  %3559 = vmatpush1.bf16.msra.mxu1 %v3548_v45 }
 0x75f   : > { %4936 = vrot.lane.b32.xlu1 %v11818_v36, %s16275_s13  ;;  %3628 = vmatprep.subr.bf16.mxu1 %v11978_v4  ;;  %s10943_s13 = smov 62  }
 0x760   : > { %v12380_v0 = vpop.permute.xlu0 %7923 }
 0x761   : > { %16322 = vst [vmem:[#allocation64_spill] sm:$0xff] %v12380_v0 }
 0x762   : > { %v12385_v44 = vpop.permute.xlu1 %5018  ;;  %5176 = vrot.lane.b32.xlu0 %v11816_v33, %s16324_s0 }
 0x763   : > { %16323 = vst [vmem:[#allocation65_spill] sm:$0xff] %v12385_v44  ;;  %5014 = vrot.lane.b32.xlu1 %v11818_v36, %s10919_s20  ;;  %s10942_s20 = smov 64  }
 0x764   : > { %v3617_v37 = vpop.permute.xlu0 %3616 }
 0x765   : > { %9486 = vmatmul.mubr.msk.bf16.vlgmr.msra.gmra.mrb[20].mxu1 %vm16072_vm2, %v10630_v1  ;;  %v3620_v33 = vsel %vm3618_vm9, %v12177_v42, %v3617_v37 }
 0x766   : > { %3629 = vmatpush1.bf16.msra.mxu1 %v3619_v25  ;;  %v12395_v45 = vpop.permute.xlu1 %5096  ;;  %3660 = vmatprep.mubr.bf16.mxu1 %v16316_v54 }
 0x767   : > { %16325 = vst [vmem:[#allocation66_spill] sm:$0xff] %v12395_v45  ;;  %3630 = vmatprep.subr.bf16.mxu1 %v3617_v37  ;;  %5092 = vrot.lane.b32.xlu1 %v11818_v36, %s10920_s21  ;;  %s10944_s21 = smov 60  }
 0x768   : > { %v3695_v45 = vpop.permute.xlu0 %3694 }
 0x76a   : > { %3631 = vmatpush1.bf16.msra.mxu1 %v3620_v33  ;;  %v12402_v0 = vpop.permute.xlu1 %5174 }
 0x76b   : > { %16326 = vst [vmem:[#allocation67_spill] sm:$0xff] %v12402_v0  ;;  %5170 = vrot.lane.b32.xlu1 %v11818_v36, %s16324_s0  ;;  %s16401_s0 = smov 93  }
 0x76e   : > { %v12409_v4 = vpop.permute.xlu1 %8156 }
 0x76f   : > { %16327 = vst [vmem:[#allocation68_spill] sm:$0xff] %v12409_v4 }
 0x771   : > { %9488 = vmatmul.mubr.msk.bf16.vlgmr.msra.gmra.mrb[20].mxu1 %vm16072_vm2, %v10631_v2  ;;  %v12429_v2 = vpop.permute.xlu0 %8042 }
 0x772   : > { %3740 = vmatprep.mubr.bf16.mxu1 %v16316_v54  ;;  %16336 = vst [vmem:[#allocation77_spill] sm:$0xff] %v12429_v2  ;;  %v10632_v2 = vld [vmem:[%s15877_s10 + $0x28] sm:$0xff]  }
 0x773   : > { %v12413_v1 = vpop.permute.xlu1 %8267 }
 0x774   : > { %16328 = vst [vmem:[#allocation69_spill] sm:$0xff] %v12413_v1 }
 0x778   : > { %v12415_v25 = vpop.permute.xlu1 %8386 }
 0x779   : > { %16329 = vst [vmem:[#allocation70_spill] sm:$0xff] %v12415_v25 }
 0x77d   : > { %v12417_v42 = vpop.permute.xlu1 %8497 }
 0x77e   : > { %16330 = vst [vmem:[#allocation71_spill] sm:$0xff] %v12417_v42  ;;  %v3773_v42 = vpop.permute.xlu0 %3772 }
 0x782   : > { %v12419_v37 = vpop.permute.xlu1 %8616 }
 0x783   : > { %16331 = vst [vmem:[#allocation72_spill] sm:$0xff] %v12419_v37  ;;  %v3697_v37 = vsel %vm3696_vm10, %v11982_v5, %v11985_v10  ;;  %v3775_v5 = vsel %vm3774_vm11, %v11990_v12, %v11992_v13  ;;  %v10633_v12 = vld [vmem:[%s15877_s10 + $0x30] sm:$0xff]  }
 0x787   : > { %v12421_v33 = vpop.permute.xlu1 %8648 }
 0x788   : > { %16332 = vst [vmem:[#allocation73_spill] sm:$0xff] %v12421_v33 }
 0x78c   : > { %v12423_v36 = vpop.permute.xlu1 %8762 }
 0x78d   : > { %16333 = vst [vmem:[#allocation74_spill] sm:$0xff] %v12423_v36  ;;  %v3700_v36 = vsel %vm3696_vm10, %v12229_v56, %v3695_v45  ;;  %v3777_v45 = vsel %vm3774_vm11, %v12149_v46, %v12237_v59 }
 0x790   : > { %v12425_v0 = vpop.permute.xlu1 %8766 }
 0x791   : > { %16334 = vst [vmem:[#allocation75_spill] sm:$0xff] %v12425_v0 }
 0x795   : > { %v12427_v4 = vpop.permute.xlu1 %8880 }
 0x796   : > { %16335 = vst [vmem:[#allocation76_spill] sm:$0xff] %v12427_v4  ;;  %v3699_v4 = vsel %vm3696_vm10, %v12142_v50, %v12229_v56 }
 0x79a   : > { %v12431_v44 = vpop.permute.xlu1 %8990 }
 0x79b   : > { %16337 = vst [vmem:[#allocation78_spill] sm:$0xff] %v12431_v44 }
 0x79e   : > { %v3689_v1 = vpop.permute.xlu1 %3688 }
 0x79f   : > { %v3698_v25 = vsel %vm3696_vm10, %v11985_v10, %v3689_v1  ;;  %v3778_v10 = vsel %vm3774_vm11, %v12237_v59, %v3773_v42  ;;  %vm4476_vm10 = vcmask 605184  }
 0x7a0   : > { %3708 = vmatprep.subr.bf16.mxu1 %v3698_v25  ;;  %v12443_v25 = vpop.permute.xlu0 %8152 }
 0x7a1   : > { %3709 = vmatpush1.bf16.msra.mxu1 %v3697_v37  ;;  %16338 = vst [vmem:[#allocation79_spill] sm:$0xff] %v12443_v25  ;;  %v3855_v37 = vsel %vm3852_vm12, %v12156_v51, %v12244_v8 }
 0x7a2   : > { %v3767_v0 = vpop.permute.xlu1 %3766  ;;  %3710 = vmatprep.subr.bf16.mxu1 %v3700_v36 }
 0x7a3   : > { %v3776_v1 = vsel %vm3774_vm11, %v11992_v13, %v3767_v0  ;;  %vm4554_vm11 = vcmask 596992  }
 0x7a4   : > { %v3851_v56 = vpop.permute.xlu0 %3850 }
 0x7a5   : > { %3711 = vmatpush1.bf16.msra.mxu1 %v3699_v4  ;;  %v3853_v4 = vsel %vm3852_vm12, %v11998_v15, %v12000_v16  ;;  %v3856_v42 = vsel %vm3852_vm12, %v12244_v8, %v3851_v56  ;;  %v10634_v15 = vld [vmem:[%s15877_s10 + $0x38] sm:$0xff]  }
 0x7a6   : > { %3786 = vmatprep.subr.bf16.mxu1 %v3776_v1  ;;  %v3845_v50 = vpop.permute.xlu1 %3844 }
 0x7a7   : > { %v3854_v0 = vsel %vm3852_vm12, %v12000_v16, %v3845_v50  ;;  %v4009_v50 = vsel %vm4008_vm14, %v12015_v22, %v12017_v27  ;;  %v10636_v22 = vld [vmem:[%s15877_s10 + $0x48] sm:$0xff]   ;;  %vm4632_vm12 = vcmask 588800  }
 0x7a8   : > { %9490 = vmatmul.mubr.msk.bf16.vlgmr.msra.gmra.mrb[20].mxu1 %vm16072_vm2, %v10632_v2  ;;  %v12456_v13 = vpop.permute.xlu0 %8271  ;;  %v3931_v2 = vsel %vm3930_vm13, %v12006_v18, %v12009_v21  ;;  %v10635_v18 = vld [vmem:[%s15877_s10 + $0x40] sm:$0xff]  }
 0x7a9   : > { %3787 = vmatpush1.bf16.msra.mxu1 %v3775_v5  ;;  %3818 = vmatprep.mubr.bf16.mxu1 %v16316_v54  ;;  %16339 = vst [vmem:[#allocation80_spill] sm:$0xff] %v12456_v13  ;;  %v3933_v5 = vsel %vm3930_vm13, %v12163_v47, %v12252_v41 }
 0x7aa   : > { %3788 = vmatprep.subr.bf16.mxu1 %v3778_v10  ;;  %v3923_v46 = vpop.permute.xlu1 %3922 }
 0x7ab   : > { %v3932_v36 = vsel %vm3930_vm13, %v12009_v21, %v3923_v46 }
 0x7ac   : > { %v3929_v59 = vpop.permute.xlu0 %3928 }
 0x7ad   : > { %3789 = vmatpush1.bf16.msra.mxu1 %v3777_v45  ;;  %v3934_v1 = vsel %vm3930_vm13, %v12252_v41, %v3929_v59  ;;  %v4011_v45 = vsel %vm4008_vm14, %v12168_v39, %v12259_v24  ;;  %v4165_v59 = vsel %vm4164_vm0, %v12031_v32, %v12033_v34  ;;  %v10638_v32 = vld [vmem:[%s15877_s10 + $0x58] sm:$0xff]   ;;  %vm4710_vm13 = vcmask 580608  }
 0x7ae   : > { %3864 = vmatprep.subr.bf16.mxu1 %v3854_v0  ;;  %v4001_v51 = vpop.permute.xlu1 %4000 }
 0x7af   : > { %v4010_v10 = vsel %vm4008_vm14, %v12017_v27, %v4001_v51  ;;  %v4245_v51 = vsel %vm4242_vm1, %v12187_v52, %v12285_v53 }
 0x7b0   : > { %v12469_v16 = vpop.permute.xlu0 %8382 }
 0x7b1   : > { %16340 = vst [vmem:[#allocation81_spill] sm:$0xff] %v12469_v16 }
 0x7b2   : > { %v4079_v41 = vpop.permute.xlu1 %4078 }
 0x7b3   : > { %v4088_v0 = vsel %vm16142_vm15, %v12025_v31, %v4079_v41 }
 0x7b4   : > { %9492 = vmatmul.mubr.msk.bf16.vlgmr.msra.gmra.mrb[20].mxu1 %vm16072_vm2, %v10633_v12  ;;  %v4007_v8 = vpop.permute.xlu0 %4006  ;;  %v4087_v12 = vsel %vm16142_vm15, %v12023_v30, %v12025_v31  ;;  %v10637_v30 = vld [vmem:[%s15877_s10 + $0x50] sm:$0xff]  }
 0x7b5   : > { %3865 = vmatpush1.bf16.msra.mxu1 %v3853_v4  ;;  %3896 = vmatprep.mubr.bf16.mxu1 %v16316_v54  ;;  %v4012_v56 = vsel %vm4008_vm14, %v12259_v24, %v4007_v8  ;;  %vm4788_vm14 = vcmask 572416  }
 0x7b6   : > { %3866 = vmatprep.subr.bf16.mxu1 %v3856_v42  ;;  %v4157_v39 = vpop.permute.xlu1 %4156  ;;  %v4089_v42 = vsel %vm16142_vm15, %v12175_v40, %v12269_v11 }
 0x7b7   : > { %v4166_v46 = vsel %vm4164_vm0, %v12033_v34, %v4157_v39  ;;  %v4477_v39 = vsel %vm4476_vm10, %v12063_v35, %v12065_v20  ;;  %v4479_v35 = vsel %vm4476_vm10, %v12204_v9, %v12311_v29  ;;  %v10642_v9 = vld [vmem:[%s15877_s10 + $0x78] sm:$0xff]  }
 0x7b8   : > { %v12482_v21 = vpop.permute.xlu0 %8501 }
 0x7b9   : > { %3867 = vmatpush1.bf16.msra.mxu1 %v3855_v37  ;;  %16341 = vst [vmem:[#allocation82_spill] sm:$0xff] %v12482_v21 }
 0x7ba   : > { %3942 = vmatprep.subr.bf16.mxu1 %v3932_v36  ;;  %v4235_v40 = vpop.permute.xlu1 %4234  ;;  %v4167_v36 = vsel %vm4164_vm0, %v12180_v48, %v12273_v63 }
 0x7bc   : > { %v4085_v47 = vpop.permute.xlu0 %4084 }
 0x7bd   : > { %v4090_v24 = vsel %vm16142_vm15, %v12269_v11, %v4085_v47  ;;  %v4401_v47 = vsel %vm4398_vm5, %v12198_v49, %v12302_v19  ;;  %v10658_v49 = vld [vmem:[%s15879_s12 + $0x48] ss:$36 sps:$4 sm:$0xff]  }
 0x7be   : > { %v4313_v48 = vpop.permute.xlu1 %4312 }
 0x7bf   : > { %v4322_v8 = vsel %vm4320_vm4, %v12049_v26, %v4313_v48  ;;  %v16348_v48 = vld [vmem:[#allocation30_spill] sm:$0xff] }
 0x7c0   : > { %9494 = vmatmul.mubr.msk.bf16.vlgmr.msra.gmra.mrb[20].mxu1 %vm16072_vm2, %v10634_v15  ;;  %v12496_v27 = vpop.permute.xlu0 %8612  ;;  %v4244_v15 = vsel %vm4242_vm1, %v12041_v58, %v4235_v40 }
 0x7c1   : > { %3943 = vmatpush1.bf16.msra.mxu1 %v3931_v2  ;;  %3974 = vmatprep.mubr.bf16.mxu1 %v16316_v54  ;;  %16342 = vst [vmem:[#allocation83_spill] sm:$0xff] %v12496_v27  ;;  %v4243_v2 = vsel %vm4242_vm1, %v12039_v57, %v12041_v58  ;;  %v10639_v57 = vld [vmem:[%s15877_s10 + $0x60] sm:$0xff]  }
 0x7c2   : > { %3944 = vmatprep.subr.bf16.mxu1 %v3934_v1  ;;  %v4391_v52 = vpop.permute.xlu1 %4390 }
 0x7c4   : > { %v4163_v4 = vpop.permute.xlu0 %4162 }
 0x7c5   : > { %3945 = vmatpush1.bf16.msra.mxu1 %v3933_v5  ;;  %v4168_v37 = vsel %vm4164_vm0, %v12273_v63, %v4163_v4  ;;  %v4321_v5 = vsel %vm4320_vm4, %v12047_v60, %v12049_v26  ;;  %v10640_v26 = vld [vmem:[%s15877_s10 + $0x68] sm:$0xff]   ;;  %vm4866_vm0 = vcmask 457728  }
 0x7c6   : > { %4020 = vmatprep.subr.bf16.mxu1 %v4010_v10 }
 0x7c8   : > { %v12512_v31 = vpop.permute.xlu0 %8652 }
 0x7c9   : > { %16343 = vst [vmem:[#allocation84_spill] sm:$0xff] %v12512_v31 }
 0x7cc   : > { %9496 = vmatmul.mubr.msk.bf16.vlgmr.msra.gmra.mrb[20].mxu1 %vm16072_vm2, %v10635_v18  ;;  %v4241_v11 = vpop.permute.xlu0 %4240  ;;  %v4323_v18 = vsel %vm4320_vm4, %v12191_v43, %v12294_v55  ;;  %v4469_v43 = vpop.permute.xlu1 %4468 }
 0x7cd   : > { %4021 = vmatpush1.bf16.msra.mxu1 %v4009_v50  ;;  %4052 = vmatprep.mubr.bf16.mxu1 %v16316_v54  ;;  %v4246_v1 = vsel %vm4242_vm1, %v12285_v53, %v4241_v11  ;;  %v4400_v50 = vsel %vm4398_vm5, %v12057_v7, %v4391_v52  ;;  %v10682_v11 = vld [vmem:[%s15879_s12 + $0x168] ss:$36 sps:$4 sm:$0xff]   ;;  %vm4944_vm1 = vcmask 449536  }
 0x7ce   : > { %4022 = vmatprep.subr.bf16.mxu1 %v4012_v56  ;;  %v4399_v56 = vsel %vm4398_vm5, %v12055_v28, %v12057_v7  ;;  %v10654_v7 = vld [vmem:[%s15879_s12 + $0x4] ss:$36 sps:$4 sm:$0xff]   ;;  %v4478_v28 = vsel %vm4476_vm10, %v12065_v20, %v4469_v43 }
 0x7cf   : > { %6177 = vmatprep.subr.bf16.mxu0 %v10654_v7  ;;  %v16349_v52 = vld [vmem:[#allocation29_spill] sm:$0xff]  ;;  %v10714_v7 = vld [vmem:[%s15879_s12 + $0x2d4] ss:$36 sps:$4 sm:$0xff]  }
 0x7d0   : > { %v12525_v34 = vpop.permute.xlu0 %8876 }
 0x7d1   : > { %4023 = vmatpush1.bf16.msra.mxu1 %v4011_v45  ;;  %16344 = vst [vmem:[#allocation85_spill] sm:$0xff] %v12525_v34  ;;  %v10652_v45 = vld [vmem:[%s15879_s12] ss:$36 sps:$4 sm:$0xff]  }
 0x7d2   : > { %4098 = vmatprep.subr.bf16.mxu1 %v4088_v0  ;;  %v10660_v0 = vld [vmem:[%s15879_s12 + $0x4c] ss:$36 sps:$4 sm:$0xff]   ;;  %6178 = vmatpush1.bf16.msra.mxu0 %v10652_v45 }
 0x7d3   : > { %6179 = vmatprep.subr.bf16.mxu0 %v10660_v0  ;;  %v10720_v0 = vld [vmem:[%s15879_s12 + $0x31c] ss:$36 sps:$4 sm:$0xff]  }
 0x7d4   : > { %v4319_v63 = vpop.permute.xlu0 %4318 }
 0x7d5   : > { %v4324_v10 = vsel %vm4320_vm4, %v12294_v55, %v4319_v63  ;;  %vm5022_vm4 = vcmask 441344  }
 0x7d6   : > { %6180 = vmatpush1.bf16.msra.mxu0 %v10658_v49 }
 0x7d8   : > { %9498 = vmatmul.mubr.msk.bf16.vlgmr.msra.gmra.mrb[20].mxu1 %vm16072_vm2, %v10636_v22  ;;  %v12538_v58 = vpop.permute.xlu0 %8994  ;;  %v10666_v22 = vld [vmem:[%s15879_s12 + $0x94] ss:$36 sps:$4 sm:$0xff]  }
 0x7d9   : > { %4099 = vmatpush1.bf16.msra.mxu1 %v4087_v12  ;;  %4130 = vmatprep.mubr.bf16.mxu1 %v16316_v54  ;;  %16345 = vst [vmem:[#allocation86_spill] sm:$0xff] %v12538_v58 }
 0x7da   : > { %4100 = vmatprep.subr.bf16.mxu1 %v4090_v24  ;;  %v10664_v24 = vld [vmem:[%s15879_s12 + $0x90] ss:$36 sps:$4 sm:$0xff]   ;;  %6181 = vmatprep.subr.bf16.mxu0 %v10666_v22  ;;  %v16352_v22 = vld [vmem:[#allocation31_spill] sm:$0xff] }
 0x7db   : > { %6182 = vmatpush1.bf16.msra.mxu0 %v10664_v24 }
 0x7dc   : > { %v12545_v53 = vpop.permute.xlu0 %5246 }
 0x7dd   : > { %4101 = vmatpush1.bf16.msra.mxu1 %v4089_v42  ;;  %v10672_v42 = vld [vmem:[%s15879_s12 + $0xdc] ss:$36 sps:$4 sm:$0xff]  }
 0x7de   : > { %4176 = vmatprep.subr.bf16.mxu1 %v4166_v46  ;;  %v4547_v46 = vpop.permute.xlu1 %4546  ;;  %6183 = vmatprep.subr.bf16.mxu0 %v10672_v42  ;;  %v10724_v42 = vld [vmem:[%s15879_s12 + $0x360] ss:$36 sps:$4 sm:$0xff]  }
 0x7df   : > { %v4556_v20 = vsel %vm4554_vm11, %v12073_v6, %v4547_v46  ;;  %v16353_v46 = vld [vmem:[#allocation52_spill] sm:$0xff] }
 0x7e0   : > { %v4397_v60 = vpop.permute.xlu0 %4396 }
 0x7e1   : > { %v4402_v41 = vsel %vm4398_vm5, %v12302_v19, %v4397_v60  ;;  %v10641_v19 = vld [vmem:[%s15877_s10 + $0x70] sm:$0xff]   ;;  %vm5100_vm5 = vcmask 433152  }
 0x7e4   : > { %9500 = vmatmul.mubr.msk.bf16.vlgmr.msra.gmra.mrb[20].mxu1 %vm16072_vm2, %v10637_v30  ;;  %v12558_v55 = vpop.permute.xlu0 %6397  ;;  %v10670_v30 = vld [vmem:[%s15879_s12 + $0xd8] ss:$36 sps:$4 sm:$0xff]  }
 0x7e5   : > { %4177 = vmatpush1.bf16.msra.mxu1 %v4165_v59  ;;  %4208 = vmatprep.mubr.bf16.mxu1 %v16316_v54  ;;  %16346 = vst [vmem:[#allocation87_spill] sm:$0xff] %v12558_v55  ;;  %v10678_v59 = vld [vmem:[%s15879_s12 + $0x124] ss:$36 sps:$4 sm:$0xff]  }
 0x7e6   : > { %4178 = vmatprep.subr.bf16.mxu1 %v4168_v37  ;;  %6184 = vmatpush1.bf16.msra.mxu0 %v10670_v30  ;;  %v10676_v37 = vld [vmem:[%s15879_s12 + $0x120] ss:$36 sps:$4 sm:$0xff]   ;;  %v4713_v30 = vsel %vm4710_vm13, %v16353_v46, %v12340_v62  ;;  %v16369_v46 = vld [vmem:[#allocation66_spill] sm:$0xff] }
 0x7e7   : > { %6185 = vmatprep.subr.bf16.mxu0 %v10678_v59  ;;  %v10732_v59 = vld [vmem:[%s15879_s12 + $0x3ac] ss:$36 sps:$4 sm:$0xff]  }
 0x7e8   : > { %v4475_v12 = vpop.permute.xlu0 %4474 }
 0x7e9   : > { %4179 = vmatpush1.bf16.msra.mxu1 %v4167_v36  ;;  %v4480_v4 = vsel %vm4476_vm10, %v12311_v29, %v4475_v12  ;;  %v10684_v29 = vld [vmem:[%s15879_s12 + $0x16c] ss:$36 sps:$4 sm:$0xff]   ;;  %v4555_v36 = vsel %vm4554_vm11, %v12071_v14, %v12073_v6  ;;  %vm5178_vm10 = vcmask 424960  }
 0x7ea   : > { %4254 = vmatprep.subr.bf16.mxu1 %v4244_v15  ;;  %6186 = vmatpush1.bf16.msra.mxu0 %v10676_v37  ;;  %v16347_v6 = vld [vmem:[#allocation49_spill] sm:$0xff] }
 0x7eb   : > { %6187 = vmatprep.subr.bf16.mxu0 %v10684_v29  ;;  %v4557_v14 = vsel %vm4554_vm11, %v16347_v6, %v12324_v3  ;;  %v10730_v37 = vld [vmem:[%s15879_s12 + $0x3a8] ss:$36 sps:$4 sm:$0xff]   ;;  %v10646_v6 = vld [vmem:[%s15877_s10 + $0x98] sm:$0xff]  }
 0x7ec   : > { %v4553_v40 = vpop.permute.xlu0 %4552  ;;  %v16355_v29 = vld [vmem:[#allocation33_spill] sm:$0xff] }
 0x7ed   : > { %v4558_v15 = vsel %vm4554_vm11, %v12324_v3, %v4553_v40  ;;  %v10643_v3 = vld [vmem:[%s15877_s10 + $0x80] sm:$0xff]   ;;  %vm7074_vm11 = vcmask 777216  }
 0x7ee   : > { %6188 = vmatpush1.bf16.msra.mxu0 %v10682_v11 }
 0x7f0   : > { %9502 = vmatmul.mubr.msk.bf16.vlgmr.msra.gmra.mrb[20].mxu1 %vm16072_vm2, %v10638_v32  ;;  %v10690_v32 = vld [vmem:[%s15879_s12 + $0x1b4] ss:$36 sps:$4 sm:$0xff]  }
 0x7f1   : > { %4255 = vmatpush1.bf16.msra.mxu1 %v4243_v2  ;;  %4286 = vmatprep.mubr.bf16.mxu1 %v16316_v54  ;;  %v4625_v2 = vpop.permute.xlu1 %4624 }
 0x7f2   : > { %4256 = vmatprep.subr.bf16.mxu1 %v4246_v1  ;;  %v10688_v1 = vld [vmem:[%s15879_s12 + $0x1b0] ss:$36 sps:$4 sm:$0xff]   ;;  %6189 = vmatprep.subr.bf16.mxu0 %v10690_v32  ;;  %v4634_v63 = vsel %vm4632_vm12, %v16348_v48, %v4625_v2  ;;  %v16357_v2 = vld [vmem:[#allocation36_spill] sm:$0xff] }
 0x7f3   : > { %6190 = vmatpush1.bf16.msra.mxu0 %v10688_v1 }
 0x7f5   : > { %4257 = vmatpush1.bf16.msra.mxu1 %v4245_v51  ;;  %v10696_v51 = vld [vmem:[%s15879_s12 + $0x1fc] ss:$36 sps:$4 sm:$0xff]   ;;  %v4703_v60 = vpop.permute.xlu1 %4702 }
 0x7f6   : > { %4332 = vmatprep.subr.bf16.mxu1 %v4322_v8  ;;  %v10694_v8 = vld [vmem:[%s15879_s12 + $0x1f8] ss:$36 sps:$4 sm:$0xff]   ;;  %6191 = vmatprep.subr.bf16.mxu0 %v10696_v51 }
 0x7f7   : > { %6192 = vmatpush1.bf16.msra.mxu0 %v10694_v8  ;;  %v16359_v8 = vld [vmem:[#allocation55_spill] sm:$0xff] }
 0x7fc   : > { %9504 = vmatmul.mubr.msk.bf16.vlgmr.msra.gmra.mrb[20].mxu1 %vm16072_vm2, %v10639_v57  ;;  %v10702_v57 = vld [vmem:[%s15879_s12 + $0x244] ss:$36 sps:$4 sm:$0xff]  }
 0x7fd   : > { %4333 = vmatpush1.bf16.msra.mxu1 %v4321_v5  ;;  %4364 = vmatprep.mubr.bf16.mxu1 %v16316_v54  ;;  %v4631_v5 = vpop.permute.xlu0 %4630 }
 0x7fe   : > { %4334 = vmatprep.subr.bf16.mxu1 %v4324_v10  ;;  %v10700_v10 = vld [vmem:[%s15879_s12 + $0x240] ss:$36 sps:$4 sm:$0xff]   ;;  %6193 = vmatprep.subr.bf16.mxu0 %v10702_v57  ;;  %v16360_v57 = vld [vmem:[#allocation38_spill] sm:$0xff] }
 0x7ff   : > { %6194 = vmatpush1.bf16.msra.mxu0 %v10700_v10  ;;  %v10647_v10 = vld [vmem:[%s15877_s10 + $0xa0] sm:$0xff]  }
 0x801   : > { %4335 = vmatpush1.bf16.msra.mxu1 %v4323_v18  ;;  %v4633_v18 = vsel %vm4632_vm12, %v16349_v52, %v16348_v48  ;;  %v4709_v49 = vpop.permute.xlu0 %4708  ;;  %v16358_v48 = vld [vmem:[#allocation35_spill] sm:$0xff] }
 0x802   : > { %4410 = vmatprep.subr.bf16.mxu1 %v4400_v50  ;;  %v4636_v50 = vsel %vm4632_vm12, %v12332_v17, %v4631_v5  ;;  %v4714_v24 = vsel %vm4710_vm13, %v12340_v62, %v4709_v49  ;;  %v10645_v62 = vld [vmem:[%s15877_s10 + $0x90] sm:$0xff]  }
 0x803   : > { %v16366_v49 = vld [vmem:[#allocation57_spill] sm:$0xff] }
 0x808   : > { %9506 = vmatmul.mubr.msk.bf16.vlgmr.msra.gmra.mrb[20].mxu1 %vm16072_vm2, %v10640_v26  ;;  %v10708_v26 = vld [vmem:[%s15879_s12 + $0x28c] ss:$36 sps:$4 sm:$0xff]  }
 0x809   : > { %4411 = vmatpush1.bf16.msra.mxu1 %v4399_v56  ;;  %4442 = vmatprep.mubr.bf16.mxu1 %v16316_v54  ;;  %v10706_v56 = vld [vmem:[%s15879_s12 + $0x288] ss:$36 sps:$4 sm:$0xff]  }
 0x80a   : > { %4412 = vmatprep.subr.bf16.mxu1 %v4402_v41  ;;  %v16350_v41 = vld [vmem:[#allocation51_spill] sm:$0xff]  ;;  %6195 = vmatprep.subr.bf16.mxu0 %v10708_v26 }
 0x80b   : > { %v4635_v43 = vsel %vm4632_vm12, %v16350_v41, %v12332_v17  ;;  %6196 = vmatpush1.bf16.msra.mxu0 %v10706_v56  ;;  %v10644_v17 = vld [vmem:[%s15877_s10 + $0x88] sm:$0xff]   ;;  %vm7189_vm12 = vcmask 769024  }
 0x80c   : > { %6197 = vmatprep.subr.bf16.mxu0 %v10714_v7  ;;  %v16363_v41 = vld [vmem:[#allocation40_spill] sm:$0xff]  ;;  %v16364_v7 = vld [vmem:[#allocation39_spill] sm:$0xff] }
 0x80d   : > { %4413 = vmatpush1.bf16.msra.mxu1 %v4401_v47  ;;  %v16351_v47 = vld [vmem:[#allocation32_spill] sm:$0xff] }
 0x80e   : > { %4488 = vmatprep.subr.bf16.mxu1 %v4478_v28  ;;  %v4712_v45 = vsel %vm4710_vm13, %v16351_v47, %v4703_v60  ;;  %v10712_v28 = vld [vmem:[%s15879_s12 + $0x2d0] ss:$36 sps:$4 sm:$0xff]   ;;  %v4711_v12 = vsel %vm4710_vm13, %v16352_v22, %v16351_v47  ;;  %v16362_v60 = vld [vmem:[#allocation56_spill] sm:$0xff]  ;;  %vm7304_vm13 = vcmask 760832  }
 0x80f   : > { %6198 = vmatpush1.bf16.msra.mxu0 %v10712_v28  ;;  %v4947_v56 = vsel %vm4944_vm1, %v16362_v60, %v12373_v61  ;;  %v10648_v47 = vld [vmem:[%s15877_s10 + $0xa8] sm:$0xff]   ;;  %v5023_v28 = vsel %vm5022_vm4, %v16364_v7, %v16363_v41  ;;  %v10721_v7 = vld [vmem:[%s15879_s12 + $0x320] ss:$36 sps:$4 sm:$0xff]  }
 0x810   : > { %6199 = vmatprep.subr.bf16.mxu0 %v10720_v0  ;;  %v16367_v22 = vld [vmem:[#allocation41_spill] sm:$0xff] }
 0x811   : > { %v10703_v60 = vld [vmem:[%s15879_s12 + $0x248] ss:$36 sps:$4 sm:$0xff]  }
 0x814   : > { %9508 = vmatmul.mubr.msk.bf16.vlgmr.msra.gmra.mrb[20].mxu1 %vm16072_vm2, %v10641_v19  ;;  %v10718_v19 = vld [vmem:[%s15879_s12 + $0x318] ss:$36 sps:$4 sm:$0xff]  }
 0x815   : > { %4489 = vmatpush1.bf16.msra.mxu1 %v4477_v39  ;;  %4520 = vmatprep.mubr.bf16.mxu1 %v16316_v54  ;;  %v10726_v39 = vld [vmem:[%s15879_s12 + $0x364] ss:$36 sps:$4 sm:$0xff]  }
 0x816   : > { %4490 = vmatprep.subr.bf16.mxu1 %v4480_v4  ;;  %v4781_v4 = vpop.permute.xlu1 %4780  ;;  %6200 = vmatpush1.bf16.msra.mxu0 %v10718_v19 }
 0x817   : > { %6201 = vmatprep.subr.bf16.mxu0 %v10726_v39 }
 0x819   : > { %4491 = vmatpush1.bf16.msra.mxu1 %v4479_v35  ;;  %v16354_v35 = vld [vmem:[#allocation34_spill] sm:$0xff] }
 0x81a   : > { %4566 = vmatprep.subr.bf16.mxu1 %v4556_v20  ;;  %v4790_v20 = vsel %vm4788_vm14, %v16354_v35, %v4781_v4  ;;  %6202 = vmatpush1.bf16.msra.mxu0 %v10724_v42  ;;  %v4789_v40 = vsel %vm4788_vm14, %v16355_v29, %v16354_v35  ;;  %v16368_v4 = vld [vmem:[#allocation42_spill] sm:$0xff] }
 0x81b   : > { %6203 = vmatprep.subr.bf16.mxu0 %v10732_v59  ;;  %v5101_v42 = vsel %vm5100_vm5, %v16368_v4, %v16367_v22  ;;  %v10746_v4 = vld [vmem:[%s15879_s12 + $0x438] ss:$36 sps:$4 sm:$0x3f]  }
 0x81e   : > { %6204 = vmatpush1.bf16.msra.mxu0 %v10730_v37  ;;  %v16371_v37 = vld [vmem:[#allocation43_spill] sm:$0xff] }
 0x820   : > { %9510 = vmatmul.mubr.msk.bf16.vlgmr.msra.gmra.mrb[20].mxu1 %vm16072_vm2, %v10642_v9  ;;  %v4787_v9 = vpop.permute.xlu0 %4786 }
 0x821   : > { %4567 = vmatpush1.bf16.msra.mxu1 %v4555_v36  ;;  %4598 = vmatprep.mubr.bf16.mxu1 %v16316_v54  ;;  %v4792_v11 = vsel %vm4788_vm14, %v12351_v38, %v4787_v9  ;;  %v4859_v36 = vpop.permute.xlu1 %4858  ;;  %v10650_v9 = vld [vmem:[%s15877_s10 + $0xb8] sm:$0xff]  }
 0x822   : > { %4568 = vmatprep.subr.bf16.mxu1 %v4558_v15  ;;  %v16356_v15 = vld [vmem:[#allocation54_spill] sm:$0xff]  ;;  %v4868_v1 = vsel %vm4866_vm0, %v16357_v2, %v4859_v36  ;;  %v16373_v36 = vld [vmem:[#allocation67_spill] sm:$0xff] }
 0x823   : > { %v4791_v32 = vsel %vm4788_vm14, %v16356_v15, %v12351_v38  ;;  %vm16141_vm14 = vcmask 523264  }
 0x825   : > { %4569 = vmatpush1.bf16.msra.mxu1 %v4557_v14  ;;  %v4865_v14 = vpop.permute.xlu0 %4864  ;;  %v4937_v38 = vpop.permute.xlu1 %4936 }
 0x826   : > { %4644 = vmatprep.subr.bf16.mxu1 %v4634_v63  ;;  %v4867_v63 = vsel %vm4866_vm0, %v16358_v48, %v16357_v2  ;;  %v4870_v51 = vsel %vm4866_vm0, %v12364_v23, %v4865_v14  ;;  %v4946_v5 = vsel %vm4944_vm1, %v16360_v57, %v4937_v38  ;;  %v16374_v2 = vld [vmem:[#allocation59_spill] sm:$0xff]  ;;  %v10655_v14 = vld [vmem:[%s15879_s12 + $0x8] ss:$36 sps:$4 sm:$0xff]   ;;  %v10661_v48 = vld [vmem:[%s15879_s12 + $0x50] ss:$36 sps:$4 sm:$0xff]  }
 0x827   : > { %v10675_v38 = vld [vmem:[%s15879_s12 + $0xe4] ss:$36 sps:$4 sm:$0xff]  }
 0x829   : > { %v4943_v52 = vpop.permute.xlu0 %4942 }
 0x82a   : > { %v4948_v26 = vsel %vm4944_vm1, %v12373_v61, %v4943_v52  ;;  %v10693_v52 = vld [vmem:[%s15879_s12 + $0x1bc] ss:$36 sps:$4 sm:$0xff]  }
 0x82c   : > { %9512 = vmatmul.mubr.msk.bf16.vlgmr.msra.gmra.mrb[20].mxu1 %vm16072_vm2, %v10643_v3  ;;  %v4869_v3 = vsel %vm4866_vm0, %v16359_v8, %v12364_v23  ;;  %v5015_v23 = vpop.permute.xlu1 %5014  ;;  %v10673_v8 = vld [vmem:[%s15879_s12 + $0xe0] ss:$36 sps:$4 sm:$0xff]   ;;  %vm16140_vm0 = vcmask 515072  }
 0x82d   : > { %4645 = vmatpush1.bf16.msra.mxu1 %v4633_v18  ;;  %4676 = vmatprep.mubr.bf16.mxu1 %v16316_v54  ;;  %v16361_v18 = vld [vmem:[#allocation37_spill] sm:$0xff] }
 0x82e   : > { %4646 = vmatprep.subr.bf16.mxu1 %v4636_v50  ;;  %v4945_v50 = vsel %vm4944_vm1, %v16361_v18, %v16360_v57  ;;  %v10679_v57 = vld [vmem:[%s15879_s12 + $0x128] ss:$36 sps:$4 sm:$0xff]   ;;  %v10691_v18 = vld [vmem:[%s15879_s12 + $0x1b8] ss:$36 sps:$4 sm:$0xff]   ;;  %vm16143_vm1 = vcmask 506880  }
 0x830   : > { %v5093_v61 = vpop.permute.xlu1 %5092 }
 0x831   : > { %4647 = vmatpush1.bf16.msra.mxu1 %v4635_v43  ;;  %v5024_v43 = vsel %vm5022_vm4, %v16363_v41, %v5015_v23  ;;  %v10705_v23 = vld [vmem:[%s15879_s12 + $0x24c] ss:$36 sps:$4 sm:$0xff]  }
 0x832   : > { %4722 = vmatprep.subr.bf16.mxu1 %v4712_v45  ;;  %v5021_v45 = vpop.permute.xlu0 %5020  ;;  %v10709_v41 = vld [vmem:[%s15879_s12 + $0x290] ss:$36 sps:$4 sm:$0xff]  }
 0x834   : > { %v5171_v35 = vpop.permute.xlu1 %5170 }
 0x836   : > { %v5099_v39 = vpop.permute.xlu0 %5098 }
 0x838   : > { %9514 = vmatmul.mubr.msk.bf16.vlgmr.msra.gmra.mrb[20].mxu1 %vm16072_vm2, %v10644_v17  ;;  %v16365_v17 = vld [vmem:[#allocation65_spill] sm:$0xff] }
 0x839   : > { %4723 = vmatpush1.bf16.msra.mxu1 %v4711_v12  ;;  %4754 = vmatprep.mubr.bf16.mxu1 %v16316_v54  ;;  %v5026_v0 = vsel %vm5022_vm4, %v16365_v17, %v5021_v45  ;;  %v5025_v19 = vsel %vm5022_vm4, %v16366_v49, %v16365_v17  ;;  %v5102_v12 = vsel %vm5100_vm5, %v16367_v22, %v5093_v61  ;;  %v10723_v45 = vld [vmem:[%s15879_s12 + $0x324] ss:$36 sps:$4 sm:$0xff]   ;;  %v10733_v61 = vld [vmem:[%s15879_s12 + $0x3b0] ss:$36 sps:$4 sm:$0xff]   ;;  %vm16071_vm4 = vcmask 498688  }
 0x83a   : > { %4724 = vmatprep.subr.bf16.mxu1 %v4714_v24  ;;  %v10649_v24 = vld [vmem:[%s15877_s10 + $0xb0] sm:$0xff]   ;;  %v5177_v29 = vpop.permute.xlu0 %5176  ;;  %v10727_v17 = vld [vmem:[%s15879_s12 + $0x368] ss:$36 sps:$4 sm:$0xff]  }
 0x83b   : > { %v5182_v15 = vsel %vm5178_vm10, %v16373_v36, %v5177_v29  ;;  %v10738_v49 = vld [vmem:[%s15879_s12 + $0x3f4] ss:$36 sps:$4 sm:$0xff]  }
 0x83c   : > { %v10736_v22 = vld [vmem:[%s15879_s12 + $0x3f0] ss:$36 sps:$4 sm:$0xff]   ;;  %6205 = vmatprep.subr.bf16.mxu0 %v10738_v49 }
 0x83d   : > { %4725 = vmatpush1.bf16.msra.mxu1 %v4713_v30  ;;  %v5104_v30 = vsel %vm5100_vm5, %v16369_v46, %v5099_v39  ;;  %6206 = vmatpush1.bf16.msra.mxu0 %v10736_v22  ;;  %v10744_v39 = vld [vmem:[%s15879_s12 + $0x444] ss:$36 sps:$4 sm:$0x3f]   ;;  %v10792_v49 = vld [vmem:[%s15879_s12 + $0x20c] ss:$36 sps:$4 sm:$0xff]  }
 0x83e   : > { %4800 = vmatprep.subr.bf16.mxu1 %v4790_v20  ;;  %v16370_v20 = vld [vmem:[#allocation58_spill] sm:$0xff]  ;;  %v10790_v22 = vld [vmem:[%s15879_s12 + $0x208] ss:$36 sps:$4 sm:$0xff]  }
 0x83f   : > { %v5103_v59 = vsel %vm5100_vm5, %v16370_v20, %v16369_v46  ;;  %v6151_v46 = vsel %vm3213_vm3, %v10746_v4, 0  ;;  %v10753_v20 = vld [vmem:[%s15879_s12 + $0x1c] ss:$36 sps:$4 sm:$0xff]   ;;  %v10796_v4 = vld [vmem:[%s15879_s12 + $0x250] ss:$36 sps:$4 sm:$0xff]   ;;  %vm16073_vm5 = vcmask 490496  }
 0x844   : > { %9516 = vmatmul.mubr.msk.bf16.vlgmr.msra.gmra.mrb[20].mxu1 %vm16072_vm2, %v10645_v62  ;;  %v5180_v62 = vsel %vm5178_vm10, %v16371_v37, %v5171_v35  ;;  %v10750_v35 = vld [vmem:[%s15879_s12 + $0x14] ss:$36 sps:$4 sm:$0xff]  }
 0x845   : > { %4801 = vmatpush1.bf16.msra.mxu1 %v4789_v40  ;;  %4832 = vmatprep.mubr.bf16.mxu1 %v16316_v54  ;;  %v16372_v40 = vld [vmem:[#allocation44_spill] sm:$0xff] }
 0x846   : > { %4802 = vmatprep.subr.bf16.mxu1 %v4792_v11  ;;  %v5179_v11 = vsel %vm5178_vm10, %v16372_v40, %v16371_v37  ;;  %v16375_v37 = vld [vmem:[#allocation9_spill] sm:$0xff] }
 0x849   : > { %4803 = vmatpush1.bf16.msra.mxu1 %v4791_v32  ;;  %v10657_v32 = vld [vmem:[%s15879_s12 + $0xc] ss:$36 sps:$4 sm:$0xff]  }
 0x84a   : > { %4878 = vmatprep.subr.bf16.mxu1 %v4868_v1  ;;  %v5181_v1 = vsel %vm5178_vm10, %v16374_v2, %v16373_v36  ;;  %vm8223_vm10 = vcmask 252928  }
 0x850   : > { %9518 = vmatmul.mubr.msk.bf16.vlgmr.msra.gmra.mrb[20].mxu1 %vm16072_vm2, %v10646_v6  ;;  %v10651_v6 = vld [vmem:[%s15877_s10 + $0xc0] sm:$0xff]  }
 0x851   : > { %4879 = vmatpush1.bf16.msra.mxu1 %v4867_v63  ;;  %4910 = vmatprep.mubr.bf16.mxu1 %v16316_v54  ;;  %v10669_v63 = vld [vmem:[%s15879_s12 + $0x9c] ss:$36 sps:$4 sm:$0xff]  }
 0x852   : > { %4880 = vmatprep.subr.bf16.mxu1 %v4870_v51  ;;  %v10667_v51 = vld [vmem:[%s15879_s12 + $0x98] ss:$36 sps:$4 sm:$0xff]  }
 0x855   : > { %4881 = vmatpush1.bf16.msra.mxu1 %v4869_v3  ;;  %v10681_v3 = vld [vmem:[%s15879_s12 + $0x12c] ss:$36 sps:$4 sm:$0xff]  }
 0x856   : > { %4956 = vmatprep.subr.bf16.mxu1 %v4946_v5  ;;  %v10687_v5 = vld [vmem:[%s15879_s12 + $0x174] ss:$36 sps:$4 sm:$0xff]  }
 0x85c   : > { %9520 = vmatmul.mubr.msk.bf16.vlgmr.msra.gmra.mrb[20].mxu1 %vm16072_vm2, %v10647_v10  ;;  %v10685_v10 = vld [vmem:[%s15879_s12 + $0x170] ss:$36 sps:$4 sm:$0xff]  }
 0x85d   : > { %4957 = vmatpush1.bf16.msra.mxu1 %v4945_v50  ;;  %4988 = vmatprep.mubr.bf16.mxu1 %v16316_v54  ;;  %v10699_v50 = vld [vmem:[%s15879_s12 + $0x204] ss:$36 sps:$4 sm:$0xff]  }
 0x85e   : > { %4958 = vmatprep.subr.bf16.mxu1 %v4948_v26  ;;  %v10697_v26 = vld [vmem:[%s15879_s12 + $0x200] ss:$36 sps:$4 sm:$0xff]  }
 0x861   : > { %4959 = vmatpush1.bf16.msra.mxu1 %v4947_v56  ;;  %v10711_v56 = vld [vmem:[%s15879_s12 + $0x294] ss:$36 sps:$4 sm:$0xff]  }
 0x862   : > { %5034 = vmatprep.subr.bf16.mxu1 %v5024_v43  ;;  %v10717_v43 = vld [vmem:[%s15879_s12 + $0x2dc] ss:$36 sps:$4 sm:$0xff]  }
 0x868   : > { %9522 = vmatmul.mubr.msk.bf16.vlgmr.msra.gmra.mrb[20].mxu1 %vm16072_vm2, %v10648_v47  ;;  %v10715_v47 = vld [vmem:[%s15879_s12 + $0x2d8] ss:$36 sps:$4 sm:$0xff]  }
 0x869   : > { %5035 = vmatpush1.bf16.msra.mxu1 %v5023_v28  ;;  %5066 = vmatprep.mubr.bf16.mxu1 %v16316_v54  ;;  %v10729_v28 = vld [vmem:[%s15879_s12 + $0x36c] ss:$36 sps:$4 sm:$0xff]  }
 0x86a   : > { %5036 = vmatprep.subr.bf16.mxu1 %v5026_v0  ;;  %v10735_v0 = vld [vmem:[%s15879_s12 + $0x3b4] ss:$36 sps:$4 sm:$0xff]  }
 0x86d   : > { %5037 = vmatpush1.bf16.msra.mxu1 %v5025_v19  ;;  %v10741_v19 = vld [vmem:[%s15879_s12 + $0x3fc] ss:$36 sps:$4 sm:$0xff]  }
 0x86e   : > { %5112 = vmatprep.subr.bf16.mxu1 %v5102_v12  ;;  %v10739_v12 = vld [vmem:[%s15879_s12 + $0x3f8] ss:$36 sps:$4 sm:$0xff]  }
 0x874   : > { %9524 = vmatmul.mubr.msk.bf16.vlgmr.msra.gmra.mrb[20].mxu1 %vm16072_vm2, %v10649_v24  ;;  %v10742_v24 = vld [vmem:[%s15879_s12 + $0x43c] ss:$36 sps:$4 sm:$0x3f]  }
 0x875   : > { %5113 = vmatpush1.bf16.msra.mxu1 %v5101_v42  ;;  %5144 = vmatprep.mubr.bf16.mxu1 %v16316_v54  ;;  %v10747_v42 = vld [vmem:[%s15879_s12 + $0x440] ss:$36 sps:$4 sm:$0x3f]  }
 0x876   : > { %5114 = vmatprep.subr.bf16.mxu1 %v5104_v30  ;;  %9673 = vmatprep.subr.msk.bf16.mxu0 %vm3213_vm3, %v10742_v24  ;;  %v6157_v30 = vsel %vm3213_vm3, %v10747_v42, 0  ;;  %v10798_v24 = vld [vmem:[%s15879_s12 + $0x254] ss:$36 sps:$4 sm:$0xff]  }
 0x877   : > { %6208 = vmatpush1.bf16.msra.mxu0 %v6151_v46  ;;  %v10799_v42 = vld [vmem:[%s15879_s12 + $0x258] ss:$36 sps:$4 sm:$0xff]  }
 0x878   : > { %6263 = vmatprep.subr.bf16.mxu0 %v10750_v35  ;;  %v10804_v46 = vld [vmem:[%s15879_s12 + $0x29c] ss:$36 sps:$4 sm:$0xff]  }
 0x879   : > { %5115 = vmatpush1.bf16.msra.mxu1 %v5103_v59  ;;  %v10802_v35 = vld [vmem:[%s15879_s12 + $0x298] ss:$36 sps:$4 sm:$0xff]  }
 0x87a   : > { %5190 = vmatprep.subr.bf16.mxu1 %v5180_v62 }
 0x880   : > { %9526 = vmatmul.mubr.msk.bf16.vlgmr.msra.gmra.mrb[20].mxu1 %vm16072_vm2, %v10650_v9 }
 0x881   : > { %5191 = vmatpush1.bf16.msra.mxu1 %v5179_v11  ;;  %5222 = vmatprep.mubr.bf16.mxu1 %v16316_v54  ;;  %v10663_v54 = vld [vmem:[%s15879_s12 + $0x54] ss:$36 sps:$4 sm:$0xff]  }
 0x882   : > { %5192 = vmatprep.subr.bf16.mxu1 %v5182_v15 }
 0x885   : > { %5193 = vmatpush1.bf16.msra.mxu1 %v5181_v1 }
 0x886   : > { %6220 = vmatprep.subr.bf16.mxu1 %v10657_v32 }
 0x88c   : > { %9528 = vmatmul.mubr.msk.bf16.vlgmr.msra.gmra.mrb[20].mxu1 %vm16072_vm2, %v10651_v6 }
 0x88d   : > { %6221 = vmatpush1.bf16.msra.mxu1 %v10655_v14 }
 0x88e   : > { %6222 = vmatprep.subr.bf16.mxu1 %v10663_v54 }
 0x891   : > { %6223 = vmatpush1.bf16.msra.mxu1 %v10661_v48  ;;  %v10748_v48 = vld [vmem:[%s15879_s12 + $0x10] ss:$36 sps:$4 sm:$0xff]  }
 0x892   : > { %6224 = vmatprep.subr.bf16.mxu1 %v10669_v63  ;;  %v10751_v63 = vld [vmem:[%s15879_s12 + $0x18] ss:$36 sps:$4 sm:$0xff]  }
 0x895   : > { %6225 = vmatpush1.bf16.msra.mxu1 %v10667_v51  ;;  %v10759_v51 = vld [vmem:[%s15879_s12 + $0x64] ss:$36 sps:$4 sm:$0xff]  }
 0x896   : > { %6226 = vmatprep.subr.bf16.mxu1 %v10675_v38  ;;  %v10754_v38 = vld [vmem:[%s15879_s12 + $0x58] ss:$36 sps:$4 sm:$0xff]  }
 0x899   : > { %6227 = vmatpush1.bf16.msra.mxu1 %v10673_v8  ;;  %v10757_v8 = vld [vmem:[%s15879_s12 + $0x60] ss:$36 sps:$4 sm:$0xff]  }
 0x89a   : > { %6228 = vmatprep.subr.bf16.mxu1 %v10681_v3  ;;  %v10762_v3 = vld [vmem:[%s15879_s12 + $0xa4] ss:$36 sps:$4 sm:$0xff]  }
 0x89d   : > { %6229 = vmatpush1.bf16.msra.mxu1 %v10679_v57  ;;  %v10765_v57 = vld [vmem:[%s15879_s12 + $0xac] ss:$36 sps:$4 sm:$0xff]  }
 0x89e   : > { %6230 = vmatprep.subr.bf16.mxu1 %v10687_v5  ;;  %v10760_v5 = vld [vmem:[%s15879_s12 + $0xa0] ss:$36 sps:$4 sm:$0xff]  }
 0x8a1   : > { %6231 = vmatpush1.bf16.msra.mxu1 %v10685_v10  ;;  %v10763_v10 = vld [vmem:[%s15879_s12 + $0xa8] ss:$36 sps:$4 sm:$0xff]  }
 0x8a2   : > { %6232 = vmatprep.subr.bf16.mxu1 %v10693_v52  ;;  %v10768_v52 = vld [vmem:[%s15879_s12 + $0xec] ss:$36 sps:$4 sm:$0xff]  }
 0x8a5   : > { %6233 = vmatpush1.bf16.msra.mxu1 %v10691_v18  ;;  %v10771_v18 = vld [vmem:[%s15879_s12 + $0xf4] ss:$36 sps:$4 sm:$0xff]  }
 0x8a6   : > { %6234 = vmatprep.subr.bf16.mxu1 %v10699_v50  ;;  %v10766_v50 = vld [vmem:[%s15879_s12 + $0xe8] ss:$36 sps:$4 sm:$0xff]  }
 0x8a9   : > { %6235 = vmatpush1.bf16.msra.mxu1 %v10697_v26  ;;  %v10769_v26 = vld [vmem:[%s15879_s12 + $0xf0] ss:$36 sps:$4 sm:$0xff]  }
 0x8aa   : > { %6236 = vmatprep.subr.bf16.mxu1 %v10705_v23  ;;  %v10774_v23 = vld [vmem:[%s15879_s12 + $0x134] ss:$36 sps:$4 sm:$0xff]  }
 0x8ad   : > { %6237 = vmatpush1.bf16.msra.mxu1 %v10703_v60  ;;  %v10777_v60 = vld [vmem:[%s15879_s12 + $0x13c] ss:$36 sps:$4 sm:$0xff]  }
 0x8ae   : > { %6238 = vmatprep.subr.bf16.mxu1 %v10711_v56  ;;  %v10772_v56 = vld [vmem:[%s15879_s12 + $0x130] ss:$36 sps:$4 sm:$0xff]  }
 0x8b1   : > { %6239 = vmatpush1.bf16.msra.mxu1 %v10709_v41  ;;  %v10775_v41 = vld [vmem:[%s15879_s12 + $0x138] ss:$36 sps:$4 sm:$0xff]  }
 0x8b2   : > { %6240 = vmatprep.subr.bf16.mxu1 %v10717_v43  ;;  %v10780_v43 = vld [vmem:[%s15879_s12 + $0x17c] ss:$36 sps:$4 sm:$0xff]  }
 0x8b5   : > { %6241 = vmatpush1.bf16.msra.mxu1 %v10715_v47  ;;  %v10783_v47 = vld [vmem:[%s15879_s12 + $0x184] ss:$36 sps:$4 sm:$0xff]  }
 0x8b6   : > { %6242 = vmatprep.subr.bf16.mxu1 %v10723_v45  ;;  %v10778_v45 = vld [vmem:[%s15879_s12 + $0x178] ss:$36 sps:$4 sm:$0xff]  }
 0x8b9   : > { %6243 = vmatpush1.bf16.msra.mxu1 %v10721_v7  ;;  %v10781_v7 = vld [vmem:[%s15879_s12 + $0x180] ss:$36 sps:$4 sm:$0xff]  }
 0x8ba   : > { %6244 = vmatprep.subr.bf16.mxu1 %v10729_v28  ;;  %v10786_v28 = vld [vmem:[%s15879_s12 + $0x1c4] ss:$36 sps:$4 sm:$0xff]  }
 0x8bd   : > { %6245 = vmatpush1.bf16.msra.mxu1 %v10727_v17  ;;  %v10789_v17 = vld [vmem:[%s15879_s12 + $0x1cc] ss:$36 sps:$4 sm:$0xff]  }
 0x8be   : > { %6246 = vmatprep.subr.bf16.mxu1 %v10735_v0  ;;  %v10784_v0 = vld [vmem:[%s15879_s12 + $0x1c0] ss:$36 sps:$4 sm:$0xff]  }
 0x8c1   : > { %6247 = vmatpush1.bf16.msra.mxu1 %v10733_v61  ;;  %v10787_v61 = vld [vmem:[%s15879_s12 + $0x1c8] ss:$36 sps:$4 sm:$0xff]  }
 0x8c2   : > { %6248 = vmatprep.subr.bf16.mxu1 %v10741_v19  ;;  %v10795_v19 = vld [vmem:[%s15879_s12 + $0x214] ss:$36 sps:$4 sm:$0xff]  }
 0x8c5   : > { %6249 = vmatpush1.bf16.msra.mxu1 %v10739_v12  ;;  %v10793_v12 = vld [vmem:[%s15879_s12 + $0x210] ss:$36 sps:$4 sm:$0xff]  }
 0x8c6   : > { %9675 = vmatprep.subr.msk.bf16.mxu1 %vm3213_vm3, %v10744_v39  ;;  %v10801_v39 = vld [vmem:[%s15879_s12 + $0x25c] ss:$36 sps:$4 sm:$0xff]  }
 0x8c9   : > { %6251 = vmatpush1.bf16.msra.mxu1 %v6157_v30  ;;  %v10807_v30 = vld [vmem:[%s15879_s12 + $0x2a4] ss:$36 sps:$4 sm:$0xff]  }
 0x8ca   : > { %6306 = vmatprep.subr.bf16.mxu1 %v10753_v20  ;;  %v10805_v20 = vld [vmem:[%s15879_s12 + $0x2a0] ss:$36 sps:$4 sm:$0xff]  }
 0x95f   : > { %v5224_v59 = vpop.f32.mrb[20].mxu1 }
 0x960   : > { %v5249_v62 = vadd.f32 %v16375_v37, %v5224_v59  ;;  %v5226_v9 = vpop.f32.mrb[21].mxu1  ;;  %v10810_v59 = vld [vmem:[%s15879_s12 + $0x2e4] ss:$36 sps:$4 sm:$0xff]  }
 0x961   : > { %v5250_v29 = vadd.f32 %v16375_v37, %v5226_v9  ;;  %v5228_v40 = vpop.f32.mrb[22].mxu1  ;;  %v10813_v37 = vld [vmem:[%s15879_s12 + $0x2ec] ss:$36 sps:$4 sm:$0xff]  }
 0x962   : > { %v5251_v11 = vadd.f32 %v12545_v53, %v5228_v40  ;;  %v5230_v36 = vpop.f32.mrb[23].mxu1  ;;  %v5253_v32 = vmax.f32 %v5249_v62, 0.0  ;;  %v10808_v62 = vld [vmem:[%s15879_s12 + $0x2e0] ss:$36 sps:$4 sm:$0xff]   ;;  %v10811_v9 = vld [vmem:[%s15879_s12 + $0x2e8] ss:$36 sps:$4 sm:$0xff]  }
 0x963   : > { %v5252_v15 = vadd.f32 %v12545_v53, %v5230_v36  ;;  %v5254_v1 = vmax.f32 %v5250_v29, 0.0  ;;  %v10756_v53 = vld [vmem:[%s15879_s12 + $0x5c] ss:$36 sps:$4 sm:$0xff]   ;;  %v10816_v29 = vld [vmem:[%s15879_s12 + $0x32c] ss:$36 sps:$4 sm:$0xff]  }
 0x964   : > { %v5255_v2 = vmax.f32 %v5251_v11, 0.0  ;;  %v10819_v40 = vld [vmem:[%s15879_s12 + $0x334] ss:$36 sps:$4 sm:$0xff]   ;;  %v10814_v11 = vld [vmem:[%s15879_s12 + $0x328] ss:$36 sps:$4 sm:$0xff]  }
 0x965   : > { %v5256_v6 = vmax.f32 %v5252_v15, 0.0  ;;  %v10817_v36 = vld [vmem:[%s15879_s12 + $0x330] ss:$36 sps:$4 sm:$0xff]  }
 0x966   : > { %v12902_v14 = vpack.c.bf16 %v5255_v2, %v5253_v32  ;;  %v10822_v15 = vld [vmem:[%s15879_s12 + $0x374] ss:$36 sps:$4 sm:$0xff]   ;;  %v10825_v32 = vld [vmem:[%s15879_s12 + $0x37c] ss:$36 sps:$4 sm:$0xff]  }
 0x967   : > { %v12904_v54 = vpack.c.bf16 %v5256_v6, %v5254_v1  ;;  %v10820_v2 = vld [vmem:[%s15879_s12 + $0x370] ss:$36 sps:$4 sm:$0xff]   ;;  %v10823_v1 = vld [vmem:[%s15879_s12 + $0x378] ss:$36 sps:$4 sm:$0xff]  }
 0x968   : > { %v10828_v6 = vld [vmem:[%s15879_s12 + $0x3bc] ss:$36 sps:$4 sm:$0xff]  }
 0x969   : > { %9674 = vmatprep.mubr.msk.bf16.mxu0 %vm3618_vm9, %v12904_v54  ;;  %9676 = vmatprep.mubr.msk.bf16.mxu1 %vm3618_vm9, %v12904_v54 }
 0x96a   : > { %6210 = vmatmul.mubr.bf16.vlgmr.msra.gmra.mrb[12].mxu0 %v12902_v14  ;;  %6253 = vmatmul.mubr.bf16.vlgmr.msra.gmra.mrb[24].mxu1 %v12902_v14 }
 0x96b   : > { %6264 = vmatpush1.bf16.msra.mxu0 %v10748_v48  ;;  %6307 = vmatpush1.bf16.msra.mxu1 %v10751_v63  ;;  %v10831_v48 = vld [vmem:[%s15879_s12 + $0x3c4] ss:$36 sps:$4 sm:$0xff]   ;;  %v10826_v63 = vld [vmem:[%s15879_s12 + $0x3b8] ss:$36 sps:$4 sm:$0xff]  }
 0x96c   : > { %9678 = vmatprep.mubr.msk.bf16.mxu0 %vm3618_vm9, %v12904_v54  ;;  %9680 = vmatprep.mubr.msk.bf16.mxu1 %vm3618_vm9, %v12904_v54 }
 0x96d   : > { %6265 = vmatprep.subr.bf16.mxu0 %v10756_v53  ;;  %6308 = vmatprep.subr.bf16.mxu1 %v10759_v51  ;;  %v10829_v53 = vld [vmem:[%s15879_s12 + $0x3c0] ss:$36 sps:$4 sm:$0xff]  }
 0x96e   : > { %v10834_v51 = vld [vmem:[%s15879_s12 + $0x404] ss:$36 sps:$4 sm:$0xff]  }
 0x96f   : > { %6266 = vmatpush1.bf16.msra.mxu0 %v10754_v38  ;;  %6309 = vmatpush1.bf16.msra.mxu1 %v10757_v8  ;;  %v10837_v38 = vld [vmem:[%s15879_s12 + $0x40c] ss:$36 sps:$4 sm:$0xff]   ;;  %v10832_v8 = vld [vmem:[%s15879_s12 + $0x400] ss:$36 sps:$4 sm:$0xff]  }
 0x970   : > { %6267 = vmatprep.subr.bf16.mxu0 %v10762_v3  ;;  %6310 = vmatprep.subr.bf16.mxu1 %v10765_v57  ;;  %v10835_v3 = vld [vmem:[%s15879_s12 + $0x408] ss:$36 sps:$4 sm:$0xff]  }
 0x971   : > { %v10838_v57 = vld [vmem:[%s15879_s12 + $0x44c] ss:$36 sps:$4 sm:$0x3f]  }
 0x973   : > { %6268 = vmatpush1.bf16.msra.mxu0 %v10760_v5  ;;  %6311 = vmatpush1.bf16.msra.mxu1 %v10763_v10  ;;  %v10840_v5 = vld [vmem:[%s15879_s12 + $0x454] ss:$36 sps:$4 sm:$0x3f]   ;;  %v10842_v10 = vld [vmem:[%s15879_s12 + $0x448] ss:$36 sps:$4 sm:$0x3f]  }
 0x974   : > { %6269 = vmatprep.subr.bf16.mxu0 %v10768_v52  ;;  %6312 = vmatprep.subr.bf16.mxu1 %v10771_v18  ;;  %v10843_v52 = vld [vmem:[%s15879_s12 + $0x450] ss:$36 sps:$4 sm:$0x3f]   ;;  %v6163_v18 = vsel %vm3213_vm3, %v10842_v10, 0 }
 0x975   : > { %v16396_v10 = vld [vmem:[#allocation22_spill] sm:$0xff] }
 0x977   : > { %6270 = vmatpush1.bf16.msra.mxu0 %v10766_v50  ;;  %6313 = vmatpush1.bf16.msra.mxu1 %v10769_v26  ;;  %v6169_v50 = vsel %vm3213_vm3, %v10843_v52, 0  ;;  %v10844_v26 = vld [vmem:[%s15879_s12 + $0x260] ss:$36 sps:$4 sm:$0xff]  }
 0x978   : > { %6271 = vmatprep.subr.bf16.mxu0 %v10774_v23  ;;  %6314 = vmatprep.subr.bf16.mxu1 %v10777_v60  ;;  %v10845_v23 = vld [vmem:[%s15879_s12 + $0x20] ss:$36 sps:$4 sm:$0xff]   ;;  %v10846_v60 = vld [vmem:[%s15879_s12 + $0x2a8] ss:$36 sps:$4 sm:$0xff]  }
 0x97b   : > { %6272 = vmatpush1.bf16.msra.mxu0 %v10772_v56  ;;  %6315 = vmatpush1.bf16.msra.mxu1 %v10775_v41  ;;  %v10847_v56 = vld [vmem:[%s15879_s12 + $0x68] ss:$36 sps:$4 sm:$0xff]   ;;  %v10848_v41 = vld [vmem:[%s15879_s12 + $0x2f0] ss:$36 sps:$4 sm:$0xff]  }
 0x97c   : > { %6273 = vmatprep.subr.bf16.mxu0 %v10780_v43  ;;  %6316 = vmatprep.subr.bf16.mxu1 %v10783_v47  ;;  %v10849_v43 = vld [vmem:[%s15879_s12 + $0xb0] ss:$36 sps:$4 sm:$0xff]   ;;  %v10850_v47 = vld [vmem:[%s15879_s12 + $0x338] ss:$36 sps:$4 sm:$0xff]  }
 0x97f   : > { %6274 = vmatpush1.bf16.msra.mxu0 %v10778_v45  ;;  %6317 = vmatpush1.bf16.msra.mxu1 %v10781_v7  ;;  %v10852_v45 = vld [vmem:[%s15879_s12 + $0x380] ss:$36 sps:$4 sm:$0xff]  }
 0x980   : > { %6275 = vmatprep.subr.bf16.mxu0 %v10786_v28  ;;  %6318 = vmatprep.subr.bf16.mxu1 %v10789_v17  ;;  %v10853_v7 = vld [vmem:[%s15879_s12 + $0x140] ss:$36 sps:$4 sm:$0xff]   ;;  %v10854_v28 = vld [vmem:[%s15879_s12 + $0x3c8] ss:$36 sps:$4 sm:$0xff]  }
 0x981   : > { %v10855_v17 = vld [vmem:[%s15879_s12 + $0x188] ss:$36 sps:$4 sm:$0xff]  }
 0x983   : > { %6276 = vmatpush1.bf16.msra.mxu0 %v10784_v0  ;;  %6319 = vmatpush1.bf16.msra.mxu1 %v10787_v61  ;;  %v10856_v0 = vld [vmem:[%s15879_s12 + $0x410] ss:$36 sps:$4 sm:$0xff]  }
 0x984   : > { %6277 = vmatprep.subr.bf16.mxu0 %v10792_v49  ;;  %6320 = vmatprep.subr.bf16.mxu1 %v10795_v19  ;;  %v10857_v61 = vld [vmem:[%s15879_s12 + $0x1d0] ss:$36 sps:$4 sm:$0xff]   ;;  %v10858_v49 = vld [vmem:[%s15879_s12 + $0x458] ss:$36 sps:$4 sm:$0x3f]  }
 0x985   : > { %v10859_v19 = vld [vmem:[%s15879_s12 + $0x218] ss:$36 sps:$4 sm:$0xff]  }
 0x987   : > { %6278 = vmatpush1.bf16.msra.mxu0 %v10790_v22  ;;  %6321 = vmatpush1.bf16.msra.mxu1 %v10793_v12 }
 0x988   : > { %6279 = vmatprep.subr.bf16.mxu0 %v10798_v24  ;;  %6322 = vmatprep.subr.bf16.mxu1 %v10801_v39 }
 0x98b   : > { %6280 = vmatpush1.bf16.msra.mxu0 %v10796_v4  ;;  %6323 = vmatpush1.bf16.msra.mxu1 %v10799_v42  ;;  %v16379_v4 = vld [vmem:[#allocation11_spill] sm:$0xff] }
 0x98c   : > { %6281 = vmatprep.subr.bf16.mxu0 %v10804_v46  ;;  %6324 = vmatprep.subr.bf16.mxu1 %v10807_v30 }
 0x98f   : > { %6282 = vmatpush1.bf16.msra.mxu0 %v10802_v35  ;;  %6325 = vmatpush1.bf16.msra.mxu1 %v10805_v20 }
 0x990   : > { %6283 = vmatprep.subr.bf16.mxu0 %v10810_v59  ;;  %6326 = vmatprep.subr.bf16.mxu1 %v10813_v37  ;;  %v16384_v59 = vld [vmem:[#allocation15_spill] sm:$0xff] }
 0x993   : > { %6284 = vmatpush1.bf16.msra.mxu0 %v10808_v62  ;;  %6327 = vmatpush1.bf16.msra.mxu1 %v10811_v9  ;;  %v16385_v62 = vld [vmem:[#allocation14_spill] sm:$0xff] }
 0x994   : > { %6285 = vmatprep.subr.bf16.mxu0 %v10816_v29  ;;  %6328 = vmatprep.subr.bf16.mxu1 %v10819_v40  ;;  %v16388_v29 = vld [vmem:[#allocation19_spill] sm:$0xff] }
 0x997   : > { %6286 = vmatpush1.bf16.msra.mxu0 %v10814_v11  ;;  %6329 = vmatpush1.bf16.msra.mxu1 %v10817_v36  ;;  %v16389_v36 = vld [vmem:[#allocation23_spill] sm:$0xff] }
 0x998   : > { %6287 = vmatprep.subr.bf16.mxu0 %v10822_v15  ;;  %6330 = vmatprep.subr.bf16.mxu1 %v10825_v32 }
 0x99b   : > { %6288 = vmatpush1.bf16.msra.mxu0 %v10820_v2  ;;  %6331 = vmatpush1.bf16.msra.mxu1 %v10823_v1  ;;  %v16391_v2 = vld [vmem:[#allocation27_spill] sm:$0xff] }
 0x99c   : > { %6289 = vmatprep.subr.bf16.mxu0 %v10828_v6  ;;  %6332 = vmatprep.subr.bf16.mxu1 %v10831_v48  ;;  %v16392_v6 = vld [vmem:[#allocation18_spill] sm:$0xff] }
 0x99f   : > { %6290 = vmatpush1.bf16.msra.mxu0 %v10826_v63  ;;  %6333 = vmatpush1.bf16.msra.mxu1 %v10829_v53  ;;  %v16393_v63 = vld [vmem:[#allocation46_spill] sm:$0xff] }
 0x9a0   : > { %6291 = vmatprep.subr.bf16.mxu0 %v10834_v51  ;;  %6334 = vmatprep.subr.bf16.mxu1 %v10837_v38  ;;  %v16394_v38 = vld [vmem:[#allocation48_spill] sm:$0xff] }
 0x9a3   : > { %6292 = vmatpush1.bf16.msra.mxu0 %v10832_v8  ;;  %6335 = vmatpush1.bf16.msra.mxu1 %v10835_v3 }
 0x9a4   : > { %9677 = vmatprep.subr.msk.bf16.mxu0 %vm3213_vm3, %v10838_v57  ;;  %9679 = vmatprep.subr.msk.bf16.mxu1 %vm3213_vm3, %v10840_v5  ;;  %v16395_v57 = vld [vmem:[#allocation53_spill] sm:$0xff] }
 0x9a7   : > { %6294 = vmatpush1.bf16.msra.mxu0 %v6163_v18  ;;  %6337 = vmatpush1.bf16.msra.mxu1 %v6169_v50  ;;  %v16398_v18 = vld [vmem:[#allocation69_spill] sm:$0xff] }
 0x9a8   : > { %9847 = vmatprep.subr.bf16.mxu0 %v10844_v26 }
 0x9aa   : > { %6296 = vmatmul.mubr.bf16.vlgmr.msra.gmra.mrb[16].mxu0 %v12902_v14  ;;  %6339 = vmatmul.mubr.bf16.vlgmr.msra.gmra.mrb[28].mxu1 %v12902_v14 }
 0x9ab   : > { %9848 = vmatpush3.bf16.msra.mxu0 %v10845_v23  ;;  %9681 = vmatprep.mubr.msk.bf16.mxu0 %vm3618_vm9, %v12904_v54  ;;  %v10851_v54 = vld [vmem:[%s15879_s12 + $0xf8] ss:$36 sps:$4 sm:$0xff]  }
 0x9ac   : > { %9849 = vmatprep.subr.bf16.mxu0 %v10846_v60  ;;  %v16399_v23 = vld [vmem:[#allocation71_spill] sm:$0xff] }
 0x9af   : > { %9850 = vmatpush3.bf16.msra.mxu0 %v10847_v56 }
 0x9b0   : > { %9851 = vmatprep.subr.bf16.mxu0 %v10848_v41  ;;  %v16400_v41 = vld [vmem:[#allocation26_spill] sm:$0xff] }
 0x9b3   : > { %9852 = vmatpush3.bf16.msra.mxu0 %v10849_v43 }
 0x9b4   : > { %9853 = vmatprep.subr.bf16.mxu0 %v10850_v47 }
 0x9b7   : > { %9854 = vmatpush3.bf16.msra.mxu0 %v10851_v54 }
 0x9b8   : > { %9855 = vmatprep.subr.bf16.mxu0 %v10852_v45 }
 0x9bb   : > { %9856 = vmatpush3.bf16.msra.mxu0 %v10853_v7 }
 0x9bc   : > { %9857 = vmatprep.subr.bf16.mxu0 %v10854_v28 }
 0x9bf   : > { %9858 = vmatpush3.bf16.msra.mxu0 %v10855_v17  ;;  %v16402_v17 = vld [vmem:[#allocation60_spill] sm:$0xff] }
 0x9c0   : > { %9859 = vmatprep.subr.bf16.mxu0 %v10856_v0 }
 0x9c3   : > { %9860 = vmatpush3.bf16.msra.mxu0 %v10857_v61 }
 0x9c4   : > { %10275 = vmatprep.subr.msk.bf16.mxu0 %vm3213_vm3, %v10858_v49  ;;  %vm6959_vm3 = vcmask 785408  }
 0x9c7   : > { %9862 = vmatpush3.bf16.msra.mxu0 %v10859_v19 }
 0x9ca   : > { %6382 = vmatmul.mubr.bf16.vlgmr.msra.gmra.mrb[20].mxu0 %v12902_v14 }
 0xa3d   : > { %v13160_v22 = vpop.f32.mrb[12].mxu0  ;;  %v13162_v12 = vpop.f32.mrb[24].mxu1 }
 0xa3e   : > { %16376 = vst [vmem:[#allocation49_spill] sm:$0xff] %v13162_v12  ;;  %v13164_v24 = vpop.f32.mrb[13].mxu0  ;;  %v13166_v39 = vpop.f32.mrb[25].mxu1  ;;  %v6438_v42 = vmul.f32 %v16379_v4, %v13162_v12  ;;  %v6436_v46 = vmul.f32 %v16379_v4, %v13160_v22  ;;  %v6668_v37 = vmul.f32 %v16384_v59, %v13162_v12  ;;  %v6551_v9 = vmul.f32 %v16385_v62, %v13160_v22 }
 0xa3f   : > { %16377 = vst [vmem:[#allocation30_spill] sm:$0xff] %v13164_v24  ;;  %16378 = vst [vmem:[#allocation29_spill] sm:$0xff] %v13166_v39  ;;  %v13172_v30 = vpop.f32.mrb[14].mxu0  ;;  %v13174_v35 = vpop.f32.mrb[26].mxu1  ;;  %v6897_v40 = vmul.f32 %v16388_v29, %v13162_v12  ;;  %v6553_v11 = vmul.f32 %v16385_v62, %v13162_v12  ;;  %v7127_v15 = vmul.f32 %v16389_v36, %v13162_v12 }
 0xa40   : > { %16380 = vst [vmem:[#allocation51_spill] sm:$0xff] %v13174_v35  ;;  %6472 = vrot.lane.b32.xlu0 %v6438_v42, %s16381_s29  ;;  %v13177_v14 = vpop.f32.mrb[27].mxu1  ;;  %6468 = vrot.lane.b32.xlu1 %v6436_v46, %s16381_s29  ;;  %v13180_v20 = vpop.f32.mrb[15].mxu0  ;;  %v6666_v32 = vmul.f32 %v16384_v59, %v13160_v22  ;;  %v7357_v1 = vmul.f32 %v16391_v2, %v13162_v12 }
 0xa41   : > { %16382 = vst [vmem:[#allocation32_spill] sm:$0xff] %v13177_v14  ;;  %16383 = vst [vmem:[#allocation31_spill] sm:$0xff] %v13180_v20  ;;  %v6781_v48 = vmul.f32 %v16392_v6, %v13160_v22  ;;  %v7587_v53 = vmul.f32 %v16393_v63, %v13162_v12  ;;  %v6783_v51 = vmul.f32 %v16392_v6, %v13162_v12 }
 0xa42   : > { %v7817_v8 = vmul.f32 %v16394_v38, %v13162_v12  ;;  %v6895_v3 = vmul.f32 %v16388_v29, %v13160_v22  ;;  %v8047_v5 = vmul.f32 %v16395_v57, %v13162_v12  ;;  %v7010_v52 = vmul.f32 %v16396_v10, %v13160_v22 }
 0xa43   : > { %v8276_v50 = vmul.f32 %v16398_v18, %v13162_v12  ;;  %v7012_v26 = vmul.f32 %v16396_v10, %v13162_v12  ;;  %v8506_v60 = vmul.f32 %v16399_v23, %v13162_v12  ;;  %v7125_v56 = vmul.f32 %v16389_v36, %v13160_v22 }
 0xa44   : > { %6702 = vrot.lane.b32.xlu0 %v6668_v37, %s16386_s27  ;;  %6583 = vrot.lane.b32.xlu1 %v6551_v9, %s16387_s14  ;;  %v7240_v43 = vmul.f32 %v16400_v41, %v13160_v22  ;;  %v6552_v47 = vmul.f32 %v16385_v62, %v13164_v24  ;;  %v7242_v54 = vmul.f32 %v16400_v41, %v13162_v12 }
 0xa45   : > { %v6554_v45 = vmul.f32 %v16385_v62, %v13166_v39  ;;  %v7355_v7 = vmul.f32 %v16391_v2, %v13160_v22  ;;  %v6782_v28 = vmul.f32 %v16392_v6, %v13164_v24  ;;  %v7470_v0 = vmul.f32 %v16402_v17, %v13160_v22 }
 0xa46   : > { %v6784_v61 = vmul.f32 %v16392_v6, %v13166_v39  ;;  %v7472_v49 = vmul.f32 %v16402_v17, %v13162_v12  ;;  %v7011_v19 = vmul.f32 %v16396_v10, %v13164_v24  ;;  %v7585_v42 = vmul.f32 %v16393_v63, %v13160_v22 }
 0xa47   : > { %v7013_v46 = vmul.f32 %v16396_v10, %v13166_v39 }
 0xa48   : > { %6931 = vrot.lane.b32.xlu0 %v6897_v40, %s10936_s16  ;;  %6587 = vrot.lane.b32.xlu1 %v6553_v11, %s16387_s14 }
 0xa4c   : > { %7161 = vrot.lane.b32.xlu0 %v7127_v15, %s16390_s22  ;;  %6698 = vrot.lane.b32.xlu1 %v6666_v32, %s16386_s27  ;;  %v16407_v15 = vld [vmem:[#allocation62_spill] sm:$0xff] }
 0xa4d   : > { %v7700_v32 = vmul.f32 %v16407_v15, %v13160_v22 }
 0xa50   : > { %7391 = vrot.lane.b32.xlu0 %v7357_v1, %s10886_s23  ;;  %6813 = vrot.lane.b32.xlu1 %v6781_v48, %s16296_s26  ;;  %v7241_v1 = vmul.f32 %v16400_v41, %v13164_v24 }
 0xa54   : > { %7621 = vrot.lane.b32.xlu0 %v7587_v53, %s10937_s24  ;;  %6817 = vrot.lane.b32.xlu1 %v6783_v51, %s16296_s26 }
 0xa58   : > { %7851 = vrot.lane.b32.xlu0 %v7817_v8, %s10938_s17  ;;  %6927 = vrot.lane.b32.xlu1 %v6895_v3, %s10936_s16  ;;  %v7702_v3 = vmul.f32 %v16407_v15, %v13162_v12 }
 0xa5c   : > { %8081 = vrot.lane.b32.xlu0 %v8047_v5, %s10939_s18  ;;  %7042 = vrot.lane.b32.xlu1 %v7010_v52, %s16397_s25  ;;  %v7243_v5 = vmul.f32 %v16400_v41, %v13166_v39  ;;  %v7815_v52 = vmul.f32 %v16394_v38, %v13160_v22 }
 0xa60   : > { %8310 = vrot.lane.b32.xlu0 %v8276_v50, %s10940_s28  ;;  %7046 = vrot.lane.b32.xlu1 %v7012_v26, %s16397_s25  ;;  %v7471_v50 = vmul.f32 %v16402_v17, %v13164_v24  ;;  %v16412_v26 = vld [vmem:[#allocation64_spill] sm:$0xff] }
 0xa64   : > { %8540 = vrot.lane.b32.xlu0 %v8506_v60, %s10941_s30  ;;  %7157 = vrot.lane.b32.xlu1 %v7125_v56, %s16390_s22  ;;  %v7930_v60 = vmul.f32 %v16412_v26, %v13160_v22  ;;  %v7473_v56 = vmul.f32 %v16402_v17, %v13166_v39 }
 0xa68   : > { %7272 = vrot.lane.b32.xlu1 %v7240_v43, %s16401_s0  ;;  %6585 = vrot.lane.b32.xlu0 %v6552_v47, %s16387_s14  ;;  %v7932_v43 = vmul.f32 %v16412_v26, %v13162_v12  ;;  %v7701_v47 = vmul.f32 %v16407_v15, %v13164_v24 }
 0xa6c   : > { %7276 = vrot.lane.b32.xlu1 %v7242_v54, %s16401_s0  ;;  %6589 = vrot.lane.b32.xlu0 %v6554_v45, %s16387_s14  ;;  %v8045_v54 = vmul.f32 %v16395_v57, %v13160_v22  ;;  %v7703_v45 = vmul.f32 %v16407_v15, %v13166_v39 }
 0xa70   : > { %7387 = vrot.lane.b32.xlu1 %v7355_v7, %s10886_s23  ;;  %6815 = vrot.lane.b32.xlu0 %v6782_v28, %s16296_s26  ;;  %v8159_v7 = vmul.f32 %v12443_v25, %v13160_v22  ;;  %v7931_v28 = vmul.f32 %v16412_v26, %v13164_v24 }
 0xa74   : > { %7502 = vrot.lane.b32.xlu1 %v7470_v0, %s10942_s20  ;;  %6819 = vrot.lane.b32.xlu0 %v6784_v61, %s16296_s26  ;;  %v8161_v0 = vmul.f32 %v12443_v25, %v13162_v12  ;;  %v7933_v61 = vmul.f32 %v16412_v26, %v13166_v39 }
 0xa78   : > { %7506 = vrot.lane.b32.xlu1 %v7472_v49, %s10942_s20  ;;  %7044 = vrot.lane.b32.xlu0 %v7011_v19, %s16397_s25 }
 0xa7c   : > { %7617 = vrot.lane.b32.xlu1 %v7585_v42, %s10937_s24  ;;  %7048 = vrot.lane.b32.xlu0 %v7013_v46, %s16397_s25  ;;  %v8274_v42 = vmul.f32 %v16398_v18, %v13160_v22  ;;  %v8160_v46 = vmul.f32 %v12443_v25, %v13164_v24 }
 0xa7d   : > { %v13272_v37 = vpop.f32.mrb[28].mxu1  ;;  %v13274_v9 = vpop.f32.mrb[16].mxu0 }
 0xa7e   : > { %16403 = vst [vmem:[#allocation52_spill] sm:$0xff] %v13272_v37  ;;  %16404 = vst [vmem:[#allocation34_spill] sm:$0xff] %v13274_v9  ;;  %v13276_v40 = vpop.f32.mrb[17].mxu0  ;;  %v13278_v11 = vpop.f32.mrb[29].mxu1 }
 0xa7f   : > { %16405 = vst [vmem:[#allocation33_spill] sm:$0xff] %v13276_v40  ;;  %16406 = vst [vmem:[#allocation54_spill] sm:$0xff] %v13278_v11  ;;  %v13284_v48 = vpop.f32.mrb[18].mxu0  ;;  %v13286_v53 = vpop.f32.mrb[30].mxu1 }
 0xa80   : > { %16408 = vst [vmem:[#allocation36_spill] sm:$0xff] %v13284_v48  ;;  %16409 = vst [vmem:[#allocation35_spill] sm:$0xff] %v13286_v53  ;;  %v13288_v51 = vpop.f32.mrb[19].mxu0  ;;  %v13290_v8 = vpop.f32.mrb[31].mxu1  ;;  %7732 = vrot.lane.b32.xlu1 %v7700_v32, %s10943_s13  ;;  %7274 = vrot.lane.b32.xlu0 %v7241_v1, %s16401_s0 }
 0xa81   : > { %16410 = vst [vmem:[#allocation55_spill] sm:$0xff] %v13288_v51  ;;  %16411 = vst [vmem:[#allocation38_spill] sm:$0xff] %v13290_v8 }
 0xa84   : > { %7736 = vrot.lane.b32.xlu1 %v7702_v3, %s10943_s13  ;;  %7278 = vrot.lane.b32.xlu0 %v7243_v5, %s16401_s0 }
 0xa88   : > { %7847 = vrot.lane.b32.xlu1 %v7815_v52, %s10938_s17  ;;  %7504 = vrot.lane.b32.xlu0 %v7471_v50, %s10942_s20  ;;  %v8389_v52 = vmul.f32 %v12469_v16, %v13160_v22  ;;  %v8162_v50 = vmul.f32 %v12443_v25, %v13166_v39 }
 0xa8c   : > { %7962 = vrot.lane.b32.xlu1 %v7930_v60, %s10944_s21  ;;  %7508 = vrot.lane.b32.xlu0 %v7473_v56, %s10942_s20  ;;  %v8391_v60 = vmul.f32 %v12469_v16, %v13162_v12  ;;  %v8390_v56 = vmul.f32 %v12469_v16, %v13164_v24 }
 0xa90   : > { %7966 = vrot.lane.b32.xlu1 %v7932_v43, %s10944_s21  ;;  %7734 = vrot.lane.b32.xlu0 %v7701_v47, %s10943_s13  ;;  %v8504_v43 = vmul.f32 %v16399_v23, %v13160_v22  ;;  %v8392_v47 = vmul.f32 %v12469_v16, %v13166_v39 }
 0xa94   : > { %8077 = vrot.lane.b32.xlu1 %v8045_v54, %s10939_s18  ;;  %7738 = vrot.lane.b32.xlu0 %v7703_v45, %s10943_s13  ;;  %v8656_v54 = vmul.f32 %v12421_v33, %v13162_v12  ;;  %v8657_v45 = vmul.f32 %v12421_v33, %v13166_v39 }
 0xa98   : > { %8191 = vrot.lane.b32.xlu1 %v8159_v7, %s10945_s19  ;;  %7964 = vrot.lane.b32.xlu0 %v7931_v28, %s10944_s21 }
 0xa9c   : > { %8195 = vrot.lane.b32.xlu1 %v8161_v0, %s10945_s19  ;;  %7968 = vrot.lane.b32.xlu0 %v7933_v61, %s10944_s21  ;;  %v16415_v0 = vld [vmem:[#allocation74_spill] sm:$0xff] }
 0xa9d   : > { %v9863_v49 = vpop.f32.mrb[20].mxu0  ;;  %v8770_v61 = vmul.f32 %v16415_v0, %v13162_v12 }
 0xa9e   : > { %v9864_v19 = vpop.f32.mrb[21].mxu0 }
 0xa9f   : > { %v13340_v32 = vadd.f32 %v9864_v19, %v9863_v49  ;;  %v9866_v1 = vpop.f32.mrb[22].mxu0  ;;  %v8769_v49 = vmul.f32 %v16415_v0, %v13164_v24 }
 0xaa0   : > { %v9867_v3 = vpop.f32.mrb[23].mxu0  ;;  %8306 = vrot.lane.b32.xlu1 %v8274_v42, %s10940_s28  ;;  %8193 = vrot.lane.b32.xlu0 %v8160_v46, %s10945_s19  ;;  %v8884_v46 = vmul.f32 %v12525_v34, %v13162_v12 }
 0xaa1   : > { %16413 = vst [vmem:[#allocation37_spill] sm:$0xff] %v13340_v32  ;;  %v13344_v5 = vadd.f32 %v9867_v3, %v9866_v1  ;;  %v8771_v1 = vmul.f32 %v16415_v0, %v13166_v39 }
 0xaa3   : > { %16414 = vst [vmem:[#allocation56_spill] sm:$0xff] %v13344_v5 }
 0xaa4   : > { %8421 = vrot.lane.b32.xlu1 %v8389_v52, %s10946_s3  ;;  %8197 = vrot.lane.b32.xlu0 %v8162_v50, %s10945_s19  ;;  %v8998_v50 = vmul.f32 %v12431_v44, %v13162_v12 }
 0xaa8   : > { %8425 = vrot.lane.b32.xlu1 %v8391_v60, %s10946_s3  ;;  %8423 = vrot.lane.b32.xlu0 %v8390_v56, %s10946_s3  ;;  %v8883_v60 = vmul.f32 %v12525_v34, %v13164_v24 }
 0xaac   : > { %8536 = vrot.lane.b32.xlu1 %v8504_v43, %s10941_s30  ;;  %8427 = vrot.lane.b32.xlu0 %v8392_v47, %s10946_s3  ;;  %v8885_v47 = vmul.f32 %v12525_v34, %v13166_v39 }
 0xab0   : > { %8689 = vrot.lane.b32.xlu1 %v8656_v54, %s16381_s29  ;;  %8691 = vrot.lane.b32.xlu0 %v8657_v45, %s16381_s29  ;;  %v6437_v54 = vmul.f32 %v16379_v4, %v13164_v24 }
 0xab2   : > { %v13370_v7 = vpop.permute.xlu0 %6472  ;;  %v13372_v28 = vpop.permute.xlu1 %6468 }
 0xab4   : > { %8803 = vrot.lane.b32.xlu1 %v8770_v61, %s16387_s14  ;;  %8801 = vrot.lane.b32.xlu0 %v8769_v49, %s16387_s14  ;;  %v8997_v49 = vmul.f32 %v12431_v44, %v13164_v24 }
 0xab6   : > { %v13380_v19 = vpop.permute.xlu0 %6702  ;;  %v13382_v42 = vpop.permute.xlu1 %6583 }
 0xab8   : > { %8917 = vrot.lane.b32.xlu1 %v8884_v46, %s16386_s27  ;;  %8805 = vrot.lane.b32.xlu0 %v8771_v1, %s16387_s14  ;;  %v6439_v46 = vmul.f32 %v16379_v4, %v13166_v39 }
 0xaba   : > { %v13390_v3 = vpop.permute.xlu0 %6931  ;;  %v13392_v52 = vpop.permute.xlu1 %6587 }
 0xabc   : > { %9031 = vrot.lane.b32.xlu1 %v8998_v50, %s16296_s26  ;;  %8915 = vrot.lane.b32.xlu0 %v8883_v60, %s16386_s27  ;;  %v8999_v60 = vmul.f32 %v12431_v44, %v13166_v39 }
 0xabe   : > { %v13400_v56 = vpop.permute.xlu0 %7161  ;;  %v13402_v43 = vpop.permute.xlu1 %6698 }
 0xac0   : > { %8919 = vrot.lane.b32.xlu0 %v8885_v47, %s16386_s27  ;;  %6470 = vrot.lane.b32.xlu1 %v6437_v54, %s16381_s29  ;;  %v6667_v47 = vmul.f32 %v16384_v59, %v13164_v24 }
 0xac2   : > { %v13410_v45 = vpop.permute.xlu0 %7391  ;;  %v13412_v61 = vpop.permute.xlu1 %6813 }
 0xac4   : > { %9029 = vrot.lane.b32.xlu0 %v8997_v49, %s16296_s26  ;;  %6474 = vrot.lane.b32.xlu1 %v6439_v46, %s16381_s29  ;;  %v6669_v49 = vmul.f32 %v16384_v59, %v13166_v39  ;;  %v16417_v46 = vld [vmem:[#allocation12_spill] sm:$0xff] }
 0xac5   : > { %v6444_v32 = vmul.f32 %v16417_v46, %v13172_v30 }
 0xac6   : > { %v13420_v1 = vpop.permute.xlu0 %7621  ;;  %v13422_v50 = vpop.permute.xlu1 %6817 }
 0xac8   : > { %9033 = vrot.lane.b32.xlu0 %v8999_v60, %s16296_s26  ;;  %6700 = vrot.lane.b32.xlu1 %v6667_v47, %s16386_s27  ;;  %v6896_v60 = vmul.f32 %v16388_v29, %v13164_v24  ;;  %v6446_v47 = vmul.f32 %v16417_v46, %v13174_v35 }
 0xaca   : > { %v13430_v54 = vpop.permute.xlu0 %7851  ;;  %v13432_v5 = vpop.permute.xlu1 %6927 }
 0xacb   : > { %16416 = vst [vmem:[#allocation40_spill] sm:$0xff] %v13430_v54 }
 0xacc   : > { %6704 = vrot.lane.b32.xlu1 %v6669_v49, %s16386_s27  ;;  %6484 = vrot.lane.b32.xlu0 %v6444_v32, %s16381_s29  ;;  %v6898_v32 = vmul.f32 %v16388_v29, %v13166_v39  ;;  %v16420_v49 = vld [vmem:[#allocation16_spill] sm:$0xff] }
 0xacd   : > { %v6674_v44 = vmul.f32 %v16420_v49, %v13172_v30 }
 0xace   : > { %v13440_v8 = vpop.permute.xlu0 %8081  ;;  %v13442_v51 = vpop.permute.xlu1 %7042 }
 0xacf   : > { %16418 = vst [vmem:[#allocation39_spill] sm:$0xff] %v13440_v8 }
 0xad0   : > { %6929 = vrot.lane.b32.xlu1 %v6896_v60, %s10936_s16  ;;  %6488 = vrot.lane.b32.xlu0 %v6446_v47, %s16381_s29  ;;  %v7126_v60 = vmul.f32 %v16389_v36, %v13164_v24  ;;  %v6676_v47 = vmul.f32 %v16420_v49, %v13174_v35 }
 0xad2   : > { %v13450_v53 = vpop.permute.xlu0 %8310  ;;  %v13452_v48 = vpop.permute.xlu1 %7046 }
 0xad3   : > { %16419 = vst [vmem:[#allocation65_spill] sm:$0xff] %v13450_v53 }
 0xad4   : > { %6933 = vrot.lane.b32.xlu1 %v6898_v32, %s10936_s16  ;;  %6714 = vrot.lane.b32.xlu0 %v6674_v44, %s16386_s27  ;;  %v7128_v44 = vmul.f32 %v16389_v36, %v13166_v39  ;;  %v16422_v32 = vld [vmem:[#allocation20_spill] sm:$0xff] }
 0xad5   : > { %v6903_v26 = vmul.f32 %v16422_v32, %v13172_v30 }
 0xad6   : > { %v13460_v34 = vpop.permute.xlu0 %8540  ;;  %v13462_v0 = vpop.permute.xlu1 %7157 }
 0xad7   : > { %16421 = vst [vmem:[#allocation57_spill] sm:$0xff] %v13460_v34 }
 0xad8   : > { %7159 = vrot.lane.b32.xlu1 %v7126_v60, %s16390_s22  ;;  %6718 = vrot.lane.b32.xlu0 %v6676_v47, %s16386_s27  ;;  %v7356_v60 = vmul.f32 %v16391_v2, %v13164_v24  ;;  %v6905_v47 = vmul.f32 %v16422_v32, %v13174_v35 }
 0xada   : > { %v13470_v16 = vpop.permute.xlu1 %7272  ;;  %v13472_v25 = vpop.permute.xlu0 %6585 }
 0xadc   : > { %7163 = vrot.lane.b32.xlu1 %v7128_v44, %s16390_s22  ;;  %6943 = vrot.lane.b32.xlu0 %v6903_v26, %s10936_s16  ;;  %v7358_v26 = vmul.f32 %v16391_v2, %v13166_v39  ;;  %v16424_v44 = vld [vmem:[#allocation24_spill] sm:$0xff] }
 0xadd   : > { %v7133_v10 = vmul.f32 %v16424_v44, %v13172_v30 }
 0xade   : > { %v13480_v15 = vpop.permute.xlu1 %7276  ;;  %v13482_v17 = vpop.permute.xlu0 %6589 }
 0xadf   : > { %16423 = vst [vmem:[#allocation41_spill] sm:$0xff] %v13482_v17 }
 0xae0   : > { %7389 = vrot.lane.b32.xlu1 %v7356_v60, %s10886_s23  ;;  %6947 = vrot.lane.b32.xlu0 %v6905_v47, %s10936_s16  ;;  %v7586_v60 = vmul.f32 %v16393_v63, %v13164_v24  ;;  %v7135_v47 = vmul.f32 %v16424_v44, %v13174_v35 }
 0xae2   : > { %v13490_v55 = vpop.permute.xlu1 %7387  ;;  %v13492_v41 = vpop.permute.xlu0 %6815 }
 0xae4   : > { %7393 = vrot.lane.b32.xlu1 %v7358_v26, %s10886_s23  ;;  %7173 = vrot.lane.b32.xlu0 %v7133_v10, %s16390_s22  ;;  %v7588_v10 = vmul.f32 %v16393_v63, %v13166_v39  ;;  %v16426_v26 = vld [vmem:[#allocation28_spill] sm:$0xff] }
 0xae5   : > { %v7363_v2 = vmul.f32 %v16426_v26, %v13172_v30 }
 0xae6   : > { %v13500_v6 = vpop.permute.xlu1 %7502  ;;  %v13502_v11 = vpop.permute.xlu0 %6819 }
 0xae7   : > { %16425 = vst [vmem:[#allocation42_spill] sm:$0xff] %v13502_v11 }
 0xae8   : > { %7619 = vrot.lane.b32.xlu1 %v7586_v60, %s10937_s24  ;;  %7177 = vrot.lane.b32.xlu0 %v7135_v47, %s16390_s22  ;;  %v7816_v60 = vmul.f32 %v16394_v38, %v13164_v24  ;;  %v7365_v47 = vmul.f32 %v16426_v26, %v13174_v35 }
 0xaea   : > { %v13510_v40 = vpop.permute.xlu1 %7506  ;;  %v13512_v62 = vpop.permute.xlu0 %7044 }
 0xaec   : > { %7623 = vrot.lane.b32.xlu1 %v7588_v10, %s10937_s24  ;;  %7403 = vrot.lane.b32.xlu0 %v7363_v2, %s10886_s23  ;;  %v7818_v2 = vmul.f32 %v16394_v38, %v13166_v39  ;;  %v16428_v10 = vld [vmem:[#allocation61_spill] sm:$0xff] }
 0xaed   : > { %v7593_v34 = vmul.f32 %v16428_v10, %v13172_v30 }
 0xaee   : > { %v13520_v36 = vpop.permute.xlu1 %7617  ;;  %v13522_v29 = vpop.permute.xlu0 %7048 }
 0xaef   : > { %16427 = vst [vmem:[#allocation66_spill] sm:$0xff] %v13522_v29 }
 0xaf0   : > { %7849 = vrot.lane.b32.xlu1 %v7816_v60, %s10938_s17  ;;  %7407 = vrot.lane.b32.xlu0 %v7365_v47, %s10886_s23  ;;  %v8046_v60 = vmul.f32 %v16395_v57, %v13164_v24  ;;  %v7595_v47 = vmul.f32 %v16428_v10, %v13174_v35 }
 0xaf2   : > { %v13530_v63 = vpop.permute.xlu1 %7732  ;;  %v13532_v59 = vpop.permute.xlu0 %7274 }
 0xaf4   : > { %7853 = vrot.lane.b32.xlu1 %v7818_v2, %s10938_s17  ;;  %7633 = vrot.lane.b32.xlu0 %v7593_v34, %s10937_s24  ;;  %v8048_v34 = vmul.f32 %v16395_v57, %v13166_v39  ;;  %v16431_v2 = vld [vmem:[#allocation63_spill] sm:$0xff] }
 0xaf5   : > { %v7823_v4 = vmul.f32 %v16431_v2, %v13172_v30 }
 0xaf6   : > { %v13540_v27 = vpop.permute.xlu1 %7736  ;;  %v13542_v26 = vpop.permute.xlu0 %7278 }
 0xaf7   : > { %16429 = vst [vmem:[#allocation58_spill] sm:$0xff] %v13542_v26 }
 0xaf8   : > { %8079 = vrot.lane.b32.xlu1 %v8046_v60, %s10939_s18  ;;  %7637 = vrot.lane.b32.xlu0 %v7595_v47, %s10937_s24  ;;  %v8275_v60 = vmul.f32 %v16398_v18, %v13164_v24  ;;  %v7825_v47 = vmul.f32 %v16431_v2, %v13174_v35 }
 0xafa   : > { %v13550_v38 = vpop.permute.xlu1 %7847  ;;  %v13552_v37 = vpop.permute.xlu0 %7504 }
 0xafb   : > { %16430 = vst [vmem:[#allocation43_spill] sm:$0xff] %v13550_v38 }
 0xafc   : > { %8083 = vrot.lane.b32.xlu1 %v8048_v34, %s10939_s18  ;;  %7863 = vrot.lane.b32.xlu0 %v7823_v4, %s10938_s17  ;;  %v8277_v4 = vmul.f32 %v16398_v18, %v13166_v39  ;;  %v16435_v34 = vld [vmem:[#allocation77_spill] sm:$0xff] }
 0xafd   : > { %v8053_v53 = vmul.f32 %v16435_v34, %v13172_v30 }
 0xafe   : > { %v13560_v9 = vpop.permute.xlu1 %7962  ;;  %v13562_v10 = vpop.permute.xlu0 %7508 }
 0xaff   : > { %16432 = vst [vmem:[#allocation44_spill] sm:$0xff] %v13560_v9  ;;  %16433 = vst [vmem:[#allocation67_spill] sm:$0xff] %v13562_v10 }
 0xb00   : > { %8308 = vrot.lane.b32.xlu1 %v8275_v60, %s10940_s28  ;;  %7867 = vrot.lane.b32.xlu0 %v7825_v47, %s10938_s17  ;;  %v8505_v60 = vmul.f32 %v16399_v23, %v13164_v24  ;;  %v8055_v47 = vmul.f32 %v16435_v34, %v13174_v35 }
 0xb02   : > { %v13570_v57 = vpop.permute.xlu1 %7966  ;;  %v13572_v44 = vpop.permute.xlu0 %7734 }
 0xb03   : > { %16434 = vst [vmem:[#allocation59_spill] sm:$0xff] %v13570_v57 }
 0xb04   : > { %8312 = vrot.lane.b32.xlu1 %v8277_v4, %s10940_s28  ;;  %8093 = vrot.lane.b32.xlu0 %v8053_v53, %s10939_s18  ;;  %v8507_v53 = vmul.f32 %v16399_v23, %v13166_v39  ;;  %v8282_v4 = vmul.f32 %v12456_v13, %v13172_v30 }
 0xb06   : > { %v13580_v32 = vpop.permute.xlu1 %8077  ;;  %v13582_v2 = vpop.permute.xlu0 %7738 }
 0xb07   : > { %16436 = vst [vmem:[#allocation9_spill] sm:$0xff] %v13580_v32  ;;  %16437 = vst [vmem:[#allocation88_spill] sm:$0xff] %v13582_v2  ;;  %v16474_v2 = vld [vmem:[#allocation10_spill] sm:$0xff] }
 0xb08   : > { %8538 = vrot.lane.b32.xlu1 %v8505_v60, %s10941_s30  ;;  %8097 = vrot.lane.b32.xlu0 %v8055_v47, %s10939_s18  ;;  %v8655_v60 = vmul.f32 %v12421_v33, %v13164_v24  ;;  %v8284_v47 = vmul.f32 %v12456_v13, %v13174_v35 }
 0xb0a   : > { %v13590_v18 = vpop.permute.xlu1 %8191  ;;  %v13592_v8 = vpop.permute.xlu0 %7964 }
 0xb0b   : > { %16438 = vst [vmem:[#allocation89_spill] sm:$0xff] %v13590_v18  ;;  %16439 = vst [vmem:[#allocation90_spill] sm:$0xff] %v13592_v8 }
 0xb0c   : > { %8542 = vrot.lane.b32.xlu1 %v8507_v53, %s10941_s30  ;;  %8322 = vrot.lane.b32.xlu0 %v8282_v4, %s10940_s28  ;;  %v16444_v53 = vld [vmem:[#allocation13_spill] sm:$0xff] }
 0xb0d   : > { %v6559_v4 = vmul.f32 %v16444_v53, %v13172_v30 }
 0xb0e   : > { %v13600_v32 = vpop.permute.xlu1 %8195  ;;  %v13602_v34 = vpop.permute.xlu0 %7968 }
 0xb0f   : > { %16440 = vst [vmem:[#allocation91_spill] sm:$0xff] %v13600_v32  ;;  %16441 = vst [vmem:[#allocation92_spill] sm:$0xff] %v13602_v34  ;;  %v8512_v32 = vmul.f32 %v12482_v21, %v13172_v30 }
 0xb10   : > { %8687 = vrot.lane.b32.xlu1 %v8655_v60, %s16381_s29  ;;  %8326 = vrot.lane.b32.xlu0 %v8284_v47, %s10940_s28  ;;  %v6561_v60 = vmul.f32 %v16444_v53, %v13174_v35  ;;  %v8514_v47 = vmul.f32 %v12482_v21, %v13174_v35 }
 0xb12   : > { %v13610_v23 = vpop.permute.xlu1 %8306  ;;  %v13612_v39 = vpop.permute.xlu0 %8193 }
 0xb13   : > { %16442 = vst [vmem:[#allocation93_spill] sm:$0xff] %v13610_v23  ;;  %16443 = vst [vmem:[#allocation94_spill] sm:$0xff] %v13612_v39 }
 0xb14   : > { %6599 = vrot.lane.b32.xlu1 %v6559_v4, %s16387_s14  ;;  %8552 = vrot.lane.b32.xlu0 %v8512_v32, %s10941_s30  ;;  %v16449_v32 = vld [vmem:[#allocation17_spill] sm:$0xff] }
 0xb15   : > { %v6789_v4 = vmul.f32 %v16449_v32, %v13172_v30 }
 0xb16   : > { %v13620_v33 = vpop.permute.xlu1 %8421  ;;  %v13622_v13 = vpop.permute.xlu0 %8197 }
 0xb17   : > { %16445 = vst [vmem:[#allocation95_spill] sm:$0xff] %v13620_v33  ;;  %16446 = vst [vmem:[#allocation96_spill] sm:$0xff] %v13622_v13  ;;  %v16450_v33 = vld [vmem:[#allocation75_spill] sm:$0xff] }
 0xb18   : > { %6603 = vrot.lane.b32.xlu1 %v6561_v60, %s16387_s14  ;;  %8556 = vrot.lane.b32.xlu0 %v8514_v47, %s10941_s30  ;;  %v8778_v13 = vmul.f32 %v16450_v33, %v13174_v35  ;;  %v6791_v60 = vmul.f32 %v16449_v32, %v13174_v35  ;;  %v16453_v47 = vld [vmem:[#allocation76_spill] sm:$0xff] }
 0xb1a   : > { %v13630_v23 = vpop.permute.xlu1 %8425  ;;  %v13632_v18 = vpop.permute.xlu0 %8423 }
 0xb1b   : > { %16447 = vst [vmem:[#allocation97_spill] sm:$0xff] %v13630_v23  ;;  %16448 = vst [vmem:[#allocation98_spill] sm:$0xff] %v13632_v18  ;;  %v8892_v23 = vmul.f32 %v16453_v47, %v13174_v35 }
 0xb1c   : > { %6829 = vrot.lane.b32.xlu1 %v6789_v4, %s16296_s26  ;;  %8819 = vrot.lane.b32.xlu0 %v8778_v13, %s16387_s14  ;;  %v16456_v13 = vld [vmem:[#allocation21_spill] sm:$0xff] }
 0xb1d   : > { %v7018_v4 = vmul.f32 %v16456_v13, %v13172_v30 }
 0xb1e   : > { %v13640_v39 = vpop.permute.xlu1 %8536  ;;  %v13642_v21 = vpop.permute.xlu0 %8427 }
 0xb1f   : > { %16451 = vst [vmem:[#allocation99_spill] sm:$0xff] %v13640_v39  ;;  %16452 = vst [vmem:[#allocation100_spill] sm:$0xff] %v13642_v21  ;;  %v9006_v21 = vmul.f32 %v12538_v58, %v13174_v35 }
 0xb20   : > { %6833 = vrot.lane.b32.xlu1 %v6791_v60, %s16296_s26  ;;  %8933 = vrot.lane.b32.xlu0 %v8892_v23, %s16386_s27  ;;  %v7020_v23 = vmul.f32 %v16456_v13, %v13174_v35  ;;  %v6560_v60 = vmul.f32 %v16444_v53, %v13180_v20 }
 0xb22   : > { %v13650_v18 = vpop.permute.xlu1 %8689  ;;  %v13652_v33 = vpop.permute.xlu0 %8691 }
 0xb23   : > { %16454 = vst [vmem:[#allocation101_spill] sm:$0xff] %v13650_v18  ;;  %16455 = vst [vmem:[#allocation102_spill] sm:$0xff] %v13652_v33 }
 0xb24   : > { %7058 = vrot.lane.b32.xlu1 %v7018_v4, %s16397_s25  ;;  %9047 = vrot.lane.b32.xlu0 %v9006_v21, %s16296_s26  ;;  %v16461_v21 = vld [vmem:[#allocation25_spill] sm:$0xff] }
 0xb25   : > { %v7248_v4 = vmul.f32 %v16461_v21, %v13172_v30  ;;  %v7251_v9 = vmul.f32 %v16461_v21, %v13177_v14 }
 0xb26   : > { %v13660_v39 = vpop.permute.xlu1 %8803  ;;  %v13662_v47 = vpop.permute.xlu0 %8801 }
 0xb27   : > { %16457 = vst [vmem:[#allocation103_spill] sm:$0xff] %v13660_v39  ;;  %16458 = vst [vmem:[#allocation104_spill] sm:$0xff] %v13662_v47  ;;  %v6562_v47 = vmul.f32 %v16444_v53, %v13177_v14 }
 0xb28   : > { %7062 = vrot.lane.b32.xlu1 %v7020_v23, %s16397_s25  ;;  %6601 = vrot.lane.b32.xlu0 %v6560_v60, %s16387_s14  ;;  %v7250_v23 = vmul.f32 %v16461_v21, %v13174_v35  ;;  %v6790_v60 = vmul.f32 %v16449_v32, %v13180_v20 }
 0xb2a   : > { %v13670_v33 = vpop.permute.xlu1 %8917  ;;  %v13672_v18 = vpop.permute.xlu0 %8805 }
 0xb2b   : > { %16459 = vst [vmem:[#allocation105_spill] sm:$0xff] %v13670_v33  ;;  %16460 = vst [vmem:[#allocation106_spill] sm:$0xff] %v13672_v18 }
 0xb2c   : > { %7288 = vrot.lane.b32.xlu1 %v7248_v4, %s16401_s0  ;;  %6605 = vrot.lane.b32.xlu0 %v6562_v47, %s16387_s14  ;;  %v16465_v4 = vld [vmem:[#allocation45_spill] sm:$0xff] }
 0xb2d   : > { %v7478_v47 = vmul.f32 %v16465_v4, %v13172_v30 }
 0xb2e   : > { %v13680_v39 = vpop.permute.xlu1 %9031  ;;  %v13682_v58 = vpop.permute.xlu0 %8915 }
 0xb2f   : > { %16462 = vst [vmem:[#allocation107_spill] sm:$0xff] %v13680_v39  ;;  %16463 = vst [vmem:[#allocation108_spill] sm:$0xff] %v13682_v58  ;;  %v6792_v39 = vmul.f32 %v16449_v32, %v13177_v14 }
 0xb30   : > { %7292 = vrot.lane.b32.xlu1 %v7250_v23, %s16401_s0  ;;  %6831 = vrot.lane.b32.xlu0 %v6790_v60, %s16296_s26  ;;  %v7480_v23 = vmul.f32 %v16465_v4, %v13174_v35  ;;  %v7019_v60 = vmul.f32 %v16456_v13, %v13180_v20 }
 0xb32   : > { %v13690_v33 = vpop.permute.xlu0 %8919  ;;  %v6471_v53 = vpop.permute.xlu1 %6470 }
 0xb33   : > { %16464 = vst [vmem:[#allocation109_spill] sm:$0xff] %v13690_v33  ;;  %v6502_v8 = vsel %vm3355_vm6, %v6471_v53, %v13370_v7 }
 0xb34   : > { %7518 = vrot.lane.b32.xlu1 %v7478_v47, %s10942_s20  ;;  %6835 = vrot.lane.b32.xlu0 %v6792_v39, %s16296_s26  ;;  %v16469_v47 = vld [vmem:[#allocation47_spill] sm:$0xff] }
 0xb35   : > { %v7708_v39 = vmul.f32 %v16469_v47, %v13172_v30 }
 0xb36   : > { %v13698_v58 = vpop.permute.xlu0 %9029  ;;  %v13700_v18 = vpop.permute.xlu1 %6474 }
 0xb37   : > { %16466 = vst [vmem:[#allocation110_spill] sm:$0xff] %v13698_v58  ;;  %16467 = vst [vmem:[#allocation111_spill] sm:$0xff] %v13700_v18  ;;  %v7021_v58 = vmul.f32 %v16456_v13, %v13177_v14 }
 0xb38   : > { %7522 = vrot.lane.b32.xlu1 %v7480_v23, %s10942_s20  ;;  %7060 = vrot.lane.b32.xlu0 %v7019_v60, %s16397_s25  ;;  %v7710_v23 = vmul.f32 %v16469_v47, %v13174_v35  ;;  %v7249_v60 = vmul.f32 %v16461_v21, %v13180_v20 }
 0xb3a   : > { %v13708_v33 = vpop.permute.xlu0 %9033  ;;  %v6701_v32 = vpop.permute.xlu1 %6700 }
 0xb3b   : > { %16468 = vst [vmem:[#allocation112_spill] sm:$0xff] %v13708_v33 }
 0xb3c   : > { %7748 = vrot.lane.b32.xlu1 %v7708_v39, %s10943_s13  ;;  %7064 = vrot.lane.b32.xlu0 %v7021_v58, %s16397_s25  ;;  %v16473_v39 = vld [vmem:[#allocation50_spill] sm:$0xff] }
 0xb3d   : > { %v7938_v58 = vmul.f32 %v16473_v39, %v13172_v30 }
 0xb3e   : > { %v13716_v34 = vpop.permute.xlu1 %6704  ;;  %v13718_v57 = vpop.permute.xlu0 %6484 }
 0xb3f   : > { %16470 = vst [vmem:[#allocation113_spill] sm:$0xff] %v13716_v34  ;;  %16471 = vst [vmem:[#allocation114_spill] sm:$0xff] %v13718_v57  ;;  %v6501_v57 = vsel %vm3355_vm6, %v13372_v28, %v6471_v53  ;;  %v7940_v28 = vmul.f32 %v16473_v39, %v13174_v35  ;;  %v7479_v53 = vmul.f32 %v16465_v4, %v13180_v20 }
 0xb40   : > { %7752 = vrot.lane.b32.xlu1 %v7710_v23, %s10943_s13  ;;  %7290 = vrot.lane.b32.xlu0 %v7249_v60, %s16401_s0  ;;  %v6400_v23 = vmul.f32 %v16474_v2, %v13160_v22  ;;  %v6401_v60 = vmul.f32 %v16474_v2, %v13164_v24  ;;  %v6503_v22 = vsel %vm3355_vm6, %v13370_v7, %v13700_v18 }
 0xb41   : > { %v6731_v7 = vsel %vm3546_vm8, %v13402_v43, %v6701_v32  ;;  %v7481_v24 = vmul.f32 %v16465_v4, %v13177_v14  ;;  %v6733_v43 = vsel %vm3546_vm8, %v13380_v19, %v13716_v34  ;;  %v16532_v4 = vld [vmem:[#allocation23_spill] sm:$0xff] }
 0xb42   : > { %v6930_v33 = vpop.permute.xlu1 %6929  ;;  %v13726_v13 = vpop.permute.xlu0 %6488  ;;  %v6530_v54 = vadd.f32 %v6502_v8, %v6401_v60  ;;  %v6616_v8 = vsel %vm3474_vm7, %v13382_v42, %v13472_v25  ;;  %v6732_v60 = vsel %vm3546_vm8, %v6701_v32, %v13380_v19 }
 0xb43   : > { %16472 = vst [vmem:[#allocation115_spill] sm:$0xff] %v13726_v13  ;;  %v6529_v13 = vadd.f32 %v6501_v57, %v6400_v23  ;;  %v16477_v57 = vld [vmem:[#allocation68_spill] sm:$0xff]  ;;  %v6617_v23 = vsel %vm3474_vm7, %v13472_v25, %v13392_v52  ;;  %v6618_v25 = vsel %vm3474_vm7, %v13392_v52, %v13482_v17  ;;  %v6846_v52 = vsel %vm3618_vm9, %v13492_v41, %v13422_v50 }
 0xb44   : > { %7978 = vrot.lane.b32.xlu1 %v7938_v58, %s10944_s21  ;;  %7294 = vrot.lane.b32.xlu0 %v7251_v9, %s16401_s0  ;;  %v6402_v58 = vmul.f32 %v16474_v2, %v13162_v12  ;;  %v8167_v9 = vmul.f32 %v16477_v57, %v13172_v30  ;;  %v6960_v19 = vsel %vm6959_vm3, %v13432_v5, %v6930_v33 }
 0xb45   : > { %v6644_v2 = vadd.f32 %v6616_v8, %v6529_v13 }
 0xb46   : > { %v13742_v38 = vpop.permute.xlu1 %6933  ;;  %v13744_v21 = vpop.permute.xlu0 %6714 }
 0xb47   : > { %16475 = vst [vmem:[#allocation116_spill] sm:$0xff] %v13742_v38  ;;  %16476 = vst [vmem:[#allocation117_spill] sm:$0xff] %v13744_v21  ;;  %v6759_v42 = vadd.f32 %v6731_v7, %v6644_v2  ;;  %v8169_v2 = vmul.f32 %v16477_v57, %v13174_v35  ;;  %v16479_v7 = vld [vmem:[#allocation70_spill] sm:$0xff] }
 0xb48   : > { %7982 = vrot.lane.b32.xlu1 %v7940_v28, %s10944_s21  ;;  %7520 = vrot.lane.b32.xlu0 %v7479_v53, %s10942_s20  ;;  %v6531_v28 = vadd.f32 %v6503_v22, %v6402_v58  ;;  %v6645_v53 = vadd.f32 %v6617_v23, %v6530_v54  ;;  %v7709_v22 = vmul.f32 %v16469_v47, %v13180_v20 }
 0xb49   : > { %v6961_v58 = vsel %vm6959_vm3, %v6930_v33, %v13390_v3  ;;  %v6847_v33 = vsel %vm3618_vm9, %v13422_v50, %v13502_v11  ;;  %v7076_v50 = vsel %vm7074_vm11, %v13512_v62, %v13452_v48 }
 0xb4a   : > { %v7160_v18 = vpop.permute.xlu1 %7159  ;;  %v13769_v21 = vpop.permute.xlu0 %6718  ;;  %v6760_v12 = vadd.f32 %v6732_v60, %v6645_v53  ;;  %v6646_v54 = vadd.f32 %v6618_v25, %v6531_v28  ;;  %v7711_v60 = vmul.f32 %v16469_v47, %v13177_v14  ;;  %v8399_v25 = vmul.f32 %v16479_v7, %v13174_v35 }
 0xb4c   : > { %8207 = vrot.lane.b32.xlu1 %v8167_v9, %s10945_s19  ;;  %7524 = vrot.lane.b32.xlu0 %v7481_v24, %s10942_s20  ;;  %v6845_v24 = vsel %vm3618_vm9, %v13412_v61, %v13492_v41  ;;  %v6761_v9 = vadd.f32 %v6733_v43, %v6646_v54  ;;  %v6874_v23 = vadd.f32 %v6846_v52, %v6760_v12 }
 0xb4d   : > { %v6873_v8 = vadd.f32 %v6845_v24, %v6759_v42  ;;  %v8397_v61 = vmul.f32 %v16479_v7, %v13172_v30  ;;  %v6962_v12 = vsel %vm6959_vm3, %v13390_v3, %v13742_v38  ;;  %v7075_v43 = vsel %vm7074_vm11, %v13442_v51, %v13512_v62 }
 0xb4e   : > { %v13781_v32 = vpop.permute.xlu1 %7163  ;;  %v13783_v13 = vpop.permute.xlu0 %6943  ;;  %v6989_v28 = vadd.f32 %v6961_v58, %v6874_v23  ;;  %v6875_v42 = vadd.f32 %v6847_v33, %v6761_v9  ;;  %v7190_v54 = vsel %vm7189_vm12, %v13462_v0, %v7160_v18  ;;  %v7191_v3 = vsel %vm7189_vm12, %v7160_v18, %v13400_v56 }
 0xb4f   : > { %16478 = vst [vmem:[#allocation118_spill] sm:$0xff] %v13781_v32  ;;  %v6988_v41 = vadd.f32 %v6960_v19, %v6873_v8  ;;  %v7939_v51 = vmul.f32 %v16473_v39, %v13180_v20  ;;  %v7077_v62 = vsel %vm7074_vm11, %v13452_v48, %v13522_v29  ;;  %v7192_v18 = vsel %vm7189_vm12, %v13400_v56, %v13781_v32  ;;  %v16542_v29 = vld [vmem:[#allocation48_spill] sm:$0xff] }
 0xb50   : > { %8211 = vrot.lane.b32.xlu1 %v8169_v2, %s10945_s19  ;;  %7750 = vrot.lane.b32.xlu0 %v7709_v22, %s10943_s13  ;;  %v6990_v2 = vadd.f32 %v6962_v12, %v6875_v42  ;;  %v7104_v24 = vadd.f32 %v7076_v50, %v6989_v28  ;;  %v7306_v48 = vsel %vm7304_vm13, %v13532_v59, %v13480_v15 }
 0xb51   : > { %v7103_v22 = vadd.f32 %v7075_v43, %v6988_v41  ;;  %v7305_v41 = vsel %vm7304_vm13, %v13470_v16, %v13532_v59  ;;  %v8168_v16 = vmul.f32 %v16477_v57, %v13180_v20  ;;  %v7307_v50 = vsel %vm7304_vm13, %v13480_v15, %v13542_v26 }
 0xb52   : > { %v7390_v5 = vpop.permute.xlu1 %7389  ;;  %v13805_v53 = vpop.permute.xlu0 %6947  ;;  %v7219_v9 = vadd.f32 %v7191_v3, %v7104_v24  ;;  %v7105_v0 = vadd.f32 %v7077_v62, %v6990_v2  ;;  %v8170_v2 = vmul.f32 %v16477_v57, %v13177_v14  ;;  %v7536_v15 = vsel %vm16141_vm14, %v13552_v37, %v13510_v40 }
 0xb53   : > { %v7218_v58 = vadd.f32 %v7190_v54, %v7103_v22  ;;  %v7420_v56 = vsel %vm16142_vm15, %v13490_v55, %v7390_v5  ;;  %v7421_v28 = vsel %vm16142_vm15, %v7390_v5, %v13410_v45  ;;  %v7535_v22 = vsel %vm16141_vm14, %v13500_v6, %v13552_v37 }
 0xb54   : > { %8437 = vrot.lane.b32.xlu1 %v8397_v61, %s10946_s3  ;;  %7754 = vrot.lane.b32.xlu0 %v7711_v60, %s10943_s13  ;;  %v8664_v61 = vmul.f32 %v12512_v31, %v13174_v35  ;;  %v7941_v60 = vmul.f32 %v16473_v39, %v13177_v14  ;;  %v7220_v33 = vadd.f32 %v7192_v18, %v7105_v0 }
 0xb55   : > { %v7333_v12 = vadd.f32 %v7305_v41, %v7218_v58  ;;  %v7334_v42 = vadd.f32 %v7306_v48, %v7219_v9  ;;  %v6447_v0 = vmul.f32 %v16417_v46, %v13177_v14  ;;  %v8398_v48 = vmul.f32 %v16479_v7, %v13180_v20 }
 0xb56   : > { %v13827_v52 = vpop.permute.xlu1 %7393  ;;  %v13829_v19 = vpop.permute.xlu0 %7173  ;;  %v7335_v3 = vadd.f32 %v7307_v50, %v7220_v33 }
 0xb57   : > { %16480 = vst [vmem:[#allocation119_spill] sm:$0xff] %v13827_v52  ;;  %v7448_v59 = vadd.f32 %v7420_v56, %v7333_v12  ;;  %v7449_v43 = vadd.f32 %v7421_v28, %v7334_v42  ;;  %v7422_v54 = vsel %vm16142_vm15, %v13410_v45, %v13827_v52  ;;  %v6675_v56 = vmul.f32 %v16420_v49, %v13180_v20  ;;  %v16484_v12 = vld [vmem:[#allocation40_spill] sm:$0xff]  ;;  %v16539_v52 = vld [vmem:[#allocation46_spill] sm:$0xff] }
 0xb58   : > { %8441 = vrot.lane.b32.xlu1 %v8399_v25, %s10946_s3  ;;  %7980 = vrot.lane.b32.xlu0 %v7939_v51, %s10944_s21  ;;  %v6445_v25 = vmul.f32 %v16417_v46, %v13180_v20  ;;  %v7450_v51 = vadd.f32 %v7422_v54, %v7335_v3  ;;  %v7765_v28 = vsel %vm16143_vm1, %v13530_v63, %v13572_v44  ;;  %v16557_v46 = vld [vmem:[#allocation33_spill] sm:$0xff] }
 0xb59   : > { %v7563_v58 = vadd.f32 %v7535_v22, %v7448_v59  ;;  %v7564_v9 = vadd.f32 %v7536_v15, %v7449_v43  ;;  %v8400_v63 = vmul.f32 %v16479_v7, %v13177_v14  ;;  %v6677_v3 = vmul.f32 %v16420_v49, %v13177_v14  ;;  %v16513_v7 = vld [vmem:[#allocation57_spill] sm:$0xff]  ;;  %v16552_v49 = vld [vmem:[#allocation71_spill] sm:$0xff] }
 0xb5a   : > { %v7620_v8 = vpop.permute.xlu1 %7619  ;;  %v13841_v23 = vpop.permute.xlu0 %7177 }
 0xb5b   : > { %v7650_v24 = vsel %vm16140_vm0, %v13520_v36, %v7620_v8  ;;  %v7651_v45 = vsel %vm16140_vm0, %v7620_v8, %v13420_v1  ;;  %v7537_v36 = vsel %vm16141_vm14, %v13510_v40, %v13562_v10  ;;  %v7766_v40 = vsel %vm16143_vm1, %v13572_v44, %v13540_v27 }
 0xb5c   : > { %8705 = vrot.lane.b32.xlu1 %v8664_v61, %s16381_s29  ;;  %7984 = vrot.lane.b32.xlu0 %v7941_v60, %s10944_s21  ;;  %v7678_v6 = vadd.f32 %v7650_v24, %v7563_v58  ;;  %v7679_v61 = vadd.f32 %v7651_v45, %v7564_v9  ;;  %v7565_v8 = vadd.f32 %v7537_v36, %v7450_v51  ;;  %v16486_v51 = vld [vmem:[#allocation90_spill] sm:$0xff]  ;;  %v16487_v58 = vld [vmem:[#allocation44_spill] sm:$0xff] }
 0xb5d   : > { %v8663_v45 = vmul.f32 %v12512_v31, %v13180_v20  ;;  %v7995_v9 = vsel %vm16073_vm5, %v16487_v58, %v16486_v51 }
 0xb5e   : > { %v13863_v55 = vpop.permute.xlu1 %7623  ;;  %v13865_v5 = vpop.permute.xlu0 %7403  ;;  %v7794_v59 = vadd.f32 %v7766_v40, %v7679_v61  ;;  %v16490_v61 = vld [vmem:[#allocation39_spill] sm:$0xff]  ;;  %v16492_v40 = vld [vmem:[#allocation20_spill] sm:$0xff] }
 0xb5f   : > { %16481 = vst [vmem:[#allocation120_spill] sm:$0xff] %v13863_v55  ;;  %v7652_v37 = vsel %vm16140_vm0, %v13420_v1, %v13863_v55  ;;  %v16483_v1 = vld [vmem:[#allocation43_spill] sm:$0xff] }
 0xb60   : > { %8209 = vrot.lane.b32.xlu0 %v8168_v16, %s10945_s19  ;;  %6486 = vrot.lane.b32.xlu1 %v6445_v25, %s16381_s29  ;;  %v7680_v16 = vadd.f32 %v7652_v37, %v7565_v8  ;;  %v7793_v25 = vadd.f32 %v7765_v28, %v7678_v6 }
 0xb62   : > { %v7850_v62 = vpop.permute.xlu1 %7849  ;;  %v13887_v18 = vpop.permute.xlu0 %7407 }
 0xb63   : > { %v7880_v33 = vsel %vm16071_vm4, %v16483_v1, %v7850_v62  ;;  %v7881_v42 = vsel %vm16071_vm4, %v7850_v62, %v16484_v12  ;;  %v16488_v62 = vld [vmem:[#allocation59_spill] sm:$0xff]  ;;  %v6904_v1 = vmul.f32 %v16492_v40, %v13180_v20 }
 0xb64   : > { %8213 = vrot.lane.b32.xlu0 %v8170_v2, %s10945_s19  ;;  %6490 = vrot.lane.b32.xlu1 %v6447_v0, %s16381_s29  ;;  %v7908_v43 = vadd.f32 %v7880_v33, %v7793_v25  ;;  %v7909_v50 = vadd.f32 %v7881_v42, %v7794_v59  ;;  %v16485_v2 = vld [vmem:[#allocation88_spill] sm:$0xff]  ;;  %v16489_v0 = vld [vmem:[#allocation9_spill] sm:$0xff] }
 0xb65   : > { %v7767_v22 = vsel %vm16143_vm1, %v13540_v27, %v16485_v2  ;;  %v7996_v27 = vsel %vm16073_vm5, %v16486_v51, %v16488_v62  ;;  %v16493_v42 = vld [vmem:[#allocation92_spill] sm:$0xff]  ;;  %v16497_v51 = vld [vmem:[#allocation93_spill] sm:$0xff] }
 0xb66   : > { %v13899_v60 = vpop.permute.xlu1 %7853  ;;  %v13901_v41 = vpop.permute.xlu0 %7633  ;;  %v7795_v24 = vadd.f32 %v7767_v22, %v7680_v16  ;;  %v8023_v8 = vadd.f32 %v7995_v9, %v7908_v43  ;;  %v7997_v16 = vsel %vm16073_vm5, %v16488_v62, %v16493_v42  ;;  %v16495_v22 = vld [vmem:[#allocation89_spill] sm:$0xff]  ;;  %vm8568_vm5 = vcmask 228352  }
 0xb67   : > { %16482 = vst [vmem:[#allocation121_spill] sm:$0xff] %v13899_v60  ;;  %v7882_v15 = vsel %vm16071_vm4, %v16484_v12, %v13899_v60  ;;  %vm8338_vm4 = vcmask 244736   ;;  %v16498_v9 = vld [vmem:[#allocation65_spill] sm:$0xff] }
 0xb68   : > { %8439 = vrot.lane.b32.xlu0 %v8398_v48, %s10946_s3  ;;  %6716 = vrot.lane.b32.xlu1 %v6675_v56, %s16386_s27  ;;  %v7910_v37 = vadd.f32 %v7882_v15, %v7795_v24  ;;  %v8024_v48 = vadd.f32 %v7996_v27, %v7909_v50  ;;  %v8665_v50 = vmul.f32 %v12512_v31, %v13177_v14  ;;  %v16496_v24 = vld [vmem:[#allocation91_spill] sm:$0xff] }
 0xb6a   : > { %v8080_v44 = vpop.permute.xlu1 %8079  ;;  %v13921_v54 = vpop.permute.xlu0 %7637  ;;  %v8025_v59 = vadd.f32 %v7997_v16, %v7910_v37  ;;  %v16502_v16 = vld [vmem:[#allocation34_spill] sm:$0xff] }
 0xb6b   : > { %v8109_v6 = vsel %vm16072_vm2, %v16489_v0, %v8080_v44  ;;  %v8110_v36 = vsel %vm16072_vm2, %v8080_v44, %v16490_v61  ;;  %v6906_v44 = vmul.f32 %v16492_v40, %v13177_v14  ;;  %v7819_v38 = vmul.f32 %v16542_v29, %v16502_v16 }
 0xb6c   : > { %8443 = vrot.lane.b32.xlu0 %v8400_v63, %s10946_s3  ;;  %6720 = vrot.lane.b32.xlu1 %v6677_v3, %s16386_s27  ;;  %v8137_v33 = vadd.f32 %v8109_v6, %v8023_v8  ;;  %v8138_v12 = vadd.f32 %v8110_v36, %v8024_v48  ;;  %v16494_v3 = vld [vmem:[#allocation94_spill] sm:$0xff] }
 0xb6d   : > { %v8224_v15 = vsel %vm8223_vm10, %v16495_v22, %v16494_v3 }
 0xb6e   : > { %v13945_v56 = vpop.permute.xlu1 %8083  ;;  %v13947_v28 = vpop.permute.xlu0 %7863  ;;  %v8252_v0 = vadd.f32 %v8224_v15, %v8137_v33  ;;  %v16507_v15 = vld [vmem:[#allocation97_spill] sm:$0xff] }
 0xb6f   : > { %16491 = vst [vmem:[#allocation43_spill] sm:$0xff] %v13945_v56  ;;  %v8111_v25 = vsel %vm16072_vm2, %v16490_v61, %v13945_v56  ;;  %v16499_v61 = vld [vmem:[#allocation24_spill] sm:$0xff]  ;;  %vm8453_vm2 = vcmask 236544   ;;  %v16536_v56 = vld [vmem:[#allocation27_spill] sm:$0xff] }
 0xb70   : > { %8703 = vrot.lane.b32.xlu0 %v8663_v45, %s16381_s29  ;;  %6945 = vrot.lane.b32.xlu1 %v6904_v1, %s10936_s16  ;;  %v8225_v45 = vsel %vm8223_vm10, %v16494_v3, %v16496_v24  ;;  %v8139_v27 = vadd.f32 %v8111_v25, %v8025_v59  ;;  %v7134_v36 = vmul.f32 %v16499_v61, %v13180_v20  ;;  %v16503_v3 = vld [vmem:[#allocation11_spill] sm:$0xff]  ;;  %v16504_v25 = vld [vmem:[#allocation96_spill] sm:$0xff] }
 0xb71   : > { %v8253_v6 = vadd.f32 %v8225_v45, %v8138_v12  ;;  %v8226_v33 = vsel %vm8223_vm10, %v16496_v24, %v16504_v25  ;;  %v7136_v24 = vmul.f32 %v16499_v61, %v13177_v14  ;;  %v7359_v42 = vmul.f32 %v16536_v56, %v16502_v16  ;;  %v16548_v61 = vld [vmem:[#allocation69_spill] sm:$0xff] }
 0xb72   : > { %v8309_v63 = vpop.permute.xlu1 %8308  ;;  %v13959_v43 = vpop.permute.xlu0 %7867  ;;  %v8254_v59 = vadd.f32 %v8226_v33, %v8139_v27 }
 0xb73   : > { %v8339_v58 = vsel %vm8338_vm4, %v16497_v51, %v8309_v63  ;;  %v8340_v62 = vsel %vm8338_vm4, %v8309_v63, %v16498_v9  ;;  %v6440_v63 = vmul.f32 %v16503_v3, %v16502_v16 }
 0xb74   : > { %8707 = vrot.lane.b32.xlu0 %v8665_v50, %s16381_s29  ;;  %6949 = vrot.lane.b32.xlu1 %v6906_v44, %s10936_s16  ;;  %v8367_v37 = vadd.f32 %v8339_v58, %v8252_v0  ;;  %v8368_v8 = vadd.f32 %v8340_v62, %v8253_v6  ;;  %v16505_v50 = vld [vmem:[#allocation98_spill] sm:$0xff]  ;;  %v16506_v44 = vld [vmem:[#allocation95_spill] sm:$0xff]  ;;  %v16509_v0 = vld [vmem:[#allocation52_spill] sm:$0xff] }
 0xb75   : > { %v8454_v22 = vsel %vm8453_vm2, %v16506_v44, %v16505_v50  ;;  %v8455_v45 = vsel %vm8453_vm2, %v16505_v50, %v16507_v15  ;;  %v6442_v6 = vmul.f32 %v16503_v3, %v16509_v0  ;;  %v16512_v44 = vld [vmem:[#allocation99_spill] sm:$0xff] }
 0xb76   : > { %v13979_v48 = vpop.permute.xlu1 %8312  ;;  %v13981_v1 = vpop.permute.xlu0 %8093  ;;  %v8482_v58 = vadd.f32 %v8454_v22, %v8367_v37  ;;  %v8483_v62 = vadd.f32 %v8455_v45, %v8368_v8  ;;  %v16514_v37 = vld [vmem:[#allocation30_spill] sm:$0xff]  ;;  %v16516_v22 = vld [vmem:[#allocation28_spill] sm:$0xff] }
 0xb77   : > { %16500 = vst [vmem:[#allocation40_spill] sm:$0xff] %v13979_v48  ;;  %16501 = vst [vmem:[#allocation90_spill] sm:$0xff] %v13981_v1  ;;  %v8341_v12 = vsel %vm8338_vm4, %v16498_v9, %v13979_v48  ;;  %v7364_v45 = vmul.f32 %v16516_v22, %v13180_v20 }
 0xb78   : > { %7175 = vrot.lane.b32.xlu1 %v7134_v36, %s16390_s22  ;;  %6476 = vrot.lane.b32.xlu0 %v6440_v63, %s16381_s29  ;;  %v8369_v51 = vadd.f32 %v8341_v12, %v8254_v59  ;;  %v16510_v36 = vld [vmem:[#allocation49_spill] sm:$0xff]  ;;  %v16511_v63 = vld [vmem:[#allocation83_spill] sm:$0xff]  ;;  %v16515_v12 = vld [vmem:[#allocation100_spill] sm:$0xff] }
 0xb79   : > { %v8620_v33 = vmul.f32 %v16511_v63, %v16510_v36  ;;  %v8619_v8 = vmul.f32 %v16511_v63, %v16514_v37  ;;  %v8456_v59 = vsel %vm8453_vm2, %v16507_v15, %v16515_v12 }
 0xb7a   : > { %v8539_v9 = vpop.permute.xlu1 %8538  ;;  %v14001_v27 = vpop.permute.xlu0 %8097 }
 0xb7b   : > { %16508 = vst [vmem:[#allocation44_spill] sm:$0xff] %v14001_v27  ;;  %v8569_v31 = vsel %vm8568_vm5, %v16512_v44, %v8539_v9  ;;  %v8570_v50 = vsel %vm8568_vm5, %v8539_v9, %v16513_v7  ;;  %v8484_v44 = vadd.f32 %v8456_v59, %v8369_v51 }
 0xb7c   : > { %v8597_v57 = vadd.f32 %v8569_v31, %v8482_v58  ;;  %v8598_v39 = vadd.f32 %v8570_v50, %v8483_v62  ;;  %7179 = vrot.lane.b32.xlu1 %v7136_v24, %s16390_s22  ;;  %6480 = vrot.lane.b32.xlu0 %v6442_v6, %s16381_s29  ;;  %v16520_v24 = vld [vmem:[#allocation15_spill] sm:$0xff] }
 0xb7d   : > { %v6670_v58 = vmul.f32 %v16520_v24, %v16502_v16  ;;  %v6672_v37 = vmul.f32 %v16520_v24, %v16509_v0  ;;  %v8508_v24 = vmul.f32 %v16552_v49, %v16502_v16 }
 0xb7e   : > { %v14020_v36 = vadd.f32 %v8620_v33, %v8598_v39  ;;  %v14022_v9 = vpop.permute.xlu1 %8542  ;;  %v14024_v31 = vpop.permute.xlu0 %8322  ;;  %v14028_v62 = vadd.f32 %v8619_v8, %v8597_v57  ;;  %v16522_v39 = vld [vmem:[#allocation29_spill] sm:$0xff]  ;;  %v7366_v57 = vmul.f32 %v16516_v22, %v13177_v14 }
 0xb7f   : > { %16518 = vst [vmem:[#allocation9_spill] sm:$0xff] %v14022_v9  ;;  %16519 = vst [vmem:[#allocation39_spill] sm:$0xff] %v14024_v31  ;;  %v8571_v6 = vsel %vm8568_vm5, %v16513_v7, %v14022_v9  ;;  %v8621_v51 = vmul.f32 %v16511_v63, %v16522_v39  ;;  %v7129_v63 = vmul.f32 %v16532_v4, %v16502_v16  ;;  %v16545_v22 = vld [vmem:[#allocation53_spill] sm:$0xff] }
 0xb80   : > { %16517 = vst [vmem:[#allocation59_spill] sm:$0xff] %v14020_v36  ;;  %16521 = vst [vmem:[#allocation94_spill] sm:$0xff] %v14028_v62  ;;  %v8599_v15 = vadd.f32 %v8571_v6, %v8484_v44  ;;  %7405 = vrot.lane.b32.xlu1 %v7364_v45, %s10886_s23  ;;  %6706 = vrot.lane.b32.xlu0 %v6670_v58, %s16386_s27  ;;  %v16527_v45 = vld [vmem:[#allocation61_spill] sm:$0xff]  ;;  %v16528_v58 = vld [vmem:[#allocation19_spill] sm:$0xff] }
 0xb81   : > { %v7594_v44 = vmul.f32 %v16527_v45, %v13180_v20  ;;  %v6899_v6 = vmul.f32 %v16528_v58, %v16502_v16 }
 0xb82   : > { %v14037_v33 = vpop.permute.xlu1 %8687  ;;  %v14039_v50 = vpop.permute.xlu0 %8326  ;;  %v14045_v8 = vadd.f32 %v8621_v51, %v8599_v15 }
 0xb83   : > { %16523 = vst [vmem:[#allocation89_spill] sm:$0xff] %v14037_v33  ;;  %16524 = vst [vmem:[#allocation91_spill] sm:$0xff] %v14039_v50 }
 0xb84   : > { %16525 = vst [vmem:[#allocation93_spill] sm:$0xff] %v14045_v8  ;;  %7409 = vrot.lane.b32.xlu1 %v7366_v57, %s10886_s23  ;;  %6710 = vrot.lane.b32.xlu0 %v6672_v37, %s16386_s27  ;;  %v7596_v57 = vmul.f32 %v16527_v45, %v13177_v14  ;;  %v6901_v37 = vmul.f32 %v16528_v58, %v16509_v0 }
 0xb86   : > { %v14049_v7 = vpop.permute.xlu1 %6599  ;;  %v14051_v59 = vpop.permute.xlu0 %8552 }
 0xb87   : > { %16526 = vst [vmem:[#allocation65_spill] sm:$0xff] %v14051_v59 }
 0xb88   : > { %7635 = vrot.lane.b32.xlu1 %v7594_v44, %s10937_s24  ;;  %6935 = vrot.lane.b32.xlu0 %v6899_v6, %s10936_s16  ;;  %v16531_v44 = vld [vmem:[#allocation63_spill] sm:$0xff] }
 0xb89   : > { %v7824_v6 = vmul.f32 %v16531_v44, %v13180_v20 }
 0xb8a   : > { %v14059_v15 = vpop.permute.xlu1 %6603  ;;  %v14061_v51 = vpop.permute.xlu0 %8556 }
 0xb8b   : > { %16529 = vst [vmem:[#allocation34_spill] sm:$0xff] %v14061_v51 }
 0xb8c   : > { %7639 = vrot.lane.b32.xlu1 %v7596_v57, %s10937_s24  ;;  %6939 = vrot.lane.b32.xlu0 %v6901_v37, %s10936_s16  ;;  %v7826_v57 = vmul.f32 %v16531_v44, %v13177_v14  ;;  %v7131_v37 = vmul.f32 %v16532_v4, %v16509_v0  ;;  %v7589_v44 = vmul.f32 %v16539_v52, %v16502_v16 }
 0xb8d   : > { %v8278_v4 = vmul.f32 %v16548_v61, %v16502_v16 }
 0xb8e   : > { %v14069_v8 = vpop.permute.xlu1 %6829  ;;  %v14071_v47 = vpop.permute.xlu0 %8819 }
 0xb8f   : > { %16530 = vst [vmem:[#allocation98_spill] sm:$0xff] %v14071_v47 }
 0xb90   : > { %7865 = vrot.lane.b32.xlu1 %v7824_v6, %s10938_s17  ;;  %7165 = vrot.lane.b32.xlu0 %v7129_v63, %s16390_s22  ;;  %v16535_v63 = vld [vmem:[#allocation77_spill] sm:$0xff] }
 0xb91   : > { %v8054_v6 = vmul.f32 %v16535_v63, %v13180_v20 }
 0xb92   : > { %v14079_v9 = vpop.permute.xlu1 %6833  ;;  %v14081_v12 = vpop.permute.xlu0 %8933 }
 0xb93   : > { %16533 = vst [vmem:[#allocation95_spill] sm:$0xff] %v14081_v12 }
 0xb94   : > { %7869 = vrot.lane.b32.xlu1 %v7826_v57, %s10938_s17  ;;  %7169 = vrot.lane.b32.xlu0 %v7131_v37, %s16390_s22  ;;  %v8056_v57 = vmul.f32 %v16535_v63, %v13177_v14  ;;  %v7361_v37 = vmul.f32 %v16536_v56, %v16509_v0  ;;  %v8049_v56 = vmul.f32 %v16545_v22, %v16502_v16 }
 0xb96   : > { %v14089_v48 = vpop.permute.xlu1 %7058  ;;  %v14091_v25 = vpop.permute.xlu0 %9047 }
 0xb97   : > { %16534 = vst [vmem:[#allocation97_spill] sm:$0xff] %v14091_v25 }
 0xb98   : > { %8095 = vrot.lane.b32.xlu1 %v8054_v6, %s10939_s18  ;;  %7395 = vrot.lane.b32.xlu0 %v7359_v42, %s10886_s23  ;;  %v16538_v42 = vld [vmem:[#allocation80_spill] sm:$0xff] }
 0xb99   : > { %v8283_v6 = vmul.f32 %v16538_v42, %v13180_v20 }
 0xb9a   : > { %v14099_v60 = vpop.permute.xlu1 %7062  ;;  %v14101_v2 = vpop.permute.xlu0 %6601 }
 0xb9c   : > { %8099 = vrot.lane.b32.xlu1 %v8056_v57, %s10939_s18  ;;  %7399 = vrot.lane.b32.xlu0 %v7361_v37, %s10886_s23  ;;  %v8285_v57 = vmul.f32 %v16538_v42, %v13177_v14  ;;  %v7591_v37 = vmul.f32 %v16539_v52, %v16509_v0 }
 0xb9e   : > { %v14109_v55 = vpop.permute.xlu1 %7288  ;;  %v14111_v10 = vpop.permute.xlu0 %6605 }
 0xb9f   : > { %16537 = vst [vmem:[#allocation52_spill] sm:$0xff] %v14111_v10 }
 0xba0   : > { %8324 = vrot.lane.b32.xlu1 %v8283_v6, %s10940_s28  ;;  %7625 = vrot.lane.b32.xlu0 %v7589_v44, %s10937_s24  ;;  %v16541_v44 = vld [vmem:[#allocation82_spill] sm:$0xff] }
 0xba1   : > { %v8513_v6 = vmul.f32 %v16541_v44, %v13180_v20 }
 0xba2   : > { %v14119_v63 = vpop.permute.xlu1 %7292  ;;  %v14121_v26 = vpop.permute.xlu0 %6831 }
 0xba4   : > { %8328 = vrot.lane.b32.xlu1 %v8285_v57, %s10940_s28  ;;  %7629 = vrot.lane.b32.xlu0 %v7591_v37, %s10937_s24  ;;  %v8515_v57 = vmul.f32 %v16541_v44, %v13177_v14  ;;  %v7821_v37 = vmul.f32 %v16542_v29, %v16509_v0 }
 0xba6   : > { %v14129_v32 = vpop.permute.xlu1 %7518  ;;  %v14131_v45 = vpop.permute.xlu0 %6835 }
 0xba7   : > { %16540 = vst [vmem:[#allocation49_spill] sm:$0xff] %v14131_v45 }
 0xba8   : > { %8554 = vrot.lane.b32.xlu1 %v8513_v6, %s10941_s30  ;;  %7855 = vrot.lane.b32.xlu0 %v7819_v38, %s10938_s17  ;;  %v16544_v38 = vld [vmem:[#allocation75_spill] sm:$0xff] }
 0xba9   : > { %v8777_v6 = vmul.f32 %v16544_v38, %v13180_v20 }
 0xbaa   : > { %v14139_v42 = vpop.permute.xlu1 %7522  ;;  %v14141_v52 = vpop.permute.xlu0 %7060 }
 0xbac   : > { %8558 = vrot.lane.b32.xlu1 %v8515_v57, %s10941_s30  ;;  %7859 = vrot.lane.b32.xlu0 %v7821_v37, %s10938_s17  ;;  %v8779_v57 = vmul.f32 %v16544_v38, %v13177_v14  ;;  %v8051_v37 = vmul.f32 %v16545_v22, %v16509_v0 }
 0xbae   : > { %v14149_v11 = vpop.permute.xlu1 %7748  ;;  %v14151_v34 = vpop.permute.xlu0 %7064 }
 0xbaf   : > { %16543 = vst [vmem:[#allocation99_spill] sm:$0xff] %v14151_v34 }
 0xbb0   : > { %8817 = vrot.lane.b32.xlu1 %v8777_v6, %s16387_s14  ;;  %8085 = vrot.lane.b32.xlu0 %v8049_v56, %s10939_s18  ;;  %v16547_v56 = vld [vmem:[#allocation76_spill] sm:$0xff] }
 0xbb1   : > { %v8891_v6 = vmul.f32 %v16547_v56, %v13180_v20 }
 0xbb2   : > { %v14159_v44 = vpop.permute.xlu1 %7752  ;;  %v14161_v29 = vpop.permute.xlu0 %7290 }
 0xbb4   : > { %8821 = vrot.lane.b32.xlu1 %v8779_v57, %s16387_s14  ;;  %8089 = vrot.lane.b32.xlu0 %v8051_v37, %s10939_s18  ;;  %v8893_v57 = vmul.f32 %v16547_v56, %v13177_v14  ;;  %v8280_v37 = vmul.f32 %v16548_v61, %v16509_v0 }
 0xbb6   : > { %v14169_v17 = vpop.permute.xlu1 %7978  ;;  %v14171_v39 = vpop.permute.xlu0 %7294 }
 0xbb7   : > { %16546 = vst [vmem:[#allocation57_spill] sm:$0xff] %v14171_v39 }
 0xbb8   : > { %8931 = vrot.lane.b32.xlu1 %v8891_v6, %s16386_s27  ;;  %8314 = vrot.lane.b32.xlu0 %v8278_v4, %s10940_s28  ;;  %v16551_v4 = vld [vmem:[#allocation86_spill] sm:$0xff] }
 0xbb9   : > { %v9005_v6 = vmul.f32 %v16551_v4, %v13180_v20 }
 0xbba   : > { %v14179_v38 = vpop.permute.xlu1 %7982  ;;  %v14181_v22 = vpop.permute.xlu0 %7520 }
 0xbbc   : > { %8935 = vrot.lane.b32.xlu1 %v8893_v57, %s16386_s27  ;;  %8318 = vrot.lane.b32.xlu0 %v8280_v37, %s10940_s28  ;;  %v9007_v57 = vmul.f32 %v16551_v4, %v13177_v14  ;;  %v8510_v37 = vmul.f32 %v16552_v49, %v16509_v0 }
 0xbbe   : > { %v14189_v40 = vpop.permute.xlu1 %8207  ;;  %v14191_v58 = vpop.permute.xlu0 %7524 }
 0xbbf   : > { %16549 = vst [vmem:[#allocation30_spill] sm:$0xff] %v14189_v40  ;;  %16550 = vst [vmem:[#allocation122_spill] sm:$0xff] %v14191_v58 }
 0xbc0   : > { %9045 = vrot.lane.b32.xlu1 %v9005_v6, %s16296_s26  ;;  %8544 = vrot.lane.b32.xlu0 %v8508_v24, %s10941_s30  ;;  %v16556_v24 = vld [vmem:[#allocation14_spill] sm:$0xff] }
 0xbc1   : > { %v6555_v6 = vmul.f32 %v16556_v24, %v16502_v16  ;;  %v6556_v3 = vmul.f32 %v16556_v24, %v16557_v46 }
 0xbc2   : > { %v14199_v56 = vpop.permute.xlu1 %8211  ;;  %v14201_v61 = vpop.permute.xlu0 %7750 }
 0xbc3   : > { %16553 = vst [vmem:[#allocation123_spill] sm:$0xff] %v14199_v56  ;;  %v16573_v56 = vld [vmem:[#allocation115_spill] sm:$0xff] }
 0xbc4   : > { %9049 = vrot.lane.b32.xlu1 %v9007_v57, %s16296_s26  ;;  %8548 = vrot.lane.b32.xlu0 %v8510_v37, %s10941_s30  ;;  %v6557_v57 = vmul.f32 %v16556_v24, %v16509_v0  ;;  %v16559_v37 = vld [vmem:[#allocation54_spill] sm:$0xff] }
 0xbc5   : > { %v6558_v47 = vmul.f32 %v16556_v24, %v16559_v37 }
 0xbc6   : > { %v14209_v25 = vpop.permute.xlu1 %8437  ;;  %v14211_v12 = vpop.permute.xlu0 %7754 }
 0xbc7   : > { %16554 = vst [vmem:[#allocation124_spill] sm:$0xff] %v14209_v25  ;;  %16555 = vst [vmem:[#allocation125_spill] sm:$0xff] %v14211_v12 }
 0xbc8   : > { %6591 = vrot.lane.b32.xlu1 %v6555_v6, %s16387_s14  ;;  %6593 = vrot.lane.b32.xlu0 %v6556_v3, %s16387_s14  ;;  %v16562_v3 = vld [vmem:[#allocation18_spill] sm:$0xff] }
 0xbc9   : > { %v6785_v6 = vmul.f32 %v16562_v3, %v16502_v16  ;;  %v6786_v33 = vmul.f32 %v16562_v3, %v16557_v46 }
 0xbca   : > { %v14219_v4 = vpop.permute.xlu1 %8441  ;;  %v14221_v49 = vpop.permute.xlu0 %7980 }
 0xbcb   : > { %16558 = vst [vmem:[#allocation14_spill] sm:$0xff] %v14219_v4 }
 0xbcc   : > { %6595 = vrot.lane.b32.xlu1 %v6557_v57, %s16387_s14  ;;  %6597 = vrot.lane.b32.xlu0 %v6558_v47, %s16387_s14  ;;  %v6787_v47 = vmul.f32 %v16562_v3, %v16509_v0  ;;  %v6788_v57 = vmul.f32 %v16562_v3, %v16559_v37 }
 0xbce   : > { %v14229_v36 = vpop.permute.xlu1 %8705  ;;  %v14231_v62 = vpop.permute.xlu0 %7984 }
 0xbcf   : > { %16560 = vst [vmem:[#allocation126_spill] sm:$0xff] %v14229_v36  ;;  %16561 = vst [vmem:[#allocation127_spill] sm:$0xff] %v14231_v62 }
 0xbd0   : > { %6821 = vrot.lane.b32.xlu1 %v6785_v6, %s16296_s26  ;;  %6823 = vrot.lane.b32.xlu0 %v6786_v33, %s16296_s26  ;;  %v16566_v6 = vld [vmem:[#allocation22_spill] sm:$0xff] }
 0xbd1   : > { %v7014_v33 = vmul.f32 %v16566_v6, %v16502_v16  ;;  %v7015_v59 = vmul.f32 %v16566_v6, %v16557_v46 }
 0xbd2   : > { %v14239_v14 = vpop.permute.xlu0 %8209  ;;  %v6487_v24 = vpop.permute.xlu1 %6486 }
 0xbd3   : > { %16563 = vst [vmem:[#allocation18_spill] sm:$0xff] %v14239_v14  ;;  %v6509_v40 = vsel %vm3355_vm6, %v6487_v24, %v16573_v56  ;;  %v16574_v14 = vld [vmem:[#allocation87_spill] sm:$0xff] }
 0xbd4   : > { %6825 = vrot.lane.b32.xlu1 %v6787_v47, %s16296_s26  ;;  %6827 = vrot.lane.b32.xlu0 %v6788_v57, %s16296_s26  ;;  %v7016_v47 = vmul.f32 %v16566_v6, %v16509_v0  ;;  %v7017_v57 = vmul.f32 %v16566_v6, %v16559_v37 }
 0xbd6   : > { %v14247_v36 = vpop.permute.xlu0 %8213  ;;  %v14249_v51 = vpop.permute.xlu1 %6490 }
 0xbd7   : > { %16564 = vst [vmem:[#allocation128_spill] sm:$0xff] %v14247_v36  ;;  %16565 = vst [vmem:[#allocation129_spill] sm:$0xff] %v14249_v51 }
 0xbd8   : > { %7050 = vrot.lane.b32.xlu1 %v7014_v33, %s16397_s25  ;;  %7052 = vrot.lane.b32.xlu0 %v7015_v59, %s16397_s25  ;;  %v16570_v33 = vld [vmem:[#allocation26_spill] sm:$0xff] }
 0xbd9   : > { %v7244_v59 = vmul.f32 %v16570_v33, %v16502_v16 }
 0xbda   : > { %v14257_v4 = vpop.permute.xlu0 %8439  ;;  %v6717_v3 = vpop.permute.xlu1 %6716 }
 0xbdb   : > { %16567 = vst [vmem:[#allocation22_spill] sm:$0xff] %v14257_v4  ;;  %v7245_v4 = vmul.f32 %v16570_v33, %v16557_v46 }
 0xbdc   : > { %7054 = vrot.lane.b32.xlu1 %v7016_v47, %s16397_s25  ;;  %7056 = vrot.lane.b32.xlu0 %v7017_v57, %s16397_s25  ;;  %v7246_v47 = vmul.f32 %v16570_v33, %v16509_v0  ;;  %v7247_v57 = vmul.f32 %v16570_v33, %v16559_v37 }
 0xbde   : > { %v14265_v25 = vpop.permute.xlu0 %8443  ;;  %v14267_v36 = vpop.permute.xlu1 %6720 }
 0xbdf   : > { %16568 = vst [vmem:[#allocation130_spill] sm:$0xff] %v14265_v25  ;;  %16569 = vst [vmem:[#allocation131_spill] sm:$0xff] %v14267_v36  ;;  %v16572_v25 = vld [vmem:[#allocation114_spill] sm:$0xff] }
 0xbe0   : > { %7280 = vrot.lane.b32.xlu1 %v7244_v59, %s16401_s0  ;;  %7282 = vrot.lane.b32.xlu0 %v7245_v4, %s16401_s0  ;;  %v6508_v31 = vsel %vm3355_vm6, %v16572_v25, %v6487_v24  ;;  %v6407_v59 = vmul.f32 %v16574_v14, %v13172_v30  ;;  %v6408_v4 = vmul.f32 %v16574_v14, %v13180_v20  ;;  %v16577_v25 = vld [vmem:[#allocation60_spill] sm:$0xff] }
 0xbe1   : > { %v7474_v1 = vmul.f32 %v16577_v25, %v16502_v16  ;;  %v7475_v24 = vmul.f32 %v16577_v25, %v16557_v46  ;;  %v6510_v30 = vsel %vm3355_vm6, %v16573_v56, %v14249_v51 }
 0xbe2   : > { %v14275_v50 = vpop.permute.xlu0 %8703  ;;  %v6946_v6 = vpop.permute.xlu1 %6945  ;;  %v6537_v62 = vadd.f32 %v6509_v40, %v6408_v4  ;;  %v7476_v40 = vmul.f32 %v16577_v25, %v16509_v0  ;;  %v6739_v4 = vsel %vm3546_vm8, %v6717_v3, %v13769_v21 }
 0xbe3   : > { %16571 = vst [vmem:[#allocation26_spill] sm:$0xff] %v14275_v50  ;;  %v6536_v50 = vadd.f32 %v6508_v31, %v6407_v59  ;;  %v6623_v31 = vsel %vm3474_vm7, %v14049_v7, %v14101_v2  ;;  %v16578_v59 = vld [vmem:[#allocation117_spill] sm:$0xff] }
 0xbe4   : > { %7284 = vrot.lane.b32.xlu1 %v7246_v47, %s16401_s0  ;;  %7286 = vrot.lane.b32.xlu0 %v7247_v57, %s16401_s0  ;;  %v6409_v47 = vmul.f32 %v16574_v14, %v13174_v35  ;;  %v6624_v57 = vsel %vm3474_vm7, %v14101_v2, %v14059_v15  ;;  %v6738_v56 = vsel %vm3546_vm8, %v16578_v59, %v6717_v3 }
 0xbe5   : > { %v6651_v14 = vadd.f32 %v6623_v31, %v6536_v50  ;;  %v7477_v35 = vmul.f32 %v16577_v25, %v16559_v37  ;;  %v6625_v2 = vsel %vm3474_vm7, %v14059_v15, %v14111_v10  ;;  %v6853_v15 = vsel %vm3618_vm9, %v14121_v26, %v14079_v9 }
 0xbe6   : > { %v14291_v27 = vpop.permute.xlu0 %8707  ;;  %v14293_v33 = vpop.permute.xlu1 %6949 }
 0xbe7   : > { %16575 = vst [vmem:[#allocation114_spill] sm:$0xff] %v14291_v27  ;;  %16576 = vst [vmem:[#allocation115_spill] sm:$0xff] %v14293_v33  ;;  %v6766_v7 = vadd.f32 %v6738_v56, %v6651_v14  ;;  %v16580_v14 = vld [vmem:[#allocation62_spill] sm:$0xff] }
 0xbe8   : > { %7510 = vrot.lane.b32.xlu1 %v7474_v1, %s10942_s20  ;;  %7512 = vrot.lane.b32.xlu0 %v7475_v24, %s10942_s20  ;;  %v6538_v1 = vadd.f32 %v6510_v30, %v6409_v47  ;;  %v6652_v24 = vadd.f32 %v6624_v57, %v6537_v62  ;;  %v6740_v62 = vsel %vm3546_vm8, %v13769_v21, %v14267_v36 }
 0xbe9   : > { %v7704_v25 = vmul.f32 %v16580_v14, %v16502_v16  ;;  %v7705_v47 = vmul.f32 %v16580_v14, %v16557_v46  ;;  %v6967_v21 = vsel %vm6959_vm3, %v13783_v13, %v6946_v6  ;;  %v7707_v13 = vmul.f32 %v16580_v14, %v16559_v37 }
 0xbea   : > { %v7176_v51 = vpop.permute.xlu1 %7175  ;;  %v14318_v27 = vpop.permute.xlu0 %6476  ;;  %v6767_v20 = vadd.f32 %v6739_v4, %v6652_v24  ;;  %v6653_v50 = vadd.f32 %v6625_v2, %v6538_v1 }
 0xbec   : > { %7514 = vrot.lane.b32.xlu1 %v7476_v40, %s10942_s20  ;;  %7516 = vrot.lane.b32.xlu0 %v7477_v35, %s10942_s20  ;;  %v6852_v35 = vsel %vm3618_vm9, %v14069_v8, %v14121_v26  ;;  %v6968_v40 = vsel %vm6959_vm3, %v6946_v6, %v13805_v53  ;;  %v6768_v31 = vadd.f32 %v6740_v62, %v6653_v50 }
 0xbed   : > { %v6880_v57 = vadd.f32 %v6852_v35, %v6766_v7  ;;  %v6881_v59 = vadd.f32 %v6853_v15, %v6767_v20  ;;  %v7706_v26 = vmul.f32 %v16580_v14, %v16509_v0  ;;  %v6854_v6 = vsel %vm3618_vm9, %v14079_v9, %v14131_v45  ;;  %v16581_v7 = vld [vmem:[#allocation64_spill] sm:$0xff] }
 0xbee   : > { %v14330_v3 = vpop.permute.xlu1 %7179  ;;  %v14332_v30 = vpop.permute.xlu0 %6480  ;;  %v6969_v20 = vsel %vm6959_vm3, %v13805_v53, %v14293_v33  ;;  %v6882_v24 = vadd.f32 %v6854_v6, %v6768_v31  ;;  %v7934_v2 = vmul.f32 %v16581_v7, %v16502_v16  ;;  %v7082_v62 = vsel %vm7074_vm11, %v14089_v48, %v14141_v52 }
 0xbef   : > { %16579 = vst [vmem:[#allocation60_spill] sm:$0xff] %v14330_v3  ;;  %v6995_v56 = vadd.f32 %v6967_v21, %v6880_v57  ;;  %v6996_v4 = vadd.f32 %v6968_v40, %v6881_v59  ;;  %v7083_v9 = vsel %vm7074_vm11, %v14141_v52, %v14099_v60  ;;  %v7197_v50 = vsel %vm7189_vm12, %v13829_v19, %v7176_v51 }
 0xbf0   : > { %7740 = vrot.lane.b32.xlu1 %v7704_v25, %s10943_s13  ;;  %7742 = vrot.lane.b32.xlu0 %v7705_v47, %s10943_s13  ;;  %v7198_v53 = vsel %vm7189_vm12, %v7176_v51, %v13841_v23  ;;  %v6997_v14 = vadd.f32 %v6969_v20, %v6882_v24  ;;  %v7935_v48 = vmul.f32 %v16581_v7, %v16557_v46 }
 0xbf1   : > { %v7110_v25 = vadd.f32 %v7082_v62, %v6995_v56  ;;  %v7111_v47 = vadd.f32 %v7083_v9, %v6996_v4  ;;  %v7084_v52 = vsel %vm7074_vm11, %v14099_v60, %v14151_v34  ;;  %v7199_v19 = vsel %vm7189_vm12, %v13841_v23, %v14330_v3 }
 0xbf2   : > { %v7406_v8 = vpop.permute.xlu1 %7405  ;;  %v14350_v1 = vpop.permute.xlu0 %6706  ;;  %v7112_v51 = vadd.f32 %v7084_v52, %v6997_v14  ;;  %v7936_v59 = vmul.f32 %v16581_v7, %v16509_v0  ;;  %v7937_v56 = vmul.f32 %v16581_v7, %v16559_v37  ;;  %v7312_v4 = vsel %vm7304_vm13, %v14109_v55, %v14161_v29 }
 0xbf3   : > { %v7225_v21 = vadd.f32 %v7197_v50, %v7110_v25  ;;  %v7226_v40 = vadd.f32 %v7198_v53, %v7111_v47  ;;  %v7313_v60 = vsel %vm7304_vm13, %v14161_v29, %v14119_v63  ;;  %v7427_v23 = vsel %vm16142_vm15, %v13865_v5, %v7406_v8  ;;  %v16584_v29 = vld [vmem:[#allocation79_spill] sm:$0xff] }
 0xbf4   : > { %7744 = vrot.lane.b32.xlu1 %v7706_v26, %s10943_s13  ;;  %7746 = vrot.lane.b32.xlu0 %v7707_v13, %s10943_s13  ;;  %v7428_v26 = vsel %vm16142_vm15, %v7406_v8, %v13887_v18  ;;  %v7227_v13 = vadd.f32 %v7199_v19, %v7112_v51  ;;  %v8163_v62 = vmul.f32 %v16584_v29, %v16502_v16 }
 0xbf5   : > { %v7340_v6 = vadd.f32 %v7312_v4, %v7225_v21  ;;  %v7341_v20 = vadd.f32 %v7313_v60, %v7226_v40  ;;  %v8164_v5 = vmul.f32 %v16584_v29, %v16557_v46  ;;  %v7314_v8 = vsel %vm7304_vm13, %v14119_v63, %v14171_v39  ;;  %v16586_v4 = vld [vmem:[#allocation81_spill] sm:$0xff] }
 0xbf6   : > { %v14376_v35 = vpop.permute.xlu1 %7409  ;;  %v14378_v15 = vpop.permute.xlu0 %6710  ;;  %v7342_v50 = vadd.f32 %v7314_v8, %v7227_v13  ;;  %v8165_v53 = vmul.f32 %v16584_v29, %v16509_v0  ;;  %v7542_v14 = vsel %vm16141_vm14, %v14129_v32, %v14181_v22  ;;  %v7543_v63 = vsel %vm16141_vm14, %v14181_v22, %v14139_v42 }
 0xbf7   : > { %16582 = vst [vmem:[#allocation117_spill] sm:$0xff] %v14376_v35  ;;  %v7455_v24 = vadd.f32 %v7427_v23, %v7340_v6  ;;  %v7456_v7 = vadd.f32 %v7428_v26, %v7341_v20  ;;  %v7429_v9 = vsel %vm16142_vm15, %v13887_v18, %v14376_v35  ;;  %v8166_v19 = vmul.f32 %v16584_v29, %v16559_v37 }
 0xbf8   : > { %7970 = vrot.lane.b32.xlu1 %v7934_v2, %s10944_s21  ;;  %7972 = vrot.lane.b32.xlu0 %v7935_v48, %s10944_s21  ;;  %v7457_v47 = vadd.f32 %v7429_v9, %v7342_v50  ;;  %v8393_v60 = vmul.f32 %v16586_v4, %v16502_v16  ;;  %v8394_v23 = vmul.f32 %v16586_v4, %v16557_v46  ;;  %v16590_v50 = vld [vmem:[#allocation73_spill] sm:$0xff] }
 0xbf9   : > { %v7570_v48 = vadd.f32 %v7542_v14, %v7455_v24  ;;  %v7571_v21 = vadd.f32 %v7543_v63, %v7456_v7  ;;  %v7772_v26 = vsel %vm16143_vm1, %v14149_v11, %v14201_v61  ;;  %v16593_v63 = vld [vmem:[#allocation90_spill] sm:$0xff] }
 0xbfa   : > { %v7636_v31 = vpop.permute.xlu1 %7635  ;;  %v14390_v57 = vpop.permute.xlu0 %6935 }
 0xbfb   : > { %v7657_v25 = vsel %vm16140_vm0, %v13901_v41, %v7636_v31  ;;  %v7658_v18 = vsel %vm16140_vm0, %v7636_v31, %v13921_v54  ;;  %v7544_v41 = vsel %vm16141_vm14, %v14139_v42, %v14191_v58  ;;  %v7773_v42 = vsel %vm16143_vm1, %v14201_v61, %v14159_v44 }
 0xbfc   : > { %7974 = vrot.lane.b32.xlu1 %v7936_v59, %s10944_s21  ;;  %7976 = vrot.lane.b32.xlu0 %v7937_v56, %s10944_s21  ;;  %v7685_v32 = vadd.f32 %v7657_v25, %v7570_v48  ;;  %v7686_v51 = vadd.f32 %v7658_v18, %v7571_v21  ;;  %v7572_v31 = vadd.f32 %v7544_v41, %v7457_v47 }
 0xbfd   : > { %v8395_v61 = vmul.f32 %v16586_v4, %v16509_v0 }
 0xbfe   : > { %v14408_v55 = vpop.permute.xlu1 %7639  ;;  %v14410_v2 = vpop.permute.xlu0 %6939  ;;  %v7800_v20 = vadd.f32 %v7772_v26, %v7685_v32  ;;  %v7801_v24 = vadd.f32 %v7773_v42, %v7686_v51  ;;  %v8661_v26 = vmul.f32 %v16590_v50, %v16559_v37  ;;  %v16600_v42 = vld [vmem:[#allocation18_spill] sm:$0xff] }
 0xbff   : > { %16583 = vst [vmem:[#allocation62_spill] sm:$0xff] %v14408_v55  ;;  %v7659_v22 = vsel %vm16140_vm0, %v13921_v54, %v14408_v55  ;;  %vm16587_vm0 = vcmask 498688  }
 0xc00   : > { %8199 = vrot.lane.b32.xlu1 %v8163_v62, %s10945_s19  ;;  %8201 = vrot.lane.b32.xlu0 %v8164_v5, %s10945_s19  ;;  %vm16588_vm14 = vmmov %vm16587_vm0  ;;  %v7687_v6 = vadd.f32 %v7659_v22, %v7572_v31  ;;  %v7774_v5 = vsel %vm16143_vm1, %v14159_v44, %v14211_v12  ;;  %vm16594_vm1 = vcmask 261120  }
 0xc02   : > { %v7866_v40 = vpop.permute.xlu1 %7865  ;;  %v14436_v52 = vpop.permute.xlu0 %7165  ;;  %v7802_v9 = vadd.f32 %v7774_v5, %v7687_v6  ;;  %v16602_v6 = vld [vmem:[#allocation123_spill] sm:$0xff] }
 0xc03   : > { %v7887_v54 = vsel %vm16587_vm0, %v13947_v28, %v7866_v40  ;;  %v7888_v13 = vsel %vm16588_vm14, %v7866_v40, %v13959_v43  ;;  %v8396_v28 = vmul.f32 %v16586_v4, %v16559_v37  ;;  %vm16589_vm14 = vmmov %vm16587_vm0  ;;  %vm16591_vm0 = vcmask 490496  }
 0xc04   : > { %8203 = vrot.lane.b32.xlu1 %v8165_v53, %s10945_s19  ;;  %8205 = vrot.lane.b32.xlu0 %v8166_v19, %s10945_s19  ;;  %v7915_v7 = vadd.f32 %v7887_v54, %v7800_v20  ;;  %v7916_v29 = vadd.f32 %v7888_v13, %v7801_v24  ;;  %v8658_v53 = vmul.f32 %v16590_v50, %v16502_v16  ;;  %vm16592_vm15 = vmmov %vm16591_vm0  ;;  %v16601_v54 = vld [vmem:[#allocation30_spill] sm:$0xff]  ;;  %v16603_v20 = vld [vmem:[#allocation39_spill] sm:$0xff] }
 0xc05   : > { %v8002_v14 = vsel %vm16591_vm0, %v14169_v17, %v14221_v49  ;;  %v8003_v44 = vsel %vm16592_vm15, %v14221_v49, %v14179_v38  ;;  %v8659_v17 = vmul.f32 %v16590_v50, %v16557_v46  ;;  %v16598_v49 = vld [vmem:[#allocation127_spill] sm:$0xff]  ;;  %vm16599_vm15 = vmmov %vm16591_vm0  ;;  %v8231_v13 = vsel %vm8223_vm10, %v16601_v54, %v16600_v42 }
 0xc06   : > { %v14448_v59 = vpop.permute.xlu1 %7869  ;;  %v14450_v56 = vpop.permute.xlu0 %7169  ;;  %v8030_v48 = vadd.f32 %v8002_v14, %v7915_v7  ;;  %v8031_v21 = vadd.f32 %v8003_v44, %v7916_v29  ;;  %v8004_v41 = vsel %vm16599_vm15, %v14179_v38, %v16598_v49  ;;  %v8232_v38 = vsel %vm8223_vm10, %v16600_v42, %v16602_v6  ;;  %v16604_v7 = vld [vmem:[#allocation91_spill] sm:$0xff]  ;;  %v16606_v14 = vld [vmem:[#allocation74_spill] sm:$0xff] }
 0xc07   : > { %16585 = vst [vmem:[#allocation64_spill] sm:$0xff] %v14448_v59  ;;  %v7889_v8 = vsel %vm16589_vm14, %v13959_v43, %v14448_v59  ;;  %v16595_v43 = vld [vmem:[#allocation44_spill] sm:$0xff]  ;;  %vm16596_vm14 = vmmov %vm16594_vm1  ;;  %v8772_v44 = vmul.f32 %v16606_v14, %v16502_v16  ;;  %v8775_v42 = vmul.f32 %v16606_v14, %v16559_v37  ;;  %v16612_v54 = vld [vmem:[#allocation31_spill] sm:$0xff]  ;;  %vm16682_vm0 = vcmask 752640  }
 0xc08   : > { %8429 = vrot.lane.b32.xlu1 %v8393_v60, %s10946_s3  ;;  %8431 = vrot.lane.b32.xlu0 %v8394_v23, %s10946_s3  ;;  %v7917_v47 = vadd.f32 %v7889_v8, %v7802_v9  ;;  %v8660_v23 = vmul.f32 %v16590_v50, %v16509_v0  ;;  %v16638_v50 = vld [vmem:[#allocation106_spill] sm:$0xff]  ;;  %vm16689_vm15 = vcmask 515072  }
 0xc0a   : > { %v8096_v11 = vpop.permute.xlu1 %8095  ;;  %v14468_v62 = vpop.permute.xlu0 %7395  ;;  %v8032_v31 = vadd.f32 %v8004_v41, %v7917_v47  ;;  %v8774_v41 = vmul.f32 %v16606_v14, %v16509_v0 }
 0xc0b   : > { %v8116_v25 = vsel %vm16594_vm1, %v16593_v63, %v8096_v11  ;;  %v8117_v18 = vsel %vm16596_vm14, %v8096_v11, %v16595_v43  ;;  %v8773_v63 = vmul.f32 %v16606_v14, %v16557_v46  ;;  %vm16684_vm14 = vcmask 523264  }
 0xc0c   : > { %8433 = vrot.lane.b32.xlu1 %v8395_v61, %s10946_s3  ;;  %8435 = vrot.lane.b32.xlu0 %v8396_v28, %s10946_s3  ;;  %v8144_v32 = vadd.f32 %v8116_v25, %v8030_v48  ;;  %v8145_v51 = vadd.f32 %v8117_v18, %v8031_v21  ;;  %v16607_v25 = vld [vmem:[#allocation128_spill] sm:$0xff]  ;;  %v16608_v48 = vld [vmem:[#allocation22_spill] sm:$0xff] }
 0xc0d   : > { %v16609_v21 = vld [vmem:[#allocation124_spill] sm:$0xff] }
 0xc0e   : > { %v14494_v40 = vpop.permute.xlu1 %8099  ;;  %v14496_v19 = vpop.permute.xlu0 %7399  ;;  %v8259_v61 = vadd.f32 %v8231_v13, %v8144_v32  ;;  %v8260_v28 = vadd.f32 %v8232_v38, %v8145_v51  ;;  %v16610_v32 = vld [vmem:[#allocation14_spill] sm:$0xff]  ;;  %v16613_v13 = vld [vmem:[#allocation72_spill] sm:$0xff]  ;;  %v16614_v38 = vld [vmem:[#allocation65_spill] sm:$0xff] }
 0xc0f   : > { %16597 = vst [vmem:[#allocation79_spill] sm:$0xff] %v14494_v40  ;;  %v8118_v22 = vsel %vm16594_vm1, %v16595_v43, %v14494_v40  ;;  %v8233_v43 = vsel %vm8223_vm10, %v16602_v6, %v16607_v25  ;;  %v8462_v51 = vsel %vm8453_vm2, %v16608_v48, %v16610_v32  ;;  %v8626_v6 = vmul.f32 %v16613_v13, %v16612_v54  ;;  %v16646_v40 = vld [vmem:[#allocation95_spill] sm:$0xff] }
 0xc10   : > { %8693 = vrot.lane.b32.xlu1 %v8658_v53, %s16381_s29  ;;  %8695 = vrot.lane.b32.xlu0 %v8659_v17, %s16381_s29  ;;  %v8146_v11 = vadd.f32 %v8118_v22, %v8032_v31  ;;  %v8461_v17 = vsel %vm8453_vm2, %v16609_v21, %v16608_v48  ;;  %vm16691_vm1 = vcmask 506880  }
 0xc12   : > { %v8325_v4 = vpop.permute.xlu1 %8324  ;;  %v14508_v60 = vpop.permute.xlu0 %7625  ;;  %v8261_v47 = vadd.f32 %v8233_v43, %v8146_v11 }
 0xc13   : > { %v8346_v24 = vsel %vm8338_vm4, %v16603_v20, %v8325_v4  ;;  %v8347_v29 = vsel %vm8338_vm4, %v8325_v4, %v16604_v7 }
 0xc14   : > { %8697 = vrot.lane.b32.xlu1 %v8660_v23, %s16381_s29  ;;  %8699 = vrot.lane.b32.xlu0 %v8661_v26, %s16381_s29  ;;  %v8374_v5 = vadd.f32 %v8346_v24, %v8259_v61  ;;  %v8375_v8 = vadd.f32 %v8347_v29, %v8260_v28  ;;  %v16615_v24 = vld [vmem:[#allocation34_spill] sm:$0xff]  ;;  %v16616_v29 = vld [vmem:[#allocation51_spill] sm:$0xff] }
 0xc15   : > { %v8627_v11 = vmul.f32 %v16613_v13, %v16616_v29  ;;  %v16628_v29 = vld [vmem:[#allocation78_spill] sm:$0xff] }
 0xc16   : > { %v14526_v9 = vpop.permute.xlu1 %8328  ;;  %v14528_v53 = vpop.permute.xlu0 %7629  ;;  %v8489_v31 = vadd.f32 %v8461_v17, %v8374_v5  ;;  %v8490_v23 = vadd.f32 %v8462_v51, %v8375_v8  ;;  %v16617_v5 = vld [vmem:[#allocation130_spill] sm:$0xff] }
 0xc17   : > { %16605 = vst [vmem:[#allocation81_spill] sm:$0xff] %v14526_v9  ;;  %v8348_v18 = vsel %vm8338_vm4, %v16604_v7, %v14526_v9  ;;  %v8463_v8 = vsel %vm8453_vm2, %v16610_v32, %v16617_v5  ;;  %v16621_v32 = vld [vmem:[#allocation32_spill] sm:$0xff]  ;;  %v16644_v9 = vld [vmem:[#allocation105_spill] sm:$0xff] }
 0xc18   : > { %8807 = vrot.lane.b32.xlu1 %v8772_v44, %s16387_s14  ;;  %8809 = vrot.lane.b32.xlu0 %v8773_v63, %s16387_s14  ;;  %v8376_v22 = vadd.f32 %v8348_v18, %v8261_v47  ;;  %v16618_v44 = vld [vmem:[#allocation85_spill] sm:$0xff] }
 0xc19   : > { %v8886_v63 = vmul.f32 %v16618_v44, %v16502_v16  ;;  %v8887_v17 = vmul.f32 %v16618_v44, %v16557_v46 }
 0xc1a   : > { %v8555_v4 = vpop.permute.xlu1 %8554  ;;  %v14550_v26 = vpop.permute.xlu0 %7855  ;;  %v8491_v47 = vadd.f32 %v8463_v8, %v8376_v22 }
 0xc1b   : > { %16611 = vst [vmem:[#allocation90_spill] sm:$0xff] %v14550_v26  ;;  %v8576_v20 = vsel %vm8568_vm5, %v16614_v38, %v8555_v4  ;;  %v8577_v7 = vsel %vm8568_vm5, %v8555_v4, %v16615_v24  ;;  %v16625_v38 = vld [vmem:[#allocation89_spill] sm:$0xff] }
 0xc1c   : > { %v8604_v61 = vadd.f32 %v8576_v20, %v8489_v31  ;;  %v8605_v28 = vadd.f32 %v8577_v7, %v8490_v23  ;;  %8811 = vrot.lane.b32.xlu1 %v8774_v41, %s16387_s14  ;;  %8813 = vrot.lane.b32.xlu0 %v8775_v42, %s16387_s14  ;;  %v8628_v31 = vmul.f32 %v16613_v13, %v16621_v32 }
 0xc1d   : > { %v8888_v23 = vmul.f32 %v16618_v44, %v16509_v0  ;;  %v8889_v42 = vmul.f32 %v16618_v44, %v16559_v37 }
 0xc1e   : > { %v8640_v43 = vadd.f32 %v8626_v6, %v8604_v61  ;;  %v8641_v18 = vadd.f32 %v8627_v11, %v8605_v28  ;;  %v14569_v48 = vpop.permute.xlu1 %8558  ;;  %v14571_v21 = vpop.permute.xlu0 %7859  ;;  %v16624_v6 = vld [vmem:[#allocation101_spill] sm:$0xff]  ;;  %v9000_v11 = vmul.f32 %v16628_v29, %v16502_v16  ;;  %v9001_v61 = vmul.f32 %v16628_v29, %v16557_v46  ;;  %v16629_v28 = vld [vmem:[#allocation94_spill] sm:$0xff] }
 0xc1f   : > { %16619 = vst [vmem:[#allocation44_spill] sm:$0xff] %v14569_v48  ;;  %16620 = vst [vmem:[#allocation18_spill] sm:$0xff] %v14571_v21  ;;  %v8578_v51 = vsel %vm8568_vm5, %v16615_v24, %v14569_v48  ;;  %v8719_v20 = vsel %vm3355_vm6, %v16625_v38, %v16624_v6 }
 0xc20   : > { %v8606_v41 = vadd.f32 %v8578_v51, %v8491_v47  ;;  %8921 = vrot.lane.b32.xlu1 %v8886_v63, %s16386_s27  ;;  %8923 = vrot.lane.b32.xlu0 %v8887_v17, %s16386_s27  ;;  %v8747_v8 = vadd.f32 %v8719_v20, %v16629_v28  ;;  %v16630_v63 = vld [vmem:[#allocation102_spill] sm:$0xff]  ;;  %v16634_v20 = vld [vmem:[#allocation59_spill] sm:$0xff] }
 0xc21   : > { %v8720_v47 = vsel %vm3355_vm6, %v16624_v6, %v16630_v63  ;;  %v16635_v6 = vld [vmem:[#allocation126_spill] sm:$0xff] }
 0xc22   : > { %v8818_v22 = vpop.permute.xlu1 %8817  ;;  %v14582_v4 = vpop.permute.xlu0 %8085  ;;  %v14588_v54 = vadd.f32 %v8628_v31, %v8606_v41  ;;  %v9002_v41 = vmul.f32 %v16628_v29, %v16509_v0  ;;  %v9003_v31 = vmul.f32 %v16628_v29, %v16559_v37  ;;  %v16636_v28 = vld [vmem:[#allocation26_spill] sm:$0xff] }
 0xc23   : > { %16622 = vst [vmem:[#allocation30_spill] sm:$0xff] %v14582_v4  ;;  %v16637_v63 = vld [vmem:[#allocation98_spill] sm:$0xff] }
 0xc24   : > { %16623 = vst [vmem:[#allocation123_spill] sm:$0xff] %v14588_v54  ;;  %8925 = vrot.lane.b32.xlu1 %v8888_v23, %s16386_s27  ;;  %8927 = vrot.lane.b32.xlu0 %v8889_v42, %s16386_s27  ;;  %v16632_v23 = vld [vmem:[#allocation103_spill] sm:$0xff]  ;;  %v16633_v42 = vld [vmem:[#allocation104_spill] sm:$0xff]  ;;  %v8726_v54 = vsel %vm3355_vm6, %v16636_v28, %v16635_v6  ;;  %v8840_v13 = vsel %vm3474_vm7, %v8818_v22, %v16637_v63 }
 0xc25   : > { %v8833_v38 = vsel %vm3474_vm7, %v16633_v42, %v16632_v23  ;;  %v8834_v48 = vsel %vm3474_vm7, %v16632_v23, %v16638_v50  ;;  %v8754_v5 = vadd.f32 %v8726_v54, %v8640_v43  ;;  %v16645_v28 = vld [vmem:[#allocation108_spill] sm:$0xff]  ;;  %v16647_v54 = vld [vmem:[#allocation114_spill] sm:$0xff] }
 0xc26   : > { %v14595_v24 = vpop.permute.xlu1 %8821  ;;  %v14597_v7 = vpop.permute.xlu0 %8089  ;;  %v8947_v25 = vsel %vm3546_vm8, %v16645_v28, %v16644_v9  ;;  %v8727_v50 = vsel %vm3355_vm6, %v16635_v6, %v16647_v54  ;;  %v16651_v6 = vld [vmem:[#allocation107_spill] sm:$0xff]  ;;  %v16652_v28 = vld [vmem:[#allocation110_spill] sm:$0xff] }
 0xc27   : > { %16626 = vst [vmem:[#allocation39_spill] sm:$0xff] %v14595_v24  ;;  %16627 = vst [vmem:[#allocation91_spill] sm:$0xff] %v14597_v7  ;;  %v8868_v43 = vadd.f32 %v8840_v13, %v8754_v5  ;;  %v8841_v59 = vsel %vm3474_vm7, %v16637_v63, %v14595_v24  ;;  %v8755_v13 = vadd.f32 %v8727_v50, %v8641_v18 }
 0xc28   : > { %9035 = vrot.lane.b32.xlu1 %v9000_v11, %s16296_s26  ;;  %9037 = vrot.lane.b32.xlu0 %v9001_v61, %s16296_s26  ;;  %v8748_v11 = vadd.f32 %v8720_v47, %v16634_v20  ;;  %v8861_v61 = vadd.f32 %v8833_v38, %v8747_v8  ;;  %v16641_v8 = vld [vmem:[#allocation11_spill] sm:$0xff]  ;;  %v16643_v38 = vld [vmem:[#allocation12_spill] sm:$0xff]  ;;  %v9061_v54 = vsel %vm3618_vm9, %v16652_v28, %v16651_v6 }
 0xc29   : > { %v8869_v50 = vadd.f32 %v8841_v59, %v8755_v13  ;;  %v16659_v59 = vld [vmem:[#allocation112_spill] sm:$0xff] }
 0xc2a   : > { %v8932_v17 = vpop.permute.xlu1 %8931  ;;  %v14609_v51 = vpop.permute.xlu0 %8314  ;;  %v8862_v22 = vadd.f32 %v8834_v48, %v8748_v11  ;;  %v8975_v23 = vadd.f32 %v8947_v25, %v8861_v61  ;;  %v6443_v48 = vmul.f32 %v16641_v8, %v16559_v37  ;;  %v16648_v11 = vld [vmem:[#allocation109_spill] sm:$0xff] }
 0xc2b   : > { %16631 = vst [vmem:[#allocation22_spill] sm:$0xff] %v14609_v51  ;;  %v8954_v49 = vsel %vm3546_vm8, %v8932_v17, %v16646_v40  ;;  %v8948_v25 = vsel %vm3546_vm8, %v16644_v9, %v16648_v11 }
 0xc2c   : > { %9039 = vrot.lane.b32.xlu1 %v9002_v41, %s16296_s26  ;;  %9041 = vrot.lane.b32.xlu0 %v9003_v31, %s16296_s26  ;;  %v6441_v41 = vmul.f32 %v16641_v8, %v16557_v46  ;;  %v16642_v31 = vld [vmem:[#allocation36_spill] sm:$0xff]  ;;  %v8982_v5 = vadd.f32 %v8954_v49, %v8868_v43  ;;  %v16653_v8 = vld [vmem:[#allocation97_spill] sm:$0xff]  ;;  %v8976_v9 = vadd.f32 %v8948_v25, %v8862_v22 }
 0xc2d   : > { %v6448_v20 = vmul.f32 %v16643_v38, %v16642_v31  ;;  %v9089_v49 = vadd.f32 %v9061_v54, %v8975_v23 }
 0xc2e   : > { %v14629_v42 = vpop.permute.xlu1 %8935  ;;  %v14631_v47 = vpop.permute.xlu0 %8318 }
 0xc2f   : > { %16639 = vst [vmem:[#allocation124_spill] sm:$0xff] %v14629_v42  ;;  %16640 = vst [vmem:[#allocation14_spill] sm:$0xff] %v14631_v47  ;;  %v8955_v63 = vsel %vm3546_vm8, %v16646_v40, %v14629_v42  ;;  %v16657_v40 = vld [vmem:[#allocation15_spill] sm:$0xff] }
 0xc30   : > { %6478 = vrot.lane.b32.xlu1 %v6441_v41, %s16381_s29  ;;  %6492 = vrot.lane.b32.xlu0 %v6448_v20, %s16381_s29  ;;  %v16650_v41 = vld [vmem:[#allocation35_spill] sm:$0xff]  ;;  %v8983_v43 = vadd.f32 %v8955_v63, %v8869_v50  ;;  %v6671_v42 = vmul.f32 %v16657_v40, %v16557_v46  ;;  %v16662_v50 = vld [vmem:[#allocation20_spill] sm:$0xff] }
 0xc31   : > { %v6450_v20 = vmul.f32 %v16643_v38, %v16650_v41 }
 0xc32   : > { %v9046_v17 = vpop.permute.xlu1 %9045  ;;  %v14655_v61 = vpop.permute.xlu0 %8544 }
 0xc33   : > { %16649 = vst [vmem:[#allocation31_spill] sm:$0xff] %v14655_v61  ;;  %v9068_v24 = vsel %vm3618_vm9, %v9046_v17, %v16653_v8  ;;  %v16658_v17 = vld [vmem:[#allocation16_spill] sm:$0xff] }
 0xc34   : > { %v9096_v18 = vadd.f32 %v9068_v24, %v8982_v5  ;;  %6482 = vrot.lane.b32.xlu1 %v6443_v48, %s16381_s29  ;;  %6496 = vrot.lane.b32.xlu0 %v6450_v20, %s16381_s29  ;;  %v6678_v22 = vmul.f32 %v16658_v17, %v16642_v31  ;;  %v9062_v24 = vsel %vm3618_vm9, %v16651_v6, %v16659_v59 }
 0xc35   : > { %v9090_v54 = vadd.f32 %v9062_v24, %v8976_v9  ;;  %v6673_v20 = vmul.f32 %v16657_v40, %v16559_v37  ;;  %v6680_v6 = vmul.f32 %v16658_v17, %v16650_v41 }
 0xc36   : > { %v14669_v11 = vadd.f32 %v9096_v18, %v9089_v49  ;;  %v14671_v12 = vpop.permute.xlu1 %9049  ;;  %v14673_v28 = vpop.permute.xlu0 %8548  ;;  %v6907_v49 = vmul.f32 %v16662_v50, %v16642_v31 }
 0xc37   : > { %16655 = vst [vmem:[#allocation34_spill] sm:$0xff] %v14671_v12  ;;  %16656 = vst [vmem:[#allocation51_spill] sm:$0xff] %v14673_v28  ;;  %v9069_v23 = vsel %vm3618_vm9, %v16653_v8, %v14671_v12  ;;  %v16661_v8 = vld [vmem:[#allocation19_spill] sm:$0xff] }
 0xc38   : > { %16654 = vst [vmem:[#allocation65_spill] sm:$0xff] %v14669_v11  ;;  %v9097_v48 = vadd.f32 %v9069_v23, %v8983_v43  ;;  %6708 = vrot.lane.b32.xlu1 %v6671_v42, %s16386_s27  ;;  %6722 = vrot.lane.b32.xlu0 %v6678_v22, %s16386_s27  ;;  %v6900_v9 = vmul.f32 %v16661_v8, %v16557_v46  ;;  %v16680_v28 = vld [vmem:[#allocation63_spill] sm:$0xff] }
 0xc39   : > { %v6902_v40 = vmul.f32 %v16661_v8, %v16559_v37  ;;  %v6909_v22 = vmul.f32 %v16662_v50, %v16650_v41 }
 0xc3a   : > { %v14687_v25 = vadd.f32 %v9097_v48, %v9090_v54  ;;  %v14689_v13 = vpop.permute.xlu1 %6591  ;;  %v14691_v5 = vpop.permute.xlu0 %6593  ;;  %v16663_v54 = vld [vmem:[#allocation23_spill] sm:$0xff] }
 0xc3b   : > { %v7130_v48 = vmul.f32 %v16663_v54, %v16557_v46  ;;  %v7132_v58 = vmul.f32 %v16663_v54, %v16559_v37  ;;  %v16671_v54 = vld [vmem:[#allocation113_spill] sm:$0xff] }
 0xc3c   : > { %16660 = vst [vmem:[#allocation101_spill] sm:$0xff] %v14687_v25  ;;  %6712 = vrot.lane.b32.xlu1 %v6673_v20, %s16386_s27  ;;  %6726 = vrot.lane.b32.xlu0 %v6680_v6, %s16386_s27  ;;  %v16664_v20 = vld [vmem:[#allocation24_spill] sm:$0xff]  ;;  %v16667_v25 = vld [vmem:[#allocation10_spill] sm:$0xff]  ;;  %v6734_v39 = vsel %vm3546_vm8, %v16671_v54, %v14350_v1 }
 0xc3d   : > { %v7137_v6 = vmul.f32 %v16664_v20, %v16642_v31 }
 0xc3e   : > { %v14699_v63 = vpop.permute.xlu1 %6595  ;;  %v14701_v42 = vpop.permute.xlu0 %6597 }
 0xc40   : > { %6937 = vrot.lane.b32.xlu1 %v6900_v9, %s10936_s16  ;;  %6951 = vrot.lane.b32.xlu0 %v6907_v49, %s10936_s16  ;;  %v16665_v9 = vld [vmem:[#allocation111_spill] sm:$0xff]  ;;  %v16666_v49 = vld [vmem:[#allocation29_spill] sm:$0xff] }
 0xc41   : > { %v6504_v8 = vsel %vm3355_vm6, %v16665_v9, %v14318_v27  ;;  %v6403_v11 = vmul.f32 %v16667_v25, %v16666_v49  ;;  %v7139_v9 = vmul.f32 %v16664_v20, %v16650_v41 }
 0xc42   : > { %v14709_v18 = vpop.permute.xlu1 %6821  ;;  %v14711_v43 = vpop.permute.xlu0 %6823 }
 0xc43   : > { %v6532_v12 = vadd.f32 %v6504_v8, %v6403_v11  ;;  %v16669_v11 = vld [vmem:[#allocation27_spill] sm:$0xff] }
 0xc44   : > { %6941 = vrot.lane.b32.xlu1 %v6902_v40, %s10936_s16  ;;  %6955 = vrot.lane.b32.xlu0 %v6909_v22, %s10936_s16  ;;  %v16668_v40 = vld [vmem:[#allocation41_spill] sm:$0xff]  ;;  %v7360_v8 = vmul.f32 %v16669_v11, %v16557_v46  ;;  %v7362_v33 = vmul.f32 %v16669_v11, %v16559_v37  ;;  %v16675_v11 = vld [vmem:[#allocation46_spill] sm:$0xff] }
 0xc45   : > { %v6619_v22 = vsel %vm3474_vm7, %v16668_v40, %v14689_v13  ;;  %v16670_v40 = vld [vmem:[#allocation28_spill] sm:$0xff]  ;;  %v7590_v45 = vmul.f32 %v16675_v11, %v16557_v46 }
 0xc46   : > { %v14719_v24 = vpop.permute.xlu1 %6825  ;;  %v14721_v23 = vpop.permute.xlu0 %6827  ;;  %v6647_v49 = vadd.f32 %v6619_v22, %v6532_v12  ;;  %v7367_v35 = vmul.f32 %v16670_v40, %v16642_v31  ;;  %v16672_v12 = vld [vmem:[#allocation42_spill] sm:$0xff]  ;;  %v7369_v54 = vmul.f32 %v16670_v40, %v16650_v41 }
 0xc48   : > { %7167 = vrot.lane.b32.xlu1 %v7130_v48, %s16390_s22  ;;  %7181 = vrot.lane.b32.xlu0 %v7137_v6, %s16390_s22  ;;  %v6762_v22 = vadd.f32 %v6734_v39, %v6647_v49  ;;  %v16673_v39 = vld [vmem:[#allocation116_spill] sm:$0xff] }
 0xc49   : > { %v6963_v49 = vsel %vm6959_vm3, %v16673_v39, %v14390_v57 }
 0xc4a   : > { %v14737_v59 = vpop.permute.xlu1 %7050  ;;  %v14739_v55 = vpop.permute.xlu0 %7052 }
 0xc4c   : > { %7171 = vrot.lane.b32.xlu1 %v7132_v58, %s16390_s22  ;;  %7185 = vrot.lane.b32.xlu0 %v7139_v9, %s16390_s22  ;;  %v6848_v58 = vsel %vm3618_vm9, %v16672_v12, %v14709_v18 }
 0xc4d   : > { %v6876_v9 = vadd.f32 %v6848_v58, %v6762_v22 }
 0xc4e   : > { %v14747_v48 = vpop.permute.xlu1 %7054  ;;  %v14749_v6 = vpop.permute.xlu0 %7056 }
 0xc4f   : > { %v6991_v12 = vadd.f32 %v6963_v49, %v6876_v9  ;;  %v7592_v9 = vmul.f32 %v16675_v11, %v16559_v37 }
 0xc50   : > { %7397 = vrot.lane.b32.xlu1 %v7360_v8, %s10886_s23  ;;  %7411 = vrot.lane.b32.xlu0 %v7367_v35, %s10886_s23  ;;  %v16674_v35 = vld [vmem:[#allocation66_spill] sm:$0xff] }
 0xc51   : > { %v7078_v8 = vsel %vm7074_vm11, %v16674_v35, %v14737_v59  ;;  %v16677_v35 = vld [vmem:[#allocation118_spill] sm:$0xff] }
 0xc52   : > { %v14763_v3 = vpop.permute.xlu1 %7280  ;;  %v14765_v34 = vpop.permute.xlu0 %7282  ;;  %v7193_v32 = vsel %vm7189_vm12, %v16677_v35, %v14436_v52  ;;  %v7827_v35 = vmul.f32 %v16680_v28, %v16642_v31 }
 0xc54   : > { %7401 = vrot.lane.b32.xlu1 %v7362_v33, %s10886_s23  ;;  %7415 = vrot.lane.b32.xlu0 %v7369_v54, %s10886_s23  ;;  %v16676_v33 = vld [vmem:[#allocation61_spill] sm:$0xff]  ;;  %v7106_v54 = vadd.f32 %v7078_v8, %v6991_v12  ;;  %v16678_v8 = vld [vmem:[#allocation58_spill] sm:$0xff] }
 0xc55   : > { %v7597_v36 = vmul.f32 %v16676_v33, %v16642_v31  ;;  %v7599_v49 = vmul.f32 %v16676_v33, %v16650_v41  ;;  %v16679_v33 = vld [vmem:[#allocation48_spill] sm:$0xff] }
 0xc56   : > { %v14779_v58 = vpop.permute.xlu1 %7284  ;;  %v14781_v22 = vpop.permute.xlu0 %7286  ;;  %v7221_v12 = vadd.f32 %v7193_v32, %v7106_v54  ;;  %v7820_v40 = vmul.f32 %v16679_v33, %v16557_v46  ;;  %v16681_v32 = vld [vmem:[#allocation119_spill] sm:$0xff]  ;;  %v7822_v44 = vmul.f32 %v16679_v33, %v16559_v37  ;;  %v16688_v33 = vld [vmem:[#allocation120_spill] sm:$0xff] }
 0xc57   : > { %v7423_v54 = vsel %vm16682_vm0, %v16681_v32, %v14468_v62  ;;  %v7653_v47 = vsel %vm16689_vm15, %v16688_v33, %v14508_v60  ;;  %vm16695_vm0 = vcmask 498688   ;;  %vm16705_vm15 = vcmask 261120  }
 0xc58   : > { %7627 = vrot.lane.b32.xlu1 %v7590_v45, %s10937_s24  ;;  %7641 = vrot.lane.b32.xlu0 %v7597_v36, %s10937_s24  ;;  %v7308_v45 = vsel %vm7304_vm13, %v16678_v8, %v14763_v3 }
 0xc59   : > { %v7336_v36 = vadd.f32 %v7308_v45, %v7221_v12 }
 0xc5a   : > { %v14789_v39 = vpop.permute.xlu1 %7510  ;;  %v14791_v10 = vpop.permute.xlu0 %7512 }
 0xc5b   : > { %v7451_v8 = vadd.f32 %v7423_v54, %v7336_v36  ;;  %v16686_v36 = vld [vmem:[#allocation53_spill] sm:$0xff] }
 0xc5c   : > { %7631 = vrot.lane.b32.xlu1 %v7592_v9, %s10937_s24  ;;  %7645 = vrot.lane.b32.xlu0 %v7599_v49, %s10937_s24  ;;  %v16683_v9 = vld [vmem:[#allocation67_spill] sm:$0xff]  ;;  %v8050_v54 = vmul.f32 %v16686_v36, %v16557_v46  ;;  %v8052_v7 = vmul.f32 %v16686_v36, %v16559_v37  ;;  %v16700_v36 = vld [vmem:[#allocation69_spill] sm:$0xff] }
 0xc5d   : > { %v7538_v49 = vsel %vm16684_vm14, %v16683_v9, %v14789_v39  ;;  %v16687_v9 = vld [vmem:[#allocation77_spill] sm:$0xff]  ;;  %vm16697_vm14 = vcmask 490496  }
 0xc5e   : > { %v14805_v29 = vpop.permute.xlu1 %7514  ;;  %v14807_v11 = vpop.permute.xlu0 %7516  ;;  %v8057_v20 = vmul.f32 %v16687_v9, %v16642_v31  ;;  %v8059_v33 = vmul.f32 %v16687_v9, %v16650_v41  ;;  %v8279_v9 = vmul.f32 %v16700_v36, %v16557_v46 }
 0xc60   : > { %7857 = vrot.lane.b32.xlu1 %v7820_v40, %s10938_s17  ;;  %7871 = vrot.lane.b32.xlu0 %v7827_v35, %s10938_s17  ;;  %v7829_v40 = vmul.f32 %v16680_v28, %v16650_v41  ;;  %v7566_v35 = vadd.f32 %v7538_v49, %v7451_v8  ;;  %v16690_v49 = vld [vmem:[#allocation88_spill] sm:$0xff] }
 0xc62   : > { %v14821_v45 = vpop.permute.xlu1 %7740  ;;  %v14823_v12 = vpop.permute.xlu0 %7742  ;;  %v7681_v8 = vadd.f32 %v7653_v47, %v7566_v35  ;;  %v16694_v47 = vld [vmem:[#allocation121_spill] sm:$0xff] }
 0xc63   : > { %v7883_v35 = vsel %vm16695_vm0, %v16694_v47, %v14550_v26 }
 0xc64   : > { %7861 = vrot.lane.b32.xlu1 %v7822_v44, %s10938_s17  ;;  %7875 = vrot.lane.b32.xlu0 %v7829_v40, %s10938_s17  ;;  %v7768_v44 = vsel %vm16691_vm1, %v16690_v49, %v14821_v45  ;;  %vm16757_vm1 = vcmask 752640  }
 0xc65   : > { %v7796_v40 = vadd.f32 %v7768_v44, %v7681_v8  ;;  %vm16758_vm0 = vmmov %vm16757_vm1 }
 0xc66   : > { %v14831_v32 = vpop.permute.xlu1 %7744  ;;  %v14833_v14 = vpop.permute.xlu0 %7746 }
 0xc67   : > { %16685 = vst [vmem:[#allocation89_spill] sm:$0xff] %v14833_v14  ;;  %v7911_v49 = vadd.f32 %v7883_v35, %v7796_v40  ;;  %v8281_v40 = vmul.f32 %v16700_v36, %v16559_v37 }
 0xc68   : > { %8087 = vrot.lane.b32.xlu1 %v8050_v54, %s10939_s18  ;;  %8101 = vrot.lane.b32.xlu0 %v8057_v20, %s10939_s18  ;;  %v16696_v20 = vld [vmem:[#allocation92_spill] sm:$0xff] }
 0xc6a   : > { %v14847_v28 = vpop.permute.xlu1 %7970  ;;  %v14849_v50 = vpop.permute.xlu0 %7972 }
 0xc6b   : > { %16692 = vst [vmem:[#allocation94_spill] sm:$0xff] %v14847_v28  ;;  %16693 = vst [vmem:[#allocation103_spill] sm:$0xff] %v14849_v50  ;;  %v7998_v54 = vsel %vm16697_vm14, %v16696_v20, %v14847_v28  ;;  %v16704_v20 = vld [vmem:[#allocation43_spill] sm:$0xff]  ;;  %v16710_v28 = vld [vmem:[#allocation82_spill] sm:$0xff] }
 0xc6c   : > { %8091 = vrot.lane.b32.xlu1 %v8052_v7, %s10939_s18  ;;  %8105 = vrot.lane.b32.xlu0 %v8059_v33, %s10939_s18  ;;  %v16701_v7 = vld [vmem:[#allocation80_spill] sm:$0xff]  ;;  %v8026_v33 = vadd.f32 %v7998_v54, %v7911_v49  ;;  %vm16759_vm14 = vmmov %vm16758_vm0 }
 0xc6d   : > { %v8286_v50 = vmul.f32 %v16701_v7, %v16642_v31  ;;  %v8288_v35 = vmul.f32 %v16701_v7, %v16650_v41  ;;  %v16706_v54 = vld [vmem:[#allocation96_spill] sm:$0xff]  ;;  %v16709_v7 = vld [vmem:[#allocation71_spill] sm:$0xff] }
 0xc6e   : > { %v14863_v44 = vpop.permute.xlu1 %7974  ;;  %v14865_v8 = vpop.permute.xlu0 %7976 }
 0xc6f   : > { %16698 = vst [vmem:[#allocation104_spill] sm:$0xff] %v14863_v44  ;;  %16699 = vst [vmem:[#allocation59_spill] sm:$0xff] %v14865_v8  ;;  %v8112_v8 = vsel %vm16705_vm15, %v16704_v20, %v14582_v4  ;;  %v8509_v44 = vmul.f32 %v16709_v7, %v16557_v46  ;;  %v8516_v20 = vmul.f32 %v16710_v28, %v16642_v31  ;;  %vm16760_vm15 = vcmask 523264  }
 0xc70   : > { %8316 = vrot.lane.b32.xlu1 %v8279_v9, %s10940_s28  ;;  %8330 = vrot.lane.b32.xlu0 %v8286_v50, %s10940_s28  ;;  %v8140_v49 = vadd.f32 %v8112_v8, %v8026_v33  ;;  %v16711_v8 = vld [vmem:[#allocation40_spill] sm:$0xff] }
 0xc71   : > { %v8342_v33 = vsel %vm8338_vm4, %v16711_v8, %v14609_v51  ;;  %v16715_v8 = vld [vmem:[#allocation9_spill] sm:$0xff]  ;;  %v16719_v51 = vld [vmem:[#allocation75_spill] sm:$0xff] }
 0xc72   : > { %v14873_v47 = vpop.permute.xlu1 %8199  ;;  %v14875_v14 = vpop.permute.xlu0 %8201 }
 0xc73   : > { %16702 = vst [vmem:[#allocation126_spill] sm:$0xff] %v14873_v47  ;;  %16703 = vst [vmem:[#allocation26_spill] sm:$0xff] %v14875_v14  ;;  %v8227_v9 = vsel %vm8223_vm10, %v16706_v54, %v14873_v47 }
 0xc74   : > { %8320 = vrot.lane.b32.xlu1 %v8281_v40, %s10940_s28  ;;  %8334 = vrot.lane.b32.xlu0 %v8288_v35, %s10940_s28  ;;  %v8255_v50 = vadd.f32 %v8227_v9, %v8140_v49  ;;  %v8511_v9 = vmul.f32 %v16709_v7, %v16559_v37  ;;  %v8518_v49 = vmul.f32 %v16710_v28, %v16650_v41  ;;  %v16718_v28 = vld [vmem:[#allocation13_spill] sm:$0xff] }
 0xc75   : > { %v6563_v37 = vmul.f32 %v16718_v28, %v16642_v31 }
 0xc76   : > { %v14889_v14 = vpop.permute.xlu1 %8203  ;;  %v14891_v36 = vpop.permute.xlu0 %8205  ;;  %v8370_v35 = vadd.f32 %v8342_v33, %v8255_v50  ;;  %v8572_v50 = vsel %vm8568_vm5, %v16715_v8, %v14655_v61  ;;  %v6565_v8 = vmul.f32 %v16718_v28, %v16650_v41 }
 0xc77   : > { %16707 = vst [vmem:[#allocation98_spill] sm:$0xff] %v14889_v14  ;;  %16708 = vst [vmem:[#allocation11_spill] sm:$0xff] %v14891_v36  ;;  %v16714_v36 = vld [vmem:[#allocation100_spill] sm:$0xff] }
 0xc78   : > { %8546 = vrot.lane.b32.xlu1 %v8509_v44, %s10941_s30  ;;  %8560 = vrot.lane.b32.xlu0 %v8516_v20, %s10941_s30 }
 0xc7a   : > { %v14902_v40 = vpop.permute.xlu1 %8429  ;;  %v14904_v54 = vpop.permute.xlu0 %8431 }
 0xc7b   : > { %16712 = vst [vmem:[#allocation36_spill] sm:$0xff] %v14902_v40  ;;  %16713 = vst [vmem:[#allocation12_spill] sm:$0xff] %v14904_v54  ;;  %v8457_v44 = vsel %vm8453_vm2, %v16714_v36, %v14902_v40  ;;  %v8780_v36 = vmul.f32 %v16719_v51, %v16642_v31 }
 0xc7c   : > { %v8485_v20 = vadd.f32 %v8457_v44, %v8370_v35  ;;  %8550 = vrot.lane.b32.xlu1 %v8511_v9, %s10941_s30  ;;  %8564 = vrot.lane.b32.xlu0 %v8518_v49, %s10941_s30  ;;  %v16720_v35 = vld [vmem:[#allocation83_spill] sm:$0xff] }
 0xc7d   : > { %v8622_v9 = vmul.f32 %v16720_v35, %v16502_v16 }
 0xc7e   : > { %v8600_v33 = vadd.f32 %v8572_v50, %v8485_v20  ;;  %v14918_v54 = vpop.permute.xlu1 %8433  ;;  %v14920_v7 = vpop.permute.xlu0 %8435  ;;  %v8782_v50 = vmul.f32 %v16719_v51, %v16650_v41 }
 0xc7f   : > { %16716 = vst [vmem:[#allocation105_spill] sm:$0xff] %v14918_v54  ;;  %16717 = vst [vmem:[#allocation108_spill] sm:$0xff] %v14920_v7 }
 0xc80   : > { %6607 = vrot.lane.b32.xlu1 %v6563_v37, %s16387_s14  ;;  %8823 = vrot.lane.b32.xlu0 %v8780_v36, %s16387_s14  ;;  %v14930_v49 = vadd.f32 %v8622_v9, %v8600_v33  ;;  %v16726_v33 = vld [vmem:[#allocation17_spill] sm:$0xff]  ;;  %v16727_v9 = vld [vmem:[#allocation76_spill] sm:$0xff] }
 0xc81   : > { %v6793_v36 = vmul.f32 %v16726_v33, %v16642_v31 }
 0xc82   : > { %16721 = vst [vmem:[#allocation95_spill] sm:$0xff] %v14930_v49  ;;  %v14932_v44 = vpop.permute.xlu1 %8693  ;;  %v14934_v20 = vpop.permute.xlu0 %8695  ;;  %v8894_v49 = vmul.f32 %v16727_v9, %v16642_v31 }
 0xc83   : > { %16722 = vst [vmem:[#allocation35_spill] sm:$0xff] %v14932_v44  ;;  %16723 = vst [vmem:[#allocation107_spill] sm:$0xff] %v14934_v20 }
 0xc84   : > { %6611 = vrot.lane.b32.xlu1 %v6565_v8, %s16387_s14  ;;  %8827 = vrot.lane.b32.xlu0 %v8782_v50, %s16387_s14  ;;  %v6795_v8 = vmul.f32 %v16726_v33, %v16650_v41  ;;  %v8896_v50 = vmul.f32 %v16727_v9, %v16650_v41 }
 0xc86   : > { %v14942_v7 = vpop.permute.xlu1 %8697  ;;  %v14944_v37 = vpop.permute.xlu0 %8699 }
 0xc87   : > { %16724 = vst [vmem:[#allocation110_spill] sm:$0xff] %v14942_v7  ;;  %16725 = vst [vmem:[#allocation97_spill] sm:$0xff] %v14944_v37 }
 0xc88   : > { %6837 = vrot.lane.b32.xlu1 %v6793_v36, %s16296_s26  ;;  %8937 = vrot.lane.b32.xlu0 %v8894_v49, %s16386_s27  ;;  %v16732_v49 = vld [vmem:[#allocation21_spill] sm:$0xff] }
 0xc89   : > { %v7022_v36 = vmul.f32 %v16732_v49, %v16642_v31 }
 0xc8a   : > { %v14952_v20 = vpop.permute.xlu1 %8807  ;;  %v14954_v44 = vpop.permute.xlu0 %8809 }
 0xc8b   : > { %16728 = vst [vmem:[#allocation15_spill] sm:$0xff] %v14952_v20  ;;  %16729 = vst [vmem:[#allocation16_spill] sm:$0xff] %v14954_v44  ;;  %v16733_v20 = vld [vmem:[#allocation86_spill] sm:$0xff] }
 0xc8c   : > { %6841 = vrot.lane.b32.xlu1 %v6795_v8, %s16296_s26  ;;  %8941 = vrot.lane.b32.xlu0 %v8896_v50, %s16386_s27  ;;  %v9008_v44 = vmul.f32 %v16733_v20, %v16642_v31  ;;  %v7024_v8 = vmul.f32 %v16732_v49, %v16650_v41  ;;  %v9010_v50 = vmul.f32 %v16733_v20, %v16650_v41 }
 0xc8e   : > { %v14962_v37 = vpop.permute.xlu1 %8811  ;;  %v14964_v7 = vpop.permute.xlu0 %8813 }
 0xc8f   : > { %16730 = vst [vmem:[#allocation19_spill] sm:$0xff] %v14962_v37  ;;  %16731 = vst [vmem:[#allocation23_spill] sm:$0xff] %v14964_v7 }
 0xc90   : > { %7066 = vrot.lane.b32.xlu1 %v7022_v36, %s16397_s25  ;;  %9051 = vrot.lane.b32.xlu0 %v9008_v44, %s16296_s26  ;;  %v16738_v44 = vld [vmem:[#allocation25_spill] sm:$0xff] }
 0xc91   : > { %v7252_v36 = vmul.f32 %v16738_v44, %v16642_v31 }
 0xc92   : > { %v14972_v51 = vpop.permute.xlu1 %8921  ;;  %v14974_v9 = vpop.permute.xlu0 %8923 }
 0xc93   : > { %16734 = vst [vmem:[#allocation111_spill] sm:$0xff] %v14972_v51  ;;  %16735 = vst [vmem:[#allocation29_spill] sm:$0xff] %v14974_v9  ;;  %v16739_v51 = vld [vmem:[#allocation55_spill] sm:$0xff] }
 0xc94   : > { %7070 = vrot.lane.b32.xlu1 %v7024_v8, %s16397_s25  ;;  %9055 = vrot.lane.b32.xlu0 %v9010_v50, %s16296_s26  ;;  %v6564_v9 = vmul.f32 %v16718_v28, %v16739_v51  ;;  %v7254_v8 = vmul.f32 %v16738_v44, %v16650_v41  ;;  %v16742_v50 = vld [vmem:[#allocation38_spill] sm:$0xff] }
 0xc96   : > { %v14982_v7 = vpop.permute.xlu1 %8925  ;;  %v14984_v37 = vpop.permute.xlu0 %8927 }
 0xc97   : > { %16736 = vst [vmem:[#allocation10_spill] sm:$0xff] %v14982_v7  ;;  %16737 = vst [vmem:[#allocation41_spill] sm:$0xff] %v14984_v37  ;;  %v6566_v37 = vmul.f32 %v16718_v28, %v16742_v50 }
 0xc98   : > { %7296 = vrot.lane.b32.xlu1 %v7252_v36, %s16401_s0  ;;  %6609 = vrot.lane.b32.xlu0 %v6564_v9, %s16387_s14  ;;  %v16745_v9 = vld [vmem:[#allocation45_spill] sm:$0xff] }
 0xc99   : > { %v7482_v36 = vmul.f32 %v16745_v9, %v16642_v31 }
 0xc9a   : > { %v14992_v61 = vpop.permute.xlu1 %9035  ;;  %v14994_v20 = vpop.permute.xlu0 %9037 }
 0xc9b   : > { %16740 = vst [vmem:[#allocation27_spill] sm:$0xff] %v14992_v61  ;;  %16741 = vst [vmem:[#allocation113_spill] sm:$0xff] %v14994_v20  ;;  %v6794_v20 = vmul.f32 %v16726_v33, %v16739_v51 }
 0xc9c   : > { %7300 = vrot.lane.b32.xlu1 %v7254_v8, %s16401_s0  ;;  %6613 = vrot.lane.b32.xlu0 %v6566_v37, %s16387_s14  ;;  %v7484_v37 = vmul.f32 %v16745_v9, %v16650_v41  ;;  %v6796_v8 = vmul.f32 %v16726_v33, %v16742_v50 }
 0xc9e   : > { %v15002_v7 = vpop.permute.xlu1 %9039  ;;  %v15004_v35 = vpop.permute.xlu0 %9041 }
 0xc9f   : > { %16743 = vst [vmem:[#allocation42_spill] sm:$0xff] %v15002_v7  ;;  %16744 = vst [vmem:[#allocation116_spill] sm:$0xff] %v15004_v35 }
 0xca0   : > { %7526 = vrot.lane.b32.xlu1 %v7482_v36, %s10942_s20  ;;  %6839 = vrot.lane.b32.xlu0 %v6794_v20, %s16296_s26  ;;  %v16748_v36 = vld [vmem:[#allocation47_spill] sm:$0xff]  ;;  %v7023_v20 = vmul.f32 %v16732_v49, %v16739_v51 }
 0xca1   : > { %v7712_v54 = vmul.f32 %v16748_v36, %v16642_v31  ;;  %v7714_v33 = vmul.f32 %v16748_v36, %v16650_v41 }
 0xca2   : > { %v6479_v61 = vpop.permute.xlu1 %6478  ;;  %v15012_v28 = vpop.permute.xlu0 %6492 }
 0xca3   : > { %16746 = vst [vmem:[#allocation66_spill] sm:$0xff] %v15012_v28 }
 0xca4   : > { %7530 = vrot.lane.b32.xlu1 %v7484_v37, %s10942_s20  ;;  %6843 = vrot.lane.b32.xlu0 %v6796_v8, %s16296_s26  ;;  %v7025_v37 = vmul.f32 %v16732_v49, %v16742_v50 }
 0xca6   : > { %v6483_v35 = vpop.permute.xlu1 %6482  ;;  %v15020_v7 = vpop.permute.xlu0 %6496 }
 0xca7   : > { %16747 = vst [vmem:[#allocation46_spill] sm:$0xff] %v15020_v7 }
 0xca8   : > { %7756 = vrot.lane.b32.xlu1 %v7712_v54, %s10943_s13  ;;  %7068 = vrot.lane.b32.xlu0 %v7023_v20, %s16397_s25  ;;  %v16751_v54 = vld [vmem:[#allocation50_spill] sm:$0xff]  ;;  %v7253_v20 = vmul.f32 %v16738_v44, %v16739_v51 }
 0xca9   : > { %v7942_v14 = vmul.f32 %v16751_v54, %v16642_v31  ;;  %v7944_v49 = vmul.f32 %v16751_v54, %v16650_v41 }
 0xcaa   : > { %v6709_v28 = vpop.permute.xlu1 %6708  ;;  %v15028_v40 = vpop.permute.xlu0 %6722 }
 0xcab   : > { %16749 = vst [vmem:[#allocation118_spill] sm:$0xff] %v15028_v40 }
 0xcac   : > { %7760 = vrot.lane.b32.xlu1 %v7714_v33, %s10943_s13  ;;  %7072 = vrot.lane.b32.xlu0 %v7025_v37, %s16397_s25  ;;  %v7255_v33 = vmul.f32 %v16738_v44, %v16742_v50  ;;  %v6505_v37 = vsel %vm3355_vm6, %v14318_v27, %v6479_v61  ;;  %v16754_v27 = vld [vmem:[#allocation68_spill] sm:$0xff] }
 0xcad   : > { %v8171_v26 = vmul.f32 %v16754_v27, %v16642_v31 }
 0xcae   : > { %v6713_v8 = vpop.permute.xlu1 %6712  ;;  %v15036_v7 = vpop.permute.xlu0 %6726 }
 0xcaf   : > { %16750 = vst [vmem:[#allocation58_spill] sm:$0xff] %v15036_v7  ;;  %v6506_v7 = vsel %vm3355_vm6, %v6479_v61, %v14332_v30  ;;  %v7483_v61 = vmul.f32 %v16745_v9, %v16739_v51 }
 0xcb0   : > { %7986 = vrot.lane.b32.xlu1 %v7942_v14, %s10944_s21  ;;  %7298 = vrot.lane.b32.xlu0 %v7253_v20, %s16401_s0  ;;  %v6404_v14 = vmul.f32 %v16667_v25, %v16502_v16  ;;  %v6405_v20 = vmul.f32 %v16667_v25, %v16557_v46  ;;  %v6507_v16 = vsel %vm3355_vm6, %v14332_v30, %v6483_v35 }
 0xcb1   : > { %v6406_v46 = vmul.f32 %v16667_v25, %v16509_v0  ;;  %v6735_v30 = vsel %vm3546_vm8, %v14350_v1, %v6709_v28  ;;  %v6736_v25 = vsel %vm3546_vm8, %v6709_v28, %v14378_v15  ;;  %v6622_v1 = vsel %vm3474_vm7, %v14699_v63, %v14701_v42  ;;  %v16755_v28 = vld [vmem:[#allocation70_spill] sm:$0xff] }
 0xcb2   : > { %v6938_v40 = vpop.permute.xlu1 %6937  ;;  %v15044_v47 = vpop.permute.xlu0 %6951  ;;  %v6534_v4 = vadd.f32 %v6506_v7, %v6405_v20  ;;  %v8173_v7 = vmul.f32 %v16754_v27, %v16650_v41 }
 0xcb3   : > { %16752 = vst [vmem:[#allocation48_spill] sm:$0xff] %v15044_v47  ;;  %v6533_v47 = vadd.f32 %v6505_v37, %v6404_v14  ;;  %v6965_v42 = vsel %vm6959_vm3, %v6938_v40, %v14410_v2 }
 0xcb4   : > { %7990 = vrot.lane.b32.xlu1 %v7944_v49, %s10944_s21  ;;  %7302 = vrot.lane.b32.xlu0 %v7255_v33, %s16401_s0  ;;  %v6620_v49 = vsel %vm3474_vm7, %v14689_v13, %v14691_v5  ;;  %v6621_v33 = vsel %vm3474_vm7, %v14691_v5, %v14699_v63  ;;  %v6850_v63 = vsel %vm3618_vm9, %v14711_v43, %v14719_v24 }
 0xcb5   : > { %v6648_v35 = vadd.f32 %v6620_v49, %v6533_v47  ;;  %v6649_v37 = vadd.f32 %v6621_v33, %v6534_v4 }
 0xcb6   : > { %v6942_v21 = vpop.permute.xlu1 %6941  ;;  %v15060_v44 = vpop.permute.xlu0 %6955 }
 0xcb7   : > { %16753 = vst [vmem:[#allocation119_spill] sm:$0xff] %v15060_v44  ;;  %v6763_v13 = vadd.f32 %v6735_v30, %v6648_v35  ;;  %v6764_v44 = vadd.f32 %v6736_v25, %v6649_v37  ;;  %v16756_v37 = vld [vmem:[#allocation84_spill] sm:$0xff] }
 0xcb8   : > { %8215 = vrot.lane.b32.xlu1 %v8171_v26, %s10945_s19  ;;  %7528 = vrot.lane.b32.xlu0 %v7483_v61, %s10942_s20  ;;  %v6535_v26 = vadd.f32 %v6507_v16, %v6406_v46  ;;  %v7485_v61 = vmul.f32 %v16745_v9, %v16742_v50  ;;  %v6737_v46 = vsel %vm3546_vm8, %v14378_v15, %v6713_v8 }
 0xcb9   : > { %v8401_v9 = vmul.f32 %v16755_v28, %v16642_v31  ;;  %v7713_v16 = vmul.f32 %v16748_v36, %v16739_v51  ;;  %v6964_v15 = vsel %vm6959_vm3, %v14390_v57, %v6938_v40  ;;  %v6878_v33 = vadd.f32 %v6850_v63, %v6764_v44 }
 0xcba   : > { %v7168_v14 = vpop.permute.xlu1 %7167  ;;  %v15084_v20 = vpop.permute.xlu0 %7181  ;;  %v6650_v4 = vadd.f32 %v6622_v1, %v6535_v26  ;;  %v7715_v57 = vmul.f32 %v16748_v36, %v16742_v50  ;;  %v6851_v40 = vsel %vm3618_vm9, %v14719_v24, %v14721_v23  ;;  %v6966_v44 = vsel %vm6959_vm3, %v14410_v2, %v6942_v21 }
 0xcbb   : > { %v6993_v25 = vadd.f32 %v6965_v42, %v6878_v33  ;;  %v7080_v36 = vsel %vm7074_vm11, %v14739_v55, %v14747_v48  ;;  %v7194_v24 = vsel %vm7189_vm12, %v14436_v52, %v7168_v14  ;;  %v7195_v2 = vsel %vm7189_vm12, %v7168_v14, %v14450_v56 }
 0xcbc   : > { %8219 = vrot.lane.b32.xlu1 %v8173_v7, %s10945_s19  ;;  %7532 = vrot.lane.b32.xlu0 %v7485_v61, %s10942_s20  ;;  %v6849_v7 = vsel %vm3618_vm9, %v14709_v18, %v14711_v43  ;;  %v6765_v8 = vadd.f32 %v6737_v46, %v6650_v4  ;;  %v8403_v43 = vmul.f32 %v16755_v28, %v16650_v41 }
 0xcbd   : > { %v6877_v49 = vadd.f32 %v6849_v7, %v6763_v13  ;;  %v8666_v61 = vmul.f32 %v16756_v37, %v16642_v31  ;;  %v7079_v13 = vsel %vm7074_vm11, %v14737_v59, %v14739_v55  ;;  %v7108_v1 = vadd.f32 %v7080_v36, %v6993_v25 }
 0xcbe   : > { %v7172_v5 = vpop.permute.xlu1 %7171  ;;  %v15095_v47 = vpop.permute.xlu0 %7185  ;;  %v6879_v35 = vadd.f32 %v6851_v40, %v6765_v8  ;;  %v7081_v55 = vsel %vm7074_vm11, %v14747_v48, %v14749_v6  ;;  %v7945_v42 = vmul.f32 %v16751_v54, %v16742_v50  ;;  %v7309_v8 = vsel %vm7304_vm13, %v14763_v3, %v14765_v34 }
 0xcbf   : > { %v6992_v30 = vadd.f32 %v6964_v15, %v6877_v49  ;;  %v7196_v52 = vsel %vm7189_vm12, %v14450_v56, %v7172_v5  ;;  %v8668_v15 = vmul.f32 %v16756_v37, %v16650_v41  ;;  %v7310_v48 = vsel %vm7304_vm13, %v14765_v34, %v14779_v58 }
 0xcc0   : > { %8445 = vrot.lane.b32.xlu1 %v8401_v9, %s10946_s3  ;;  %7758 = vrot.lane.b32.xlu0 %v7713_v16, %s10943_s13  ;;  %v6994_v21 = vadd.f32 %v6966_v44, %v6879_v35  ;;  %v7943_v9 = vmul.f32 %v16751_v54, %v16739_v51  ;;  %v7223_v16 = vadd.f32 %v7195_v2, %v7108_v1 }
 0xcc1   : > { %v7107_v23 = vadd.f32 %v7079_v13, %v6992_v30  ;;  %v8172_v34 = vmul.f32 %v16754_v27, %v16739_v51  ;;  %v8174_v40 = vmul.f32 %v16754_v27, %v16742_v50  ;;  %v7539_v44 = vsel %vm16760_vm15, %v14789_v39, %v14791_v10 }
 0xcc2   : > { %v7398_v18 = vpop.permute.xlu1 %7397  ;;  %v15113_v26 = vpop.permute.xlu0 %7411  ;;  %v7109_v14 = vadd.f32 %v7081_v55, %v6994_v21  ;;  %v7338_v33 = vadd.f32 %v7310_v48, %v7223_v16  ;;  %v6451_v27 = vmul.f32 %v16643_v38, %v16742_v50  ;;  %v16775_v48 = vld [vmem:[#allocation89_spill] sm:$0xff] }
 0xcc3   : > { %v7222_v59 = vadd.f32 %v7194_v24, %v7107_v23  ;;  %v7424_v56 = vsel %vm16757_vm1, %v14468_v62, %v7398_v18  ;;  %v7425_v6 = vsel %vm16758_vm0, %v7398_v18, %v14496_v19  ;;  %v6449_v62 = vmul.f32 %v16643_v38, %v16739_v51  ;;  %vm16761_vm1 = vmmov %vm16760_vm15 }
 0xcc4   : > { %8449 = vrot.lane.b32.xlu1 %v8403_v43, %s10946_s3  ;;  %7762 = vrot.lane.b32.xlu0 %v7715_v57, %s10943_s13  ;;  %v7224_v5 = vadd.f32 %v7196_v52, %v7109_v14  ;;  %v7453_v30 = vadd.f32 %v7425_v6, %v7338_v33  ;;  %v7311_v18 = vsel %vm7304_vm13, %v14779_v58, %v14781_v22  ;;  %vm16762_vm0 = vcmask 515072   ;;  %vm16765_vm15 = vmmov %vm16761_vm1  ;;  %v16777_v33 = vld [vmem:[#allocation103_spill] sm:$0xff] }
 0xcc5   : > { %v7337_v49 = vadd.f32 %v7309_v8, %v7222_v59  ;;  %v7540_v35 = vsel %vm16761_vm1, %v14791_v10, %v14805_v29  ;;  %v7541_v10 = vsel %vm16765_vm15, %v14805_v29, %v14807_v11  ;;  %vm16766_vm1 = vmmov %vm16762_vm0  ;;  %v8402_v38 = vmul.f32 %v16755_v28, %v16739_v51  ;;  %v16770_v11 = vld [vmem:[#allocation90_spill] sm:$0xff] }
 0xcc6   : > { %v7402_v46 = vpop.permute.xlu1 %7401  ;;  %v15138_v4 = vpop.permute.xlu0 %7415  ;;  %v7339_v57 = vadd.f32 %v7311_v18, %v7224_v5  ;;  %v7568_v13 = vadd.f32 %v7540_v35, %v7453_v30  ;;  %vm16771_vm15 = vcmask 498688   ;;  %v16772_v59 = vld [vmem:[#allocation18_spill] sm:$0xff]  ;;  %v6681_v8 = vmul.f32 %v16658_v17, %v16742_v50  ;;  %v16787_v35 = vld [vmem:[#allocation20_spill] sm:$0xff] }
 0xcc7   : > { %v7452_v54 = vadd.f32 %v7424_v56, %v7337_v49  ;;  %v7426_v43 = vsel %vm16759_vm14, %v14496_v19, %v7402_v46  ;;  %vm16763_vm14 = vmmov %vm16762_vm0  ;;  %v6679_v46 = vmul.f32 %v16658_v17, %v16739_v51  ;;  %v8667_v49 = vmul.f32 %v16756_v37, %v16739_v51  ;;  %v16780_v17 = vld [vmem:[#allocation104_spill] sm:$0xff] }
 0xcc8   : > { %8709 = vrot.lane.b32.xlu1 %v8666_v61, %s16381_s29  ;;  %7988 = vrot.lane.b32.xlu0 %v7943_v9, %s10944_s21  ;;  %v7454_v22 = vadd.f32 %v7426_v43, %v7339_v57 }
 0xcc9   : > { %v7567_v61 = vadd.f32 %v7539_v44, %v7452_v54 }
 0xcca   : > { %v7628_v7 = vpop.permute.xlu1 %7627  ;;  %v15149_v63 = vpop.permute.xlu0 %7641  ;;  %v7569_v21 = vadd.f32 %v7541_v10, %v7454_v22  ;;  %v8669_v10 = vmul.f32 %v16756_v37, %v16742_v50 }
 0xccb   : > { %v7654_v58 = vsel %vm16762_vm0, %v14508_v60, %v7628_v7  ;;  %v7655_v19 = vsel %vm16763_vm14, %v7628_v7, %v14528_v53  ;;  %vm16768_vm0 = vcmask 506880  }
 0xccc   : > { %8713 = vrot.lane.b32.xlu1 %v8668_v15, %s16381_s29  ;;  %7992 = vrot.lane.b32.xlu0 %v7945_v42, %s10944_s21  ;;  %v7682_v39 = vadd.f32 %v7654_v58, %v7567_v61  ;;  %v7683_v2 = vadd.f32 %v7655_v19, %v7568_v13  ;;  %v7769_v9 = vsel %vm16768_vm0, %v14821_v45, %v14823_v12  ;;  %vm16769_vm14 = vmmov %vm16768_vm0  ;;  %v16788_v61 = vld [vmem:[#allocation59_spill] sm:$0xff] }
 0xccd   : > { %v7770_v29 = vsel %vm16769_vm14, %v14823_v12, %v14831_v32  ;;  %v8404_v12 = vmul.f32 %v16755_v28, %v16742_v50  ;;  %v7771_v56 = vsel %vm16768_vm0, %v14831_v32, %v16775_v48  ;;  %v16778_v28 = vld [vmem:[#allocation94_spill] sm:$0xff]  ;;  %vm16783_vm0 = vcmask 261120  }
 0xcce   : > { %v7632_v3 = vpop.permute.xlu1 %7631  ;;  %v15167_v25 = vpop.permute.xlu0 %7645  ;;  %v7797_v52 = vadd.f32 %v7769_v9, %v7682_v39  ;;  %v7798_v14 = vadd.f32 %v7770_v29, %v7683_v2  ;;  %v16782_v32 = vld [vmem:[#allocation30_spill] sm:$0xff]  ;;  %v6908_v58 = vmul.f32 %v16787_v35, %v16739_v51 }
 0xccf   : > { %v7656_v60 = vsel %vm16766_vm1, %v14528_v53, %v7632_v3  ;;  %vm16773_vm1 = vmmov %vm16771_vm15  ;;  %v16795_v29 = vld [vmem:[#allocation22_spill] sm:$0xff] }
 0xcd0   : > { %8217 = vrot.lane.b32.xlu0 %v8172_v34, %s10945_s19  ;;  %6494 = vrot.lane.b32.xlu1 %v6449_v62, %s16381_s29  ;;  %v7684_v55 = vadd.f32 %v7656_v60, %v7569_v21  ;;  %vm16776_vm14 = vmmov %vm16773_vm1  ;;  %v16784_v34 = vld [vmem:[#allocation91_spill] sm:$0xff]  ;;  %v6910_v60 = vmul.f32 %v16787_v35, %v16742_v50  ;;  %v16792_v21 = vld [vmem:[#allocation26_spill] sm:$0xff] }
 0xcd1   : > { %v16799_v48 = vld [vmem:[#allocation74_spill] sm:$0xff]  ;;  %v16806_v35 = vld [vmem:[#allocation85_spill] sm:$0xff] }
 0xcd2   : > { %v7858_v36 = vpop.permute.xlu1 %7857  ;;  %v15192_v24 = vpop.permute.xlu0 %7871  ;;  %v7799_v5 = vadd.f32 %v7771_v56, %v7684_v55  ;;  %v16800_v56 = vld [vmem:[#allocation37_spill] sm:$0xff] }
 0xcd3   : > { %16764 = vst [vmem:[#allocation67_spill] sm:$0xff] %v15192_v24  ;;  %v7884_v53 = vsel %vm16771_vm15, %v16770_v11, %v7858_v36  ;;  %v7885_v16 = vsel %vm16773_vm1, %v7858_v36, %v16772_v59  ;;  %vm16779_vm15 = vcmask 490496  }
 0xcd4   : > { %8221 = vrot.lane.b32.xlu0 %v8174_v40, %s10945_s19  ;;  %6498 = vrot.lane.b32.xlu1 %v6451_v27, %s16381_s29  ;;  %v7912_v7 = vadd.f32 %v7884_v53, %v7797_v52  ;;  %v7913_v15 = vadd.f32 %v7885_v16, %v7798_v14  ;;  %v7999_v54 = vsel %vm16779_vm15, %v16778_v28, %v16777_v33  ;;  %vm16781_vm1 = vmmov %vm16779_vm15  ;;  %v16796_v53 = vld [vmem:[#allocation14_spill] sm:$0xff] }
 0xcd5   : > { %v8000_v30 = vsel %vm16781_vm1, %v16777_v33, %v16780_v17  ;;  %vm16789_vm15 = vmmov %vm16781_vm1 }
 0xcd6   : > { %v7862_v23 = vpop.permute.xlu1 %7861  ;;  %v15203_v1 = vpop.permute.xlu0 %7875  ;;  %v8027_v43 = vadd.f32 %v7999_v54, %v7912_v7  ;;  %v8028_v57 = vadd.f32 %v8000_v30, %v7913_v15  ;;  %v8001_v13 = vsel %vm16789_vm15, %v16780_v17, %v16788_v61  ;;  %vm16790_vm1 = vmmov %vm16783_vm0  ;;  %v16802_v54 = vld [vmem:[#allocation12_spill] sm:$0xff]  ;;  %vm16845_vm15 = vcmask 515072  }
 0xcd7   : > { %16767 = vst [vmem:[#allocation53_spill] sm:$0xff] %v15203_v1  ;;  %v7886_v6 = vsel %vm16776_vm14, %v16772_v59, %v7862_v23  ;;  %vm16785_vm14 = vmmov %vm16783_vm0  ;;  %v16793_v23 = vld [vmem:[#allocation126_spill] sm:$0xff]  ;;  %v16803_v17 = vld [vmem:[#allocation36_spill] sm:$0xff] }
 0xcd8   : > { %8447 = vrot.lane.b32.xlu0 %v8402_v38, %s10946_s3  ;;  %6724 = vrot.lane.b32.xlu1 %v6679_v46, %s16386_s27  ;;  %v7914_v18 = vadd.f32 %v7886_v6, %v7799_v5  ;;  %v8228_v38 = vsel %vm8223_vm10, %v16793_v23, %v16792_v21  ;;  %v16794_v46 = vld [vmem:[#allocation98_spill] sm:$0xff]  ;;  %v8776_v6 = vmul.f32 %v16800_v56, %v16799_v48  ;;  %v16801_v5 = vld [vmem:[#allocation11_spill] sm:$0xff]  ;;  %v16811_v23 = vld [vmem:[#allocation108_spill] sm:$0xff] }
 0xcd9   : > { %v8229_v9 = vsel %vm8223_vm10, %v16792_v21, %v16794_v46  ;;  %v8458_v30 = vsel %vm8453_vm2, %v16803_v17, %v16802_v54 }
 0xcda   : > { %v8088_v45 = vpop.permute.xlu1 %8087  ;;  %v15221_v42 = vpop.permute.xlu0 %8101  ;;  %v8029_v27 = vadd.f32 %v8001_v13, %v7914_v18  ;;  %v16809_v13 = vld [vmem:[#allocation31_spill] sm:$0xff] }
 0xcdb   : > { %16774 = vst [vmem:[#allocation120_spill] sm:$0xff] %v15221_v42  ;;  %v8113_v3 = vsel %vm16783_vm0, %v16782_v32, %v8088_v45  ;;  %v8114_v62 = vsel %vm16785_vm14, %v8088_v45, %v16784_v34  ;;  %v16804_v32 = vld [vmem:[#allocation105_spill] sm:$0xff]  ;;  %vm16840_vm0 = vcmask 752640   ;;  %vm16842_vm14 = vcmask 523264  }
 0xcdc   : > { %8451 = vrot.lane.b32.xlu0 %v8404_v12, %s10946_s3  ;;  %6728 = vrot.lane.b32.xlu1 %v6681_v8, %s16386_s27  ;;  %v8141_v19 = vadd.f32 %v8113_v3, %v8027_v43  ;;  %v8142_v22 = vadd.f32 %v8114_v62, %v8028_v57  ;;  %v16798_v12 = vld [vmem:[#allocation24_spill] sm:$0xff]  ;;  %v8459_v3 = vsel %vm8453_vm2, %v16802_v54, %v16804_v32 }
 0xcdd   : > { %v7138_v8 = vmul.f32 %v16798_v12, %v16739_v51 }
 0xcde   : > { %v8092_v40 = vpop.permute.xlu1 %8091  ;;  %v15246_v44 = vpop.permute.xlu0 %8105  ;;  %v8256_v55 = vadd.f32 %v8228_v38, %v8141_v19  ;;  %v8257_v52 = vadd.f32 %v8229_v9, %v8142_v22  ;;  %v16807_v19 = vld [vmem:[#allocation33_spill] sm:$0xff]  ;;  %v16808_v22 = vld [vmem:[#allocation83_spill] sm:$0xff]  ;;  %v8460_v38 = vsel %vm8453_vm2, %v16804_v32, %v16811_v23  ;;  %v16823_v32 = vld [vmem:[#allocation52_spill] sm:$0xff] }
 0xcdf   : > { %16786 = vst [vmem:[#allocation88_spill] sm:$0xff] %v15246_v44  ;;  %v8115_v36 = vsel %vm16790_vm1, %v16784_v34, %v8092_v40  ;;  %v7140_v34 = vmul.f32 %v16798_v12, %v16742_v50  ;;  %v8623_v61 = vmul.f32 %v16808_v22, %v16807_v19  ;;  %v16818_v12 = vld [vmem:[#allocation66_spill] sm:$0xff]  ;;  %v16827_v19 = vld [vmem:[#allocation131_spill] sm:$0xff]  ;;  %vm16847_vm1 = vcmask 506880  }
 0xce0   : > { %8711 = vrot.lane.b32.xlu0 %v8667_v49, %s16381_s29  ;;  %6953 = vrot.lane.b32.xlu1 %v6908_v58, %s10936_s16  ;;  %v8143_v16 = vadd.f32 %v8115_v36, %v8029_v27  ;;  %v8230_v49 = vsel %vm8223_vm10, %v16794_v46, %v16801_v5  ;;  %v8890_v58 = vmul.f32 %v16800_v56, %v16806_v35  ;;  %v16810_v27 = vld [vmem:[#allocation51_spill] sm:$0xff]  ;;  %v16812_v46 = vld [vmem:[#allocation28_spill] sm:$0xff] }
 0xce1   : > { %v7368_v9 = vmul.f32 %v16812_v46, %v16739_v51  ;;  %v16820_v5 = vld [vmem:[#allocation32_spill] sm:$0xff]  ;;  %v7370_v17 = vmul.f32 %v16812_v46, %v16742_v50 }
 0xce2   : > { %v8317_v39 = vpop.permute.xlu1 %8316  ;;  %v15257_v2 = vpop.permute.xlu0 %8330  ;;  %v8258_v28 = vadd.f32 %v8230_v49, %v8143_v16  ;;  %v16816_v16 = vld [vmem:[#allocation78_spill] sm:$0xff]  ;;  %v16821_v49 = vld [vmem:[#allocation87_spill] sm:$0xff] }
 0xce3   : > { %16791 = vst [vmem:[#allocation121_spill] sm:$0xff] %v15257_v2  ;;  %v8343_v11 = vsel %vm8338_vm4, %v16795_v29, %v8317_v39  ;;  %v8344_v59 = vsel %vm8338_vm4, %v8317_v39, %v16796_v53 }
 0xce4   : > { %8715 = vrot.lane.b32.xlu0 %v8669_v10, %s16381_s29  ;;  %6957 = vrot.lane.b32.xlu1 %v6910_v60, %s10936_s16  ;;  %v8371_v14 = vadd.f32 %v8343_v11, %v8256_v55  ;;  %v8372_v7 = vadd.f32 %v8344_v59, %v8257_v52  ;;  %v8624_v10 = vmul.f32 %v16808_v22, %v16509_v0 }
 0xce5   : > { %v9004_v55 = vmul.f32 %v16800_v56, %v16816_v16 }
 0xce6   : > { %v8321_v15 = vpop.permute.xlu1 %8320  ;;  %v15275_v45 = vpop.permute.xlu0 %8334  ;;  %v8486_v18 = vadd.f32 %v8458_v30, %v8371_v14  ;;  %v8487_v57 = vadd.f32 %v8459_v3, %v8372_v7  ;;  %v16817_v7 = vld [vmem:[#allocation54_spill] sm:$0xff] }
 0xce7   : > { %16797 = vst [vmem:[#allocation92_spill] sm:$0xff] %v15275_v45  ;;  %v8345_v33 = vsel %vm8338_vm4, %v16796_v53, %v8321_v15  ;;  %v8625_v15 = vmul.f32 %v16808_v22, %v16817_v7  ;;  %v16833_v7 = vld [vmem:[#allocation99_spill] sm:$0xff] }
 0xce8   : > { %7183 = vrot.lane.b32.xlu1 %v7138_v8, %s16390_s22  ;;  %8815 = vrot.lane.b32.xlu0 %v8776_v6, %s16387_s14  ;;  %v8373_v62 = vadd.f32 %v8345_v33, %v8258_v28  ;;  %v16819_v8 = vld [vmem:[#allocation129_spill] sm:$0xff]  ;;  %v9152_v6 = vld [vmem:[#allocation3] sm:$0x1]  ;;  %v6410_v33 = vmul.f32 %v16821_v49, %v16820_v5 }
 0xce9   : > { %v6511_v48 = vsel %vm3355_vm6, %v16819_v8, %v16818_v12  ;;  %v16835_v5 = vld [vmem:[#allocation77_spill] sm:$0xff] }
 0xcea   : > { %v8547_v43 = vpop.permute.xlu1 %8546  ;;  %v15296_v40 = vpop.permute.xlu0 %8560  ;;  %v8488_v53 = vadd.f32 %v8460_v38, %v8373_v62  ;;  %v16830_v38 = vld [vmem:[#allocation63_spill] sm:$0xff] }
 0xceb   : > { %16805 = vst [vmem:[#allocation69_spill] sm:$0xff] %v15296_v40  ;;  %v8573_v36 = vsel %vm8568_vm5, %v16809_v13, %v8547_v43  ;;  %v8574_v39 = vsel %vm8568_vm5, %v8547_v43, %v16810_v27  ;;  %v7828_v46 = vmul.f32 %v16830_v38, %v16739_v51 }
 0xcec   : > { %v8601_v60 = vadd.f32 %v8573_v36, %v8486_v18  ;;  %v8602_v21 = vadd.f32 %v8574_v39, %v8487_v57  ;;  %7187 = vrot.lane.b32.xlu1 %v7140_v34, %s16390_s22  ;;  %8929 = vrot.lane.b32.xlu0 %v8890_v58, %s16386_s27  ;;  %v6539_v34 = vadd.f32 %v6511_v48, %v6410_v33  ;;  %v16825_v57 = vld [vmem:[#allocation61_spill] sm:$0xff]  ;;  %v16826_v58 = vld [vmem:[#allocation118_spill] sm:$0xff] }
 0xced   : > { %v7598_v35 = vmul.f32 %v16825_v57, %v16739_v51  ;;  %v6741_v22 = vsel %vm3546_vm8, %v16827_v19, %v16826_v58  ;;  %v16828_v39 = vld [vmem:[#allocation49_spill] sm:$0xff]  ;;  %v8058_v33 = vmul.f32 %v16835_v5, %v16739_v51 }
 0xcee   : > { %v15315_v29 = vadd.f32 %v8623_v61, %v8601_v60  ;;  %v15317_v11 = vadd.f32 %v8624_v10, %v8602_v21  ;;  %v8551_v59 = vpop.permute.xlu1 %8550  ;;  %v15319_v0 = vpop.permute.xlu0 %8564 }
 0xcef   : > { %16815 = vst [vmem:[#allocation71_spill] sm:$0xff] %v15319_v0  ;;  %v8575_v52 = vsel %vm8568_vm5, %v16810_v27, %v8551_v59  ;;  %v7600_v27 = vmul.f32 %v16825_v57, %v16742_v50  ;;  %v8060_v57 = vmul.f32 %v16835_v5, %v16742_v50 }
 0xcf0   : > { %16813 = vst [vmem:[#allocation43_spill] sm:$0xff] %v15315_v29  ;;  %16814 = vst [vmem:[#allocation96_spill] sm:$0xff] %v15317_v11  ;;  %v8603_v14 = vadd.f32 %v8575_v52, %v8488_v53  ;;  %7413 = vrot.lane.b32.xlu1 %v7368_v9, %s10886_s23  ;;  %9043 = vrot.lane.b32.xlu0 %v9004_v55, %s16296_s26  ;;  %v16831_v9 = vld [vmem:[#allocation48_spill] sm:$0xff]  ;;  %v16832_v53 = vld [vmem:[#allocation115_spill] sm:$0xff] }
 0xcf1   : > { %v6970_v59 = vsel %vm6959_vm3, %v16832_v53, %v16831_v9 }
 0xcf2   : > { %v15334_v28 = vpop.permute.xlu1 %6607  ;;  %v15336_v54 = vpop.permute.xlu0 %8823  ;;  %v15340_v30 = vadd.f32 %v8625_v15, %v8603_v14  ;;  %v7830_v14 = vmul.f32 %v16830_v38, %v16742_v50 }
 0xcf3   : > { %v6626_v3 = vsel %vm3474_vm7, %v16823_v32, %v15334_v28 }
 0xcf4   : > { %16822 = vst [vmem:[#allocation40_spill] sm:$0xff] %v15340_v30  ;;  %7417 = vrot.lane.b32.xlu1 %v7370_v17, %s10886_s23  ;;  %9155 = vperm.xlu0 %10512, %v9152_v6   ;;  %v6654_v62 = vadd.f32 %v6626_v3, %v6539_v34  ;;  %v16836_v17 = vld [vmem:[#allocation60_spill] sm:$0xff] }
 0xcf5   : > { %v7200_v32 = vsel %vm7189_vm12, %v16836_v17, %v15084_v20 }
 0xcf6   : > { %v15346_v18 = vpop.permute.xlu1 %6611  ;;  %v15348_v43 = vpop.permute.xlu0 %8827  ;;  %v6769_v13 = vadd.f32 %v6741_v22, %v6654_v62 }
 0xcf7   : > { %16824 = vst [vmem:[#allocation100_spill] sm:$0xff] %v15348_v43 }
 0xcf8   : > { %7643 = vrot.lane.b32.xlu1 %v7598_v35, %s10937_s24  ;;  %v16837_v35 = vld [vmem:[#allocation57_spill] sm:$0xff] }
 0xcfa   : > { %v15356_v61 = vpop.permute.xlu1 %6837  ;;  %v15358_v36 = vpop.permute.xlu0 %8937 }
 0xcfb   : > { %v6855_v10 = vsel %vm3618_vm9, %v16828_v39, %v15356_v61  ;;  %v16838_v39 = vld [vmem:[#allocation80_spill] sm:$0xff] }
 0xcfc   : > { %v6883_v60 = vadd.f32 %v6855_v10, %v6769_v13  ;;  %7647 = vrot.lane.b32.xlu1 %v7600_v27, %s10937_s24  ;;  %v8287_v10 = vmul.f32 %v16838_v39, %v16739_v51 }
 0xcfe   : > { %v15366_v21 = vpop.permute.xlu1 %6841  ;;  %v15368_v23 = vpop.permute.xlu0 %8941  ;;  %v6998_v55 = vadd.f32 %v6970_v59, %v6883_v60  ;;  %v16839_v60 = vld [vmem:[#allocation117_spill] sm:$0xff] }
 0xcff   : > { %16829 = vst [vmem:[#allocation9_spill] sm:$0xff] %v15368_v23  ;;  %v7430_v38 = vsel %vm16840_vm0, %v16839_v60, %v15113_v26  ;;  %vm16850_vm0 = vcmask 498688  }
 0xd00   : > { %7873 = vrot.lane.b32.xlu1 %v7828_v46, %s10938_s17 }
 0xd02   : > { %v15376_v16 = vpop.permute.xlu1 %7066  ;;  %v15378_v52 = vpop.permute.xlu0 %9051 }
 0xd03   : > { %v7085_v15 = vsel %vm7074_vm11, %v16833_v7, %v15376_v16 }
 0xd04   : > { %v7113_v8 = vadd.f32 %v7085_v15, %v6998_v55  ;;  %7877 = vrot.lane.b32.xlu1 %v7830_v14, %s10938_s17  ;;  %v8289_v55 = vmul.f32 %v16838_v39, %v16742_v50  ;;  %v16841_v14 = vld [vmem:[#allocation122_spill] sm:$0xff]  ;;  %v16846_v39 = vld [vmem:[#allocation125_spill] sm:$0xff] }
 0xd06   : > { %v15386_v48 = vpop.permute.xlu1 %7070  ;;  %v15388_v6 = vpop.permute.xlu0 %9055  ;;  %v7228_v34 = vadd.f32 %v7200_v32, %v7113_v8  ;;  %v16844_v32 = vld [vmem:[#allocation62_spill] sm:$0xff] }
 0xd07   : > { %16834 = vst [vmem:[#allocation13_spill] sm:$0xff] %v15388_v6 }
 0xd08   : > { %8103 = vrot.lane.b32.xlu1 %v8058_v33, %s10939_s18  ;;  %v16843_v33 = vld [vmem:[#allocation82_spill] sm:$0xff] }
 0xd09   : > { %v8517_v17 = vmul.f32 %v16843_v33, %v16739_v51 }
 0xd0a   : > { %v15396_v3 = vpop.permute.xlu1 %7296  ;;  %v15398_v62 = vpop.permute.xlu0 %6609 }
 0xd0b   : > { %v7315_v19 = vsel %vm7304_vm13, %v16837_v35, %v15396_v3 }
 0xd0c   : > { %v7343_v22 = vadd.f32 %v7315_v19, %v7228_v34  ;;  %8107 = vrot.lane.b32.xlu1 %v8060_v57, %s10939_s18  ;;  %v7660_v34 = vsel %vm16845_vm15, %v16844_v32, %v15149_v63  ;;  %vm16857_vm15 = vcmask 261120  }
 0xd0e   : > { %v15406_v13 = vpop.permute.xlu1 %7300  ;;  %v15408_v27 = vpop.permute.xlu0 %6613  ;;  %v7458_v53 = vadd.f32 %v7430_v38, %v7343_v22  ;;  %v8519_v22 = vmul.f32 %v16843_v33, %v16742_v50 }
 0xd10   : > { %8332 = vrot.lane.b32.xlu1 %v8287_v10, %s10940_s28 }
 0xd12   : > { %v15416_v46 = vpop.permute.xlu1 %7526  ;;  %v15418_v59 = vpop.permute.xlu0 %6839 }
 0xd13   : > { %v7545_v7 = vsel %vm16842_vm14, %v16841_v14, %v15416_v46  ;;  %vm16853_vm14 = vcmask 490496  }
 0xd14   : > { %v7573_v15 = vadd.f32 %v7545_v7, %v7458_v53  ;;  %8336 = vrot.lane.b32.xlu1 %v8289_v55, %s10940_s28  ;;  %v16848_v55 = vld [vmem:[#allocation75_spill] sm:$0xff]  ;;  %v16849_v7 = vld [vmem:[#allocation64_spill] sm:$0xff] }
 0xd15   : > { %v8781_v14 = vmul.f32 %v16848_v55, %v16739_v51 }
 0xd16   : > { %v15426_v8 = vpop.permute.xlu1 %7530  ;;  %v15428_v5 = vpop.permute.xlu0 %6843  ;;  %v7688_v35 = vadd.f32 %v7660_v34, %v7573_v15  ;;  %v7890_v15 = vsel %vm16850_vm0, %v16849_v7, %v15192_v24  ;;  %v8783_v34 = vmul.f32 %v16848_v55, %v16742_v50  ;;  %v16855_v7 = vld [vmem:[#allocation76_spill] sm:$0xff] }
 0xd17   : > { %v8895_v30 = vmul.f32 %v16855_v7, %v16739_v51 }
 0xd18   : > { %8562 = vrot.lane.b32.xlu1 %v8517_v17, %s10941_s30 }
 0xd1a   : > { %v15436_v57 = vpop.permute.xlu1 %7756  ;;  %v15438_v19 = vpop.permute.xlu0 %7068 }
 0xd1b   : > { %v7775_v10 = vsel %vm16847_vm1, %v16846_v39, %v15436_v57 }
 0xd1c   : > { %v7803_v60 = vadd.f32 %v7775_v10, %v7688_v35  ;;  %8566 = vrot.lane.b32.xlu1 %v8519_v22, %s10941_s30  ;;  %v16852_v35 = vld [vmem:[#allocation127_spill] sm:$0xff] }
 0xd1e   : > { %v15446_v38 = vpop.permute.xlu1 %7760  ;;  %v15448_v53 = vpop.permute.xlu0 %7072  ;;  %v7918_v17 = vadd.f32 %v7890_v15, %v7803_v60  ;;  %v16856_v60 = vld [vmem:[#allocation79_spill] sm:$0xff] }
 0xd1f   : > { %v8119_v15 = vsel %vm16857_vm15, %v16856_v60, %v15221_v42  ;;  %v16861_v60 = vld [vmem:[#allocation86_spill] sm:$0xff] }
 0xd20   : > { %8825 = vrot.lane.b32.xlu1 %v8781_v14, %s16387_s14  ;;  %v9009_v29 = vmul.f32 %v16861_v60, %v16739_v51 }
 0xd22   : > { %v15456_v33 = vpop.permute.xlu1 %7986  ;;  %v15458_v32 = vpop.permute.xlu0 %7298 }
 0xd23   : > { %16851 = vst [vmem:[#allocation17_spill] sm:$0xff] %v15456_v33  ;;  %v8005_v22 = vsel %vm16853_vm14, %v16852_v35, %v15456_v33  ;;  %vm16896_vm14 = vcmask 515072  }
 0xd24   : > { %v8033_v39 = vadd.f32 %v8005_v22, %v7918_v17  ;;  %8829 = vrot.lane.b32.xlu1 %v8783_v34, %s16387_s14  ;;  %v8897_v17 = vmul.f32 %v16855_v7, %v16742_v50  ;;  %v16859_v34 = vld [vmem:[#allocation128_spill] sm:$0xff]  ;;  %vm16897_vm15 = vmmov %vm16896_vm14 }
 0xd26   : > { %v15466_v10 = vpop.permute.xlu1 %7990  ;;  %v15468_v14 = vpop.permute.xlu0 %7302  ;;  %v8147_v23 = vadd.f32 %v8119_v15, %v8033_v39  ;;  %v16862_v39 = vld [vmem:[#allocation81_spill] sm:$0xff] }
 0xd27   : > { %16854 = vst [vmem:[#allocation21_spill] sm:$0xff] %v15466_v10  ;;  %v8349_v15 = vsel %vm8338_vm4, %v16862_v39, %v15257_v2 }
 0xd28   : > { %8939 = vrot.lane.b32.xlu1 %v8895_v30, %s16386_s27 }
 0xd2a   : > { %v15476_v6 = vpop.permute.xlu1 %8215  ;;  %v15478_v35 = vpop.permute.xlu0 %7528 }
 0xd2b   : > { %16858 = vst [vmem:[#allocation25_spill] sm:$0xff] %v15476_v6  ;;  %v8234_v22 = vsel %vm8223_vm10, %v16859_v34, %v15476_v6 }
 0xd2c   : > { %v8262_v43 = vadd.f32 %v8234_v22, %v8147_v23  ;;  %8943 = vrot.lane.b32.xlu1 %v8897_v17, %s16386_s27  ;;  %v9011_v23 = vmul.f32 %v16861_v60, %v16742_v50  ;;  %v16864_v17 = vld [vmem:[#allocation130_spill] sm:$0xff]  ;;  %v16868_v50 = vld [vmem:[#allocation72_spill] sm:$0xff] }
 0xd2d   : > { %v8629_v42 = vmul.f32 %v16868_v50, %v16642_v31  ;;  %v16875_v50 = vld [vmem:[#allocation114_spill] sm:$0xff] }
 0xd2e   : > { %v15486_v30 = vpop.permute.xlu1 %8219  ;;  %v15488_v11 = vpop.permute.xlu0 %7532  ;;  %v8377_v45 = vadd.f32 %v8349_v15, %v8262_v43  ;;  %v16867_v15 = vld [vmem:[#allocation73_spill] sm:$0xff] }
 0xd2f   : > { %16860 = vst [vmem:[#allocation55_spill] sm:$0xff] %v15486_v30  ;;  %v8662_v44 = vmul.f32 %v16800_v56, %v16867_v15  ;;  %v16874_v56 = vld [vmem:[#allocation106_spill] sm:$0xff] }
 0xd30   : > { %9053 = vrot.lane.b32.xlu1 %v9009_v29, %s16296_s26  ;;  %v16865_v29 = vld [vmem:[#allocation44_spill] sm:$0xff] }
 0xd31   : > { %v8579_v6 = vsel %vm8568_vm5, %v16865_v29, %v15296_v40 }
 0xd32   : > { %v15496_v0 = vpop.permute.xlu1 %8445  ;;  %v15498_v34 = vpop.permute.xlu0 %7758 }
 0xd33   : > { %16863 = vst [vmem:[#allocation45_spill] sm:$0xff] %v15496_v0  ;;  %v8464_v22 = vsel %vm8453_vm2, %v16864_v17, %v15496_v0  ;;  %v16870_v17 = vld [vmem:[#allocation102_spill] sm:$0xff]  ;;  %v16877_v0 = vld [vmem:[#allocation123_spill] sm:$0xff] }
 0xd34   : > { %v8492_v30 = vadd.f32 %v8464_v22, %v8377_v45  ;;  %9057 = vrot.lane.b32.xlu1 %v9011_v23, %s16296_s26  ;;  %v16869_v23 = vld [vmem:[#allocation35_spill] sm:$0xff] }
 0xd35   : > { %v8721_v22 = vsel %vm3355_vm6, %v16870_v17, %v16869_v23  ;;  %v16878_v17 = vld [vmem:[#allocation111_spill] sm:$0xff]  ;;  %v16879_v23 = vld [vmem:[#allocation109_spill] sm:$0xff] }
 0xd36   : > { %v8607_v39 = vadd.f32 %v8579_v6, %v8492_v30  ;;  %v15509_v2 = vpop.permute.xlu1 %8449  ;;  %v15511_v43 = vpop.permute.xlu0 %7762  ;;  %v16872_v30 = vld [vmem:[#allocation56_spill] sm:$0xff]  ;;  %v8949_v33 = vsel %vm3546_vm8, %v16879_v23, %v16878_v17 }
 0xd37   : > { %16866 = vst [vmem:[#allocation47_spill] sm:$0xff] %v15509_v2  ;;  %v8670_v40 = vmul.f32 %v16872_v30, %v16756_v37  ;;  %v16873_v2 = vld [vmem:[#allocation15_spill] sm:$0xff] }
 0xd38   : > { %8701 = vrot.lane.b32.xlu1 %v8662_v44, %s16381_s29  ;;  %v15518_v45 = vadd.f32 %v8629_v42, %v8607_v39  ;;  %v8835_v15 = vsel %vm3474_vm7, %v16874_v56, %v16873_v2  ;;  %v16876_v44 = vld [vmem:[#allocation93_spill] sm:$0xff]  ;;  %v16880_v37 = vld [vmem:[#allocation39_spill] sm:$0xff] }
 0xd39   : > { %v8749_v39 = vadd.f32 %v8721_v22, %v16876_v44  ;;  %v16882_v22 = vld [vmem:[#allocation112_spill] sm:$0xff] }
 0xd3a   : > { %v15523_v29 = vpop.permute.xlu1 %8709  ;;  %v15525_v6 = vpop.permute.xlu0 %7988 }
 0xd3b   : > { %16871 = vst [vmem:[#allocation50_spill] sm:$0xff] %v15525_v6  ;;  %v8728_v42 = vsel %vm3355_vm6, %v16875_v50, %v15523_v29  ;;  %v8842_v6 = vsel %vm3474_vm7, %v16880_v37, %v15336_v54  ;;  %v8863_v1 = vadd.f32 %v8835_v15, %v8749_v39  ;;  %v8784_v50 = vmul.f32 %v16872_v30, %v16848_v55 }
 0xd3c   : > { %v8756_v10 = vadd.f32 %v8728_v42, %v16877_v0  ;;  %8717 = vrot.lane.b32.xlu1 %v8670_v40, %s16381_s29  ;;  %v16881_v0 = vld [vmem:[#allocation27_spill] sm:$0xff]  ;;  %v16883_v42 = vld [vmem:[#allocation124_spill] sm:$0xff]  ;;  %v6411_v15 = vmul.f32 %v16821_v49, %v16642_v31 }
 0xd3d   : > { %v9063_v40 = vsel %vm3618_vm9, %v16882_v22, %v16881_v0  ;;  %v8956_v23 = vsel %vm3546_vm8, %v16883_v42, %v15358_v36  ;;  %v8977_v44 = vadd.f32 %v8949_v33, %v8863_v1  ;;  %v6412_v0 = vmul.f32 %v16821_v49, %v16739_v51 }
 0xd3e   : > { %v8870_v56 = vadd.f32 %v8842_v6, %v8756_v10  ;;  %v15544_v2 = vpop.permute.xlu1 %8713  ;;  %v15546_v24 = vpop.permute.xlu0 %7992  ;;  %v16884_v10 = vld [vmem:[#allocation34_spill] sm:$0xff]  ;;  %v8898_v1 = vmul.f32 %v16872_v30, %v16855_v7  ;;  %v9012_v7 = vmul.f32 %v16872_v30, %v16861_v60 }
 0xd3f   : > { %v9070_v6 = vsel %vm3618_vm9, %v16884_v10, %v15378_v52  ;;  %v9091_v55 = vadd.f32 %v9063_v40, %v8977_v44  ;;  %v16886_v30 = vld [vmem:[#allocation58_spill] sm:$0xff] }
 0xd40   : > { %v8984_v17 = vadd.f32 %v8956_v23, %v8870_v56  ;;  %8831 = vrot.lane.b32.xlu1 %v8784_v50, %s16387_s14  ;;  %v16885_v56 = vld [vmem:[#allocation46_spill] sm:$0xff]  ;;  %v6413_v23 = vmul.f32 %v16821_v49, %v16650_v41 }
 0xd42   : > { %v9098_v39 = vadd.f32 %v9070_v6, %v8984_v17  ;;  %v15562_v37 = vpop.permute.xlu0 %8217  ;;  %v6495_v22 = vpop.permute.xlu1 %6494  ;;  %v6628_v6 = vsel %vm3474_vm7, %v15398_v62, %v15346_v18 }
 0xd43   : > { %v6512_v33 = vsel %vm3355_vm6, %v16818_v12, %v6495_v22  ;;  %v6513_v50 = vsel %vm3355_vm6, %v6495_v22, %v16885_v56 }
 0xd44   : > { %v15572_v42 = vadd.f32 %v9098_v39, %v9091_v55  ;;  %v6540_v31 = vadd.f32 %v6512_v33, %v6411_v15  ;;  %v6541_v40 = vadd.f32 %v6513_v50, %v6412_v0  ;;  %8945 = vrot.lane.b32.xlu1 %v8898_v1, %s16386_s27  ;;  %v6627_v0 = vsel %vm3474_vm7, %v15334_v28, %v15398_v62 }
 0xd45   : > { %v6629_v28 = vsel %vm3474_vm7, %v15346_v18, %v15408_v27  ;;  %v6856_v62 = vsel %vm3618_vm9, %v15356_v61, %v15418_v59  ;;  %v6858_v18 = vsel %vm3618_vm9, %v15366_v21, %v15428_v5  ;;  %v7087_v5 = vsel %vm7074_vm11, %v15438_v19, %v15386_v48 }
 0xd46   : > { %v15575_v17 = vpop.permute.xlu0 %8221  ;;  %v6499_v44 = vpop.permute.xlu1 %6498  ;;  %v6655_v49 = vadd.f32 %v6627_v0, %v6540_v31  ;;  %v6656_v39 = vadd.f32 %v6628_v6, %v6541_v40  ;;  %v16887_v0 = vld [vmem:[#allocation119_spill] sm:$0xff] }
 0xd47   : > { %v6514_v12 = vsel %vm3355_vm6, %v16885_v56, %v6499_v44  ;;  %v6857_v56 = vsel %vm3618_vm9, %v15418_v59, %v15366_v21  ;;  %v7086_v21 = vsel %vm7074_vm11, %v15376_v16, %v15438_v19 }
 0xd48   : > { %v6542_v10 = vadd.f32 %v6514_v12, %v6413_v23  ;;  %9059 = vrot.lane.b32.xlu1 %v9012_v7, %s16296_s26 }
 0xd4a   : > { %v15590_v15 = vpop.permute.xlu0 %8447  ;;  %v6725_v55 = vpop.permute.xlu1 %6724 }
 0xd4b   : > { %v6742_v60 = vsel %vm3546_vm8, %v16826_v58, %v6725_v55  ;;  %v6743_v22 = vsel %vm3546_vm8, %v6725_v55, %v16886_v30  ;;  %v6657_v58 = vadd.f32 %v6629_v28, %v6542_v10 }
 0xd4c   : > { %v6770_v1 = vadd.f32 %v6742_v60, %v6655_v49  ;;  %v6771_v33 = vadd.f32 %v6743_v22, %v6656_v39 }
 0xd4e   : > { %v15605_v50 = vpop.permute.xlu0 %8451  ;;  %v6729_v31 = vpop.permute.xlu1 %6728  ;;  %v6884_v40 = vadd.f32 %v6856_v62, %v6770_v1  ;;  %v6885_v23 = vadd.f32 %v6857_v56, %v6771_v33  ;;  %v7316_v56 = vsel %vm7304_vm13, %v15396_v3, %v15458_v32  ;;  %v7318_v3 = vsel %vm7304_vm13, %v15406_v13, %v15468_v14 }
 0xd4f   : > { %v6744_v44 = vsel %vm3546_vm8, %v16886_v30, %v6729_v31 }
 0xd50   : > { %v6772_v7 = vadd.f32 %v6744_v44, %v6657_v58  ;;  %v7317_v58 = vsel %vm7304_vm13, %v15458_v32, %v15406_v13 }
 0xd52   : > { %v15612_v27 = vpop.permute.xlu0 %8711  ;;  %v6954_v61 = vpop.permute.xlu1 %6953  ;;  %v6886_v12 = vadd.f32 %v6858_v18, %v6772_v7  ;;  %v16889_v7 = vld [vmem:[#allocation101_spill] sm:$0xff] }
 0xd53   : > { %v8729_v59 = vsel %vm3355_vm6, %v15523_v29, %v15612_v27  ;;  %v6971_v10 = vsel %vm6959_vm3, %v16831_v9, %v6954_v61  ;;  %v6972_v6 = vsel %vm6959_vm3, %v6954_v61, %v16887_v0  ;;  %v9111_v18 = vrot.slane %v16889_v7, 4 }
 0xd54   : > { %v15622_v49 = vadd.f32 %v8729_v59, %v15518_v45  ;;  %v6999_v55 = vadd.f32 %v6971_v10, %v6884_v40  ;;  %v7000_v39 = vadd.f32 %v6972_v6, %v6885_v23  ;;  %v7088_v45 = vsel %vm7074_vm11, %v15386_v48, %v15448_v53  ;;  %v16888_v23 = vld [vmem:[#allocation65_spill] sm:$0xff] }
 0xd56   : > { %v6958_v29 = vpop.permute.xlu1 %6957  ;;  %v7114_v60 = vadd.f32 %v7086_v21, %v6999_v55  ;;  %v7115_v30 = vadd.f32 %v7087_v5, %v7000_v39  ;;  %v15645_v31 = vpop.permute.xlu0 %8715 }
 0xd57   : > { %v6973_v9 = vsel %vm6959_vm3, %v16887_v0, %v6958_v29  ;;  %vm16890_vm3 = vcmask 752640  }
 0xd58   : > { %v7001_v22 = vadd.f32 %v6973_v9, %v6886_v12  ;;  %vm16891_vm11 = vmmov %vm16890_vm3 }
 0xd59   : > { %vm16894_vm1 = vmmov %vm16890_vm3 }
 0xd5a   : > { %v7184_v1 = vpop.permute.xlu1 %7183  ;;  %v7116_v33 = vadd.f32 %v7088_v45, %v7001_v22  ;;  %v15655_v10 = vpop.permute.xlu0 %8815 }
 0xd5b   : > { %v7201_v16 = vsel %vm7189_vm12, %v15084_v20, %v7184_v1  ;;  %v7202_v28 = vsel %vm7189_vm12, %v7184_v1, %v15095_v47  ;;  %v9104_v20 = vrot.slane %v16888_v23, 4 }
 0xd5c   : > { %v7229_v19 = vadd.f32 %v7201_v16, %v7114_v60  ;;  %v7230_v62 = vadd.f32 %v7202_v28, %v7115_v30 }
 0xd5d   : > { %v9105_v32 = vadd.f32 %v9104_v20, %v16888_v23 }
 0xd5e   : > { %v7188_v48 = vpop.permute.xlu1 %7187  ;;  %v7344_v53 = vadd.f32 %v7316_v56, %v7229_v19  ;;  %v7345_v40 = vadd.f32 %v7317_v58, %v7230_v62  ;;  %v15673_v45 = vpop.permute.xlu0 %8929 }
 0xd5f   : > { %v7203_v44 = vsel %vm7189_vm12, %v15095_v47, %v7188_v48  ;;  %v9112_v47 = vadd.f32 %v9111_v18, %v16889_v7  ;;  %vm16892_vm12 = vcmask 523264   ;;  %v9106_v60 = vrot.slane %v9105_v32, 2  ;;  %v16902_v18 = vld [vmem:[#allocation67_spill] sm:$0xff] }
 0xd60   : > { %v7231_v61 = vadd.f32 %v7203_v44, %v7116_v33  ;;  %v7546_v13 = vsel %vm16892_vm12, %v15416_v46, %v15478_v35  ;;  %vm16893_vm13 = vmmov %vm16892_vm12 }
 0xd61   : > { %v7547_v14 = vsel %vm16893_vm13, %v15478_v35, %v15426_v8  ;;  %v9113_v30 = vrot.slane %v9112_v47, 2  ;;  %vm16895_vm0 = vmmov %vm16892_vm12  ;;  %v9107_v33 = vadd.f32 %v9106_v60, %v9105_v32 }
 0xd62   : > { %v7414_v12 = vpop.permute.xlu1 %7413  ;;  %v7346_v59 = vadd.f32 %v7318_v3, %v7231_v61  ;;  %v7548_v22 = vsel %vm16895_vm0, %v15426_v8, %v15488_v11  ;;  %vm16900_vm12 = vmmov %vm16896_vm14  ;;  %v16904_v61 = vld [vmem:[#allocation53_spill] sm:$0xff] }
 0xd63   : > { %v7431_v0 = vsel %vm16890_vm3, %v15113_v26, %v7414_v12  ;;  %v7432_v6 = vsel %vm16891_vm11, %v7414_v12, %v15138_v4  ;;  %v9114_v28 = vadd.f32 %v9113_v30, %v9112_v47  ;;  %vm16898_vm3 = vcmask 506880   ;;  %v16907_v47 = vld [vmem:[#allocation50_spill] sm:$0xff] }
 0xd64   : > { %v7459_v55 = vadd.f32 %v7431_v0, %v7344_v53  ;;  %v7460_v39 = vadd.f32 %v7432_v6, %v7345_v40  ;;  %v7776_v62 = vsel %vm16898_vm3, %v15436_v57, %v15498_v34  ;;  %vm16899_vm11 = vmmov %vm16898_vm3  ;;  %v9108_v48 = vrot.slane %v9107_v33, 1  ;;  %v15685_v53 = vpop.permute.xlu0 %9043 }
 0xd65   : > { %v7777_v11 = vsel %vm16899_vm11, %v15498_v34, %v15446_v38  ;;  %v9115_v40 = vrot.slane %v9114_v28, 1  ;;  %vm16901_vm13 = vmmov %vm16898_vm3 }
 0xd66   : > { %v7418_v21 = vpop.permute.xlu1 %7417  ;;  %v7574_v5 = vadd.f32 %v7546_v13, %v7459_v55  ;;  %v7575_v29 = vadd.f32 %v7547_v14, %v7460_v39  ;;  %v7778_v20 = vsel %vm16901_vm13, %v15446_v38, %v15511_v43  ;;  %v9109_v7 = vadd.f32 %v9108_v48, %v9107_v33  ;;  %v16908_v55 = vld [vmem:[#allocation17_spill] sm:$0xff] }
 0xd67   : > { %v7433_v26 = vsel %vm16894_vm1, %v15138_v4, %v7418_v21  ;;  %vm16903_vm1 = vcmask 498688   ;;  %v16910_v43 = vld [vmem:[#allocation21_spill] sm:$0xff] }
 0xd68   : > { %v7461_v9 = vadd.f32 %v7433_v26, %v7346_v59  ;;  %vm16905_vm0 = vmmov %vm16903_vm1  ;;  %v9116_v59 = vadd.f32 %v9115_v40, %v9114_v28 }
 0xd69   : > { %vm16912_vm3 = vmmov %vm16905_vm0 }
 0xd6a   : > { %v7644_v46 = vpop.permute.xlu1 %7643  ;;  %v7576_v1 = vadd.f32 %v7548_v22, %v7461_v9 }
 0xd6b   : > { %v7661_v35 = vsel %vm16896_vm14, %v15149_v63, %v7644_v46  ;;  %v7662_v16 = vsel %vm16897_vm15, %v7644_v46, %v15167_v25  ;;  %vm16909_vm14 = vcmask 490496  }
 0xd6c   : > { %v7689_v19 = vadd.f32 %v7661_v35, %v7574_v5  ;;  %v7690_v4 = vadd.f32 %v7662_v16, %v7575_v29  ;;  %v8006_v38 = vsel %vm16909_vm14, %v16908_v55, %v16907_v47  ;;  %vm16911_vm15 = vmmov %vm16909_vm14  ;;  %v16916_v35 = vld [vmem:[#allocation88_spill] sm:$0xff] }
 0xd6d   : > { %v8007_v39 = vsel %vm16911_vm15, %v16907_v47, %v16910_v43  ;;  %vm16913_vm11 = vmmov %vm16909_vm14 }
 0xd6e   : > { %v7648_v8 = vpop.permute.xlu1 %7647  ;;  %v7804_v56 = vadd.f32 %v7776_v62, %v7689_v19  ;;  %v7805_v58 = vadd.f32 %v7777_v11, %v7690_v4  ;;  %v8008_v9 = vsel %vm16913_vm11, %v16910_v43, %v15546_v24  ;;  %v16918_v4 = vld [vmem:[#allocation25_spill] sm:$0xff]  ;;  %v16919_v11 = vld [vmem:[#allocation55_spill] sm:$0xff] }
 0xd6f   : > { %v7663_v63 = vsel %vm16900_vm12, %v15167_v25, %v7648_v8  ;;  %v16906_v25 = vld [vmem:[#allocation5_spill] sm:$0xff]  ;;  %vm16915_vm12 = vcmask 261120   ;;  %v8235_v62 = vsel %vm8223_vm10, %v16918_v4, %v15562_v37  ;;  %v8236_v8 = vsel %vm8223_vm10, %v15562_v37, %v16919_v11 }
 0xd70   : > { %v7691_v23 = vadd.f32 %v7663_v63, %v7576_v1  ;;  %v16914_v1 = vld [vmem:[#allocation120_spill] sm:$0xff]  ;;  %vm16917_vm13 = vmmov %vm16915_vm12  ;;  %v8237_v40 = vsel %vm8223_vm10, %v16919_v11, %v15575_v17 }
 0xd72   : > { %v7874_v57 = vpop.permute.xlu1 %7873  ;;  %v7806_v44 = vadd.f32 %v7778_v20, %v7691_v23 }
 0xd73   : > { %v7891_v34 = vsel %vm16903_vm1, %v16902_v18, %v7874_v57  ;;  %v7892_v3 = vsel %vm16905_vm0, %v7874_v57, %v16904_v61  ;;  %v9156_v12 = vpop.permute.xlu0 %9155  ;;  %vm16920_vm1 = vmmov %vm16915_vm12  ;;  %v16921_v57 = vld [vmem:[#allocation121_spill] sm:$0xff] }
 0xd74   : > { %v7919_v32 = vadd.f32 %v7891_v34, %v7804_v56  ;;  %v7920_v0 = vadd.f32 %v7892_v3, %v7805_v58  ;;  %v15697_v6 = vrot.slane %v9156_v12, %v16906_v25  ;;  %v16924_v12 = vld [vmem:[#allocation47_spill] sm:$0xff] }
 0xd75   : > { %v8467_v55 = vsel %vm8453_vm2, %v16924_v12, %v15605_v50  ;;  %v8730_v50 = vsel %vm3355_vm6, %v15612_v27, %v15544_v2  ;;  %v16930_v27 = vld [vmem:[#allocation35_spill] sm:$0xff] }
 0xd76   : > { %v15706_v13 = vadd.f32 %v15697_v6, %v9109_v7  ;;  %v15709_v14 = vadd.f32 %v15697_v6, %v9116_v59  ;;  %v7878_v21 = vpop.permute.xlu1 %7877  ;;  %v8034_v5 = vadd.f32 %v8006_v38, %v7919_v32  ;;  %v8035_v29 = vadd.f32 %v8007_v39, %v7920_v0  ;;  %v16922_v7 = vld [vmem:[#allocation92_spill] sm:$0xff]  ;;  %v16925_v39 = vld [vmem:[#allocation69_spill] sm:$0xff] }
 0xd77   : > { %v7893_v60 = vsel %vm16912_vm3, %v16904_v61, %v7878_v21  ;;  %v16923_v61 = vld [vmem:[#allocation45_spill] sm:$0xff]  ;;  %v8466_v59 = vsel %vm8453_vm2, %v15590_v15, %v16924_v12  ;;  %v16939_v12 = vld [vmem:[#allocation111_spill] sm:$0xff] }
 0xd78   : > { %v7921_v26 = vadd.f32 %v7893_v60, %v7806_v44  ;;  %v9176_v30 = vcombine.low %v15706_v13, %v15709_v14  ;;  %v8465_v3 = vsel %vm8453_vm2, %v16923_v61, %v15590_v15  ;;  %v16927_v15 = vld [vmem:[#allocation72_spill] sm:$0xff] }
 0xd79   : > { %v8630_v60 = vmul.f32 %v16927_v15, %v16739_v51 }
 0xd7a   : > { %v8104_v22 = vpop.permute.xlu1 %8103  ;;  %v8036_v46 = vadd.f32 %v8008_v9, %v7921_v26  ;;  %v8631_v26 = vmul.f32 %v16927_v15, %v16650_v41  ;;  %v16928_v41 = vld [vmem:[#allocation38_spill] sm:$0xff] }
 0xd7b   : > { %v8120_v33 = vsel %vm16915_vm12, %v16914_v1, %v8104_v22  ;;  %v8121_v16 = vsel %vm16917_vm13, %v8104_v22, %v16916_v35  ;;  %v8632_v4 = vmul.f32 %v16927_v15, %v16928_v41 }
 0xd7c   : > { %v8148_v28 = vadd.f32 %v8120_v33, %v8034_v5  ;;  %v8149_v19 = vadd.f32 %v8121_v16, %v8035_v29  ;;  %v16926_v5 = vld [vmem:[#allocation71_spill] sm:$0xff] }
 0xd7e   : > { %v8108_v56 = vpop.permute.xlu1 %8107  ;;  %v8263_v24 = vadd.f32 %v8235_v62, %v8148_v28  ;;  %v8264_v58 = vadd.f32 %v8236_v8, %v8149_v19 }
 0xd7f   : > { %v8122_v48 = vsel %vm16920_vm1, %v16916_v35, %v8108_v56  ;;  %v8731_v35 = vsel %vm3355_vm6, %v15544_v2, %v15645_v31  ;;  %v16929_v56 = vld [vmem:[#allocation107_spill] sm:$0xff] }
 0xd80   : > { %v8150_v63 = vadd.f32 %v8122_v48, %v8036_v46  ;;  %v16932_v48 = vld [vmem:[#allocation43_spill] sm:$0xff] }
 0xd82   : > { %v8333_v23 = vpop.permute.xlu1 %8332  ;;  %v8265_v20 = vadd.f32 %v8237_v40, %v8150_v63  ;;  %v16933_v40 = vld [vmem:[#allocation16_spill] sm:$0xff] }
 0xd83   : > { %v8350_v44 = vsel %vm8338_vm4, %v16921_v57, %v8333_v23  ;;  %v8351_v18 = vsel %vm8338_vm4, %v8333_v23, %v16922_v7  ;;  %v16934_v23 = vld [vmem:[#allocation15_spill] sm:$0xff] }
 0xd84   : > { %v8378_v37 = vadd.f32 %v8350_v44, %v8263_v24  ;;  %v8379_v34 = vadd.f32 %v8351_v18, %v8264_v58  ;;  %v8722_v24 = vsel %vm3355_vm6, %v16930_v27, %v16929_v56  ;;  %v16931_v58 = vld [vmem:[#allocation110_spill] sm:$0xff]  ;;  %v16935_v57 = vld [vmem:[#allocation95_spill] sm:$0xff] }
 0xd85   : > { %v8723_v2 = vsel %vm3355_vm6, %v16929_v56, %v16931_v58  ;;  %v8750_v44 = vadd.f32 %v8722_v24, %v16935_v57  ;;  %v16948_v56 = vld [vmem:[#allocation42_spill] sm:$0xff] }
 0xd86   : > { %v8337_v32 = vpop.permute.xlu1 %8336  ;;  %v8493_v17 = vadd.f32 %v8465_v3, %v8378_v37  ;;  %v8494_v0 = vadd.f32 %v8466_v59, %v8379_v34  ;;  %v8751_v63 = vadd.f32 %v8723_v2, %v16932_v48  ;;  %v16937_v34 = vld [vmem:[#allocation19_spill] sm:$0xff]  ;;  %v16938_v3 = vld [vmem:[#allocation29_spill] sm:$0xff] }
 0xd87   : > { %v8352_v25 = vsel %vm8338_vm4, %v16922_v7, %v8337_v32  ;;  %v16936_v7 = vld [vmem:[#allocation97_spill] sm:$0xff]  ;;  %v8837_v61 = vsel %vm3474_vm7, %v16933_v40, %v16937_v34  ;;  %v8950_v59 = vsel %vm3546_vm8, %v16939_v12, %v16938_v3  ;;  %v16940_v32 = vld [vmem:[#allocation96_spill] sm:$0xff] }
 0xd88   : > { %v8380_v47 = vadd.f32 %v8352_v25, %v8265_v20  ;;  %v8836_v20 = vsel %vm3474_vm7, %v16934_v23, %v16933_v40  ;;  %v8724_v18 = vsel %vm3355_vm6, %v16931_v58, %v16936_v7  ;;  %v8865_v25 = vadd.f32 %v8837_v61, %v8751_v63  ;;  %v16949_v48 = vld [vmem:[#allocation13_spill] sm:$0xff] }
 0xd8a   : > { %v8563_v38 = vpop.permute.xlu1 %8562  ;;  %v8495_v43 = vadd.f32 %v8467_v55, %v8380_v47  ;;  %v16941_v55 = vld [vmem:[#allocation100_spill] sm:$0xff] }
 0xd8b   : > { %v8580_v21 = vsel %vm8568_vm5, %v16925_v39, %v8563_v38  ;;  %v8581_v29 = vsel %vm8568_vm5, %v8563_v38, %v16926_v5 }
 0xd8c   : > { %v8608_v9 = vadd.f32 %v8580_v21, %v8493_v17  ;;  %v8609_v22 = vadd.f32 %v8581_v29, %v8494_v0  ;;  %v8752_v17 = vadd.f32 %v8724_v18, %v16940_v32  ;;  %v8864_v0 = vadd.f32 %v8836_v20, %v8750_v44  ;;  %v16944_v29 = vld [vmem:[#allocation27_spill] sm:$0xff]  ;;  %v16950_v18 = vld [vmem:[#allocation116_spill] sm:$0xff] }
 0xd8e   : > { %v8644_v46 = vadd.f32 %v8630_v60, %v8608_v9  ;;  %v8645_v1 = vadd.f32 %v8631_v26, %v8609_v22  ;;  %v8567_v33 = vpop.permute.xlu1 %8566  ;;  %v8978_v21 = vadd.f32 %v8950_v59, %v8864_v0  ;;  %v9118_v60 = vrot.slane %v15572_v42, 4  ;;  %v16945_v9 = vld [vmem:[#allocation10_spill] sm:$0xff] }
 0xd8f   : > { %v8582_v16 = vsel %vm8568_vm5, %v16926_v5, %v8567_v33  ;;  %v16943_v5 = vld [vmem:[#allocation113_spill] sm:$0xff] }
 0xd90   : > { %v8610_v51 = vadd.f32 %v8582_v16, %v8495_v43  ;;  %v8758_v28 = vadd.f32 %v8730_v50, %v8644_v46  ;;  %v8759_v19 = vadd.f32 %v8731_v35, %v8645_v1  ;;  %v16942_v43 = vld [vmem:[#allocation23_spill] sm:$0xff]  ;;  %v9064_v15 = vsel %vm3618_vm9, %v16944_v29, %v16943_v5  ;;  %v16946_v1 = vld [vmem:[#allocation9_spill] sm:$0xff] }
 0xd91   : > { %v8838_v39 = vsel %vm3474_vm7, %v16937_v34, %v16942_v43  ;;  %v9119_v27 = vadd.f32 %v9118_v60, %v15572_v42  ;;  %v9066_v42 = vsel %vm3618_vm9, %v16948_v56, %v16950_v18 }
 0xd92   : > { %v8826_v62 = vpop.permute.xlu1 %8825  ;;  %v15766_v11 = vadd.f32 %v8632_v4, %v8610_v51  ;;  %v8866_v22 = vadd.f32 %v8838_v39, %v8752_v17  ;;  %v16947_v51 = vld [vmem:[#allocation41_spill] sm:$0xff]  ;;  %v9092_v4 = vadd.f32 %v9064_v15, %v8978_v21  ;;  %v10947_v39 = vmov 1966171168  }
 0xd93   : > { %v8843_v47 = vsel %vm3474_vm7, %v15336_v54, %v8826_v62  ;;  %v8844_v38 = vsel %vm3474_vm7, %v8826_v62, %v16941_v55  ;;  %v8951_v54 = vsel %vm3546_vm8, %v16938_v3, %v16945_v9  ;;  %v8952_v41 = vsel %vm3546_vm8, %v16945_v9, %v16947_v51 }
 0xd94   : > { %v8871_v50 = vadd.f32 %v8843_v47, %v15622_v49  ;;  %v8872_v35 = vadd.f32 %v8844_v38, %v8758_v28  ;;  %v8979_v16 = vadd.f32 %v8951_v54, %v8865_v25  ;;  %v8980_v40 = vadd.f32 %v8952_v41, %v8866_v22 }
 0xd95   : > { %v9180_v21 = vunpack.c.l.s4 %v10947_v39 }
 0xd96   : > { %v15768_v8 = vpop.permute.xlu1 %8829  ;;  %v9094_v59 = vadd.f32 %v9066_v42, %v8980_v40 }
 0xd97   : > { %v8845_v62 = vsel %vm3474_vm7, %v16941_v55, %v15768_v8 }
 0xd98   : > { %v8873_v23 = vadd.f32 %v8845_v62, %v8759_v19 }
 0xd9a   : > { %v8940_v37 = vpop.permute.xlu1 %8939 }
 0xd9b   : > { %v8957_v46 = vsel %vm3546_vm8, %v15358_v36, %v8940_v37  ;;  %v8958_v33 = vsel %vm3546_vm8, %v8940_v37, %v16946_v1  ;;  %v9065_v36 = vsel %vm3618_vm9, %v16943_v5, %v16948_v56  ;;  %v9120_v37 = vrot.slane %v9119_v27, 2 }
 0xd9c   : > { %v8985_v24 = vadd.f32 %v8957_v46, %v8871_v50  ;;  %v8986_v58 = vadd.f32 %v8958_v33, %v8872_v35  ;;  %v9093_v20 = vadd.f32 %v9065_v36, %v8979_v16  ;;  %v9181_v33 = vunpack.c.0.s8 %v9180_v21  ;;  %v16951_v50 = vld [vmem:[#allocation40_spill] sm:$0xff] }
 0xd9d   : > { %v9121_v19 = vadd.f32 %v9120_v37, %v9119_v27  ;;  %v8839_v56 = vsel %vm3474_vm7, %v16942_v43, %v15655_v10  ;;  %v8953_v10 = vsel %vm3546_vm8, %v16947_v51, %v15673_v45 }
 0xd9e   : > { %v15802_v26 = vpop.permute.xlu1 %8943 }
 0xd9f   : > { %v8959_v28 = vsel %vm3546_vm8, %v16946_v1, %v15802_v26  ;;  %v9122_v9 = vrot.slane %v9121_v19, 1 }
 0xda0   : > { %v8987_v34 = vadd.f32 %v8959_v28, %v8873_v23 }
 0xda1   : > { %v9123_v62 = vadd.f32 %v9122_v9, %v9121_v19 }
 0xda2   : > { %v9054_v49 = vpop.permute.xlu1 %9053 }
 0xda3   : > { %v9071_v2 = vsel %vm3618_vm9, %v15378_v52, %v9054_v49  ;;  %v9072_v63 = vsel %vm3618_vm9, %v9054_v49, %v16949_v48 }
 0xda4   : > { %v9099_v57 = vadd.f32 %v9071_v2, %v8985_v24  ;;  %v9100_v44 = vadd.f32 %v9072_v63, %v8986_v58 }
 0xda6   : > { %v9124_v61 = vadd.f32 %v9099_v57, %v9092_v4  ;;  %v9131_v3 = vadd.f32 %v9100_v44, %v9093_v20  ;;  %v9058_v12 = vpop.permute.xlu1 %9057 }
 0xda7   : > { %v9073_v52 = vsel %vm3618_vm9, %v16949_v48, %v9058_v12  ;;  %v9164_v48 = vadd.f32 %v15697_v6, %v9123_v62 }
 0xda8   : > { %v9125_v32 = vrot.slane %v9124_v61, 4  ;;  %v9132_v17 = vrot.slane %v9131_v3, 4  ;;  %v9101_v0 = vadd.f32 %v9073_v52, %v8987_v34 }
 0xdaa   : > { %v9126_v25 = vadd.f32 %v9125_v32, %v9124_v61  ;;  %v9133_v47 = vadd.f32 %v9132_v17, %v9131_v3  ;;  %v9138_v55 = vadd.f32 %v9101_v0, %v9094_v59  ;;  %v8702_v38 = vpop.permute.xlu1 %8701 }
 0xdab   : > { %v8725_v60 = vsel %vm3355_vm6, %v16936_v7, %v8702_v38  ;;  %v16952_v7 = vld [vmem:[#allocation4_spill] sm:$0xff] }
 0xdac   : > { %v9127_v5 = vrot.slane %v9126_v25, 2  ;;  %v9134_v29 = vrot.slane %v9133_v47, 2  ;;  %v9139_v15 = vrot.slane %v9138_v55, 4  ;;  %v8753_v35 = vadd.f32 %v8725_v60, %v16951_v50 }
 0xdad   : > { %v9184_v58 = vsub.s32 %v9181_v33, %v16952_v7 }
 0xdae   : > { %v9128_v54 = vadd.f32 %v9127_v5, %v9126_v25  ;;  %v9135_v22 = vadd.f32 %v9134_v29, %v9133_v47  ;;  %v9140_v46 = vadd.f32 %v9139_v15, %v9138_v55  ;;  %v8718_v1 = vpop.permute.xlu1 %8717  ;;  %v8867_v49 = vadd.f32 %v8839_v56, %v8753_v35 }
 0xdaf   : > { %v8732_v28 = vsel %vm3355_vm6, %v15645_v31, %v8718_v1  ;;  %v9185_v31 = vrot.slane %v9176_v30, %v9184_v58 }
 0xdb0   : > { %v9129_v16 = vrot.slane %v9128_v54, 1  ;;  %v9136_v41 = vrot.slane %v9135_v22, 1  ;;  %v9141_v4 = vrot.slane %v9140_v46, 2  ;;  %v8760_v57 = vadd.f32 %v8732_v28, %v15766_v11 }
 0xdb1   : > { %v8981_v42 = vadd.f32 %v8953_v10, %v8867_v49  ;;  %v9067_v11 = vsel %vm3618_vm9, %v16950_v18, %v15685_v53  ;;  %v16953_v53 = vlaneseq }
 0xdb2   : > { %v9130_v36 = vadd.f32 %v9129_v16, %v9128_v54  ;;  %v9142_v27 = vadd.f32 %v9141_v4, %v9140_v46  ;;  %v8832_v24 = vpop.permute.xlu1 %8831  ;;  %v9137_v2 = vadd.f32 %v9136_v41, %v9135_v22 }
 0xdb3   : > { %v8846_v23 = vsel %vm3474_vm7, %v15768_v8, %v8832_v24  ;;  %v9095_v14 = vadd.f32 %v9067_v11, %v8981_v42  ;;  %vm9227_vm2 = vcmp.lt.s32.totalorder %v16953_v53, 896 }
 0xdb4   : > { %v9165_v63 = vadd.f32 %v15697_v6, %v9130_v36  ;;  %v9143_v40 = vrot.slane %v9142_v27, 1  ;;  %v9166_v34 = vadd.f32 %v15697_v6, %v9137_v2  ;;  %v8874_v3 = vadd.f32 %v8846_v23, %v8760_v57 }
 0xdb6   : > { %v9177_v43 = vcombine.low %v9164_v48, %v9165_v63  ;;  %v9144_v20 = vadd.f32 %v9143_v40, %v9142_v27  ;;  %v8946_v44 = vpop.permute.xlu1 %8945 }
 0xdb7   : > { %v8960_v37 = vsel %vm3546_vm8, %v15802_v26, %v8946_v44 }
 0xdb8   : > { %v9192_v8 = vrot.slane %v9177_v43, %v9184_v58  ;;  %v9167_v61 = vadd.f32 %v15697_v6, %v9144_v20  ;;  %v8988_v59 = vadd.f32 %v8960_v37, %v8874_v3 }
 0xdba   : > { %v9207_v45 = vcombine.low %v9185_v31, %v9192_v8  ;;  %v9178_v51 = vcombine.low %v9166_v34, %v9167_v61  ;;  %v9060_v52 = vpop.permute.xlu1 %9059 }
 0xdbb   : > { %v9074_v13 = vsel %vm3618_vm9, %v9058_v12, %v9060_v52 }
 0xdbc   : > { %v9102_v30 = vadd.f32 %v9074_v13, %v8988_v59  ;;  %v9199_v38 = vrot.slane %v9178_v51, %v9184_v58  ;;  %v9215_v5 = vrot.slane %v9207_v45, %v9184_v58 }
 0xdbe   : > { %v9145_v26 = vadd.f32 %v9102_v30, %v9095_v14 }
 0xdc0   : > { %v9146_v32 = vrot.slane %v9145_v26, 4 }
 0xdc2   : > { %v9147_v17 = vadd.f32 %v9146_v32, %v9145_v26 }
 0xdc4   : > { %v9148_v0 = vrot.slane %v9147_v17, 2 }
 0xdc6   : > { %v9149_v19 = vadd.f32 %v9148_v0, %v9147_v17 }
 0xdc8   : > { %v9150_v25 = vrot.slane %v9149_v19, 1 }
 0xdca   : > { %v9151_v47 = vadd.f32 %v9150_v25, %v9149_v19 }
 0xdcc   : > { %v9168_v55 = vadd.f32 %v15697_v6, %v9151_v47 }
 0xdce   : > { %v9206_v39 = vrot.slane %v9168_v55, %v9184_v58 }
 0xdd0   : > { %v9208_v21 = vcombine.low %v9199_v38, %v9206_v39  ;;  %635 = sbr.rel (!%p633_p0) target bundleno = 444 (0x1bc), region = 89 }
 0xdd2   : > { %v9222_v29 = vrot.slane %v9208_v21, %v9184_v58 }
 0xdd4   : > { %v9223_v18 = vcombine.low %v9215_v5, %v9222_v29 }
 0xdd6   : > { %9233 = vst.msk [vmem:[%s9232_s2] ss:$8 sm:$0xf] %vm9227_vm2, %v9223_v18  ;;  %9234 = vst.msk [vmem:[%s9232_s2] ss:$8 sm:$0x70] %vm9227_vm2, %v9223_v18 }

</bundles_post_ra>
